<compile_context>
chip_gen: v7x
topology: tpu7x:2x2x1
jax: 0.10.0
libtpu: 0.0.40
codegen_flags: <defaults>
</compile_context>

<pallas_src>
import functools

import jax
import jax.numpy as jnp
from jax.experimental import pallas as pl
from jax.experimental.pallas import tpu as pltpu

EPS = 1e-5      # nn.BatchNorm2d default eps
LANE = 128      # TPU lane width; channel dims padded to a multiple of this
SUB = 8         # sublane granularity


def _ceil_to(x, m):
    return (x + m - 1) // m * m


# ---------------------------------------------------------------------------
# Kernel 1: direct 3x3 convolution (padding=1) on a flattened padded lattice
# ---------------------------------------------------------------------------
def _conv3x3_kernel(x_hbm, w_ref, b_ref, o_ref, win_ref, sem,
                    *, offsets, gh, tm, win):
    i = pl.program_id(0)          # output row tile
    j = pl.program_id(1)          # output channel tile

    # Fetch the halo window (tm + 2*gh rows) for this row tile once (at j==0)
    # and reuse it for every Cout tile.  Weights / bias / output tiles are
    # auto-pipelined by their BlockSpecs.
    @pl.when(j == 0)
    def _():
        row0 = pl.multiple_of(i * tm, SUB)
        cp = pltpu.make_async_copy(x_hbm.at[pl.ds(row0, win), :],
                                   win_ref, sem.at[0])
        cp.start()
        cp.wait()
        # TODO(synk): double-buffer this halo DMA across row tiles (needs
        # core-aware priming to stay safe under megacore grid splitting).

    acc = jnp.zeros(o_ref.shape, jnp.float32)
    for t, off in enumerate(offsets):          # statically unrolled 9 taps
        a = win_ref[gh + off:gh + off + tm, :]                 # (tm, C_pad) bf16
        acc = acc + jnp.dot(a, w_ref[t], preferred_element_type=jnp.float32)
    o_ref[...] = acc + b_ref[...]


def conv3x3(x_nhwc, w_taps, bias_row, *, stride, tm=256, tn=LANE):
    """3x3 conv, padding=1, stride `stride`.

    x_nhwc:   (N, H, W, C_pad)      float (cast to bf16 for the MXU)
    w_taps:   (9, C_pad, Cout_pad)  bf16, tap-major (dh*3 + dw)
    bias_row: (1, Cout_pad)         f32
    returns   (N, Ho, Wo, Cout_pad) f32
    """
    N, H, W, C_pad = x_nhwc.shape
    n_taps, c_in, Cout_pad = w_taps.shape
    assert n_taps == 9 and c_in == C_pad and Cout_pad % tn == 0

    Hp, Wp = H + 2, W + 2
    gh = _ceil_to(Wp + 1, SUB)                 # halo rows on each side
    # Tap offsets in the flattened (h, w) row space of the padded image:
    # input row for output row p at tap (dh, dw) is  p + (dh-1)*Wp + (dw-1).
    offsets = tuple((dh - 1) * Wp + (dw - 1)
                    for dh in range(3) for dw in range(3))

    xp = jnp.pad(x_nhwc.astype(jnp.bfloat16), ((0, 0), (1, 1), (1, 1), (0, 0)))
    P = N * Hp * Wp
    tm = min(tm, _ceil_to(P, SUB))
    n_i = pl.cdiv(P, tm)
    n_j = Cout_pad // tn
    win = tm + 2 * gh
    L = n_i * tm + 2 * gh
    x2g = jnp.pad(xp.reshape(P, C_pad), ((gh, L - gh - P), (0, 0)))

    kernel = functools.partial(_conv3x3_kernel, offsets=offsets,
                               gh=gh, tm=tm, win=win)
    outp = pl.pallas_call(
        kernel,
        out_shape=jax.ShapeDtypeStruct((n_i * tm, Cout_pad), jnp.float32),
        grid=(n_i, n_j),
        in_specs=[
            pl.BlockSpec(memory_space=pl.ANY),                     # stays in HBM
            pl.BlockSpec((9, C_pad, tn), lambda i, j: (0, 0, j)),
            pl.BlockSpec((1, tn), lambda i, j: (0, j)),
        ],
        out_specs=pl.BlockSpec((tm, tn), lambda i, j: (i, j)),
        scratch_shapes=[
            pltpu.VMEM((win, C_pad), jnp.bfloat16),
            pltpu.SemaphoreType.DMA((1,)),
        ],
        compiler_params=pltpu.CompilerParams(
            dimension_semantics=("parallel", "arbitrary")),
    )(x2g, w_taps, bias_row)

    out = outp[:P].reshape(N, Hp, Wp, Cout_pad)
    # Valid outputs live at [1:H+1, 1:W+1]; stride is applied by subsampling.
    # TODO(synk): a strided conv recomputes ~4x here; folding the stride into
    # the gather needs strided in-kernel slices (only 2 convs/net are strided).
    return out[:, 1:H + 1:stride, 1:W + 1:stride, :]


# ---------------------------------------------------------------------------
# Kernel 2: streaming BatchNorm statistics (per-channel sum / sum of squares)
# ---------------------------------------------------------------------------
def _bn_stats_kernel(x_ref, sum_ref, sq_ref):
    @pl.when(pl.program_id(0) == 0)
    def _():
        sum_ref[...] = jnp.zeros_like(sum_ref)
        sq_ref[...] = jnp.zeros_like(sq_ref)
    x = x_ref[...].astype(jnp.float32)
    sum_ref[...] += jnp.sum(x, axis=0, keepdims=True)
    sq_ref[...] += jnp.sum(x * x, axis=0, keepdims=True)


def bn_batch_scale_shift(x2d, n_rows, gamma, beta, *, tm=512):
    """Training-mode BatchNorm over the first `n_rows` rows of x2d (M, C).

    Returns per-channel (1, C) scale/shift with y = x*scale + shift.
    Zero-padded rows / channels contribute nothing to the sums.
    """
    M, C = x2d.shape
    tm = min(tm, _ceil_to(M, SUB))
    Mp = _ceil_to(M, tm)
    if Mp != M:
        x2d = jnp.pad(x2d, ((0, Mp - M), (0, 0)))
    s, ss = pl.pallas_call(
        _bn_stats_kernel,
        out_shape=(jax.ShapeDtypeStruct((1, C), jnp.float32),
                   jax.ShapeDtypeStruct((1, C), jnp.float32)),
        grid=(Mp // tm,),
        in_specs=[pl.BlockSpec((tm, C), lambda i: (i, 0))],
        out_specs=(pl.BlockSpec((1, C), lambda i: (0, 0)),
                   pl.BlockSpec((1, C), lambda i: (0, 0))),
        compiler_params=pltpu.CompilerParams(
            dimension_semantics=("arbitrary",)),
    )(x2d)
    mean = s / n_rows
    var = jnp.maximum(ss / n_rows - mean * mean, 0.0)   # biased var (PyTorch fwd)
    scale = gamma.reshape(1, C) * jax.lax.rsqrt(var + EPS)
    shift = beta.reshape(1, C) - mean * scale
    return scale, shift


# ---------------------------------------------------------------------------
# Kernel 3: elementwise scale*x + shift followed by ReLU (BN apply)
# ---------------------------------------------------------------------------
def _scale_shift_relu_kernel(x_ref, sc_ref, sh_ref, o_ref):
    y = x_ref[...].astype(jnp.float32) * sc_ref[...] + sh_ref[...]
    o_ref[...] = jnp.maximum(y, 0.0).astype(o_ref.dtype)


def bn_apply_relu(x2d, scale, shift, *, tm=512, out_dtype=jnp.bfloat16):
    M, C = x2d.shape
    tm = min(tm, _ceil_to(M, SUB))
    Mp = _ceil_to(M, tm)
    xp = x2d if Mp == M else jnp.pad(x2d, ((0, Mp - M), (0, 0)))
    out = pl.pallas_call(
        _scale_shift_relu_kernel,
        out_shape=jax.ShapeDtypeStruct((Mp, C), out_dtype),
        grid=(Mp // tm,),
        in_specs=[pl.BlockSpec((tm, C), lambda i: (i, 0)),
                  pl.BlockSpec((1, C), lambda i: (0, 0)),
                  pl.BlockSpec((1, C), lambda i: (0, 0))],
        out_specs=pl.BlockSpec((tm, C), lambda i: (i, 0)),
        compiler_params=pltpu.CompilerParams(
            dimension_semantics=("parallel",)),
    )(xp, scale, shift)
    return out[:M]


# ---------------------------------------------------------------------------
# Kernel 4: fully-connected layer (single MXU matmul, padded to lane width)
# ---------------------------------------------------------------------------
def _linear_kernel(x_ref, w_ref, b_ref, o_ref):
    o_ref[...] = (jnp.dot(x_ref[...], w_ref[...],
                          preferred_element_type=jnp.float32) + b_ref[...])


def linear(x_bf16, w_bf16, bias_row):
    """x (M, K_pad) bf16, w (K_pad, N_pad) bf16, bias (1, N_pad) f32 -> (M, N_pad) f32."""
    M, K = x_bf16.shape
    Mp = _ceil_to(M, SUB)
    xp = x_bf16 if Mp == M else jnp.pad(x_bf16, ((0, Mp - M), (0, 0)))
    out = pl.pallas_call(
        _linear_kernel,
        out_shape=jax.ShapeDtypeStruct((Mp, w_bf16.shape[1]), jnp.float32),
    )(xp, w_bf16, bias_row)
    return out[:M]


# ---------------------------------------------------------------------------
# Linker / avg-pool (cheap reshapes + elementwise; left to XLA)
# ---------------------------------------------------------------------------
def linker_nhwc(x, inplanes, outplanes, k, cout_pad):
    """AvgPool(k, k) followed by centered zero channel padding (NHWC, padded C)."""
    r = x[..., :inplanes].astype(jnp.float32)
    N, H, W, _ = r.shape
    if k > 1:
        Ho, Wo = H // k, W // k
        r = r[:, :Ho * k, :Wo * k, :].reshape(N, Ho, k, Wo, k, inplanes).mean(axis=(2, 4))
    p0 = (outplanes - inplanes) // 2          # PyTorch Linker: centered, even diff
    return jnp.pad(r, ((0, 0), (0, 0), (0, 0), (p0, cout_pad - inplanes - p0)))


# ---------------------------------------------------------------------------
# Network configuration / parameters (mirrors the PyTorch module init)
# ---------------------------------------------------------------------------
def wideresnet_config(depth, width):
    assert (depth - 4) % 6 == 0, "Wide-resnet depth should be 6n+4"
    n = (depth - 4) // 6
    widths = [int(v * width) for v in (16, 32, 64)]
    layers, ins = [], 16
    for (outp, stride, abr) in [(widths[0], 1, True),
                                (widths[1], 2, False),
                                (widths[2], 2, False)]:
        blocks = [dict(inplanes=ins, outplanes=outp, stride=stride, abr=abr)]
        for _ in range(1, n):
            blocks.append(dict(inplanes=outp, outplanes=outp, stride=1, abr=False))
        layers.append(dict(blocks=blocks, link_in=ins, link_out=outp, link_k=stride))
        ins = outp
    return dict(widths=widths, layers=layers)


def init_wideresnet_params(key, depth, width, n_classes=10):
    cfg = wideresnet_config(depth, width)
    keys = iter(jax.random.split(key, 256))

    def conv_init(cout, cin):  # kaiming_normal_, fan_in, relu gain; bias = 0
        std = jnp.sqrt(2.0 / (cin * 9))
        return jax.random.normal(next(keys), (cout, cin, 3, 3), jnp.float32) * std

    params = dict(
        conv1_w=conv_init(16, 3), conv1_b=jnp.zeros((16,), jnp.float32),
        blocks=[],
        bn_gamma=jax.random.uniform(next(keys), (cfg["widths"][2],), jnp.float32),
        bn_beta=jnp.zeros((cfg["widths"][2],), jnp.float32),
        fc_w=(jax.random.normal(next(keys), (n_classes, cfg["widths"][2]), jnp.float32)
              * jnp.sqrt(2.0 / cfg["widths"][2])),
        fc_b=jnp.zeros((n_classes,), jnp.float32),
    )
    for layer in cfg["layers"]:
        for b in layer["blocks"]:
            ci, co = b["inplanes"], b["outplanes"]
            params["blocks"].append(dict(
                conv1_w=conv_init(co, ci), conv1_b=jnp.zeros((co,), jnp.float32),
                conv2_w=conv_init(co, co), conv2_b=jnp.zeros((co,), jnp.float32),
                bn1_gamma=jax.random.uniform(next(keys), (ci,), jnp.float32),
                bn1_beta=jnp.zeros((ci,), jnp.float32),
                bn2_gamma=jax.random.uniform(next(keys), (co,), jnp.float32),
                bn2_beta=jnp.zeros((co,), jnp.float32)))
    return params, cfg


def prepare_params(params, cfg, n_classes):
    """One-time layout work: pad channels to lane multiples, convert conv
    weights to tap-major (9, Cin_pad, Cout_pad) bf16 slabs, transpose FC."""
    def prep_conv_w(w):
        cout, cin = w.shape[0], w.shape[1]
        cinp, coutp = _ceil_to(cin, LANE), _ceil_to(cout, LANE)
        wt = jnp.transpose(w, (2, 3, 1, 0)).reshape(9, cin, cout)
        wt = jnp.pad(wt, ((0, 0), (0, cinp - cin), (0, coutp - cout)))
        return wt.astype(jnp.bfloat16)

    def pad_row(v):
        cp = _ceil_to(v.shape[0], LANE)
        return jnp.pad(v, (0, cp - v.shape[0])).reshape(1, cp).astype(jnp.float32)

    def pad_vec(v):
        cp = _ceil_to(v.shape[0], LANE)
        return jnp.pad(v, (0, cp - v.shape[0])).astype(jnp.float32)

    prep = dict(
        stem_w=prep_conv_w(params["conv1_w"]), stem_b=pad_row(params["conv1_b"]),
        bn_gamma=pad_vec(params["bn_gamma"]), bn_beta=pad_vec(params["bn_beta"]),
    )
    C = params["fc_w"].shape[1]
    Cp, Np = _ceil_to(C, LANE), _ceil_to(n_classes, LANE)
    prep["fc_w"] = jnp.pad(params["fc_w"].T,
                           ((0, Cp - C), (0, Np - n_classes))).astype(jnp.bfloat16)
    prep["fc_b"] = jnp.pad(params["fc_b"],
                           (0, Np - n_classes)).reshape(1, Np).astype(jnp.float32)

    prep_layers, bi = [], 0
    for layer in cfg["layers"]:
        blks = []
        for _ in layer["blocks"]:
            raw = params["blocks"][bi]; bi += 1
            blks.append(dict(
                w1=prep_conv_w(raw["conv1_w"]), b1=pad_row(raw["conv1_b"]),
                w2=prep_conv_w(raw["conv2_w"]), b2=pad_row(raw["conv2_b"]),
                bn1_gamma=pad_vec(raw["bn1_gamma"]), bn1_beta=pad_vec(raw["bn1_beta"]),
                bn2_gamma=pad_vec(raw["bn2_gamma"]), bn2_beta=pad_vec(raw["bn2_beta"])))
        prep_layers.append(dict(blocks=blks))
    prep["layers"] = prep_layers
    return prep


# ---------------------------------------------------------------------------
# Block forward (NHWC, channel-padded)
# ---------------------------------------------------------------------------
def wideresnet_block_nhwc(x, meta, bp):
    inplanes, outplanes = meta["inplanes"], meta["outplanes"]
    stride, abr = meta["stride"], meta["abr"]
    N, H, W, cin_pad = x.shape
    cout_pad = bp["w1"].shape[2]

    # bn1 + relu (streaming stats + apply)
    m1 = N * H * W
    x2d = x.reshape(m1, cin_pad)
    sc1, sh1 = bn_batch_scale_shift(x2d, m1, bp["bn1_gamma"], bp["bn1_beta"])
    out0 = bn_apply_relu(x2d, sc1, sh1).reshape(N, H, W, cin_pad)        # bf16
    res_src = out0.astype(jnp.float32) if abr else x

    # conv1 (direct 3x3 Pallas conv)
    out1 = conv3x3(out0, bp["w1"], bp["b1"], stride=stride)              # f32
    Ho, Wo = out1.shape[1], out1.shape[2]

    # bn2 + relu
    # TODO(synk): the bn2 sum/sumsq accumulation could be emitted as extra
    # outputs of the conv1 kernel (saving one full read of out1).
    m2 = N * Ho * Wo
    o1_2d = out1.reshape(m2, cout_pad)
    sc2, sh2 = bn_batch_scale_shift(o1_2d, m2, bp["bn2_gamma"], bp["bn2_beta"])
    out2 = bn_apply_relu(o1_2d, sc2, sh2).reshape(N, Ho, Wo, cout_pad)   # bf16
    # Dropout with p == 0.0 is the identity.
    # TODO(synk): stochastic dropout (p > 0) would use pltpu.prng_seed /
    # prng_random_bits masking inside _scale_shift_relu_kernel.

    # conv2
    out3 = conv3x3(out2, bp["w2"], bp["b2"], stride=1)                   # f32

    # residual branch (Linker: AvgPool(stride) + centered zero channel pad)
    if inplanes == outplanes and stride == 1:
        residual = res_src.astype(jnp.float32)
    else:
        residual = linker_nhwc(res_src, inplanes, outplanes, stride, cout_pad)
    return out3 + residual


# ---------------------------------------------------------------------------
# Full network forward
# ---------------------------------------------------------------------------
def wideresnet_forward(x_nchw, prep, *, cfg, n_classes):
    N, Cin, H, W = x_nchw.shape
    cin_pad = _ceil_to(Cin, LANE)

    # NCHW -> NHWC, channels zero-padded to a lane multiple (stripped at the end).
    x = jnp.transpose(x_nchw, (0, 2, 3, 1)).astype(jnp.float32)
    x = jnp.pad(x, ((0, 0), (0, 0), (0, 0), (0, cin_pad - Cin)))

    # stem conv (3x3, stride 1, 3 -> 16)
    x = conv3x3(x, prep["stem_w"], prep["stem_b"], stride=1)             # f32
    first_x = x

    # residual stages + stage-level Linker skips
    for lcfg, lprep in zip(cfg["layers"], prep["layers"]):
        x_in = x
        for meta, bp in zip(lcfg["blocks"], lprep["blocks"]):
            x = wideresnet_block_nhwc(x, meta, bp)
        cout_pad = _ceil_to(lcfg["link_out"], LANE)
        x = x + linker_nhwc(x_in, lcfg["link_in"], lcfg["link_out"],
                            lcfg["link_k"], cout_pad)

    # global skip from the stem (Linker(16, widths[-1], 4, strides=4))
    wlast = cfg["widths"][2]
    x = x + linker_nhwc(first_x, 16, wlast, 4, _ceil_to(wlast, LANE))

    # final BN + ReLU
    Nn, Hf, Wf, Cp = x.shape
    Mf = Nn * Hf * Wf
    x2d = x.reshape(Mf, Cp)
    sc, sh = bn_batch_scale_shift(x2d, Mf, prep["bn_gamma"], prep["bn_beta"])
    x = bn_apply_relu(x2d, sc, sh, out_dtype=jnp.float32).reshape(Nn, Hf, Wf, Cp)

    # avg_pool2d(kernel=8) -> flatten -> fc
    k = 8
    ho, wo = Hf // k, Wf // k
    x = x[:, :ho * k, :wo * k, :].reshape(Nn, ho, k, wo, k, Cp).mean(axis=(2, 4))
    # TODO(synk): torch.flatten(NCHW) ordering differs from NHWC when the pooled
    # map is larger than 1x1; standard 32x32 inputs always reduce to 1x1 here.
    assert ho == 1 and wo == 1
    feat = x.reshape(Nn, Cp)
    logits = linear(feat.astype(jnp.bfloat16), prep["fc_w"], prep["fc_b"])
    return logits[:, :n_classes]


# ---------------------------------------------------------------------------
# Pure-JAX f32 reference (mirrors the PyTorch module, training-mode BN)
# ---------------------------------------------------------------------------
def _reference_wideresnet(x, params, cfg, n_classes):
    def bn(t, g, b):
        m = t.mean(axis=(0, 2, 3), keepdims=True)
        v = ((t - m) ** 2).mean(axis=(0, 2, 3), keepdims=True)
        return ((t - m) * jax.lax.rsqrt(v + EPS) * g.reshape(1, -1, 1, 1)
                + b.reshape(1, -1, 1, 1))

    def conv(t, w, b, s):
        y = jax.lax.conv_general_dilated(
            t, w, (s, s), ((1, 1), (1, 1)),
            dimension_numbers=("NCHW", "OIHW", "NCHW"))
        return y + b.reshape(1, -1, 1, 1)

    def avgpool(t, k):
        if k == 1:
            return t
        n, c, h, w = t.shape
        ho, wo = h // k, w // k
        return t[:, :, :ho * k, :wo * k].reshape(n, c, ho, k, wo, k).mean(axis=(3, 5))

    def linker(t, inp, outp, k):
        t = avgpool(t, k)
        p0 = (outp - inp) // 2
        return jnp.pad(t, ((0, 0), (p0, outp - inp - p0), (0, 0), (0, 0)))

    def block(t, bp, meta):
        out0 = jax.nn.relu(bn(t, bp["bn1_gamma"], bp["bn1_beta"]))
        res = out0 if meta["abr"] else t
        out = conv(out0, bp["conv1_w"], bp["conv1_b"], meta["stride"])
        out = jax.nn.relu(bn(out, bp["bn2_gamma"], bp["bn2_beta"]))
        out = conv(out, bp["conv2_w"], bp["conv2_b"], 1)
        if meta["inplanes"] == meta["outplanes"] and meta["stride"] == 1:
            return out + res
        return out + linker(res, meta["inplanes"], meta["outplanes"], meta["stride"])

    x = conv(x, params["conv1_w"], params["conv1_b"], 1)
    first_x = x
    bi = 0
    for layer in cfg["layers"]:
        x_in = x
        for meta in layer["blocks"]:
            x = block(x, params["blocks"][bi], meta); bi += 1
        x = x + linker(x_in, layer["link_in"], layer["link_out"], layer["link_k"])
    x = x + linker(first_x, 16, cfg["widths"][2], 4)
    x = jax.nn.relu(bn(x, params["bn_gamma"], params["bn_beta"]))
    x = avgpool(x, 8)
    x = x.reshape(x.shape[0], -1)
    return x @ params["fc_w"].T + params["fc_b"]


# ---------------------------------------------------------------------------
if __name__ == "__main__":
    key = jax.random.PRNGKey(0)
    kx, kp = jax.random.split(key)

    depth, width, n_classes = 10, 1, 10            # smallest legal WideResNet
    x = jax.random.normal(kx, (2, 3, 32, 32), jnp.float32)

    params, cfg = init_wideresnet_params(kp, depth, width, n_classes)
    prep = prepare_params(params, cfg, n_classes)

    fwd = jax.jit(functools.partial(wideresnet_forward, cfg=cfg,
                                    n_classes=n_classes))
    y = jax.block_until_ready(fwd(x, prep))

    assert y.shape == (2, n_classes), y.shape
    assert bool(jnp.all(jnp.isfinite(y)))

    # Sanity check vs. a pure-JAX f32 reference (bf16 MXU tolerance).
    y_ref = _reference_wideresnet(x, params, cfg, n_classes)
    err = float(jnp.max(jnp.abs(y - y_ref)))
    ref_scale = float(jnp.max(jnp.abs(y_ref)))
    assert err < 0.25 + 0.1 * ref_scale, (err, ref_scale)

    print("KERNEL_OK")
</pallas_src>

<mosaic_0001>
module attributes {stable_mosaic.version = 11 : i64} {
  func.func @_conv3x3_kernel(%arg0: i32, %arg1: i32, %arg2: memref<2640x128xbf16, #tpu.memory_space<any>>, %arg3: memref<9x128x128xbf16, #tpu.memory_space<vmem>>, %arg4: memref<1x128xf32, #tpu.memory_space<vmem>>, %arg5: memref<256x128xf32, #tpu.memory_space<vmem>>, %arg6: memref<336x128xbf16, #tpu.memory_space<vmem>>, %arg7: memref<1x!tpu.dma_semaphore, #tpu.memory_space<semaphore_mem>>) attributes {dimension_semantics = [#tpu.dimension_semantics<parallel>, #tpu.dimension_semantics<arbitrary>], iteration_bounds = array<i64: 10, 1>, scalar_prefetch = 0 : i64, scratch_operands = 2 : i64, tpu.core_type = #tpu.core_type<tc>, window_params = [{}, {transform_indices = @transform_1, window_bounds = array<i64: 9, 128, 128>}, {transform_indices = @transform_2, window_bounds = array<i64: 1, 128>}, {transform_indices = @transform_3, window_bounds = array<i64: 256, 128>}]} {
    %c0_i32 = arith.constant 0 : i32
    %0 = arith.cmpi eq, %arg1, %c0_i32 : i32
    %1 = arith.extui %0 : i1 to i32
    %c0_i32_0 = arith.constant 0 : i32
    %2 = arith.cmpi ne, %1, %c0_i32_0 : i32
    scf.if %2 {
      %c256_i32 = arith.constant 256 : i32
      %53 = arith.muli %arg0, %c256_i32 : i32
      %54 = tpu.assume_multiple %53, 8 : i32
      %c0_i32_44 = arith.constant 0 : i32
      %c0_i32_45 = arith.constant 0 : i32
      %55 = tpu.memref_slice %arg2[%54, %c0_i32_45] : memref<2640x128xbf16, #tpu.memory_space<any>> -> memref<336x128xbf16, #tpu.memory_space<any>>
      %56 = tpu.memref_slice %arg7[%c0_i32_44] : memref<1x!tpu.dma_semaphore, #tpu.memory_space<semaphore_mem>> -> memref<1x!tpu.dma_semaphore, #tpu.memory_space<semaphore_mem>>
      %57 = tpu.memref_squeeze %56 : memref<1x!tpu.dma_semaphore, #tpu.memory_space<semaphore_mem>> -> memref<!tpu.dma_semaphore, #tpu.memory_space<semaphore_mem>>
      tpu.enqueue_dma source(%55 : memref<336x128xbf16, #tpu.memory_space<any>>) target(%arg6 : memref<336x128xbf16, #tpu.memory_space<vmem>>) target_semaphore(%57 : memref<!tpu.dma_semaphore, #tpu.memory_space<semaphore_mem>>)
      %c0_i32_46 = arith.constant 0 : i32
      %c0_i32_47 = arith.constant 0 : i32
      %58 = tpu.memref_slice %arg2[%54, %c0_i32_47] : memref<2640x128xbf16, #tpu.memory_space<any>> -> memref<336x128xbf16, #tpu.memory_space<any>>
      %59 = tpu.memref_slice %arg7[%c0_i32_46] : memref<1x!tpu.dma_semaphore, #tpu.memory_space<semaphore_mem>> -> memref<1x!tpu.dma_semaphore, #tpu.memory_space<semaphore_mem>>
      %60 = tpu.memref_squeeze %59 : memref<1x!tpu.dma_semaphore, #tpu.memory_space<semaphore_mem>> -> memref<!tpu.dma_semaphore, #tpu.memory_space<semaphore_mem>>
      tpu.wait_dma2 semaphore(%60 : memref<!tpu.dma_semaphore, #tpu.memory_space<semaphore_mem>>) src(%58 : memref<336x128xbf16, #tpu.memory_space<any>>) dst(%arg6 : memref<336x128xbf16, #tpu.memory_space<vmem>>)
    } else {
    }
    %cst = arith.constant 0.000000e+00 : f32
    %3 = vector.broadcast %cst : f32 to vector<256x128xf32>
    %c5 = arith.constant 5 : index
    %c0 = arith.constant 0 : index
    %4 = vector.load %arg6[%c5, %c0] : memref<336x128xbf16, #tpu.memory_space<vmem>>, vector<256x128xbf16>
    %c0_1 = arith.constant 0 : index
    %c0_2 = arith.constant 0 : index
    %c0_3 = arith.constant 0 : index
    %5 = vector.load %arg3[%c0_1, %c0_2, %c0_3] : memref<9x128x128xbf16, #tpu.memory_space<vmem>>, vector<1x128x128xbf16>
    %6 = vector.shape_cast %5 : vector<1x128x128xbf16> to vector<128x128xbf16>
    %cst_4 = arith.constant dense<0.000000e+00> : vector<256x128xf32>
    %7 = tpu.matmul %4, %6, %cst_4 {dimension_numbers = #tpu.dot_dimension_numbers<[1], [0], [0], [1], [0, 0, 1, 1], [], []>} : vector<256x128xbf16>, vector<128x128xbf16>, vector<256x128xf32> -> vector<256x128xf32>
    %8 = arith.addf %3, %7 : vector<256x128xf32>
    %c6 = arith.constant 6 : index
    %c0_5 = arith.constant 0 : index
    %9 = vector.load %arg6[%c6, %c0_5] : memref<336x128xbf16, #tpu.memory_space<vmem>>, vector<256x128xbf16>
    %c1 = arith.constant 1 : index
    %c0_6 = arith.constant 0 : index
    %c0_7 = arith.constant 0 : index
    %10 = vector.load %arg3[%c1, %c0_6, %c0_7] : memref<9x128x128xbf16, #tpu.memory_space<vmem>>, vector<1x128x128xbf16>
    %11 = vector.shape_cast %10 : vector<1x128x128xbf16> to vector<128x128xbf16>
    %cst_8 = arith.constant dense<0.000000e+00> : vector<256x128xf32>
    %12 = tpu.matmul %9, %11, %cst_8 {dimension_numbers = #tpu.dot_dimension_numbers<[1], [0], [0], [1], [0, 0, 1, 1], [], []>} : vector<256x128xbf16>, vector<128x128xbf16>, vector<256x128xf32> -> vector<256x128xf32>
    %13 = arith.addf %8, %12 : vector<256x128xf32>
    %c7 = arith.constant 7 : index
    %c0_9 = arith.constant 0 : index
    %14 = vector.load %arg6[%c7, %c0_9] : memref<336x128xbf16, #tpu.memory_space<vmem>>, vector<256x128xbf16>
    %c2 = arith.constant 2 : index
    %c0_10 = arith.constant 0 : index
    %c0_11 = arith.constant 0 : index
    %15 = vector.load %arg3[%c2, %c0_10, %c0_11] : memref<9x128x128xbf16, #tpu.memory_space<vmem>>, vector<1x128x128xbf16>
    %16 = vector.shape_cast %15 : vector<1x128x128xbf16> to vector<128x128xbf16>
    %cst_12 = arith.constant dense<0.000000e+00> : vector<256x128xf32>
    %17 = tpu.matmul %14, %16, %cst_12 {dimension_numbers = #tpu.dot_dimension_numbers<[1], [0], [0], [1], [0, 0, 1, 1], [], []>} : vector<256x128xbf16>, vector<128x128xbf16>, vector<256x128xf32> -> vector<256x128xf32>
    %18 = arith.addf %13, %17 : vector<256x128xf32>
    %c39 = arith.constant 39 : index
    %c0_13 = arith.constant 0 : index
    %19 = vector.load %arg6[%c39, %c0_13] : memref<336x128xbf16, #tpu.memory_space<vmem>>, vector<256x128xbf16>
    %c3 = arith.constant 3 : index
    %c0_14 = arith.constant 0 : index
    %c0_15 = arith.constant 0 : index
    %20 = vector.load %arg3[%c3, %c0_14, %c0_15] : memref<9x128x128xbf16, #tpu.memory_space<vmem>>, vector<1x128x128xbf16>
    %21 = vector.shape_cast %20 : vector<1x128x128xbf16> to vector<128x128xbf16>
    %cst_16 = arith.constant dense<0.000000e+00> : vector<256x128xf32>
    %22 = tpu.matmul %19, %21, %cst_16 {dimension_numbers = #tpu.dot_dimension_numbers<[1], [0], [0], [1], [0, 0, 1, 1], [], []>} : vector<256x128xbf16>, vector<128x128xbf16>, vector<256x128xf32> -> vector<256x128xf32>
    %23 = arith.addf %18, %22 : vector<256x128xf32>
    %c40 = arith.constant 40 : index
    %c0_17 = arith.constant 0 : index
    %24 = vector.load %arg6[%c40, %c0_17] : memref<336x128xbf16, #tpu.memory_space<vmem>>, vector<256x128xbf16>
    %c4 = arith.constant 4 : index
    %c0_18 = arith.constant 0 : index
    %c0_19 = arith.constant 0 : index
    %25 = vector.load %arg3[%c4, %c0_18, %c0_19] : memref<9x128x128xbf16, #tpu.memory_space<vmem>>, vector<1x128x128xbf16>
    %26 = vector.shape_cast %25 : vector<1x128x128xbf16> to vector<128x128xbf16>
    %cst_20 = arith.constant dense<0.000000e+00> : vector<256x128xf32>
    %27 = tpu.matmul %24, %26, %cst_20 {dimension_numbers = #tpu.dot_dimension_numbers<[1], [0], [0], [1], [0, 0, 1, 1], [], []>} : vector<256x128xbf16>, vector<128x128xbf16>, vector<256x128xf32> -> vector<256x128xf32>
    %28 = arith.addf %23, %27 : vector<256x128xf32>
    %c41 = arith.constant 41 : index
    %c0_21 = arith.constant 0 : index
    %29 = vector.load %arg6[%c41, %c0_21] : memref<336x128xbf16, #tpu.memory_space<vmem>>, vector<256x128xbf16>
    %c5_22 = arith.constant 5 : index
    %c0_23 = arith.constant 0 : index
    %c0_24 = arith.constant 0 : index
    %30 = vector.load %arg3[%c5_22, %c0_23, %c0_24] : memref<9x128x128xbf16, #tpu.memory_space<vmem>>, vector<1x128x128xbf16>
    %31 = vector.shape_cast %30 : vector<1x128x128xbf16> to vector<128x128xbf16>
    %cst_25 = arith.constant dense<0.000000e+00> : vector<256x128xf32>
    %32 = tpu.matmul %29, %31, %cst_25 {dimension_numbers = #tpu.dot_dimension_numbers<[1], [0], [0], [1], [0, 0, 1, 1], [], []>} : vector<256x128xbf16>, vector<128x128xbf16>, vector<256x128xf32> -> vector<256x128xf32>
    %33 = arith.addf %28, %32 : vector<256x128xf32>
    %c73 = arith.constant 73 : index
    %c0_26 = arith.constant 0 : index
    %34 = vector.load %arg6[%c73, %c0_26] : memref<336x128xbf16, #tpu.memory_space<vmem>>, vector<256x128xbf16>
    %c6_27 = arith.constant 6 : index
    %c0_28 = arith.constant 0 : index
    %c0_29 = arith.constant 0 : index
    %35 = vector.load %arg3[%c6_27, %c0_28, %c0_29] : memref<9x128x128xbf16, #tpu.memory_space<vmem>>, vector<1x128x128xbf16>
    %36 = vector.shape_cast %35 : vector<1x128x128xbf16> to vector<128x128xbf16>
    %cst_30 = arith.constant dense<0.000000e+00> : vector<256x128xf32>
    %37 = tpu.matmul %34, %36, %cst_30 {dimension_numbers = #tpu.dot_dimension_numbers<[1], [0], [0], [1], [0, 0, 1, 1], [], []>} : vector<256x128xbf16>, vector<128x128xbf16>, vector<256x128xf32> -> vector<256x128xf32>
    %38 = arith.addf %33, %37 : vector<256x128xf32>
    %c74 = arith.constant 74 : index
    %c0_31 = arith.constant 0 : index
    %39 = vector.load %arg6[%c74, %c0_31] : memref<336x128xbf16, #tpu.memory_space<vmem>>, vector<256x128xbf16>
    %c7_32 = arith.constant 7 : index
    %c0_33 = arith.constant 0 : index
    %c0_34 = arith.constant 0 : index
    %40 = vector.load %arg3[%c7_32, %c0_33, %c0_34] : memref<9x128x128xbf16, #tpu.memory_space<vmem>>, vector<1x128x128xbf16>
    %41 = vector.shape_cast %40 : vector<1x128x128xbf16> to vector<128x128xbf16>
    %cst_35 = arith.constant dense<0.000000e+00> : vector<256x128xf32>
    %42 = tpu.matmul %39, %41, %cst_35 {dimension_numbers = #tpu.dot_dimension_numbers<[1], [0], [0], [1], [0, 0, 1, 1], [], []>} : vector<256x128xbf16>, vector<128x128xbf16>, vector<256x128xf32> -> vector<256x128xf32>
    %43 = arith.addf %38, %42 : vector<256x128xf32>
    %c75 = arith.constant 75 : index
    %c0_36 = arith.constant 0 : index
    %44 = vector.load %arg6[%c75, %c0_36] : memref<336x128xbf16, #tpu.memory_space<vmem>>, vector<256x128xbf16>
    %c8 = arith.constant 8 : index
    %c0_37 = arith.constant 0 : index
    %c0_38 = arith.constant 0 : index
    %45 = vector.load %arg3[%c8, %c0_37, %c0_38] : memref<9x128x128xbf16, #tpu.memory_space<vmem>>, vector<1x128x128xbf16>
    %46 = vector.shape_cast %45 : vector<1x128x128xbf16> to vector<128x128xbf16>
    %cst_39 = arith.constant dense<0.000000e+00> : vector<256x128xf32>
    %47 = tpu.matmul %44, %46, %cst_39 {dimension_numbers = #tpu.dot_dimension_numbers<[1], [0], [0], [1], [0, 0, 1, 1], [], []>} : vector<256x128xbf16>, vector<128x128xbf16>, vector<256x128xf32> -> vector<256x128xf32>
    %48 = arith.addf %43, %47 : vector<256x128xf32>
    %c0_40 = arith.constant 0 : index
    %c0_41 = arith.constant 0 : index
    %49 = vector.load %arg4[%c0_40, %c0_41] : memref<1x128xf32, #tpu.memory_space<vmem>>, vector<1x128xf32>
    %50 = vector.broadcast %49 : vector<1x128xf32> to vector<256x128xf32>
    %51 = arith.addf %48, %50 : vector<256x128xf32>
    %c0_42 = arith.constant 0 : index
    %c0_43 = arith.constant 0 : index
    %52 = vector.load %arg5[%c0_42, %c0_43] : memref<256x128xf32, #tpu.memory_space<vmem>>, vector<256x128xf32>
    tpu.vector_store %arg5[%c0_42, %c0_43], %51 {strides = array<i32>} : memref<256x128xf32, #tpu.memory_space<vmem>>, vector<256x128xf32>,
    return
  }
  func.func @transform_1(%arg0: i32, %arg1: i32) -> (i32, i32, i32) {
    %c0_i32 = arith.constant 0 : i32
    %c0_i32_0 = arith.constant 0 : i32
    %c0_i32_1 = arith.constant 0 : i32
    return %c0_i32, %c0_i32_0, %arg1 : i32, i32, i32
  }
  func.func @transform_2(%arg0: i32, %arg1: i32) -> (i32, i32) {
    %c0_i32 = arith.constant 0 : i32
    %c0_i32_0 = arith.constant 0 : i32
    return %c0_i32, %arg1 : i32, i32
  }
  func.func @transform_3(%arg0: i32, %arg1: i32) -> (i32, i32) {
    %c0_i32 = arith.constant 0 : i32
    return %arg0, %arg1 : i32, i32
  }
}

module attributes {stable_mosaic.version = 11 : i64} {
  func.func @_bn_stats_kernel(%arg0: i32, %arg1: memref<512x128xf32, #tpu.memory_space<vmem>>, %arg2: memref<1x128xf32, #tpu.memory_space<vmem>>, %arg3: memref<1x128xf32, #tpu.memory_space<vmem>>) attributes {dimension_semantics = [#tpu.dimension_semantics<arbitrary>], iteration_bounds = array<i64: 4>, scalar_prefetch = 0 : i64, scratch_operands = 0 : i64, tpu.core_type = #tpu.core_type<tc>, window_params = [{transform_indices = @transform_0, window_bounds = array<i64: 512, 128>}, {pipeline_mode = #tpu.pipeline_mode<synchronous>, transform_indices = @transform_1, window_bounds = array<i64: 1, 128>}, {pipeline_mode = #tpu.pipeline_mode<synchronous>, transform_indices = @transform_2, window_bounds = array<i64: 1, 128>}]} {
    %c0_i32 = arith.constant 0 : i32
    %0 = arith.cmpi eq, %arg0, %c0_i32 : i32
    %1 = arith.extui %0 : i1 to i32
    %c0_i32_0 = arith.constant 0 : i32
    %2 = arith.cmpi ne, %1, %c0_i32_0 : i32
    scf.if %2 {
      %cst_11 = arith.constant 0.000000e+00 : f32
      %15 = vector.broadcast %cst_11 : f32 to vector<1x128xf32>
      %c0_12 = arith.constant 0 : index
      %c0_13 = arith.constant 0 : index
      %16 = vector.load %arg2[%c0_12, %c0_13] : memref<1x128xf32, #tpu.memory_space<vmem>>, vector<1x128xf32>
      tpu.vector_store %arg2[%c0_12, %c0_13], %15 {strides = array<i32>} : memref<1x128xf32, #tpu.memory_space<vmem>>, vector<1x128xf32>,
      %cst_14 = arith.constant 0.000000e+00 : f32
      %17 = vector.broadcast %cst_14 : f32 to vector<1x128xf32>
      %c0_15 = arith.constant 0 : index
      %c0_16 = arith.constant 0 : index
      %18 = vector.load %arg3[%c0_15, %c0_16] : memref<1x128xf32, #tpu.memory_space<vmem>>, vector<1x128xf32>
      tpu.vector_store %arg3[%c0_15, %c0_16], %17 {strides = array<i32>} : memref<1x128xf32, #tpu.memory_space<vmem>>, vector<1x128xf32>,
    } else {
    }
    %c0 = arith.constant 0 : index
    %c0_1 = arith.constant 0 : index
    %3 = vector.load %arg1[%c0, %c0_1] : memref<512x128xf32, #tpu.memory_space<vmem>>, vector<512x128xf32>
    %c0_2 = arith.constant 0 : index
    %c0_3 = arith.constant 0 : index
    %4 = vector.load %arg2[%c0_2, %c0_3] : memref<1x128xf32, #tpu.memory_space<vmem>>, vector<1x128xf32>
    %cst = arith.constant dense<0.000000e+00> : vector<128xf32>
    %5 = vector.multi_reduction <add>, %3, %cst [0] : vector<512x128xf32> to vector<128xf32>
    %6 = vector.shape_cast %5 : vector<128xf32> to vector<1x128xf32>
    %7 = arith.addf %4, %6 : vector<1x128xf32>
    %c0_4 = arith.constant 0 : index
    %c0_5 = arith.constant 0 : index
    %8 = vector.load %arg2[%c0_4, %c0_5] : memref<1x128xf32, #tpu.memory_space<vmem>>, vector<1x128xf32>
    tpu.vector_store %arg2[%c0_4, %c0_5], %7 {strides = array<i32>} : memref<1x128xf32, #tpu.memory_space<vmem>>, vector<1x128xf32>,
    %c0_6 = arith.constant 0 : index
    %c0_7 = arith.constant 0 : index
    %9 = vector.load %arg3[%c0_6, %c0_7] : memref<1x128xf32, #tpu.memory_space<vmem>>, vector<1x128xf32>
    %10 = arith.mulf %3, %3 : vector<512x128xf32>
    %cst_8 = arith.constant dense<0.000000e+00> : vector<128xf32>
    %11 = vector.multi_reduction <add>, %10, %cst_8 [0] : vector<512x128xf32> to vector<128xf32>
    %12 = vector.shape_cast %11 : vector<128xf32> to vector<1x128xf32>
    %13 = arith.addf %9, %12 : vector<1x128xf32>
    %c0_9 = arith.constant 0 : index
    %c0_10 = arith.constant 0 : index
    %14 = vector.load %arg3[%c0_9, %c0_10] : memref<1x128xf32, #tpu.memory_space<vmem>>, vector<1x128xf32>
    tpu.vector_store %arg3[%c0_9, %c0_10], %13 {strides = array<i32>} : memref<1x128xf32, #tpu.memory_space<vmem>>, vector<1x128xf32>,
    return
  }
  func.func @transform_0(%arg0: i32) -> (i32, i32) {
    %c0_i32 = arith.constant 0 : i32
    %c0_i32_0 = arith.constant 0 : i32
    return %arg0, %c0_i32 : i32, i32
  }
  func.func @transform_1(%arg0: i32) -> (i32, i32) {
    %c0_i32 = arith.constant 0 : i32
    %c0_i32_0 = arith.constant 0 : i32
    %c0_i32_1 = arith.constant 0 : i32
    return %c0_i32, %c0_i32_0 : i32, i32
  }
  func.func @transform_2(%arg0: i32) -> (i32, i32) {
    %c0_i32 = arith.constant 0 : i32
    %c0_i32_0 = arith.constant 0 : i32
    %c0_i32_1 = arith.constant 0 : i32
    return %c0_i32, %c0_i32_0 : i32, i32
  }
}

module attributes {stable_mosaic.version = 11 : i64} {
  func.func @_scale_shift_relu_kernel(%arg0: i32, %arg1: memref<512x128xf32, #tpu.memory_space<vmem>>, %arg2: memref<1x128xf32, #tpu.memory_space<vmem>>, %arg3: memref<1x128xf32, #tpu.memory_space<vmem>>, %arg4: memref<512x128xbf16, #tpu.memory_space<vmem>>) attributes {dimension_semantics = [#tpu.dimension_semantics<parallel>], iteration_bounds = array<i64: 4>, scalar_prefetch = 0 : i64, scratch_operands = 0 : i64, tpu.core_type = #tpu.core_type<tc>, window_params = [{transform_indices = @transform_0, window_bounds = array<i64: 512, 128>}, {pipeline_mode = #tpu.pipeline_mode<synchronous>, transform_indices = @transform_1, window_bounds = array<i64: 1, 128>}, {pipeline_mode = #tpu.pipeline_mode<synchronous>, transform_indices = @transform_2, window_bounds = array<i64: 1, 128>}, {transform_indices = @transform_3, window_bounds = array<i64: 512, 128>}]} {
    %c0 = arith.constant 0 : index
    %c0_0 = arith.constant 0 : index
    %0 = vector.load %arg1[%c0, %c0_0] : memref<512x128xf32, #tpu.memory_space<vmem>>, vector<512x128xf32>
    %c0_1 = arith.constant 0 : index
    %c0_2 = arith.constant 0 : index
    %1 = vector.load %arg2[%c0_1, %c0_2] : memref<1x128xf32, #tpu.memory_space<vmem>>, vector<1x128xf32>
    %2 = vector.broadcast %1 : vector<1x128xf32> to vector<512x128xf32>
    %3 = arith.mulf %0, %2 : vector<512x128xf32>
    %c0_3 = arith.constant 0 : index
    %c0_4 = arith.constant 0 : index
    %4 = vector.load %arg3[%c0_3, %c0_4] : memref<1x128xf32, #tpu.memory_space<vmem>>, vector<1x128xf32>
    %5 = vector.broadcast %4 : vector<1x128xf32> to vector<512x128xf32>
    %6 = arith.addf %3, %5 : vector<512x128xf32>
    %cst = arith.constant 0.000000e+00 : f32
    %7 = vector.broadcast %cst : f32 to vector<512x128xf32>
    %8 = arith.maximumf %6, %7 : vector<512x128xf32>
    %9 = arith.truncf %8 : vector<512x128xf32> to vector<512x128xbf16>
    %c0_5 = arith.constant 0 : index
    %c0_6 = arith.constant 0 : index
    %10 = vector.load %arg4[%c0_5, %c0_6] : memref<512x128xbf16, #tpu.memory_space<vmem>>, vector<512x128xbf16>
    tpu.vector_store %arg4[%c0_5, %c0_6], %9 {strides = array<i32>} : memref<512x128xbf16, #tpu.memory_space<vmem>>, vector<512x128xbf16>,
    return
  }
  func.func @transform_0(%arg0: i32) -> (i32, i32) {
    %c0_i32 = arith.constant 0 : i32
    %c0_i32_0 = arith.constant 0 : i32
    return %arg0, %c0_i32 : i32, i32
  }
  func.func @transform_1(%arg0: i32) -> (i32, i32) {
    %c0_i32 = arith.constant 0 : i32
    %c0_i32_0 = arith.constant 0 : i32
    %c0_i32_1 = arith.constant 0 : i32
    return %c0_i32, %c0_i32_0 : i32, i32
  }
  func.func @transform_2(%arg0: i32) -> (i32, i32) {
    %c0_i32 = arith.constant 0 : i32
    %c0_i32_0 = arith.constant 0 : i32
    %c0_i32_1 = arith.constant 0 : i32
    return %c0_i32, %c0_i32_0 : i32, i32
  }
  func.func @transform_3(%arg0: i32) -> (i32, i32) {
    %c0_i32 = arith.constant 0 : i32
    %c0_i32_0 = arith.constant 0 : i32
    return %arg0, %c0_i32 : i32, i32
  }
}

module attributes {stable_mosaic.version = 11 : i64} {
  func.func @_bn_stats_kernel(%arg0: i32, %arg1: memref<512x128xf32, #tpu.memory_space<vmem>>, %arg2: memref<1x128xf32, #tpu.memory_space<vmem>>, %arg3: memref<1x128xf32, #tpu.memory_space<vmem>>) attributes {dimension_semantics = [#tpu.dimension_semantics<arbitrary>], iteration_bounds = array<i64: 1>, scalar_prefetch = 0 : i64, scratch_operands = 0 : i64, tpu.core_type = #tpu.core_type<tc>, window_params = [{transform_indices = @transform_0, window_bounds = array<i64: 512, 128>}, {pipeline_mode = #tpu.pipeline_mode<synchronous>, transform_indices = @transform_1, window_bounds = array<i64: 1, 128>}, {pipeline_mode = #tpu.pipeline_mode<synchronous>, transform_indices = @transform_2, window_bounds = array<i64: 1, 128>}]} {
    %c0_i32 = arith.constant 0 : i32
    %0 = arith.cmpi eq, %arg0, %c0_i32 : i32
    %1 = arith.extui %0 : i1 to i32
    %c0_i32_0 = arith.constant 0 : i32
    %2 = arith.cmpi ne, %1, %c0_i32_0 : i32
    scf.if %2 {
      %cst_11 = arith.constant 0.000000e+00 : f32
      %15 = vector.broadcast %cst_11 : f32 to vector<1x128xf32>
      %c0_12 = arith.constant 0 : index
      %c0_13 = arith.constant 0 : index
      %16 = vector.load %arg2[%c0_12, %c0_13] : memref<1x128xf32, #tpu.memory_space<vmem>>, vector<1x128xf32>
      tpu.vector_store %arg2[%c0_12, %c0_13], %15 {strides = array<i32>} : memref<1x128xf32, #tpu.memory_space<vmem>>, vector<1x128xf32>,
      %cst_14 = arith.constant 0.000000e+00 : f32
      %17 = vector.broadcast %cst_14 : f32 to vector<1x128xf32>
      %c0_15 = arith.constant 0 : index
      %c0_16 = arith.constant 0 : index
      %18 = vector.load %arg3[%c0_15, %c0_16] : memref<1x128xf32, #tpu.memory_space<vmem>>, vector<1x128xf32>
      tpu.vector_store %arg3[%c0_15, %c0_16], %17 {strides = array<i32>} : memref<1x128xf32, #tpu.memory_space<vmem>>, vector<1x128xf32>,
    } else {
    }
    %c0 = arith.constant 0 : index
    %c0_1 = arith.constant 0 : index
    %3 = vector.load %arg1[%c0, %c0_1] : memref<512x128xf32, #tpu.memory_space<vmem>>, vector<512x128xf32>
    %c0_2 = arith.constant 0 : index
    %c0_3 = arith.constant 0 : index
    %4 = vector.load %arg2[%c0_2, %c0_3] : memref<1x128xf32, #tpu.memory_space<vmem>>, vector<1x128xf32>
    %cst = arith.constant dense<0.000000e+00> : vector<128xf32>
    %5 = vector.multi_reduction <add>, %3, %cst [0] : vector<512x128xf32> to vector<128xf32>
    %6 = vector.shape_cast %5 : vector<128xf32> to vector<1x128xf32>
    %7 = arith.addf %4, %6 : vector<1x128xf32>
    %c0_4 = arith.constant 0 : index
    %c0_5 = arith.constant 0 : index
    %8 = vector.load %arg2[%c0_4, %c0_5] : memref<1x128xf32, #tpu.memory_space<vmem>>, vector<1x128xf32>
    tpu.vector_store %arg2[%c0_4, %c0_5], %7 {strides = array<i32>} : memref<1x128xf32, #tpu.memory_space<vmem>>, vector<1x128xf32>,
    %c0_6 = arith.constant 0 : index
    %c0_7 = arith.constant 0 : index
    %9 = vector.load %arg3[%c0_6, %c0_7] : memref<1x128xf32, #tpu.memory_space<vmem>>, vector<1x128xf32>
    %10 = arith.mulf %3, %3 : vector<512x128xf32>
    %cst_8 = arith.constant dense<0.000000e+00> : vector<128xf32>
    %11 = vector.multi_reduction <add>, %10, %cst_8 [0] : vector<512x128xf32> to vector<128xf32>
    %12 = vector.shape_cast %11 : vector<128xf32> to vector<1x128xf32>
    %13 = arith.addf %9, %12 : vector<1x128xf32>
    %c0_9 = arith.constant 0 : index
    %c0_10 = arith.constant 0 : index
    %14 = vector.load %arg3[%c0_9, %c0_10] : memref<1x128xf32, #tpu.memory_space<vmem>>, vector<1x128xf32>
    tpu.vector_store %arg3[%c0_9, %c0_10], %13 {strides = array<i32>} : memref<1x128xf32, #tpu.memory_space<vmem>>, vector<1x128xf32>,
    return
  }
  func.func @transform_0(%arg0: i32) -> (i32, i32) {
    %c0_i32 = arith.constant 0 : i32
    %c0_i32_0 = arith.constant 0 : i32
    return %arg0, %c0_i32 : i32, i32
  }
  func.func @transform_1(%arg0: i32) -> (i32, i32) {
    %c0_i32 = arith.constant 0 : i32
    %c0_i32_0 = arith.constant 0 : i32
    %c0_i32_1 = arith.constant 0 : i32
    return %c0_i32, %c0_i32_0 : i32, i32
  }
  func.func @transform_2(%arg0: i32) -> (i32, i32) {
    %c0_i32 = arith.constant 0 : i32
    %c0_i32_0 = arith.constant 0 : i32
    %c0_i32_1 = arith.constant 0 : i32
    return %c0_i32, %c0_i32_0 : i32, i32
  }
}

module attributes {stable_mosaic.version = 11 : i64} {
  func.func @_scale_shift_relu_kernel(%arg0: i32, %arg1: memref<512x128xf32, #tpu.memory_space<vmem>>, %arg2: memref<1x128xf32, #tpu.memory_space<vmem>>, %arg3: memref<1x128xf32, #tpu.memory_space<vmem>>, %arg4: memref<512x128xbf16, #tpu.memory_space<vmem>>) attributes {dimension_semantics = [#tpu.dimension_semantics<parallel>], iteration_bounds = array<i64: 1>, scalar_prefetch = 0 : i64, scratch_operands = 0 : i64, tpu.core_type = #tpu.core_type<tc>, window_params = [{transform_indices = @transform_0, window_bounds = array<i64: 512, 128>}, {pipeline_mode = #tpu.pipeline_mode<synchronous>, transform_indices = @transform_1, window_bounds = array<i64: 1, 128>}, {pipeline_mode = #tpu.pipeline_mode<synchronous>, transform_indices = @transform_2, window_bounds = array<i64: 1, 128>}, {transform_indices = @transform_3, window_bounds = array<i64: 512, 128>}]} {
    %c0 = arith.constant 0 : index
    %c0_0 = arith.constant 0 : index
    %0 = vector.load %arg1[%c0, %c0_0] : memref<512x128xf32, #tpu.memory_space<vmem>>, vector<512x128xf32>
    %c0_1 = arith.constant 0 : index
    %c0_2 = arith.constant 0 : index
    %1 = vector.load %arg2[%c0_1, %c0_2] : memref<1x128xf32, #tpu.memory_space<vmem>>, vector<1x128xf32>
    %2 = vector.broadcast %1 : vector<1x128xf32> to vector<512x128xf32>
    %3 = arith.mulf %0, %2 : vector<512x128xf32>
    %c0_3 = arith.constant 0 : index
    %c0_4 = arith.constant 0 : index
    %4 = vector.load %arg3[%c0_3, %c0_4] : memref<1x128xf32, #tpu.memory_space<vmem>>, vector<1x128xf32>
    %5 = vector.broadcast %4 : vector<1x128xf32> to vector<512x128xf32>
    %6 = arith.addf %3, %5 : vector<512x128xf32>
    %cst = arith.constant 0.000000e+00 : f32
    %7 = vector.broadcast %cst : f32 to vector<512x128xf32>
    %8 = arith.maximumf %6, %7 : vector<512x128xf32>
    %9 = arith.truncf %8 : vector<512x128xf32> to vector<512x128xbf16>
    %c0_5 = arith.constant 0 : index
    %c0_6 = arith.constant 0 : index
    %10 = vector.load %arg4[%c0_5, %c0_6] : memref<512x128xbf16, #tpu.memory_space<vmem>>, vector<512x128xbf16>
    tpu.vector_store %arg4[%c0_5, %c0_6], %9 {strides = array<i32>} : memref<512x128xbf16, #tpu.memory_space<vmem>>, vector<512x128xbf16>,
    return
  }
  func.func @transform_0(%arg0: i32) -> (i32, i32) {
    %c0_i32 = arith.constant 0 : i32
    %c0_i32_0 = arith.constant 0 : i32
    return %arg0, %c0_i32 : i32, i32
  }
  func.func @transform_1(%arg0: i32) -> (i32, i32) {
    %c0_i32 = arith.constant 0 : i32
    %c0_i32_0 = arith.constant 0 : i32
    %c0_i32_1 = arith.constant 0 : i32
    return %c0_i32, %c0_i32_0 : i32, i32
  }
  func.func @transform_2(%arg0: i32) -> (i32, i32) {
    %c0_i32 = arith.constant 0 : i32
    %c0_i32_0 = arith.constant 0 : i32
    %c0_i32_1 = arith.constant 0 : i32
    return %c0_i32, %c0_i32_0 : i32, i32
  }
  func.func @transform_3(%arg0: i32) -> (i32, i32) {
    %c0_i32 = arith.constant 0 : i32
    %c0_i32_0 = arith.constant 0 : i32
    return %arg0, %c0_i32 : i32, i32
  }
}

module attributes {stable_mosaic.version = 11 : i64} {
  func.func @_conv3x3_kernel(%arg0: i32, %arg1: i32, %arg2: memref<816x128xbf16, #tpu.memory_space<any>>, %arg3: memref<9x128x128xbf16, #tpu.memory_space<vmem>>, %arg4: memref<1x128xf32, #tpu.memory_space<vmem>>, %arg5: memref<256x128xf32, #tpu.memory_space<vmem>>, %arg6: memref<304x128xbf16, #tpu.memory_space<vmem>>, %arg7: memref<1x!tpu.dma_semaphore, #tpu.memory_space<semaphore_mem>>) attributes {dimension_semantics = [#tpu.dimension_semantics<parallel>, #tpu.dimension_semantics<arbitrary>], iteration_bounds = array<i64: 3, 1>, scalar_prefetch = 0 : i64, scratch_operands = 2 : i64, tpu.core_type = #tpu.core_type<tc>, window_params = [{}, {transform_indices = @transform_1, window_bounds = array<i64: 9, 128, 128>}, {transform_indices = @transform_2, window_bounds = array<i64: 1, 128>}, {transform_indices = @transform_3, window_bounds = array<i64: 256, 128>}]} {
    %c0_i32 = arith.constant 0 : i32
    %0 = arith.cmpi eq, %arg1, %c0_i32 : i32
    %1 = arith.extui %0 : i1 to i32
    %c0_i32_0 = arith.constant 0 : i32
    %2 = arith.cmpi ne, %1, %c0_i32_0 : i32
    scf.if %2 {
      %c256_i32 = arith.constant 256 : i32
      %53 = arith.muli %arg0, %c256_i32 : i32
      %54 = tpu.assume_multiple %53, 8 : i32
      %c0_i32_44 = arith.constant 0 : i32
      %c0_i32_45 = arith.constant 0 : i32
      %55 = tpu.memref_slice %arg2[%54, %c0_i32_45] : memref<816x128xbf16, #tpu.memory_space<any>> -> memref<304x128xbf16, #tpu.memory_space<any>>
      %56 = tpu.memref_slice %arg7[%c0_i32_44] : memref<1x!tpu.dma_semaphore, #tpu.memory_space<semaphore_mem>> -> memref<1x!tpu.dma_semaphore, #tpu.memory_space<semaphore_mem>>
      %57 = tpu.memref_squeeze %56 : memref<1x!tpu.dma_semaphore, #tpu.memory_space<semaphore_mem>> -> memref<!tpu.dma_semaphore, #tpu.memory_space<semaphore_mem>>
      tpu.enqueue_dma source(%55 : memref<304x128xbf16, #tpu.memory_space<any>>) target(%arg6 : memref<304x128xbf16, #tpu.memory_space<vmem>>) target_semaphore(%57 : memref<!tpu.dma_semaphore, #tpu.memory_space<semaphore_mem>>)
      %c0_i32_46 = arith.constant 0 : i32
      %c0_i32_47 = arith.constant 0 : i32
      %58 = tpu.memref_slice %arg2[%54, %c0_i32_47] : memref<816x128xbf16, #tpu.memory_space<any>> -> memref<304x128xbf16, #tpu.memory_space<any>>
      %59 = tpu.memref_slice %arg7[%c0_i32_46] : memref<1x!tpu.dma_semaphore, #tpu.memory_space<semaphore_mem>> -> memref<1x!tpu.dma_semaphore, #tpu.memory_space<semaphore_mem>>
      %60 = tpu.memref_squeeze %59 : memref<1x!tpu.dma_semaphore, #tpu.memory_space<semaphore_mem>> -> memref<!tpu.dma_semaphore, #tpu.memory_space<semaphore_mem>>
      tpu.wait_dma2 semaphore(%60 : memref<!tpu.dma_semaphore, #tpu.memory_space<semaphore_mem>>) src(%58 : memref<304x128xbf16, #tpu.memory_space<any>>) dst(%arg6 : memref<304x128xbf16, #tpu.memory_space<vmem>>)
    } else {
    }
    %cst = arith.constant 0.000000e+00 : f32
    %3 = vector.broadcast %cst : f32 to vector<256x128xf32>
    %c5 = arith.constant 5 : index
    %c0 = arith.constant 0 : index
    %4 = vector.load %arg6[%c5, %c0] : memref<304x128xbf16, #tpu.memory_space<vmem>>, vector<256x128xbf16>
    %c0_1 = arith.constant 0 : index
    %c0_2 = arith.constant 0 : index
    %c0_3 = arith.constant 0 : index
    %5 = vector.load %arg3[%c0_1, %c0_2, %c0_3] : memref<9x128x128xbf16, #tpu.memory_space<vmem>>, vector<1x128x128xbf16>
    %6 = vector.shape_cast %5 : vector<1x128x128xbf16> to vector<128x128xbf16>
    %cst_4 = arith.constant dense<0.000000e+00> : vector<256x128xf32>
    %7 = tpu.matmul %4, %6, %cst_4 {dimension_numbers = #tpu.dot_dimension_numbers<[1], [0], [0], [1], [0, 0, 1, 1], [], []>} : vector<256x128xbf16>, vector<128x128xbf16>, vector<256x128xf32> -> vector<256x128xf32>
    %8 = arith.addf %3, %7 : vector<256x128xf32>
    %c6 = arith.constant 6 : index
    %c0_5 = arith.constant 0 : index
    %9 = vector.load %arg6[%c6, %c0_5] : memref<304x128xbf16, #tpu.memory_space<vmem>>, vector<256x128xbf16>
    %c1 = arith.constant 1 : index
    %c0_6 = arith.constant 0 : index
    %c0_7 = arith.constant 0 : index
    %10 = vector.load %arg3[%c1, %c0_6, %c0_7] : memref<9x128x128xbf16, #tpu.memory_space<vmem>>, vector<1x128x128xbf16>
    %11 = vector.shape_cast %10 : vector<1x128x128xbf16> to vector<128x128xbf16>
    %cst_8 = arith.constant dense<0.000000e+00> : vector<256x128xf32>
    %12 = tpu.matmul %9, %11, %cst_8 {dimension_numbers = #tpu.dot_dimension_numbers<[1], [0], [0], [1], [0, 0, 1, 1], [], []>} : vector<256x128xbf16>, vector<128x128xbf16>, vector<256x128xf32> -> vector<256x128xf32>
    %13 = arith.addf %8, %12 : vector<256x128xf32>
    %c7 = arith.constant 7 : index
    %c0_9 = arith.constant 0 : index
    %14 = vector.load %arg6[%c7, %c0_9] : memref<304x128xbf16, #tpu.memory_space<vmem>>, vector<256x128xbf16>
    %c2 = arith.constant 2 : index
    %c0_10 = arith.constant 0 : index
    %c0_11 = arith.constant 0 : index
    %15 = vector.load %arg3[%c2, %c0_10, %c0_11] : memref<9x128x128xbf16, #tpu.memory_space<vmem>>, vector<1x128x128xbf16>
    %16 = vector.shape_cast %15 : vector<1x128x128xbf16> to vector<128x128xbf16>
    %cst_12 = arith.constant dense<0.000000e+00> : vector<256x128xf32>
    %17 = tpu.matmul %14, %16, %cst_12 {dimension_numbers = #tpu.dot_dimension_numbers<[1], [0], [0], [1], [0, 0, 1, 1], [], []>} : vector<256x128xbf16>, vector<128x128xbf16>, vector<256x128xf32> -> vector<256x128xf32>
    %18 = arith.addf %13, %17 : vector<256x128xf32>
    %c23 = arith.constant 23 : index
    %c0_13 = arith.constant 0 : index
    %19 = vector.load %arg6[%c23, %c0_13] : memref<304x128xbf16, #tpu.memory_space<vmem>>, vector<256x128xbf16>
    %c3 = arith.constant 3 : index
    %c0_14 = arith.constant 0 : index
    %c0_15 = arith.constant 0 : index
    %20 = vector.load %arg3[%c3, %c0_14, %c0_15] : memref<9x128x128xbf16, #tpu.memory_space<vmem>>, vector<1x128x128xbf16>
    %21 = vector.shape_cast %20 : vector<1x128x128xbf16> to vector<128x128xbf16>
    %cst_16 = arith.constant dense<0.000000e+00> : vector<256x128xf32>
    %22 = tpu.matmul %19, %21, %cst_16 {dimension_numbers = #tpu.dot_dimension_numbers<[1], [0], [0], [1], [0, 0, 1, 1], [], []>} : vector<256x128xbf16>, vector<128x128xbf16>, vector<256x128xf32> -> vector<256x128xf32>
    %23 = arith.addf %18, %22 : vector<256x128xf32>
    %c24 = arith.constant 24 : index
    %c0_17 = arith.constant 0 : index
    %24 = vector.load %arg6[%c24, %c0_17] : memref<304x128xbf16, #tpu.memory_space<vmem>>, vector<256x128xbf16>
    %c4 = arith.constant 4 : index
    %c0_18 = arith.constant 0 : index
    %c0_19 = arith.constant 0 : index
    %25 = vector.load %arg3[%c4, %c0_18, %c0_19] : memref<9x128x128xbf16, #tpu.memory_space<vmem>>, vector<1x128x128xbf16>
    %26 = vector.shape_cast %25 : vector<1x128x128xbf16> to vector<128x128xbf16>
    %cst_20 = arith.constant dense<0.000000e+00> : vector<256x128xf32>
    %27 = tpu.matmul %24, %26, %cst_20 {dimension_numbers = #tpu.dot_dimension_numbers<[1], [0], [0], [1], [0, 0, 1, 1], [], []>} : vector<256x128xbf16>, vector<128x128xbf16>, vector<256x128xf32> -> vector<256x128xf32>
    %28 = arith.addf %23, %27 : vector<256x128xf32>
    %c25 = arith.constant 25 : index
    %c0_21 = arith.constant 0 : index
    %29 = vector.load %arg6[%c25, %c0_21] : memref<304x128xbf16, #tpu.memory_space<vmem>>, vector<256x128xbf16>
    %c5_22 = arith.constant 5 : index
    %c0_23 = arith.constant 0 : index
    %c0_24 = arith.constant 0 : index
    %30 = vector.load %arg3[%c5_22, %c0_23, %c0_24] : memref<9x128x128xbf16, #tpu.memory_space<vmem>>, vector<1x128x128xbf16>
    %31 = vector.shape_cast %30 : vector<1x128x128xbf16> to vector<128x128xbf16>
    %cst_25 = arith.constant dense<0.000000e+00> : vector<256x128xf32>
    %32 = tpu.matmul %29, %31, %cst_25 {dimension_numbers = #tpu.dot_dimension_numbers<[1], [0], [0], [1], [0, 0, 1, 1], [], []>} : vector<256x128xbf16>, vector<128x128xbf16>, vector<256x128xf32> -> vector<256x128xf32>
    %33 = arith.addf %28, %32 : vector<256x128xf32>
    %c41 = arith.constant 41 : index
    %c0_26 = arith.constant 0 : index
    %34 = vector.load %arg6[%c41, %c0_26] : memref<304x128xbf16, #tpu.memory_space<vmem>>, vector<256x128xbf16>
    %c6_27 = arith.constant 6 : index
    %c0_28 = arith.constant 0 : index
    %c0_29 = arith.constant 0 : index
    %35 = vector.load %arg3[%c6_27, %c0_28, %c0_29] : memref<9x128x128xbf16, #tpu.memory_space<vmem>>, vector<1x128x128xbf16>
    %36 = vector.shape_cast %35 : vector<1x128x128xbf16> to vector<128x128xbf16>
    %cst_30 = arith.constant dense<0.000000e+00> : vector<256x128xf32>
    %37 = tpu.matmul %34, %36, %cst_30 {dimension_numbers = #tpu.dot_dimension_numbers<[1], [0], [0], [1], [0, 0, 1, 1], [], []>} : vector<256x128xbf16>, vector<128x128xbf16>, vector<256x128xf32> -> vector<256x128xf32>
    %38 = arith.addf %33, %37 : vector<256x128xf32>
    %c42 = arith.constant 42 : index
    %c0_31 = arith.constant 0 : index
    %39 = vector.load %arg6[%c42, %c0_31] : memref<304x128xbf16, #tpu.memory_space<vmem>>, vector<256x128xbf16>
    %c7_32 = arith.constant 7 : index
    %c0_33 = arith.constant 0 : index
    %c0_34 = arith.constant 0 : index
    %40 = vector.load %arg3[%c7_32, %c0_33, %c0_34] : memref<9x128x128xbf16, #tpu.memory_space<vmem>>, vector<1x128x128xbf16>
    %41 = vector.shape_cast %40 : vector<1x128x128xbf16> to vector<128x128xbf16>
    %cst_35 = arith.constant dense<0.000000e+00> : vector<256x128xf32>
    %42 = tpu.matmul %39, %41, %cst_35 {dimension_numbers = #tpu.dot_dimension_numbers<[1], [0], [0], [1], [0, 0, 1, 1], [], []>} : vector<256x128xbf16>, vector<128x128xbf16>, vector<256x128xf32> -> vector<256x128xf32>
    %43 = arith.addf %38, %42 : vector<256x128xf32>
    %c43 = arith.constant 43 : index
    %c0_36 = arith.constant 0 : index
    %44 = vector.load %arg6[%c43, %c0_36] : memref<304x128xbf16, #tpu.memory_space<vmem>>, vector<256x128xbf16>
    %c8 = arith.constant 8 : index
    %c0_37 = arith.constant 0 : index
    %c0_38 = arith.constant 0 : index
    %45 = vector.load %arg3[%c8, %c0_37, %c0_38] : memref<9x128x128xbf16, #tpu.memory_space<vmem>>, vector<1x128x128xbf16>
    %46 = vector.shape_cast %45 : vector<1x128x128xbf16> to vector<128x128xbf16>
    %cst_39 = arith.constant dense<0.000000e+00> : vector<256x128xf32>
    %47 = tpu.matmul %44, %46, %cst_39 {dimension_numbers = #tpu.dot_dimension_numbers<[1], [0], [0], [1], [0, 0, 1, 1], [], []>} : vector<256x128xbf16>, vector<128x128xbf16>, vector<256x128xf32> -> vector<256x128xf32>
    %48 = arith.addf %43, %47 : vector<256x128xf32>
    %c0_40 = arith.constant 0 : index
    %c0_41 = arith.constant 0 : index
    %49 = vector.load %arg4[%c0_40, %c0_41] : memref<1x128xf32, #tpu.memory_space<vmem>>, vector<1x128xf32>
    %50 = vector.broadcast %49 : vector<1x128xf32> to vector<256x128xf32>
    %51 = arith.addf %48, %50 : vector<256x128xf32>
    %c0_42 = arith.constant 0 : index
    %c0_43 = arith.constant 0 : index
    %52 = vector.load %arg5[%c0_42, %c0_43] : memref<256x128xf32, #tpu.memory_space<vmem>>, vector<256x128xf32>
    tpu.vector_store %arg5[%c0_42, %c0_43], %51 {strides = array<i32>} : memref<256x128xf32, #tpu.memory_space<vmem>>, vector<256x128xf32>,
    return
  }
  func.func @transform_1(%arg0: i32, %arg1: i32) -> (i32, i32, i32) {
    %c0_i32 = arith.constant 0 : i32
    %c0_i32_0 = arith.constant 0 : i32
    %c0_i32_1 = arith.constant 0 : i32
    return %c0_i32, %c0_i32_0, %arg1 : i32, i32, i32
  }
  func.func @transform_2(%arg0: i32, %arg1: i32) -> (i32, i32) {
    %c0_i32 = arith.constant 0 : i32
    %c0_i32_0 = arith.constant 0 : i32
    return %c0_i32, %arg1 : i32, i32
  }
  func.func @transform_3(%arg0: i32, %arg1: i32) -> (i32, i32) {
    %c0_i32 = arith.constant 0 : i32
    return %arg0, %arg1 : i32, i32
  }
}

module attributes {stable_mosaic.version = 11 : i64} {
  func.func @_bn_stats_kernel(%arg0: i32, %arg1: memref<128x128xf32, #tpu.memory_space<vmem>>, %arg2: memref<1x128xf32, #tpu.memory_space<vmem>>, %arg3: memref<1x128xf32, #tpu.memory_space<vmem>>) attributes {dimension_semantics = [#tpu.dimension_semantics<arbitrary>], iteration_bounds = array<i64: 1>, scalar_prefetch = 0 : i64, scratch_operands = 0 : i64, tpu.core_type = #tpu.core_type<tc>, window_params = [{transform_indices = @transform_0, window_bounds = array<i64: 128, 128>}, {pipeline_mode = #tpu.pipeline_mode<synchronous>, transform_indices = @transform_1, window_bounds = array<i64: 1, 128>}, {pipeline_mode = #tpu.pipeline_mode<synchronous>, transform_indices = @transform_2, window_bounds = array<i64: 1, 128>}]} {
    %c0_i32 = arith.constant 0 : i32
    %0 = arith.cmpi eq, %arg0, %c0_i32 : i32
    %1 = arith.extui %0 : i1 to i32
    %c0_i32_0 = arith.constant 0 : i32
    %2 = arith.cmpi ne, %1, %c0_i32_0 : i32
    scf.if %2 {
      %cst_11 = arith.constant 0.000000e+00 : f32
      %15 = vector.broadcast %cst_11 : f32 to vector<1x128xf32>
      %c0_12 = arith.constant 0 : index
      %c0_13 = arith.constant 0 : index
      %16 = vector.load %arg2[%c0_12, %c0_13] : memref<1x128xf32, #tpu.memory_space<vmem>>, vector<1x128xf32>
      tpu.vector_store %arg2[%c0_12, %c0_13], %15 {strides = array<i32>} : memref<1x128xf32, #tpu.memory_space<vmem>>, vector<1x128xf32>,
      %cst_14 = arith.constant 0.000000e+00 : f32
      %17 = vector.broadcast %cst_14 : f32 to vector<1x128xf32>
      %c0_15 = arith.constant 0 : index
      %c0_16 = arith.constant 0 : index
      %18 = vector.load %arg3[%c0_15, %c0_16] : memref<1x128xf32, #tpu.memory_space<vmem>>, vector<1x128xf32>
      tpu.vector_store %arg3[%c0_15, %c0_16], %17 {strides = array<i32>} : memref<1x128xf32, #tpu.memory_space<vmem>>, vector<1x128xf32>,
    } else {
    }
    %c0 = arith.constant 0 : index
    %c0_1 = arith.constant 0 : index
    %3 = vector.load %arg1[%c0, %c0_1] : memref<128x128xf32, #tpu.memory_space<vmem>>, vector<128x128xf32>
    %c0_2 = arith.constant 0 : index
    %c0_3 = arith.constant 0 : index
    %4 = vector.load %arg2[%c0_2, %c0_3] : memref<1x128xf32, #tpu.memory_space<vmem>>, vector<1x128xf32>
    %cst = arith.constant dense<0.000000e+00> : vector<128xf32>
    %5 = vector.multi_reduction <add>, %3, %cst [0] : vector<128x128xf32> to vector<128xf32>
    %6 = vector.shape_cast %5 : vector<128xf32> to vector<1x128xf32>
    %7 = arith.addf %4, %6 : vector<1x128xf32>
    %c0_4 = arith.constant 0 : index
    %c0_5 = arith.constant 0 : index
    %8 = vector.load %arg2[%c0_4, %c0_5] : memref<1x128xf32, #tpu.memory_space<vmem>>, vector<1x128xf32>
    tpu.vector_store %arg2[%c0_4, %c0_5], %7 {strides = array<i32>} : memref<1x128xf32, #tpu.memory_space<vmem>>, vector<1x128xf32>,
    %c0_6 = arith.constant 0 : index
    %c0_7 = arith.constant 0 : index
    %9 = vector.load %arg3[%c0_6, %c0_7] : memref<1x128xf32, #tpu.memory_space<vmem>>, vector<1x128xf32>
    %10 = arith.mulf %3, %3 : vector<128x128xf32>
    %cst_8 = arith.constant dense<0.000000e+00> : vector<128xf32>
    %11 = vector.multi_reduction <add>, %10, %cst_8 [0] : vector<128x128xf32> to vector<128xf32>
    %12 = vector.shape_cast %11 : vector<128xf32> to vector<1x128xf32>
    %13 = arith.addf %9, %12 : vector<1x128xf32>
    %c0_9 = arith.constant 0 : index
    %c0_10 = arith.constant 0 : index
    %14 = vector.load %arg3[%c0_9, %c0_10] : memref<1x128xf32, #tpu.memory_space<vmem>>, vector<1x128xf32>
    tpu.vector_store %arg3[%c0_9, %c0_10], %13 {strides = array<i32>} : memref<1x128xf32, #tpu.memory_space<vmem>>, vector<1x128xf32>,
    return
  }
  func.func @transform_0(%arg0: i32) -> (i32, i32) {
    %c0_i32 = arith.constant 0 : i32
    %c0_i32_0 = arith.constant 0 : i32
    return %arg0, %c0_i32 : i32, i32
  }
  func.func @transform_1(%arg0: i32) -> (i32, i32) {
    %c0_i32 = arith.constant 0 : i32
    %c0_i32_0 = arith.constant 0 : i32
    %c0_i32_1 = arith.constant 0 : i32
    return %c0_i32, %c0_i32_0 : i32, i32
  }
  func.func @transform_2(%arg0: i32) -> (i32, i32) {
    %c0_i32 = arith.constant 0 : i32
    %c0_i32_0 = arith.constant 0 : i32
    %c0_i32_1 = arith.constant 0 : i32
    return %c0_i32, %c0_i32_0 : i32, i32
  }
}

module attributes {stable_mosaic.version = 11 : i64} {
  func.func @_scale_shift_relu_kernel(%arg0: i32, %arg1: memref<128x128xf32, #tpu.memory_space<vmem>>, %arg2: memref<1x128xf32, #tpu.memory_space<vmem>>, %arg3: memref<1x128xf32, #tpu.memory_space<vmem>>, %arg4: memref<128x128xbf16, #tpu.memory_space<vmem>>) attributes {dimension_semantics = [#tpu.dimension_semantics<parallel>], iteration_bounds = array<i64: 1>, scalar_prefetch = 0 : i64, scratch_operands = 0 : i64, tpu.core_type = #tpu.core_type<tc>, window_params = [{transform_indices = @transform_0, window_bounds = array<i64: 128, 128>}, {pipeline_mode = #tpu.pipeline_mode<synchronous>, transform_indices = @transform_1, window_bounds = array<i64: 1, 128>}, {pipeline_mode = #tpu.pipeline_mode<synchronous>, transform_indices = @transform_2, window_bounds = array<i64: 1, 128>}, {transform_indices = @transform_3, window_bounds = array<i64: 128, 128>}]} {
    %c0 = arith.constant 0 : index
    %c0_0 = arith.constant 0 : index
    %0 = vector.load %arg1[%c0, %c0_0] : memref<128x128xf32, #tpu.memory_space<vmem>>, vector<128x128xf32>
    %c0_1 = arith.constant 0 : index
    %c0_2 = arith.constant 0 : index
    %1 = vector.load %arg2[%c0_1, %c0_2] : memref<1x128xf32, #tpu.memory_space<vmem>>, vector<1x128xf32>
    %2 = vector.broadcast %1 : vector<1x128xf32> to vector<128x128xf32>
    %3 = arith.mulf %0, %2 : vector<128x128xf32>
    %c0_3 = arith.constant 0 : index
    %c0_4 = arith.constant 0 : index
    %4 = vector.load %arg3[%c0_3, %c0_4] : memref<1x128xf32, #tpu.memory_space<vmem>>, vector<1x128xf32>
    %5 = vector.broadcast %4 : vector<1x128xf32> to vector<128x128xf32>
    %6 = arith.addf %3, %5 : vector<128x128xf32>
    %cst = arith.constant 0.000000e+00 : f32
    %7 = vector.broadcast %cst : f32 to vector<128x128xf32>
    %8 = arith.maximumf %6, %7 : vector<128x128xf32>
    %9 = arith.truncf %8 : vector<128x128xf32> to vector<128x128xbf16>
    %c0_5 = arith.constant 0 : index
    %c0_6 = arith.constant 0 : index
    %10 = vector.load %arg4[%c0_5, %c0_6] : memref<128x128xbf16, #tpu.memory_space<vmem>>, vector<128x128xbf16>
    tpu.vector_store %arg4[%c0_5, %c0_6], %9 {strides = array<i32>} : memref<128x128xbf16, #tpu.memory_space<vmem>>, vector<128x128xbf16>,
    return
  }
  func.func @transform_0(%arg0: i32) -> (i32, i32) {
    %c0_i32 = arith.constant 0 : i32
    %c0_i32_0 = arith.constant 0 : i32
    return %arg0, %c0_i32 : i32, i32
  }
  func.func @transform_1(%arg0: i32) -> (i32, i32) {
    %c0_i32 = arith.constant 0 : i32
    %c0_i32_0 = arith.constant 0 : i32
    %c0_i32_1 = arith.constant 0 : i32
    return %c0_i32, %c0_i32_0 : i32, i32
  }
  func.func @transform_2(%arg0: i32) -> (i32, i32) {
    %c0_i32 = arith.constant 0 : i32
    %c0_i32_0 = arith.constant 0 : i32
    %c0_i32_1 = arith.constant 0 : i32
    return %c0_i32, %c0_i32_0 : i32, i32
  }
  func.func @transform_3(%arg0: i32) -> (i32, i32) {
    %c0_i32 = arith.constant 0 : i32
    %c0_i32_0 = arith.constant 0 : i32
    return %arg0, %c0_i32 : i32, i32
  }
}

module attributes {stable_mosaic.version = 11 : i64} {
  func.func @_conv3x3_kernel(%arg0: i32, %arg1: i32, %arg2: memref<232x128xbf16, #tpu.memory_space<any>>, %arg3: memref<9x128x128xbf16, #tpu.memory_space<vmem>>, %arg4: memref<1x128xf32, #tpu.memory_space<vmem>>, %arg5: memref<200x128xf32, #tpu.memory_space<vmem>>, %arg6: memref<232x128xbf16, #tpu.memory_space<vmem>>, %arg7: memref<1x!tpu.dma_semaphore, #tpu.memory_space<semaphore_mem>>) attributes {dimension_semantics = [#tpu.dimension_semantics<parallel>, #tpu.dimension_semantics<arbitrary>], iteration_bounds = array<i64: 1, 1>, scalar_prefetch = 0 : i64, scratch_operands = 2 : i64, tpu.core_type = #tpu.core_type<tc>, window_params = [{}, {transform_indices = @transform_1, window_bounds = array<i64: 9, 128, 128>}, {transform_indices = @transform_2, window_bounds = array<i64: 1, 128>}, {transform_indices = @transform_3, window_bounds = array<i64: 200, 128>}]} {
    %c0_i32 = arith.constant 0 : i32
    %0 = arith.cmpi eq, %arg1, %c0_i32 : i32
    %1 = arith.extui %0 : i1 to i32
    %c0_i32_0 = arith.constant 0 : i32
    %2 = arith.cmpi ne, %1, %c0_i32_0 : i32
    scf.if %2 {
      %c200_i32 = arith.constant 200 : i32
      %53 = arith.muli %arg0, %c200_i32 : i32
      %54 = tpu.assume_multiple %53, 8 : i32
      %c0_i32_44 = arith.constant 0 : i32
      %c0_i32_45 = arith.constant 0 : i32
      %55 = tpu.memref_slice %arg2[%54, %c0_i32_45] : memref<232x128xbf16, #tpu.memory_space<any>> -> memref<232x128xbf16, #tpu.memory_space<any>>
      %56 = tpu.memref_slice %arg7[%c0_i32_44] : memref<1x!tpu.dma_semaphore, #tpu.memory_space<semaphore_mem>> -> memref<1x!tpu.dma_semaphore, #tpu.memory_space<semaphore_mem>>
      %57 = tpu.memref_squeeze %56 : memref<1x!tpu.dma_semaphore, #tpu.memory_space<semaphore_mem>> -> memref<!tpu.dma_semaphore, #tpu.memory_space<semaphore_mem>>
      tpu.enqueue_dma source(%55 : memref<232x128xbf16, #tpu.memory_space<any>>) target(%arg6 : memref<232x128xbf16, #tpu.memory_space<vmem>>) target_semaphore(%57 : memref<!tpu.dma_semaphore, #tpu.memory_space<semaphore_mem>>)
      %c0_i32_46 = arith.constant 0 : i32
      %c0_i32_47 = arith.constant 0 : i32
      %58 = tpu.memref_slice %arg2[%54, %c0_i32_47] : memref<232x128xbf16, #tpu.memory_space<any>> -> memref<232x128xbf16, #tpu.memory_space<any>>
      %59 = tpu.memref_slice %arg7[%c0_i32_46] : memref<1x!tpu.dma_semaphore, #tpu.memory_space<semaphore_mem>> -> memref<1x!tpu.dma_semaphore, #tpu.memory_space<semaphore_mem>>
      %60 = tpu.memref_squeeze %59 : memref<1x!tpu.dma_semaphore, #tpu.memory_space<semaphore_mem>> -> memref<!tpu.dma_semaphore, #tpu.memory_space<semaphore_mem>>
      tpu.wait_dma2 semaphore(%60 : memref<!tpu.dma_semaphore, #tpu.memory_space<semaphore_mem>>) src(%58 : memref<232x128xbf16, #tpu.memory_space<any>>) dst(%arg6 : memref<232x128xbf16, #tpu.memory_space<vmem>>)
    } else {
    }
    %cst = arith.constant 0.000000e+00 : f32
    %3 = vector.broadcast %cst : f32 to vector<200x128xf32>
    %c5 = arith.constant 5 : index
    %c0 = arith.constant 0 : index
    %4 = vector.load %arg6[%c5, %c0] : memref<232x128xbf16, #tpu.memory_space<vmem>>, vector<200x128xbf16>
    %c0_1 = arith.constant 0 : index
    %c0_2 = arith.constant 0 : index
    %c0_3 = arith.constant 0 : index
    %5 = vector.load %arg3[%c0_1, %c0_2, %c0_3] : memref<9x128x128xbf16, #tpu.memory_space<vmem>>, vector<1x128x128xbf16>
    %6 = vector.shape_cast %5 : vector<1x128x128xbf16> to vector<128x128xbf16>
    %cst_4 = arith.constant dense<0.000000e+00> : vector<200x128xf32>
    %7 = tpu.matmul %4, %6, %cst_4 {dimension_numbers = #tpu.dot_dimension_numbers<[1], [0], [0], [1], [0, 0, 1, 1], [], []>} : vector<200x128xbf16>, vector<128x128xbf16>, vector<200x128xf32> -> vector<200x128xf32>
    %8 = arith.addf %3, %7 : vector<200x128xf32>
    %c6 = arith.constant 6 : index
    %c0_5 = arith.constant 0 : index
    %9 = vector.load %arg6[%c6, %c0_5] : memref<232x128xbf16, #tpu.memory_space<vmem>>, vector<200x128xbf16>
    %c1 = arith.constant 1 : index
    %c0_6 = arith.constant 0 : index
    %c0_7 = arith.constant 0 : index
    %10 = vector.load %arg3[%c1, %c0_6, %c0_7] : memref<9x128x128xbf16, #tpu.memory_space<vmem>>, vector<1x128x128xbf16>
    %11 = vector.shape_cast %10 : vector<1x128x128xbf16> to vector<128x128xbf16>
    %cst_8 = arith.constant dense<0.000000e+00> : vector<200x128xf32>
    %12 = tpu.matmul %9, %11, %cst_8 {dimension_numbers = #tpu.dot_dimension_numbers<[1], [0], [0], [1], [0, 0, 1, 1], [], []>} : vector<200x128xbf16>, vector<128x128xbf16>, vector<200x128xf32> -> vector<200x128xf32>
    %13 = arith.addf %8, %12 : vector<200x128xf32>
    %c7 = arith.constant 7 : index
    %c0_9 = arith.constant 0 : index
    %14 = vector.load %arg6[%c7, %c0_9] : memref<232x128xbf16, #tpu.memory_space<vmem>>, vector<200x128xbf16>
    %c2 = arith.constant 2 : index
    %c0_10 = arith.constant 0 : index
    %c0_11 = arith.constant 0 : index
    %15 = vector.load %arg3[%c2, %c0_10, %c0_11] : memref<9x128x128xbf16, #tpu.memory_space<vmem>>, vector<1x128x128xbf16>
    %16 = vector.shape_cast %15 : vector<1x128x128xbf16> to vector<128x128xbf16>
    %cst_12 = arith.constant dense<0.000000e+00> : vector<200x128xf32>
    %17 = tpu.matmul %14, %16, %cst_12 {dimension_numbers = #tpu.dot_dimension_numbers<[1], [0], [0], [1], [0, 0, 1, 1], [], []>} : vector<200x128xbf16>, vector<128x128xbf16>, vector<200x128xf32> -> vector<200x128xf32>
    %18 = arith.addf %13, %17 : vector<200x128xf32>
    %c15 = arith.constant 15 : index
    %c0_13 = arith.constant 0 : index
    %19 = vector.load %arg6[%c15, %c0_13] : memref<232x128xbf16, #tpu.memory_space<vmem>>, vector<200x128xbf16>
    %c3 = arith.constant 3 : index
    %c0_14 = arith.constant 0 : index
    %c0_15 = arith.constant 0 : index
    %20 = vector.load %arg3[%c3, %c0_14, %c0_15] : memref<9x128x128xbf16, #tpu.memory_space<vmem>>, vector<1x128x128xbf16>
    %21 = vector.shape_cast %20 : vector<1x128x128xbf16> to vector<128x128xbf16>
    %cst_16 = arith.constant dense<0.000000e+00> : vector<200x128xf32>
    %22 = tpu.matmul %19, %21, %cst_16 {dimension_numbers = #tpu.dot_dimension_numbers<[1], [0], [0], [1], [0, 0, 1, 1], [], []>} : vector<200x128xbf16>, vector<128x128xbf16>, vector<200x128xf32> -> vector<200x128xf32>
    %23 = arith.addf %18, %22 : vector<200x128xf32>
    %c16 = arith.constant 16 : index
    %c0_17 = arith.constant 0 : index
    %24 = vector.load %arg6[%c16, %c0_17] : memref<232x128xbf16, #tpu.memory_space<vmem>>, vector<200x128xbf16>
    %c4 = arith.constant 4 : index
    %c0_18 = arith.constant 0 : index
    %c0_19 = arith.constant 0 : index
    %25 = vector.load %arg3[%c4, %c0_18, %c0_19] : memref<9x128x128xbf16, #tpu.memory_space<vmem>>, vector<1x128x128xbf16>
    %26 = vector.shape_cast %25 : vector<1x128x128xbf16> to vector<128x128xbf16>
    %cst_20 = arith.constant dense<0.000000e+00> : vector<200x128xf32>
    %27 = tpu.matmul %24, %26, %cst_20 {dimension_numbers = #tpu.dot_dimension_numbers<[1], [0], [0], [1], [0, 0, 1, 1], [], []>} : vector<200x128xbf16>, vector<128x128xbf16>, vector<200x128xf32> -> vector<200x128xf32>
    %28 = arith.addf %23, %27 : vector<200x128xf32>
    %c17 = arith.constant 17 : index
    %c0_21 = arith.constant 0 : index
    %29 = vector.load %arg6[%c17, %c0_21] : memref<232x128xbf16, #tpu.memory_space<vmem>>, vector<200x128xbf16>
    %c5_22 = arith.constant 5 : index
    %c0_23 = arith.constant 0 : index
    %c0_24 = arith.constant 0 : index
    %30 = vector.load %arg3[%c5_22, %c0_23, %c0_24] : memref<9x128x128xbf16, #tpu.memory_space<vmem>>, vector<1x128x128xbf16>
    %31 = vector.shape_cast %30 : vector<1x128x128xbf16> to vector<128x128xbf16>
    %cst_25 = arith.constant dense<0.000000e+00> : vector<200x128xf32>
    %32 = tpu.matmul %29, %31, %cst_25 {dimension_numbers = #tpu.dot_dimension_numbers<[1], [0], [0], [1], [0, 0, 1, 1], [], []>} : vector<200x128xbf16>, vector<128x128xbf16>, vector<200x128xf32> -> vector<200x128xf32>
    %33 = arith.addf %28, %32 : vector<200x128xf32>
    %c25 = arith.constant 25 : index
    %c0_26 = arith.constant 0 : index
    %34 = vector.load %arg6[%c25, %c0_26] : memref<232x128xbf16, #tpu.memory_space<vmem>>, vector<200x128xbf16>
    %c6_27 = arith.constant 6 : index
    %c0_28 = arith.constant 0 : index
    %c0_29 = arith.constant 0 : index
    %35 = vector.load %arg3[%c6_27, %c0_28, %c0_29] : memref<9x128x128xbf16, #tpu.memory_space<vmem>>, vector<1x128x128xbf16>
    %36 = vector.shape_cast %35 : vector<1x128x128xbf16> to vector<128x128xbf16>
    %cst_30 = arith.constant dense<0.000000e+00> : vector<200x128xf32>
    %37 = tpu.matmul %34, %36, %cst_30 {dimension_numbers = #tpu.dot_dimension_numbers<[1], [0], [0], [1], [0, 0, 1, 1], [], []>} : vector<200x128xbf16>, vector<128x128xbf16>, vector<200x128xf32> -> vector<200x128xf32>
    %38 = arith.addf %33, %37 : vector<200x128xf32>
    %c26 = arith.constant 26 : index
    %c0_31 = arith.constant 0 : index
    %39 = vector.load %arg6[%c26, %c0_31] : memref<232x128xbf16, #tpu.memory_space<vmem>>, vector<200x128xbf16>
    %c7_32 = arith.constant 7 : index
    %c0_33 = arith.constant 0 : index
    %c0_34 = arith.constant 0 : index
    %40 = vector.load %arg3[%c7_32, %c0_33, %c0_34] : memref<9x128x128xbf16, #tpu.memory_space<vmem>>, vector<1x128x128xbf16>
    %41 = vector.shape_cast %40 : vector<1x128x128xbf16> to vector<128x128xbf16>
    %cst_35 = arith.constant dense<0.000000e+00> : vector<200x128xf32>
    %42 = tpu.matmul %39, %41, %cst_35 {dimension_numbers = #tpu.dot_dimension_numbers<[1], [0], [0], [1], [0, 0, 1, 1], [], []>} : vector<200x128xbf16>, vector<128x128xbf16>, vector<200x128xf32> -> vector<200x128xf32>
    %43 = arith.addf %38, %42 : vector<200x128xf32>
    %c27 = arith.constant 27 : index
    %c0_36 = arith.constant 0 : index
    %44 = vector.load %arg6[%c27, %c0_36] : memref<232x128xbf16, #tpu.memory_space<vmem>>, vector<200x128xbf16>
    %c8 = arith.constant 8 : index
    %c0_37 = arith.constant 0 : index
    %c0_38 = arith.constant 0 : index
    %45 = vector.load %arg3[%c8, %c0_37, %c0_38] : memref<9x128x128xbf16, #tpu.memory_space<vmem>>, vector<1x128x128xbf16>
    %46 = vector.shape_cast %45 : vector<1x128x128xbf16> to vector<128x128xbf16>
    %cst_39 = arith.constant dense<0.000000e+00> : vector<200x128xf32>
    %47 = tpu.matmul %44, %46, %cst_39 {dimension_numbers = #tpu.dot_dimension_numbers<[1], [0], [0], [1], [0, 0, 1, 1], [], []>} : vector<200x128xbf16>, vector<128x128xbf16>, vector<200x128xf32> -> vector<200x128xf32>
    %48 = arith.addf %43, %47 : vector<200x128xf32>
    %c0_40 = arith.constant 0 : index
    %c0_41 = arith.constant 0 : index
    %49 = vector.load %arg4[%c0_40, %c0_41] : memref<1x128xf32, #tpu.memory_space<vmem>>, vector<1x128xf32>
    %50 = vector.broadcast %49 : vector<1x128xf32> to vector<200x128xf32>
    %51 = arith.addf %48, %50 : vector<200x128xf32>
    %c0_42 = arith.constant 0 : index
    %c0_43 = arith.constant 0 : index
    %52 = vector.load %arg5[%c0_42, %c0_43] : memref<200x128xf32, #tpu.memory_space<vmem>>, vector<200x128xf32>
    tpu.vector_store %arg5[%c0_42, %c0_43], %51 {strides = array<i32>} : memref<200x128xf32, #tpu.memory_space<vmem>>, vector<200x128xf32>,
    return
  }
  func.func @transform_1(%arg0: i32, %arg1: i32) -> (i32, i32, i32) {
    %c0_i32 = arith.constant 0 : i32
    %c0_i32_0 = arith.constant 0 : i32
    %c0_i32_1 = arith.constant 0 : i32
    return %c0_i32, %c0_i32_0, %arg1 : i32, i32, i32
  }
  func.func @transform_2(%arg0: i32, %arg1: i32) -> (i32, i32) {
    %c0_i32 = arith.constant 0 : i32
    %c0_i32_0 = arith.constant 0 : i32
    return %c0_i32, %arg1 : i32, i32
  }
  func.func @transform_3(%arg0: i32, %arg1: i32) -> (i32, i32) {
    %c0_i32 = arith.constant 0 : i32
    return %arg0, %arg1 : i32, i32
  }
}

module attributes {stable_mosaic.version = 11 : i64} {
  func.func @_scale_shift_relu_kernel(%arg0: i32, %arg1: memref<128x128xf32, #tpu.memory_space<vmem>>, %arg2: memref<1x128xf32, #tpu.memory_space<vmem>>, %arg3: memref<1x128xf32, #tpu.memory_space<vmem>>, %arg4: memref<128x128xf32, #tpu.memory_space<vmem>>) attributes {dimension_semantics = [#tpu.dimension_semantics<parallel>], iteration_bounds = array<i64: 1>, scalar_prefetch = 0 : i64, scratch_operands = 0 : i64, tpu.core_type = #tpu.core_type<tc>, window_params = [{transform_indices = @transform_0, window_bounds = array<i64: 128, 128>}, {pipeline_mode = #tpu.pipeline_mode<synchronous>, transform_indices = @transform_1, window_bounds = array<i64: 1, 128>}, {pipeline_mode = #tpu.pipeline_mode<synchronous>, transform_indices = @transform_2, window_bounds = array<i64: 1, 128>}, {transform_indices = @transform_3, window_bounds = array<i64: 128, 128>}]} {
    %c0 = arith.constant 0 : index
    %c0_0 = arith.constant 0 : index
    %0 = vector.load %arg1[%c0, %c0_0] : memref<128x128xf32, #tpu.memory_space<vmem>>, vector<128x128xf32>
    %c0_1 = arith.constant 0 : index
    %c0_2 = arith.constant 0 : index
    %1 = vector.load %arg2[%c0_1, %c0_2] : memref<1x128xf32, #tpu.memory_space<vmem>>, vector<1x128xf32>
    %2 = vector.broadcast %1 : vector<1x128xf32> to vector<128x128xf32>
    %3 = arith.mulf %0, %2 : vector<128x128xf32>
    %c0_3 = arith.constant 0 : index
    %c0_4 = arith.constant 0 : index
    %4 = vector.load %arg3[%c0_3, %c0_4] : memref<1x128xf32, #tpu.memory_space<vmem>>, vector<1x128xf32>
    %5 = vector.broadcast %4 : vector<1x128xf32> to vector<128x128xf32>
    %6 = arith.addf %3, %5 : vector<128x128xf32>
    %cst = arith.constant 0.000000e+00 : f32
    %7 = vector.broadcast %cst : f32 to vector<128x128xf32>
    %8 = arith.maximumf %6, %7 : vector<128x128xf32>
    %c0_5 = arith.constant 0 : index
    %c0_6 = arith.constant 0 : index
    %9 = vector.load %arg4[%c0_5, %c0_6] : memref<128x128xf32, #tpu.memory_space<vmem>>, vector<128x128xf32>
    tpu.vector_store %arg4[%c0_5, %c0_6], %8 {strides = array<i32>} : memref<128x128xf32, #tpu.memory_space<vmem>>, vector<128x128xf32>,
    return
  }
  func.func @transform_0(%arg0: i32) -> (i32, i32) {
    %c0_i32 = arith.constant 0 : i32
    %c0_i32_0 = arith.constant 0 : i32
    return %arg0, %c0_i32 : i32, i32
  }
  func.func @transform_1(%arg0: i32) -> (i32, i32) {
    %c0_i32 = arith.constant 0 : i32
    %c0_i32_0 = arith.constant 0 : i32
    %c0_i32_1 = arith.constant 0 : i32
    return %c0_i32, %c0_i32_0 : i32, i32
  }
  func.func @transform_2(%arg0: i32) -> (i32, i32) {
    %c0_i32 = arith.constant 0 : i32
    %c0_i32_0 = arith.constant 0 : i32
    %c0_i32_1 = arith.constant 0 : i32
    return %c0_i32, %c0_i32_0 : i32, i32
  }
  func.func @transform_3(%arg0: i32) -> (i32, i32) {
    %c0_i32 = arith.constant 0 : i32
    %c0_i32_0 = arith.constant 0 : i32
    return %arg0, %c0_i32 : i32, i32
  }
}

module attributes {stable_mosaic.version = 11 : i64} {
  func.func @_linear_kernel(%arg0: memref<8x128xbf16, #tpu.memory_space<vmem>>, %arg1: memref<128x128xbf16, #tpu.memory_space<vmem>>, %arg2: memref<1x128xf32, #tpu.memory_space<vmem>>, %arg3: memref<8x128xf32, #tpu.memory_space<vmem>>) attributes {dimension_semantics = [], scalar_prefetch = 0 : i64, scratch_operands = 0 : i64, tpu.core_type = #tpu.core_type<tc>} {
    %c0 = arith.constant 0 : index
    %c0_0 = arith.constant 0 : index
    %0 = vector.load %arg0[%c0, %c0_0] : memref<8x128xbf16, #tpu.memory_space<vmem>>, vector<8x128xbf16>
    %c0_1 = arith.constant 0 : index
    %c0_2 = arith.constant 0 : index
    %1 = vector.load %arg1[%c0_1, %c0_2] : memref<128x128xbf16, #tpu.memory_space<vmem>>, vector<128x128xbf16>
    %cst = arith.constant dense<0.000000e+00> : vector<8x128xf32>
    %2 = tpu.matmul %0, %1, %cst {dimension_numbers = #tpu.dot_dimension_numbers<[1], [0], [0], [1], [0, 0, 1, 1], [], []>} : vector<8x128xbf16>, vector<128x128xbf16>, vector<8x128xf32> -> vector<8x128xf32>
    %c0_3 = arith.constant 0 : index
    %c0_4 = arith.constant 0 : index
    %3 = vector.load %arg2[%c0_3, %c0_4] : memref<1x128xf32, #tpu.memory_space<vmem>>, vector<1x128xf32>
    %4 = vector.broadcast %3 : vector<1x128xf32> to vector<8x128xf32>
    %5 = arith.addf %2, %4 : vector<8x128xf32>
    %c0_5 = arith.constant 0 : index
    %c0_6 = arith.constant 0 : index
    %6 = vector.load %arg3[%c0_5, %c0_6] : memref<8x128xf32, #tpu.memory_space<vmem>>, vector<8x128xf32>
    tpu.vector_store %arg3[%c0_5, %c0_6], %5 {strides = array<i32>} : memref<8x128xf32, #tpu.memory_space<vmem>>, vector<8x128xf32>,
    return
  }
}

</mosaic_0001>

<bundles_post_ra>
// kernel: wideresnet_forward.23
= control target key start
LH: loop header
LB: loop body
LE: loop exit
PB: predicated region body
PF: predicated region fallthrough
CT: control target
= control target key end

     0   :  { %s483_s9 = smov 0   ;;  %s581_s0 = inlined_call_operand.vmem [shape: f32[2048,128], index: 0, kind: input, shape index: {}]   ;;  %s582_s1 = inlined_call_operand.vmem [shape: f32[1,128], index: 1, kind: output, shape index: {0}]   ;;  %s583_s2 = inlined_call_operand.vmem [shape: f32[1,128], index: 2, kind: output, shape index: {1}]  }
   0x1 LB: > { %s441_s10 = sadd.s32 4294967295, %s465_s9   ;;  %p444_p0 = scmp.ge.s32.totalorder %s465_s9, 1  ;;  %s465_s9 = sphi %s483_s9, %s13_s9  }
   0x2   : > { %p106_p1 = scmp.lt.s32.totalorder %s465_s9, 5 }
   0x4   : > { %p107_p2 = pnand %p444_p0, %p106_p1 }
   0x5   : > { %s445_s11 = sshll.u32 (!%p107_p2), %s441_s10, 6  ;;  %p447_p4 = scmp.ne.s32.totalorder (!%p107_p2), %s441_s10, 0 }
   0x6   : > { %110 = sbr.rel (%p107_p2) target bundleno = 164 (0xa4), region = 24  ;;  %p124_p3 = scmp.lt.s32.totalorder (!%p107_p2), %s445_s11, 255 }
   0xd   : > { %s585_s11 = smov (!%p124_p3, %s445_s11), 255  ;;  %132 = sbr.rel (%p447_p4) target bundleno = 20 (0x14), region = 28 }
   0xe   : > { %s446_s12 = sshll.u32 %s585_s11, 3  ;;  %v467_v0 = vmov (!%p447_p4), 0.0  }
   0xf   : > { %s494_s15 = scalar_lea.vmem %s581_s0, %s446_s12  ;;  %133 = vst [vmem:[%s582_s1] sm:$0x1] (!%p447_p4), %v467_v0  ;;  %134 = vst [vmem:[%s583_s2] sm:$0x1] (!%p447_p4), %v467_v0 }
  0x14 PF: > { %v135_v1 = vld [vmem:[%s494_s15] sm:$0xff]  ;;  %v136_v2 = vld [vmem:[%s494_s15 + $0x8] sm:$0xff]  ;;  %v137_v3 = vld [vmem:[%s494_s15 + $0x10] sm:$0xff] }
  0x15   : > { %v138_v4 = vld [vmem:[%s494_s15 + $0x18] sm:$0xff]  ;;  %v200_v5 = vadd.f32 %v136_v2, %v135_v1  ;;  %v272_v6 = vmul.f32 %v135_v1, %v135_v1  ;;  %v273_v7 = vmul.f32 %v136_v2, %v136_v2  ;;  %v274_v8 = vmul.f32 %v137_v3, %v137_v3  ;;  %v139_v9 = vld [vmem:[%s494_s15 + $0x20] sm:$0xff]  ;;  %v140_v13 = vld [vmem:[%s494_s15 + $0x28] sm:$0xff] }
  0x16   : > { %v275_v11 = vmul.f32 %v138_v4, %v138_v4  ;;  %v276_v15 = vmul.f32 %v139_v9, %v139_v9  ;;  %v141_v17 = vld [vmem:[%s494_s15 + $0x30] sm:$0xff]  ;;  %v277_v19 = vmul.f32 %v140_v13, %v140_v13  ;;  %v142_v21 = vld [vmem:[%s494_s15 + $0x38] sm:$0xff]  ;;  %v143_v25 = vld [vmem:[%s494_s15 + $0x40] sm:$0xff] }
  0x17   : > { %v201_v10 = vadd.f32 %v200_v5, %v137_v3  ;;  %v336_v12 = vadd.f32 %v273_v7, %v272_v6  ;;  %v278_v23 = vmul.f32 %v141_v17, %v141_v17  ;;  %v279_v27 = vmul.f32 %v142_v21, %v142_v21  ;;  %v144_v29 = vld [vmem:[%s494_s15 + $0x48] sm:$0xff]  ;;  %v145_v33 = vld [vmem:[%s494_s15 + $0x50] sm:$0xff]  ;;  %v146_v37 = vld [vmem:[%s494_s15 + $0x58] sm:$0xff] }
  0x18   : > { %v280_v31 = vmul.f32 %v143_v25, %v143_v25  ;;  %v281_v35 = vmul.f32 %v144_v29, %v144_v29  ;;  %v282_v39 = vmul.f32 %v145_v33, %v145_v33  ;;  %v147_v41 = vld [vmem:[%s494_s15 + $0x60] sm:$0xff]  ;;  %v283_v43 = vmul.f32 %v146_v37, %v146_v37  ;;  %v148_v45 = vld [vmem:[%s494_s15 + $0x68] sm:$0xff]  ;;  %v149_v49 = vld [vmem:[%s494_s15 + $0x70] sm:$0xff] }
  0x19   : > { %v202_v14 = vadd.f32 %v201_v10, %v138_v4  ;;  %v337_v16 = vadd.f32 %v336_v12, %v274_v8  ;;  %v284_v47 = vmul.f32 %v147_v41, %v147_v41  ;;  %v285_v51 = vmul.f32 %v148_v45, %v148_v45  ;;  %v150_v53 = vld [vmem:[%s494_s15 + $0x78] sm:$0xff]  ;;  %v151_v57 = vld [vmem:[%s494_s15 + $0x80] sm:$0xff]  ;;  %v152_v61 = vld [vmem:[%s494_s15 + $0x88] sm:$0xff] }
  0x1a   : > { %v286_v55 = vmul.f32 %v149_v49, %v149_v49  ;;  %v287_v59 = vmul.f32 %v150_v53, %v150_v53  ;;  %v288_v63 = vmul.f32 %v151_v57, %v151_v57  ;;  %v153_v1 = vld [vmem:[%s494_s15 + $0x90] sm:$0xff]  ;;  %v289_v3 = vmul.f32 %v152_v61, %v152_v61  ;;  %v154_v5 = vld [vmem:[%s494_s15 + $0x98] sm:$0xff] }
  0x1b   : > { %v203_v18 = vadd.f32 %v202_v14, %v139_v9  ;;  %v338_v20 = vadd.f32 %v337_v16, %v275_v11  ;;  %v290_v7 = vmul.f32 %v153_v1, %v153_v1  ;;  %v155_v9 = vld [vmem:[%s494_s15 + $0xa0] sm:$0xff]  ;;  %v291_v11 = vmul.f32 %v154_v5, %v154_v5 }
  0x1d   : > { %v204_v22 = vadd.f32 %v203_v18, %v140_v13  ;;  %v339_v24 = vadd.f32 %v338_v20, %v276_v15  ;;  %v156_v13 = vld [vmem:[%s494_s15 + $0xa8] sm:$0xff]  ;;  %v292_v15 = vmul.f32 %v155_v9, %v155_v9 }
  0x1f   : > { %v205_v26 = vadd.f32 %v204_v22, %v141_v17  ;;  %v340_v28 = vadd.f32 %v339_v24, %v277_v19  ;;  %v157_v17 = vld [vmem:[%s494_s15 + $0xb0] sm:$0xff]  ;;  %v293_v19 = vmul.f32 %v156_v13, %v156_v13 }
  0x21   : > { %v206_v30 = vadd.f32 %v205_v26, %v142_v21  ;;  %v341_v32 = vadd.f32 %v340_v28, %v278_v23  ;;  %v158_v21 = vld [vmem:[%s494_s15 + $0xb8] sm:$0xff]  ;;  %v294_v23 = vmul.f32 %v157_v17, %v157_v17 }
  0x23   : > { %v207_v34 = vadd.f32 %v206_v30, %v143_v25  ;;  %v342_v36 = vadd.f32 %v341_v32, %v279_v27  ;;  %v159_v25 = vld [vmem:[%s494_s15 + $0xc0] sm:$0xff]  ;;  %v295_v27 = vmul.f32 %v158_v21, %v158_v21 }
  0x25   : > { %v208_v38 = vadd.f32 %v207_v34, %v144_v29  ;;  %v343_v40 = vadd.f32 %v342_v36, %v280_v31  ;;  %v160_v29 = vld [vmem:[%s494_s15 + $0xc8] sm:$0xff]  ;;  %v296_v31 = vmul.f32 %v159_v25, %v159_v25 }
  0x27   : > { %v209_v42 = vadd.f32 %v208_v38, %v145_v33  ;;  %v344_v44 = vadd.f32 %v343_v40, %v281_v35  ;;  %v161_v33 = vld [vmem:[%s494_s15 + $0xd0] sm:$0xff]  ;;  %v297_v35 = vmul.f32 %v160_v29, %v160_v29 }
  0x29   : > { %v210_v46 = vadd.f32 %v209_v42, %v146_v37  ;;  %v345_v48 = vadd.f32 %v344_v44, %v282_v39  ;;  %v162_v37 = vld [vmem:[%s494_s15 + $0xd8] sm:$0xff]  ;;  %v298_v39 = vmul.f32 %v161_v33, %v161_v33 }
  0x2b   : > { %v211_v50 = vadd.f32 %v210_v46, %v147_v41  ;;  %v346_v52 = vadd.f32 %v345_v48, %v283_v43  ;;  %v163_v41 = vld [vmem:[%s494_s15 + $0xe0] sm:$0xff]  ;;  %v299_v43 = vmul.f32 %v162_v37, %v162_v37 }
  0x2d   : > { %v212_v54 = vadd.f32 %v211_v50, %v148_v45  ;;  %v347_v56 = vadd.f32 %v346_v52, %v284_v47  ;;  %v164_v45 = vld [vmem:[%s494_s15 + $0xe8] sm:$0xff]  ;;  %v300_v47 = vmul.f32 %v163_v41, %v163_v41 }
  0x2f   : > { %v213_v58 = vadd.f32 %v212_v54, %v149_v49  ;;  %v348_v60 = vadd.f32 %v347_v56, %v285_v51  ;;  %v165_v49 = vld [vmem:[%s494_s15 + $0xf0] sm:$0xff]  ;;  %v301_v51 = vmul.f32 %v164_v45, %v164_v45 }
  0x31   : > { %v214_v62 = vadd.f32 %v213_v58, %v150_v53  ;;  %v349_v0 = vadd.f32 %v348_v60, %v286_v55  ;;  %v166_v53 = vld [vmem:[%s494_s15 + $0xf8] sm:$0xff]  ;;  %v302_v55 = vmul.f32 %v165_v49, %v165_v49 }
  0x33   : > { %v215_v2 = vadd.f32 %v214_v62, %v151_v57  ;;  %v350_v4 = vadd.f32 %v349_v0, %v287_v59  ;;  %v167_v57 = vld [vmem:[%s494_s15 + $0x100] sm:$0xff]  ;;  %v303_v59 = vmul.f32 %v166_v53, %v166_v53 }
  0x35   : > { %v216_v6 = vadd.f32 %v215_v2, %v152_v61  ;;  %v351_v8 = vadd.f32 %v350_v4, %v288_v63  ;;  %v168_v61 = vld [vmem:[%s494_s15 + $0x108] sm:$0xff]  ;;  %v304_v63 = vmul.f32 %v167_v57, %v167_v57 }
  0x37   : > { %v217_v10 = vadd.f32 %v216_v6, %v153_v1  ;;  %v352_v12 = vadd.f32 %v351_v8, %v289_v3  ;;  %v169_v1 = vld [vmem:[%s494_s15 + $0x110] sm:$0xff]  ;;  %v305_v3 = vmul.f32 %v168_v61, %v168_v61 }
  0x39   : > { %v218_v14 = vadd.f32 %v217_v10, %v154_v5  ;;  %v353_v16 = vadd.f32 %v352_v12, %v290_v7  ;;  %v170_v5 = vld [vmem:[%s494_s15 + $0x118] sm:$0xff]  ;;  %v306_v7 = vmul.f32 %v169_v1, %v169_v1 }
  0x3b   : > { %v219_v18 = vadd.f32 %v218_v14, %v155_v9  ;;  %v354_v20 = vadd.f32 %v353_v16, %v291_v11  ;;  %v171_v9 = vld [vmem:[%s494_s15 + $0x120] sm:$0xff]  ;;  %v307_v11 = vmul.f32 %v170_v5, %v170_v5 }
  0x3d   : > { %v220_v22 = vadd.f32 %v219_v18, %v156_v13  ;;  %v355_v24 = vadd.f32 %v354_v20, %v292_v15  ;;  %v172_v13 = vld [vmem:[%s494_s15 + $0x128] sm:$0xff]  ;;  %v308_v15 = vmul.f32 %v171_v9, %v171_v9 }
  0x3f   : > { %v221_v26 = vadd.f32 %v220_v22, %v157_v17  ;;  %v356_v28 = vadd.f32 %v355_v24, %v293_v19  ;;  %v173_v17 = vld [vmem:[%s494_s15 + $0x130] sm:$0xff]  ;;  %v309_v19 = vmul.f32 %v172_v13, %v172_v13 }
  0x41   : > { %v222_v30 = vadd.f32 %v221_v26, %v158_v21  ;;  %v357_v32 = vadd.f32 %v356_v28, %v294_v23  ;;  %v174_v21 = vld [vmem:[%s494_s15 + $0x138] sm:$0xff]  ;;  %v310_v23 = vmul.f32 %v173_v17, %v173_v17 }
  0x43   : > { %v223_v34 = vadd.f32 %v222_v30, %v159_v25  ;;  %v358_v36 = vadd.f32 %v357_v32, %v295_v27  ;;  %v175_v25 = vld [vmem:[%s494_s15 + $0x140] sm:$0xff]  ;;  %v311_v27 = vmul.f32 %v174_v21, %v174_v21 }
  0x45   : > { %v224_v38 = vadd.f32 %v223_v34, %v160_v29  ;;  %v359_v40 = vadd.f32 %v358_v36, %v296_v31  ;;  %v176_v29 = vld [vmem:[%s494_s15 + $0x148] sm:$0xff]  ;;  %v312_v31 = vmul.f32 %v175_v25, %v175_v25 }
  0x47   : > { %v225_v42 = vadd.f32 %v224_v38, %v161_v33  ;;  %v360_v44 = vadd.f32 %v359_v40, %v297_v35  ;;  %v177_v33 = vld [vmem:[%s494_s15 + $0x150] sm:$0xff]  ;;  %v313_v35 = vmul.f32 %v176_v29, %v176_v29 }
  0x49   : > { %v226_v46 = vadd.f32 %v225_v42, %v162_v37  ;;  %v361_v48 = vadd.f32 %v360_v44, %v298_v39  ;;  %v178_v37 = vld [vmem:[%s494_s15 + $0x158] sm:$0xff]  ;;  %v314_v39 = vmul.f32 %v177_v33, %v177_v33 }
  0x4b   : > { %v227_v50 = vadd.f32 %v226_v46, %v163_v41  ;;  %v362_v52 = vadd.f32 %v361_v48, %v299_v43  ;;  %v179_v41 = vld [vmem:[%s494_s15 + $0x160] sm:$0xff]  ;;  %v315_v43 = vmul.f32 %v178_v37, %v178_v37 }
  0x4d   : > { %v228_v54 = vadd.f32 %v227_v50, %v164_v45  ;;  %v363_v56 = vadd.f32 %v362_v52, %v300_v47  ;;  %v180_v45 = vld [vmem:[%s494_s15 + $0x168] sm:$0xff]  ;;  %v316_v47 = vmul.f32 %v179_v41, %v179_v41 }
  0x4f   : > { %v229_v58 = vadd.f32 %v228_v54, %v165_v49  ;;  %v364_v60 = vadd.f32 %v363_v56, %v301_v51  ;;  %v181_v49 = vld [vmem:[%s494_s15 + $0x170] sm:$0xff]  ;;  %v317_v51 = vmul.f32 %v180_v45, %v180_v45 }
  0x51   : > { %v230_v62 = vadd.f32 %v229_v58, %v166_v53  ;;  %v365_v0 = vadd.f32 %v364_v60, %v302_v55  ;;  %v182_v53 = vld [vmem:[%s494_s15 + $0x178] sm:$0xff]  ;;  %v318_v55 = vmul.f32 %v181_v49, %v181_v49 }
  0x53   : > { %v231_v2 = vadd.f32 %v230_v62, %v167_v57  ;;  %v366_v4 = vadd.f32 %v365_v0, %v303_v59  ;;  %v183_v57 = vld [vmem:[%s494_s15 + $0x180] sm:$0xff]  ;;  %v319_v59 = vmul.f32 %v182_v53, %v182_v53 }
  0x55   : > { %v232_v6 = vadd.f32 %v231_v2, %v168_v61  ;;  %v367_v8 = vadd.f32 %v366_v4, %v304_v63  ;;  %v184_v61 = vld [vmem:[%s494_s15 + $0x188] sm:$0xff]  ;;  %v320_v63 = vmul.f32 %v183_v57, %v183_v57 }
  0x57   : > { %v233_v10 = vadd.f32 %v232_v6, %v169_v1  ;;  %v368_v12 = vadd.f32 %v367_v8, %v305_v3  ;;  %v185_v1 = vld [vmem:[%s494_s15 + $0x190] sm:$0xff]  ;;  %v321_v3 = vmul.f32 %v184_v61, %v184_v61 }
  0x59   : > { %v234_v14 = vadd.f32 %v233_v10, %v170_v5  ;;  %v369_v16 = vadd.f32 %v368_v12, %v306_v7  ;;  %v186_v5 = vld [vmem:[%s494_s15 + $0x198] sm:$0xff]  ;;  %v322_v7 = vmul.f32 %v185_v1, %v185_v1 }
  0x5b   : > { %v235_v18 = vadd.f32 %v234_v14, %v171_v9  ;;  %v370_v20 = vadd.f32 %v369_v16, %v307_v11  ;;  %v187_v9 = vld [vmem:[%s494_s15 + $0x1a0] sm:$0xff]  ;;  %v323_v11 = vmul.f32 %v186_v5, %v186_v5 }
  0x5d   : > { %v236_v22 = vadd.f32 %v235_v18, %v172_v13  ;;  %v371_v24 = vadd.f32 %v370_v20, %v308_v15  ;;  %v188_v13 = vld [vmem:[%s494_s15 + $0x1a8] sm:$0xff]  ;;  %v324_v15 = vmul.f32 %v187_v9, %v187_v9 }
  0x5f   : > { %v237_v26 = vadd.f32 %v236_v22, %v173_v17  ;;  %v372_v28 = vadd.f32 %v371_v24, %v309_v19  ;;  %v189_v17 = vld [vmem:[%s494_s15 + $0x1b0] sm:$0xff]  ;;  %v325_v19 = vmul.f32 %v188_v13, %v188_v13 }
  0x61   : > { %v238_v30 = vadd.f32 %v237_v26, %v174_v21  ;;  %v373_v32 = vadd.f32 %v372_v28, %v310_v23  ;;  %v190_v21 = vld [vmem:[%s494_s15 + $0x1b8] sm:$0xff]  ;;  %v326_v23 = vmul.f32 %v189_v17, %v189_v17 }
  0x63   : > { %v239_v34 = vadd.f32 %v238_v30, %v175_v25  ;;  %v374_v36 = vadd.f32 %v373_v32, %v311_v27  ;;  %v191_v25 = vld [vmem:[%s494_s15 + $0x1c0] sm:$0xff]  ;;  %v327_v27 = vmul.f32 %v190_v21, %v190_v21 }
  0x65   : > { %v240_v38 = vadd.f32 %v239_v34, %v176_v29  ;;  %v375_v40 = vadd.f32 %v374_v36, %v312_v31  ;;  %v192_v29 = vld [vmem:[%s494_s15 + $0x1c8] sm:$0xff]  ;;  %v328_v31 = vmul.f32 %v191_v25, %v191_v25 }
  0x67   : > { %v241_v42 = vadd.f32 %v240_v38, %v177_v33  ;;  %v376_v44 = vadd.f32 %v375_v40, %v313_v35  ;;  %v193_v33 = vld [vmem:[%s494_s15 + $0x1d0] sm:$0xff]  ;;  %v329_v35 = vmul.f32 %v192_v29, %v192_v29 }
  0x69   : > { %v242_v46 = vadd.f32 %v241_v42, %v178_v37  ;;  %v377_v48 = vadd.f32 %v376_v44, %v314_v39  ;;  %v194_v37 = vld [vmem:[%s494_s15 + $0x1d8] sm:$0xff]  ;;  %v330_v39 = vmul.f32 %v193_v33, %v193_v33 }
  0x6b   : > { %v243_v50 = vadd.f32 %v242_v46, %v179_v41  ;;  %v378_v52 = vadd.f32 %v377_v48, %v315_v43  ;;  %v195_v41 = vld [vmem:[%s494_s15 + $0x1e0] sm:$0xff]  ;;  %v331_v43 = vmul.f32 %v194_v37, %v194_v37 }
  0x6d   : > { %v244_v54 = vadd.f32 %v243_v50, %v180_v45  ;;  %v379_v56 = vadd.f32 %v378_v52, %v316_v47  ;;  %v196_v45 = vld [vmem:[%s494_s15 + $0x1e8] sm:$0xff]  ;;  %v332_v47 = vmul.f32 %v195_v41, %v195_v41 }
  0x6f   : > { %v245_v58 = vadd.f32 %v244_v54, %v181_v49  ;;  %v380_v60 = vadd.f32 %v379_v56, %v317_v51  ;;  %v197_v49 = vld [vmem:[%s494_s15 + $0x1f0] sm:$0xff]  ;;  %v333_v51 = vmul.f32 %v196_v45, %v196_v45 }
  0x71   : > { %v246_v62 = vadd.f32 %v245_v58, %v182_v53  ;;  %v381_v0 = vadd.f32 %v380_v60, %v318_v55  ;;  %v198_v53 = vld [vmem:[%s494_s15 + $0x1f8] sm:$0xff]  ;;  %v334_v55 = vmul.f32 %v197_v49, %v197_v49 }
  0x72   : > { %v335_v58 = vmul.f32 %v198_v53, %v198_v53 }
  0x73   : > { %v247_v2 = vadd.f32 %v246_v62, %v183_v57  ;;  %v382_v4 = vadd.f32 %v381_v0, %v319_v59 }
  0x75   : > { %v248_v6 = vadd.f32 %v247_v2, %v184_v61  ;;  %v383_v8 = vadd.f32 %v382_v4, %v320_v63 }
  0x77   : > { %v249_v10 = vadd.f32 %v248_v6, %v185_v1  ;;  %v384_v12 = vadd.f32 %v383_v8, %v321_v3 }
  0x79   : > { %v250_v14 = vadd.f32 %v249_v10, %v186_v5  ;;  %v385_v16 = vadd.f32 %v384_v12, %v322_v7  ;;  %v199_v7 = vld [vmem:[%s582_s1] sm:$0x1] }
  0x7a   : > { %v271_v12 = vld [vmem:[%s583_s2] sm:$0x1] }
  0x7b   : > { %v251_v18 = vadd.f32 %v250_v14, %v187_v9  ;;  %v386_v20 = vadd.f32 %v385_v16, %v323_v11 }
  0x7d   : > { %v252_v22 = vadd.f32 %v251_v18, %v188_v13  ;;  %v387_v24 = vadd.f32 %v386_v20, %v324_v15 }
  0x7f   : > { %v253_v26 = vadd.f32 %v252_v22, %v189_v17  ;;  %v388_v28 = vadd.f32 %v387_v24, %v325_v19 }
  0x81   : > { %v254_v30 = vadd.f32 %v253_v26, %v190_v21  ;;  %v389_v32 = vadd.f32 %v388_v28, %v326_v23 }
  0x83   : > { %v255_v34 = vadd.f32 %v254_v30, %v191_v25  ;;  %v390_v36 = vadd.f32 %v389_v32, %v327_v27 }
  0x85   : > { %v256_v38 = vadd.f32 %v255_v34, %v192_v29  ;;  %v391_v40 = vadd.f32 %v390_v36, %v328_v31 }
  0x87   : > { %v257_v42 = vadd.f32 %v256_v38, %v193_v33  ;;  %v392_v44 = vadd.f32 %v391_v40, %v329_v35 }
  0x89   : > { %v258_v46 = vadd.f32 %v257_v42, %v194_v37  ;;  %v393_v48 = vadd.f32 %v392_v44, %v330_v39 }
  0x8b   : > { %v259_v50 = vadd.f32 %v258_v46, %v195_v41  ;;  %v394_v52 = vadd.f32 %v393_v48, %v331_v43 }
  0x8d   : > { %v260_v54 = vadd.f32 %v259_v50, %v196_v45  ;;  %v395_v56 = vadd.f32 %v394_v52, %v332_v47 }
  0x8f   : > { %v261_v57 = vadd.f32 %v260_v54, %v197_v49  ;;  %v396_v59 = vadd.f32 %v395_v56, %v333_v51 }
  0x91   : > { %v262_v60 = vadd.f32 %v261_v57, %v198_v53  ;;  %v397_v61 = vadd.f32 %v396_v59, %v334_v55 }
  0x93   : > { %v263_v62 = vrot.slane %v262_v60, 4  ;;  %v398_v63 = vadd.f32 %v397_v61, %v335_v58 }
  0x95   : > { %v264_v0 = vadd.f32 %v263_v62, %v262_v60  ;;  %v399_v1 = vrot.slane %v398_v63, 4 }
  0x97   : > { %v265_v2 = vrot.slane %v264_v0, 2  ;;  %v400_v3 = vadd.f32 %v399_v1, %v398_v63 }
  0x99   : > { %v266_v4 = vadd.f32 %v265_v2, %v264_v0  ;;  %v401_v5 = vrot.slane %v400_v3, 2 }
  0x9b   : > { %v267_v6 = vrot.slane %v266_v4, 1  ;;  %v402_v8 = vadd.f32 %v401_v5, %v400_v3 }
  0x9d   : > { %v268_v9 = vadd.f32 %v267_v6, %v266_v4  ;;  %v403_v10 = vrot.slane %v402_v8, 1 }
  0x9f   : > { %v269_v11 = vadd.f32 %v268_v9, %v199_v7  ;;  %v404_v13 = vadd.f32 %v403_v10, %v402_v8 }
  0xa1   : > { %270 = vst [vmem:[%s582_s1] sm:$0x1] %v269_v11  ;;  %v405_v14 = vadd.f32 %v404_v13, %v271_v12 }
  0xa3   : > { %406 = vst [vmem:[%s583_s2] sm:$0x1] %v405_v14 }
  0xa4 PF: > { %s13_s9 = sadd.s32 1, %s465_s9  }
  0xa5   : > { %p10_p5 = scmp.ge.s32.totalorder %s13_s9, 6  }
  0xa7   :  { %12 = sbr.rel (!%p10_p5) target bundleno = 1 (0x1), region = 62 }

// kernel: wideresnet_forward.22
= control target key start
LH: loop header
LB: loop body
LE: loop exit
PB: predicated region body
PF: predicated region fallthrough
CT: control target
= control target key end

     0   :  { %s5049_s12 = smov 0   ;;  %s5051_s13 = smov 0   ;;  %s6071_s0 = inlined_call_operand.vmem [shape: bf16[2640,128], index: 0, kind: input, shape index: {}]   ;;  %s6072_s1 = inlined_call_operand.vmem [shape: bf16[9,128,128], index: 1, kind: input, shape index: {}]   ;;  %s6073_s2 = inlined_call_operand.vmem [shape: f32[1,128], index: 2, kind: input, shape index: {}]   ;;  %s6074_s3 = inlined_call_operand.vmem [shape: f32[2560,128], index: 3, kind: output, shape index: {}]  }
   0x1   :  { %s5053_s14 = smov 0  }
   0x2 LB: > { %s25_s15 = sadd.s32 1, %s5023_s13  ;;  %p3757_p0 = scmp.ge.s32.totalorder %s5027_s14, 1  ;;  %s5027_s14 = sphi %s5053_s14, %s13_s14   ;;  %s5023_s13 = sphi %s5051_s13, %s6128_s13   ;;  %s5019_s12 = sphi %s5049_s12, %s6127_s12  }
   0x3   : > { %p27_p1 = scmp.ge.s32.totalorder %s25_s15, 10  ;;  %p134_p2 = scmp.lt.s32.totalorder %s5027_s14, 11 }
   0x5   : > { %s6130_s15 = smov (%p27_p1, %s25_s15), 0  ;;  %p135_p3 = pnand %p3757_p0, %p134_p2 }
   0x7   : > { %138 = sbr.rel (%p135_p3) target bundleno = 566 (0x236), region = 28 }
   0xe   : > { %s3758_s16 = sshll.u32 %s5019_s12, 5  ;;  %s3760_s17 = sshll.u32 %s5019_s12, 8 }
   0xf   : > { %p169_p4 = scmp.lt.s32.totalorder %s3758_s16, 319  ;;  %s183_s18 = sshra.s32 %s3760_s17, 3 }
  0x10   : > { %s3761_s19 = sshll.u32 %s183_s18, 2 }
  0x11   : > { %s6132_s16 = smov (!%p169_p4, %s3758_s16), 319  ;;  %s5070_s22 = scalar_lea.vmem %s6071_s0, %s3761_s19 }
  0x12   : > { %s3759_s23 = sshll.u32 %s6132_s16, 3  ;;  %v219_v0 = vld [vmem:[%s5070_s22] sm:$0xff]  ;;  %v221_v1 = vld [vmem:[%s5070_s22 + $0x8] sm:$0xff]  ;;  %v223_v2 = vld [vmem:[%s5070_s22 + $0x10] sm:$0xff] }
  0x13   : > { %s5078_s26 = scalar_lea.vmem %s6074_s3, %s3759_s23  ;;  %220 = vst [vmem:[#allocation2] sm:$0xff] %v219_v0  ;;  %222 = vst [vmem:[#allocation2 + $0x8] sm:$0xff] %v221_v1  ;;  %v225_v3 = vld [vmem:[%s5070_s22 + $0x18] sm:$0xff]  ;;  %v227_v4 = vld [vmem:[%s5070_s22 + $0x20] sm:$0xff] }
  0x14   : > { %224 = vst [vmem:[#allocation2 + $0x10] sm:$0xff] %v223_v2  ;;  %v229_v5 = vld [vmem:[%s5070_s22 + $0x28] sm:$0xff]  ;;  %226 = vst [vmem:[#allocation2 + $0x18] sm:$0xff] %v225_v3  ;;  %v231_v6 = vld [vmem:[%s5070_s22 + $0x30] sm:$0xff] }
  0x15   : > { %228 = vst [vmem:[#allocation2 + $0x20] sm:$0xff] %v227_v4  ;;  %230 = vst [vmem:[#allocation2 + $0x28] sm:$0xff] %v229_v5  ;;  %v233_v7 = vld [vmem:[%s5070_s22 + $0x38] sm:$0xff]  ;;  %v235_v8 = vld [vmem:[%s5070_s22 + $0x40] sm:$0xff] }
  0x16   : > { %232 = vst [vmem:[#allocation2 + $0x30] sm:$0xff] %v231_v6  ;;  %234 = vst [vmem:[#allocation2 + $0x38] sm:$0xff] %v233_v7  ;;  %v237_v9 = vld [vmem:[%s5070_s22 + $0x48] sm:$0xff]  ;;  %v239_v10 = vld [vmem:[%s5070_s22 + $0x50] sm:$0xff] }
  0x17   : > { %236 = vst [vmem:[#allocation2 + $0x40] sm:$0xff] %v235_v8  ;;  %v241_v11 = vld [vmem:[%s5070_s22 + $0x58] sm:$0xff]  ;;  %238 = vst [vmem:[#allocation2 + $0x48] sm:$0xff] %v237_v9  ;;  %v243_v12 = vld [vmem:[%s5070_s22 + $0x60] sm:$0xff] }
  0x18   : > { %240 = vst [vmem:[#allocation2 + $0x50] sm:$0xff] %v239_v10  ;;  %242 = vst [vmem:[#allocation2 + $0x58] sm:$0xff] %v241_v11  ;;  %v245_v13 = vld [vmem:[%s5070_s22 + $0x68] sm:$0xff]  ;;  %v247_v14 = vld [vmem:[%s5070_s22 + $0x70] sm:$0xff] }
  0x19   : > { %244 = vst [vmem:[#allocation2 + $0x60] sm:$0xff] %v243_v12  ;;  %246 = vst [vmem:[#allocation2 + $0x68] sm:$0xff] %v245_v13  ;;  %v249_v15 = vld [vmem:[%s5070_s22 + $0x78] sm:$0xff]  ;;  %v251_v16 = vld [vmem:[%s5070_s22 + $0x80] sm:$0xff] }
  0x1a   : > { %248 = vst [vmem:[#allocation2 + $0x70] sm:$0xff] %v247_v14  ;;  %v253_v17 = vld [vmem:[%s5070_s22 + $0x88] sm:$0xff]  ;;  %250 = vst [vmem:[#allocation2 + $0x78] sm:$0xff] %v249_v15  ;;  %v255_v18 = vld [vmem:[%s5070_s22 + $0x90] sm:$0xff] }
  0x1b   : > { %252 = vst [vmem:[#allocation2 + $0x80] sm:$0xff] %v251_v16  ;;  %254 = vst [vmem:[#allocation2 + $0x88] sm:$0xff] %v253_v17  ;;  %v257_v19 = vld [vmem:[%s5070_s22 + $0x98] sm:$0xff]  ;;  %v259_v20 = vld [vmem:[%s5070_s22 + $0xa0] sm:$0xff] }
  0x1c   : > { %256 = vst [vmem:[#allocation2 + $0x90] sm:$0xff] %v255_v18  ;;  %258 = vst [vmem:[#allocation2 + $0x98] sm:$0xff] %v257_v19 }
  0x1d   : > { %260 = vst [vmem:[#allocation2 + $0xa0] sm:$0xff] %v259_v20 }
  0x1e   : > { %268 = vsyncadd [#allocation3], 2688 }
  0x1f   : > { %5015 = dma.done.wait [#allocation3], 2688 }
  0x20   : > { %5016 = vsyncadd [#allocation3], 4294964608  ;;  %v4910_v21 = vld [vmem:[%s6072_s1 + $0x40] sm:$0xff]   ;;  %v4912_v23 = vld [vmem:[%s6072_s1 + $0x48] sm:$0xff]   ;;  %vm341_vm0 = vcmask 1044480   ;;  %vm1809_vm1 = vcmask 1043456  }
  0x21   : > { %v4911_v22 = vld [vmem:[%s6072_s1 + $0x100] sm:$0xff]   ;;  %4182 = vmatprep.subr.bf16.mxu1 %v4910_v21  ;;  %v4913_v24 = vld [vmem:[%s6072_s1 + $0x108] sm:$0xff]   ;;  %v4914_v25 = vld [vmem:[%s6072_s1 + $0x50] sm:$0xff]   ;;  %vm2118_vm2 = vsmask.f32 3328  ;;  %vm2931_vm5 = vcmask 1042432  }
  0x22   : > { %4374 = vmatprep.subr.bf16.mxu0 %v4911_v22  ;;  %4183 = vmatpush3.bf16.msra.mxu1 %v4910_v21  ;;  %v4915_v26 = vld [vmem:[%s6072_s1 + $0x110] sm:$0xff]   ;;  %v4916_v27 = vld [vmem:[%s6072_s1 + $0x58] sm:$0xff]   ;;  %v4918_v29 = vld [vmem:[%s6072_s1 + $0x60] sm:$0xff]   ;;  %vm600_vm3 = vsmask.f32 5376 }
  0x23   : > { %4375 = vmatpush3.bf16.msra.mxu0 %v4911_v22  ;;  %4184 = vmatprep.subr.bf16.mxu1 %v4912_v23  ;;  %v4917_v28 = vld [vmem:[%s6072_s1 + $0x118] sm:$0xff]   ;;  %v4919_v30 = vld [vmem:[%s6072_s1 + $0x120] sm:$0xff]   ;;  %v4920_v31 = vld [vmem:[%s6072_s1 + $0x68] sm:$0xff]   ;;  %vm996_vm4 = vsmask.f32 4352 }
  0x24   : > { %4376 = vmatprep.subr.bf16.mxu0 %v4913_v24  ;;  %v5131_v32 = vld [vmem:[#allocation2 + $0x8] sm:$0xff]  ;;  %v5133_v33 = vld [vmem:[#allocation2] sm:$0xf8]  ;;  %v5135_v34 = vld [vmem:[#allocation2 + $0x18] sm:$0xff]  ;;  %vm3240_vm6 = vsmask.f32 2304 }
  0x25   : > { %v4921_v35 = vld [vmem:[%s6072_s1 + $0x128] sm:$0xff]   ;;  %v342_v36 = vrot.slane %v5133_v33, 3  ;;  %v343_v37 = vrot.slane %v5131_v32, 3  ;;  %v5142_v38 = vld [vmem:[#allocation2 + $0x10] sm:$0xf0]  ;;  %v1811_v40 = vrot.slane %v5135_v34, 4 }
  0x26   : > { %4185 = vmatpush3.bf16.msra.mxu1 %v4912_v23  ;;  %v1810_v39 = vrot.slane %v5142_v38, 4  ;;  %v4922_v42 = vld [vmem:[%s6072_s1 + $0x70] sm:$0xff]   ;;  %v4924_v45 = vld [vmem:[%s6072_s1 + $0x78] sm:$0xff]   ;;  %v5162_v48 = vld [vmem:[#allocation2 + $0x20] sm:$0xff]  ;;  %v347_v54 = vrot.slane %v5135_v34, 3  ;;  %v5216_v15 = vshrl.u32 %v5135_v34, 16 }
  0x27   : > { %4377 = vmatpush3.bf16.msra.mxu0 %v4913_v24  ;;  %4186 = vmatprep.subr.bf16.mxu1 %v4914_v25  ;;  %v344_v41 = vsel %vm341_vm0, %v342_v36, %v343_v37  ;;  %v4923_v43 = vld [vmem:[%s6072_s1 + $0x130] sm:$0xff]   ;;  %v4925_v46 = vld [vmem:[%s6072_s1 + $0x138] sm:$0xff]   ;;  %v5165_v50 = vld [vmem:[#allocation2 + $0x28] sm:$0xff]  ;;  %v1813_v52 = vrot.slane %v5162_v48, 4  ;;  %v349_v0 = vrot.slane %v5162_v48, 3  ;;  %v2120_v18 = vshrl.u32 %v5142_v38, 16 }
  0x28   : > { %4378 = vmatprep.subr.bf16.mxu0 %v4915_v26  ;;  %v1812_v44 = vsel %vm1809_vm1, %v1810_v39, %v1811_v40  ;;  %4198 = vmatprep.mubr.bf16.mxu1 %v344_v41  ;;  %v5160_v47 = vld [vmem:[#allocation2 + $0x10] sm:$0xff]  ;;  %v4926_v51 = vld [vmem:[%s6072_s1] sm:$0xff]   ;;  %v1815_v55 = vrot.slane %v5165_v50, 4  ;;  %v4928_v58 = vld [vmem:[%s6072_s1 + $0x148] sm:$0xff]   ;;  %v351_v2 = vrot.slane %v5165_v50, 3  ;;  %v5222_v19 = vshll.u32 %v5135_v34, 16 }
  0x29   : > { %4390 = vmatprep.mubr.bf16.mxu0 %v1812_v44  ;;  %v345_v49 = vrot.slane %v5160_v47, 3  ;;  %v4927_v53 = vld [vmem:[%s6072_s1 + $0x140] sm:$0xff]   ;;  %v1814_v57 = vsel %vm1809_vm1, %v1811_v40, %v1813_v52  ;;  %v4929_v60 = vld [vmem:[%s6072_s1 + $0x8] sm:$0xff]   ;;  %v5185_v61 = vld [vmem:[#allocation2 + $0x30] sm:$0xff]  ;;  %v350_v6 = vsel %vm341_vm0, %v347_v54, %v349_v0  ;;  %v2123_v22 = vshll.u32 %v5142_v38, 16 }
  0x2a   : > { %4187 = vmatpush3.bf16.msra.mxu1 %v4914_v25  ;;  %v1816_v62 = vsel %vm1809_vm1, %v1813_v52, %v1815_v55  ;;  %v5188_v63 = vld [vmem:[#allocation2 + $0x38] sm:$0xff]  ;;  %v1817_v1 = vrot.slane %v5185_v61, 4  ;;  %v4932_v3 = vld [vmem:[%s6072_s1 + $0x10] sm:$0xff]   ;;  %v352_v9 = vsel %vm341_vm0, %v349_v0, %v351_v2  ;;  %v5207_v11 = vld [vmem:[#allocation2 + $0x40] sm:$0xff]  ;;  %v353_v14 = vrot.slane %v5185_v61, 3 }
  0x2b   : > { %4379 = vmatpush3.bf16.msra.mxu0 %v4915_v26  ;;  %4188 = vmatprep.subr.bf16.mxu1 %v4916_v27  ;;  %v346_v56 = vsel %vm341_vm0, %v343_v37, %v345_v49  ;;  %v348_v59 = vsel %vm341_vm0, %v345_v49, %v347_v54  ;;  %v4930_v4 = vld [vmem:[%s6072_s1 + $0x150] sm:$0xff]   ;;  %v1819_v5 = vrot.slane %v5188_v63, 4  ;;  %v4931_v8 = vld [vmem:[%s6072_s1 + $0x158] sm:$0xff]   ;;  %v5209_v12 = vld [vmem:[#allocation2 + $0x48] sm:$0xff]  ;;  %v1821_v16 = vrot.slane %v5207_v11, 4 }
  0x2c   : > { %4380 = vmatprep.subr.bf16.mxu0 %v4917_v28  ;;  %v1818_v7 = vsel %vm1809_vm1, %v1815_v55, %v1817_v1  ;;  %v4935_v13 = vld [vmem:[%s6072_s1 + $0x18] sm:$0xff]   ;;  %v355_v17 = vrot.slane %v5188_v63, 3  ;;  %v4933_v20 = vld [vmem:[%s6072_s1 + $0x160] sm:$0xff]   ;;  %v1823_v21 = vrot.slane %v5209_v12, 4  ;;  %v354_v24 = vsel %vm341_vm0, %v351_v2, %v353_v14  ;;  %v4934_v26 = vld [vmem:[%s6072_s1 + $0x168] sm:$0xff]  }
  0x2d   : > { %v1820_v10 = vsel %vm1809_vm1, %v1817_v1, %v1819_v5  ;;  %v4938_v23 = vld [vmem:[%s6072_s1 + $0x20] sm:$0xff]   ;;  %v1822_v25 = vsel %vm1809_vm1, %v1819_v5, %v1821_v16  ;;  %v2125_v34 = vrot.slane %v2123_v22, 5  ;;  %v5244_v36 = vshrl.u32 %v5162_v48, 16  ;;  %v4940_v39 = vld [vmem:[%s6072_s1 + $0x28] sm:$0xff]   ;;  %v4936_v44 = vld [vmem:[%s6072_s1 + $0x170] sm:$0xff]  }
  0x2e   : > { %4189 = vmatpush3.bf16.msra.mxu1 %v4916_v27  ;;  %v356_v27 = vsel %vm341_vm0, %v353_v14, %v355_v17  ;;  %v5247_v37 = vshll.u32 %v5162_v48, 16  ;;  %v357_v38 = vrot.slane %v5207_v11, 3  ;;  %v359_v41 = vrot.slane %v5209_v12, 3  ;;  %v4942_v48 = vld [vmem:[%s6072_s1 + $0x30] sm:$0xff]   ;;  %v4939_v0 = vld [vmem:[%s6072_s1 + $0x180] sm:$0xff]   ;;  %v5318_v14 = vld [vmem:[#allocation2 + $0x68] sm:$0xff] }
  0x2f   : > { %4381 = vmatpush3.bf16.msra.mxu0 %v4917_v28  ;;  %4190 = vmatprep.subr.bf16.mxu1 %v4918_v29  ;;  %v5238_v28 = vld [vmem:[#allocation2 + $0x50] sm:$0xff]  ;;  %v5299_v5 = vshrl.u32 %v5188_v63, 16 }
  0x30   : > { %4382 = vmatprep.subr.bf16.mxu0 %v4919_v30  ;;  %6098 = vst [vmem:[#allocation6_spill] sm:$0xff] %v5238_v28  ;;  %v6075_v40 = vrot.slane %v5238_v28, 4  ;;  %v358_v49 = vsel %vm341_vm0, %v355_v17, %v357_v38  ;;  %v360_v54 = vsel %vm341_vm0, %v357_v38, %v359_v41 }
  0x31   : > { %6100 = vst [vmem:[#allocation8_spill] sm:$0xff] %v5299_v5 }
  0x32   : > { %4191 = vmatpush3.bf16.msra.mxu1 %v4918_v29  ;;  %v2122_v29 = vrot.slane %v2120_v18, 4  ;;  %v1826_v52 = vsel %vm1809_vm1, %v1823_v21, %v6075_v40 }
  0x33   : > { %4383 = vmatpush3.bf16.msra.mxu0 %v4919_v30  ;;  %4192 = vmatprep.subr.bf16.mxu1 %v4920_v31  ;;  %v2127_v30 = vrot.slane %v5216_v15, 4 }
  0x34   : > { %4384 = vmatprep.subr.bf16.mxu0 %v4921_v35 }
  0x36   : > { %4193 = vmatpush3.bf16.msra.mxu1 %v4920_v31  ;;  %v1824_v31 = vsel %vm1809_vm1, %v1821_v16, %v1823_v21  ;;  %v2143_v21 = vrot.slane %v5299_v5, 4 }
  0x37   : > { %4385 = vmatpush3.bf16.msra.mxu0 %v4921_v35  ;;  %4194 = vmatprep.subr.bf16.mxu1 %v4922_v42  ;;  %v2128_v35 = vrot.slane %v5222_v19, 5 }
  0x38   : > { %4386 = vmatprep.subr.bf16.mxu0 %v4923_v43 }
  0x3a   : > { %4195 = vmatpush3.bf16.msra.mxu1 %v4922_v42  ;;  %v5256_v42 = vshrl.u32 %v5165_v50, 16 }
  0x3b   : > { %4387 = vmatpush3.bf16.msra.mxu0 %v4923_v43  ;;  %4196 = vmatprep.subr.bf16.mxu1 %v4924_v45  ;;  %v5259_v43 = vshll.u32 %v5165_v50, 16  ;;  %v2132_v50 = vrot.slane %v5247_v37, 5 }
  0x3c   : > { %4388 = vmatprep.subr.bf16.mxu0 %v4925_v46  ;;  %v2135_v55 = vrot.slane %v5256_v42, 4 }
  0x3e   : > { %4197 = vmatpush3.bf16.msra.mxu1 %v4924_v45  ;;  %v2126_v45 = vor.u32 %v2125_v34, %v2122_v29  ;;  %v5348_v34 = vld [vmem:[#allocation2 + $0x78] sm:$0xff] }
  0x3f   : > { %4389 = vmatpush3.bf16.msra.mxu0 %v4925_v46  ;;  %4230 = vmatprep.subr.bf16.mxu1 %v4926_v51  ;;  %v2129_v46 = vor.u32 %v2128_v35, %v2127_v30  ;;  %v5342_v30 = vld [vmem:[#allocation2 + $0x70] sm:$0xff]  ;;  %v273_v35 = vld [vmem:[#allocation2] sm:$0xfc] }
  0x40   : > { %4422 = vmatprep.subr.bf16.mxu0 %v4927_v53 }
  0x41   : > { %4199 = vmatmul.mubr.bf16.vlgmr.msra.gmra.mrb[0].mxu1 %v346_v56  ;;  %v2136_v56 = vrot.slane %v5259_v43, 5 }
  0x42   : > { %4391 = vmatmul.mubr.bf16.vlgmr.msra.gmra.mrb[0].mxu0 %v1814_v57  ;;  %4231 = vmatpush3.bf16.msra.mxu1 %v4926_v51  ;;  %v2131_v51 = vrot.slane %v5244_v36, 4  ;;  %v2130_v57 = vsel %vm2118_vm2, %v2126_v45, %v2129_v46 }
  0x43   : > { %4423 = vmatpush3.bf16.msra.mxu0 %v4927_v53  ;;  %4202 = vmatprep.mubr.bf16.mxu1 %v348_v59  ;;  %v4937_v53 = vld [vmem:[%s6072_s1 + $0x178] sm:$0xff]   ;;  %v5290_v2 = vor.u32 %v2136_v56, %v2135_v55  ;;  %v605_v55 = vshll.u32 %v273_v35, 16 }
  0x44   : > { %4424 = vmatprep.subr.bf16.mxu0 %v4928_v58  ;;  %4394 = vmatprep.mubr.bf16.mxu0 %v1816_v62  ;;  %v4944_v59 = vld [vmem:[%s6072_s1 + $0x38] sm:$0xff]   ;;  %v2133_v62 = vor.u32 %v2132_v50, %v2131_v51  ;;  %v602_v50 = vshrl.u32 %v273_v35, 16  ;;  %v5410_v35 = vld [vmem:[#allocation2 + $0x88] sm:$0xff] }
  0x45   : > { %4232 = vmatprep.subr.bf16.mxu1 %v4929_v60  ;;  %6103 = vst [vmem:[#allocation11_spill] sm:$0xff] %v5410_v35 }
  0x46   : > { %4233 = vmatpush3.bf16.msra.mxu1 %v4929_v60  ;;  %v361_v60 = vrot.slane %v5238_v28, 3  ;;  %v2138_v17 = vsel %vm2118_vm2, %v2133_v62, %v5290_v2 }
  0x47   : > { %4425 = vmatpush3.bf16.msra.mxu0 %v4928_v58  ;;  %4234 = vmatprep.subr.bf16.mxu1 %v4932_v3  ;;  %v5280_v58 = vld [vmem:[#allocation2 + $0x58] sm:$0xff] }
  0x48   : > { %4426 = vmatprep.subr.bf16.mxu0 %v4930_v4  ;;  %v363_v1 = vrot.slane %v5280_v58, 3 }
  0x49   : > { %4203 = vmatmul.mubr.bf16.gmra.mrb[4].mxu1 %v350_v6  ;;  %v5302_v6 = vshll.u32 %v5188_v63, 16  ;;  %v4941_v63 = vld [vmem:[%s6072_s1 + $0x188] sm:$0xff]  }
  0x4a   : > { %4395 = vmatmul.mubr.bf16.gmra.mrb[4].mxu0 %v1818_v7  ;;  %4206 = vmatprep.mubr.bf16.mxu1 %v352_v9  ;;  %v5304_v7 = vld [vmem:[#allocation2 + $0x60] sm:$0xff]  ;;  %v610_v9 = vshrl.u32 %v5131_v32, 16  ;;  %v364_v16 = vsel %vm341_vm0, %v361_v60, %v363_v1 }
  0x4b   : > { %4427 = vmatpush3.bf16.msra.mxu0 %v4930_v4  ;;  %4398 = vmatprep.mubr.bf16.mxu0 %v1820_v10  ;;  %v5296_v4 = vshll.u32 %v5185_v61, 16  ;;  %6101 = vst [vmem:[#allocation9_spill] sm:$0xff] %v5302_v6  ;;  %v362_v10 = vsel %vm341_vm0, %v359_v41, %v361_v60  ;;  %v2144_v22 = vrot.slane %v5302_v6, 5  ;;  %v365_v29 = vrot.slane %v5304_v7, 3  ;;  %v4945_v60 = vld [vmem:[%s6072_s1 + $0x198] sm:$0xff]  }
  0x4c   : > { %4428 = vmatprep.subr.bf16.mxu0 %v4931_v8  ;;  %4235 = vmatpush3.bf16.msra.mxu1 %v4932_v3  ;;  %v5293_v3 = vshrl.u32 %v5185_v61, 16  ;;  %v613_v61 = vshll.u32 %v5131_v32, 16  ;;  %v630_v32 = vrot.slane %v5216_v15, 2 }
  0x4d   : > { %4236 = vmatprep.subr.bf16.mxu1 %v4935_v13  ;;  %6099 = vst [vmem:[#allocation7_spill] sm:$0xff] %v5296_v4  ;;  %v2145_v38 = vor.u32 %v2144_v22, %v2143_v21  ;;  %v366_v51 = vsel %vm341_vm0, %v363_v1, %v365_v29 }
  0x4e   : > { %v2139_v18 = vrot.slane %v5293_v3, 4 }
  0x4f   : > { %4429 = vmatpush3.bf16.msra.mxu0 %v4931_v8  ;;  %v5309_v8 = vld [vmem:[%s6072_s1 + $0x80] sm:$0xff]  }
  0x50   : > { %4430 = vmatprep.subr.bf16.mxu0 %v4933_v20  ;;  %4237 = vmatpush3.bf16.msra.mxu1 %v4935_v13  ;;  %v2134_v13 = vsel %vm2118_vm2, %v2129_v46, %v2133_v62  ;;  %v5355_v46 = vshrl.u32 %v5238_v28, 16 }
  0x51   : > { %4207 = vmatmul.mubr.bf16.gmra.mrb[8].mxu1 %v354_v24  ;;  %4238 = vmatprep.subr.bf16.mxu1 %v4938_v23  ;;  %v5331_v24 = vshll.u32 %v5207_v11, 16 }
  0x52   : > { %4399 = vmatmul.mubr.bf16.gmra.mrb[8].mxu0 %v1822_v25  ;;  %4210 = vmatprep.mubr.bf16.mxu1 %v356_v27  ;;  %v5334_v25 = vshrl.u32 %v5209_v12, 16  ;;  %v619_v27 = vshrl.u32 %v5160_v47, 16  ;;  %v2155_v1 = vrot.slane %v5355_v46, 4 }
  0x53   : > { %4431 = vmatpush3.bf16.msra.mxu0 %v4933_v20  ;;  %4402 = vmatprep.mubr.bf16.mxu0 %v1824_v31  ;;  %v2140_v20 = vrot.slane %v5296_v4, 5  ;;  %v2148_v41 = vrot.slane %v5331_v24, 5 }
  0x54   : > { %4432 = vmatprep.subr.bf16.mxu0 %v4934_v26  ;;  %4239 = vmatpush3.bf16.msra.mxu1 %v4938_v23  ;;  %v5328_v23 = vshrl.u32 %v5207_v11, 16  ;;  %v4943_v11 = vld [vmem:[%s6072_s1 + $0x190] sm:$0xff]  }
  0x55   : > { %4240 = vmatprep.subr.bf16.mxu1 %v4940_v39  ;;  %v2141_v31 = vor.u32 %v2140_v20, %v2139_v18  ;;  %v607_v18 = vrot.slane %v605_v55, 3  ;;  %v5393_v20 = vshll.u32 %v5280_v58, 16  ;;  %v5428_v55 = vshrl.u32 %v5410_v35, 16 }
  0x57   : > { %4433 = vmatpush3.bf16.msra.mxu0 %v4934_v26  ;;  %v5337_v26 = vshll.u32 %v5209_v12, 16  ;;  %v367_v12 = vrot.slane %v5318_v14, 3  ;;  %v5369_v56 = vsel %vm2118_vm2, %v2141_v31, %v2145_v38  ;;  %6104 = vst [vmem:[#allocation12_spill] sm:$0xff] %v5428_v55 }
  0x58   : > { %4434 = vmatprep.subr.bf16.mxu0 %v4936_v44  ;;  %4241 = vmatpush3.bf16.msra.mxu1 %v4940_v39  ;;  %v2147_v39 = vrot.slane %v5328_v23, 4 }
  0x59   : > { %4211 = vmatmul.mubr.bf16.gmra.mrb[12].mxu1 %v358_v49  ;;  %4242 = vmatprep.subr.bf16.mxu1 %v4942_v48  ;;  %6102 = vst [vmem:[#allocation10_spill] sm:$0xff] %v5337_v26  ;;  %v2152_v45 = vrot.slane %v5337_v26, 5  ;;  %v622_v49 = vshll.u32 %v5160_v47, 16 }
  0x5a   : > { %4403 = vmatmul.mubr.bf16.gmra.mrb[12].mxu0 %v1826_v52  ;;  %4214 = vmatprep.mubr.bf16.mxu1 %v360_v54  ;;  %v5364_v52 = vsel %vm2118_vm2, %v5290_v2, %v2141_v31  ;;  %v369_v54 = vrot.slane %v5342_v30, 3  ;;  %v2149_v62 = vor.u32 %v2148_v41, %v2147_v39 }
  0x5b   : > { %4435 = vmatpush3.bf16.msra.mxu0 %v4936_v44  ;;  %4438 = vmatprep.mubr.bf16.mxu0 %v2130_v57  ;;  %v2151_v44 = vrot.slane %v5334_v25, 4  ;;  %v371_v57 = vrot.slane %v5348_v34, 3 }
  0x5c   : > { %4436 = vmatprep.subr.bf16.mxu0 %v4937_v53  ;;  %4243 = vmatpush3.bf16.msra.mxu1 %v4942_v48  ;;  %v5358_v48 = vshll.u32 %v5238_v28, 16  ;;  %v370_v21 = vsel %vm341_vm0, %v367_v12, %v369_v54  ;;  %v5401_v31 = vsel %vm2118_vm2, %v2145_v38, %v2149_v62  ;;  %v998_v38 = vshrl.u32 %v5133_v33, 16 }
  0x5d   : > { %4244 = vmatprep.subr.bf16.mxu1 %v4944_v59 }
  0x5f   : > { %4437 = vmatpush3.bf16.msra.mxu0 %v4937_v53  ;;  %v368_v53 = vsel %vm341_vm0, %v365_v29, %v367_v12  ;;  %v4947_v29 = vld [vmem:[%s6072_s1 + $0x1a0] sm:$0xff]  }
  0x60   : > { %4470 = vmatprep.subr.bf16.mxu0 %v4939_v0  ;;  %4245 = vmatpush3.bf16.msra.mxu1 %v4944_v59  ;;  %v5372_v59 = vld [vmem:[#allocation2 + $0x80] sm:$0x7] }
  0x61   : > { %4215 = vmatmul.mubr.bf16.gmra.mrb[16].mxu1 %v362_v10  ;;  %4278 = vmatprep.subr.bf16.mxu1 %v5309_v8  ;;  %v2156_v10 = vrot.slane %v5358_v48, 5  ;;  %v373_v22 = vrot.slane %v5372_v59, 3 }
  0x62   : > { %4439 = vmatmul.mubr.bf16.vlgmr.msra.gmra.mrb[0].mxu0 %v2134_v13  ;;  %4218 = vmatprep.mubr.bf16.mxu1 %v364_v16  ;;  %v5382_v13 = vrot.slane %v602_v50, 2  ;;  %v615_v16 = vrot.slane %v613_v61, 3  ;;  %v5421_v50 = vshrl.u32 %v5304_v7, 16 }
  0x63   : > { %4471 = vmatpush3.bf16.msra.mxu0 %v4939_v0  ;;  %4442 = vmatprep.mubr.bf16.mxu0 %v2138_v17  ;;  %v5377_v0 = vor.u32 %v2152_v45, %v2151_v44  ;;  %v5389_v17 = vshrl.u32 %v5280_v58, 16  ;;  %v2157_v12 = vor.u32 %v2156_v10, %v2155_v1  ;;  %v621_v44 = vrot.slane %v619_v27, 2 }
  0x64   : > { %4472 = vmatprep.subr.bf16.mxu0 %v4941_v63  ;;  %v608_v45 = vor.u32 %v607_v18, %v5382_v13  ;;  %v1006_v1 = vrot.slane %v613_v61, 4  ;;  %v5435_v10 = vshll.u32 %v5410_v35, 16  ;;  %v5441_v18 = vshll.u32 %v5304_v7, 16 }
  0x65   : > { %v5408_v58 = vsel %vm2118_vm2, %v2149_v62, %v5377_v0  ;;  %v2159_v41 = vrot.slane %v5389_v17, 4  ;;  %v1000_v62 = vrot.slane %v998_v38, 3  ;;  %v5446_v61 = vshrl.u32 %v5318_v14, 16 }
  0x66   : > { %6105 = vst [vmem:[#allocation13_spill] sm:$0xff] %v5435_v10  ;;  %v633_v7 = vrot.slane %v5222_v19, 3  ;;  %v5455_v38 = vshll.u32 %v5318_v14, 16  ;;  %v374_v14 = vsel %vm341_vm0, %v371_v57, %v373_v22  ;;  %v4953_v22 = vld [vmem:[%s6072_s1 + $0x1b8] sm:$0xff]  }
  0x67   : > { %4473 = vmatpush3.bf16.msra.mxu0 %v4941_v63  ;;  %v612_v63 = vrot.slane %v610_v9, 2 }
  0x68   : > { %4474 = vmatprep.subr.bf16.mxu0 %v4943_v11 }
  0x69   : > { %4219 = vmatmul.mubr.bf16.gmra.mrb[20].mxu1 %v366_v51  ;;  %v5412_v39 = vor.u32 %v615_v16, %v612_v63  ;;  %v2160_v51 = vrot.slane %v5393_v20, 5  ;;  %v1009_v63 = vrot.slane %v619_v27, 3  ;;  %v624_v16 = vrot.slane %v622_v49, 3 }
  0x6a   : > { %4443 = vmatmul.mubr.bf16.gmra.mrb[4].mxu0 %v5364_v52  ;;  %4222 = vmatprep.mubr.bf16.mxu1 %v368_v53  ;;  %v4949_v53 = vld [vmem:[%s6072_s1 + $0x1a8] sm:$0xff]  }
  0x6b   : > { %4446 = vmatprep.mubr.bf16.mxu0 %v5369_v56  ;;  %4475 = vmatpush3.bf16.msra.mxu0 %v4943_v11  ;;  %v372_v11 = vsel %vm341_vm0, %v369_v54, %v371_v57  ;;  %v1001_v54 = vshll.u32 %v5133_v33, 16  ;;  %v1010_v33 = vrot.slane %v622_v49, 4  ;;  %v2163_v49 = vrot.slane %v5421_v50, 4 }
  0x6c   : > { %4476 = vmatprep.subr.bf16.mxu0 %v4945_v60  ;;  %v2168_v57 = vrot.slane %v5455_v38, 5 }
  0x6d   : > { %v1003_v13 = vrot.slane %v1001_v54, 4  ;;  %v5448_v27 = vor.u32 %v1010_v33, %v1009_v63  ;;  %v2183_v54 = vrot.slane %v5428_v55, 4  ;;  %v617_v63 = vsel %vm600_vm3, %v608_v45, %v5412_v39 }
  0x6e   : > { %v2164_v33 = vrot.slane %v5441_v18, 5  ;;  %v5500_v55 = vshrl.u32 %v5342_v30, 16 }
  0x6f   : > { %4477 = vmatpush3.bf16.msra.mxu0 %v4945_v60  ;;  %v1005_v60 = vrot.slane %v610_v9, 3  ;;  %v1004_v47 = vor.u32 %v1003_v13, %v1000_v62  ;;  %v2184_v62 = vrot.slane %v5435_v10, 5  ;;  %v5476_v13 = vsel %vm2118_vm2, %v5377_v0, %v2157_v12 }
  0x70   : > { %4478 = vmatprep.subr.bf16.mxu0 %v4947_v29  ;;  %v2165_v28 = vor.u32 %v2164_v33, %v2163_v49  ;;  %v634_v10 = vor.u32 %v633_v7, %v630_v32  ;;  %v642_v49 = vrot.slane %v5247_v37, 3 }
  0x71   : > { %4223 = vmatmul.mubr.bf16.gmra.mrb[24].mxu1 %v370_v21  ;;  %v1007_v9 = vor.u32 %v1006_v1, %v1005_v60  ;;  %v5450_v21 = vld [vmem:[#allocation2 + $0x90] sm:$0xff] }
  0x72   : > { %4447 = vmatmul.mubr.bf16.gmra.mrb[8].mxu0 %v5401_v31  ;;  %4226 = vmatprep.mubr.bf16.mxu1 %v372_v11  ;;  %v2161_v11 = vor.u32 %v2160_v51, %v2159_v41  ;;  %v6081_v51 = vshrl.u32 %v5450_v21, 16  ;;  %v6082_v1 = vshll.u32 %v5450_v21, 16 }
  0x73   : > { %4450 = vmatprep.mubr.bf16.mxu0 %v5408_v58  ;;  %4479 = vmatpush3.bf16.msra.mxu0 %v4947_v29  ;;  %v4951_v29 = vld [vmem:[%s6072_s1 + $0x1b0] sm:$0xff]   ;;  %v5463_v60 = vsel %vm996_vm4, %v1004_v47, %v1007_v9  ;;  %v5467_v41 = vsel %vm996_vm4, %v1007_v9, %v5448_v27  ;;  %v2167_v9 = vrot.slane %v5446_v61, 4 }
  0x74   : > { %4480 = vmatprep.subr.bf16.mxu0 %v4949_v53  ;;  %v5483_v47 = vsel %vm2118_vm2, %v2157_v12, %v2161_v11  ;;  %v2615_v0 = vrot.slane %v6081_v51, 4  ;;  %v2618_v45 = vrot.slane %v6082_v1, 5  ;;  %v5494_v12 = vor.u32 %v2184_v62, %v2183_v54  ;;  %v4948_v62 = vld [vmem:[%s6072_s1 + $0x88] sm:$0xff]  }
  0x75   : > { %v5503_v51 = vshll.u32 %v5342_v30, 16  ;;  %v5506_v1 = vshrl.u32 %v5348_v34, 16  ;;  %v639_v30 = vrot.slane %v5244_v36, 2  ;;  %v5528_v54 = vsel %vm2118_vm2, %v2161_v11, %v2165_v28 }
  0x76   : > { %v5496_v40 = vor.u32 %v2618_v45, %v2615_v0 }
  0x77   : > { %4481 = vmatpush3.bf16.msra.mxu0 %v4949_v53  ;;  %v625_v53 = vor.u32 %v624_v16, %v621_v44  ;;  %v5509_v44 = vshll.u32 %v5348_v34, 16  ;;  %v5514_v16 = vld [vmem:[%s6072_s1 + $0x1c0] sm:$0xff]   ;;  %v648_v34 = vrot.slane %v5256_v42, 2  ;;  %v2172_v33 = vrot.slane %v5503_v51, 5 }
  0x78   : > { %4482 = vmatprep.subr.bf16.mxu0 %v4951_v29  ;;  %6106 = vst [vmem:[#allocation14_spill] sm:$0xff] %v5496_v40  ;;  %v5519_v32 = vsel %vm2118_vm2, %v5494_v12, %v5496_v40  ;;  %v2175_v0 = vrot.slane %v5506_v1, 4  ;;  %v643_v45 = vor.u32 %v642_v49, %v639_v30 }
  0x79   : > { %4227 = vmatmul.mubr.bf16.gmra.mrb[28].mxu1 %v374_v14  ;;  %v2169_v14 = vor.u32 %v2168_v57, %v2167_v9  ;;  %6107 = vst [vmem:[#allocation15_spill] sm:$0xff] %v5519_v32  ;;  %v626_v7 = vsel %vm600_vm3, %v5412_v39, %v625_v53  ;;  %v5535_v9 = vld [vmem:[#allocation2 + $0x80] sm:$0xff]  ;;  %v635_v39 = vsel %vm600_vm3, %v625_v53, %v634_v10  ;;  %v2176_v11 = vrot.slane %v5509_v44, 5 }
  0x7a   : > { %4451 = vmatmul.mubr.bf16.gmra.mrb[12].mxu0 %v5476_v13  ;;  %4246 = vmatprep.mubr.bf16.mxu1 %v617_v63  ;;  %v2171_v63 = vrot.slane %v5500_v55, 4  ;;  %6108 = vst [vmem:[#allocation16_spill] sm:$0xff] %v5535_v9  ;;  %v5551_v53 = vshrl.u32 %v5535_v9, 16  ;;  %v5554_v32 = vshll.u32 %v5535_v9, 16  ;;  %v644_v49 = vsel %vm600_vm3, %v634_v10, %v643_v45 }
  0x7b   : > { %4454 = vmatprep.mubr.bf16.mxu0 %v5483_v47  ;;  %4483 = vmatpush3.bf16.msra.mxu0 %v4951_v29  ;;  %v651_v29 = vrot.slane %v5259_v43, 3  ;;  %v5539_v57 = vsel %vm2118_vm2, %v2165_v28, %v2169_v14  ;;  %v2177_v30 = vor.u32 %v2176_v11, %v2175_v0  ;;  %v669_v0 = vrot.slane %v5302_v6, 3  ;;  %v2100_v11 = vld [vmem:[#allocation2 + $0x90] sm:$0x1f] }
  0x7c   : > { %4484 = vmatprep.subr.bf16.mxu0 %v4953_v22  ;;  %v2173_v28 = vor.u32 %v2172_v33, %v2171_v63  ;;  %6109 = vst [vmem:[#allocation17_spill] sm:$0xff] %v5551_v53  ;;  %6110 = vst [vmem:[#allocation18_spill] sm:$0xff] %v5554_v32  ;;  %v2179_v33 = vrot.slane %v5551_v53, 4  ;;  %v2188_v9 = vshrl.u32 %v2100_v11, 16  ;;  %v2191_v40 = vshll.u32 %v2100_v11, 16 }
  0x7d   : > { %v652_v35 = vor.u32 %v651_v29, %v648_v34  ;;  %v660_v34 = vrot.slane %v5296_v4, 3  ;;  %v666_v29 = vrot.slane %v5299_v5, 2  ;;  %v4954_v5 = vld [vmem:[%s6072_s1 + $0xa0] sm:$0xff]   ;;  %v678_v4 = vrot.slane %v5331_v24, 3 }
  0x7e   : > { %v5562_v63 = vsel %vm2118_vm2, %v2169_v14, %v2173_v28  ;;  %v5568_v10 = vsel %vm2118_vm2, %v2173_v28, %v2177_v30 }
  0x7f   : > { %4485 = vmatpush3.bf16.msra.mxu0 %v4953_v22  ;;  %v4950_v22 = vld [vmem:[%s6072_s1 + $0x90] sm:$0xff]  }
  0x80   : > { %4518 = vmatprep.subr.bf16.mxu0 %v5514_v16 }
  0x81   : > { %4247 = vmatmul.mubr.bf16.vlgmr.msra.gmra.mrb[0].mxu1 %v626_v7  ;;  %v657_v7 = vrot.slane %v5293_v3, 2 }
  0x82   : > { %4455 = vmatmul.mubr.bf16.gmra.mrb[16].mxu0 %v5528_v54  ;;  %4279 = vmatpush3.bf16.msra.mxu1 %v5309_v8  ;;  %v653_v8 = vsel %vm600_vm3, %v643_v45, %v652_v35  ;;  %v2453_v45 = vld [vmem:[#allocation2 + $0x20] sm:$0xf0] }
  0x83   : > { %4250 = vmatprep.mubr.bf16.mxu1 %v635_v39  ;;  %4458 = vmatprep.mubr.bf16.mxu0 %v5539_v57  ;;  %v2180_v39 = vrot.slane %v5554_v32, 5  ;;  %v661_v14 = vor.u32 %v660_v34, %v657_v7  ;;  %v670_v32 = vor.u32 %v669_v0, %v666_v29  ;;  %v2488_v28 = vshrl.u32 %v2453_v45, 16 }
  0x84   : > { %4280 = vmatprep.subr.bf16.mxu1 %v4948_v62  ;;  %v2491_v6 = vshll.u32 %v2453_v45, 16  ;;  %v684_v7 = vrot.slane %v5334_v25, 2 }
  0x85   : > { %v2181_v53 = vor.u32 %v2180_v39, %v2179_v33  ;;  %v671_v29 = vsel %vm600_vm3, %v661_v14, %v670_v32  ;;  %v2190_v33 = vrot.slane %v2188_v9, 4  ;;  %v2193_v39 = vrot.slane %v2191_v40, 5  ;;  %v5596_v9 = vld [vmem:[#allocation2 + $0x98] sm:$0xff] }
  0x86   : > { %4281 = vmatpush3.bf16.msra.mxu1 %v4948_v62  ;;  %v4952_v62 = vld [vmem:[%s6072_s1 + $0x98] sm:$0xff]   ;;  %v2490_v11 = vrot.slane %v2488_v28, 4  ;;  %v2493_v45 = vrot.slane %v2491_v6, 5  ;;  %v4958_v6 = vld [vmem:[%s6072_s1 + $0xb0] sm:$0xff]  }
  0x87   : > { %4282 = vmatprep.subr.bf16.mxu1 %v4950_v22  ;;  %v5584_v34 = vsel %vm2118_vm2, %v2177_v30, %v2181_v53  ;;  %v5589_v0 = vsel %vm2118_vm2, %v2181_v53, %v5494_v12  ;;  %v2194_v40 = vor.u32 %v2193_v39, %v2190_v33  ;;  %v4960_v39 = vld [vmem:[%s6072_s1 + $0xb8] sm:$0xff]  }
  0x88   : > { %v2494_v53 = vor.u32 %v2493_v45, %v2490_v11 }
  0x89   : > { %4251 = vmatmul.mubr.bf16.gmra.mrb[4].mxu1 %v644_v49  ;;  %v675_v49 = vrot.slane %v5328_v23, 2 }
  0x8a   : > { %4459 = vmatmul.mubr.bf16.gmra.mrb[20].mxu0 %v5562_v63  ;;  %4254 = vmatprep.mubr.bf16.mxu1 %v653_v8  ;;  %v662_v8 = vsel %vm600_vm3, %v652_v35, %v661_v14  ;;  %v4956_v35 = vld [vmem:[%s6072_s1 + $0xa8] sm:$0xff]   ;;  %v2503_v33 = vsel %vm2118_vm2, %v2494_v53, %v5290_v2  ;;  %v5630_v2 = vld [vmem:[%s6072_s1 + $0xc0] sm:$0xff]   ;;  %v714_v53 = vrot.slane %v5441_v18, 3 }
  0x8b   : > { %4462 = vmatprep.mubr.bf16.mxu0 %v5568_v10  ;;  %4283 = vmatpush3.bf16.msra.mxu1 %v4950_v22  ;;  %v687_v22 = vrot.slane %v5337_v26, 3  ;;  %v679_v26 = vor.u32 %v678_v4, %v675_v49  ;;  %v2961_v4 = vrot.slane %v5596_v9, 5  ;;  %v693_v49 = vrot.slane %v5355_v46, 2 }
  0x8c   : > { %4284 = vmatprep.subr.bf16.mxu1 %v4952_v62 }
  0x8d   : > { %v688_v30 = vor.u32 %v687_v22, %v684_v7  ;;  %v680_v14 = vsel %vm600_vm3, %v670_v32, %v679_v26  ;;  %v2195_v22 = vsel %vm2118_vm2, %v5494_v12, %v2194_v40  ;;  %v705_v32 = vrot.slane %v5393_v20, 3 }
  0x8e   : > { %v711_v40 = vrot.slane %v5421_v50, 2 }
  0x8f   : > { %4285 = vmatpush3.bf16.msra.mxu1 %v4952_v62  ;;  %v2959_v62 = vrot.slane %v5450_v21, 5  ;;  %v689_v28 = vsel %vm600_vm3, %v679_v26, %v688_v30 }
  0x90   : > { %4286 = vmatprep.subr.bf16.mxu1 %v4954_v5 }
  0x91   : > { %4255 = vmatmul.mubr.bf16.gmra.mrb[8].mxu1 %v662_v8  ;;  %v5607_v8 = vld [vmem:[#allocation2 + $0xa0] sm:$0x1f]  ;;  %v5612_v7 = vsel %vm2931_vm5, %v2959_v62, %v2961_v4 }
  0x92   : > { %4463 = vmatmul.mubr.bf16.gmra.mrb[24].mxu0 %v5584_v34  ;;  %4258 = vmatprep.mubr.bf16.mxu1 %v671_v29  ;;  %v702_v29 = vrot.slane %v5389_v17, 2  ;;  %v2963_v26 = vrot.slane %v5607_v8, 5 }
  0x93   : > { %4466 = vmatprep.mubr.bf16.mxu0 %v5589_v0  ;;  %4287 = vmatpush3.bf16.msra.mxu1 %v4954_v5  ;;  %v696_v5 = vrot.slane %v5358_v48, 3 }
  0x94   : > { %4288 = vmatprep.subr.bf16.mxu1 %v4956_v35  ;;  %v5625_v11 = vsel %vm2931_vm5, %v2961_v4, %v2963_v26  ;;  %v706_v45 = vor.u32 %v705_v32, %v702_v29  ;;  %v729_v29 = vrot.slane %v5500_v55, 2  ;;  %v732_v32 = vrot.slane %v5503_v51, 3 }
  0x95   : > { %v697_v12 = vor.u32 %v696_v5, %v693_v49  ;;  %v4959_v5 = vld [vmem:[%s6072_s1 + $0x1d0] sm:$0xff]   ;;  %v738_v26 = vrot.slane %v5506_v1, 2 }
  0x97   : > { %4289 = vmatpush3.bf16.msra.mxu1 %v4956_v35  ;;  %v698_v35 = vsel %vm600_vm3, %v688_v30, %v697_v12  ;;  %v707_v4 = vsel %vm600_vm3, %v697_v12, %v706_v45  ;;  %v715_v30 = vor.u32 %v714_v53, %v711_v40  ;;  %v748_v12 = vshll.u32 %v5372_v59, 16 }
  0x98   : > { %4290 = vmatprep.subr.bf16.mxu1 %v4958_v6 }
  0x99   : > { %4259 = vmatmul.mubr.bf16.gmra.mrb[12].mxu1 %v680_v14  ;;  %v720_v14 = vrot.slane %v5446_v61, 2 }
  0x9a   : > { %4467 = vmatmul.mubr.bf16.gmra.mrb[28].mxu0 %v2195_v22  ;;  %4262 = vmatprep.mubr.bf16.mxu1 %v689_v28  ;;  %v723_v28 = vrot.slane %v5455_v38, 3  ;;  %v716_v22 = vsel %vm600_vm3, %v706_v45, %v715_v30 }
  0x9b   : > { %4486 = vmatprep.mubr.bf16.mxu0 %v2503_v33  ;;  %4291 = vmatpush3.bf16.msra.mxu1 %v4958_v6  ;;  %v4957_v6 = vld [vmem:[%s6072_s1 + $0x1c8] sm:$0xff]   ;;  %v733_v33 = vor.u32 %v732_v32, %v729_v29  ;;  %v2625_v29 = vshll.u32 %v5596_v9, 16 }
  0x9c   : > { %4292 = vmatprep.subr.bf16.mxu1 %v4960_v39  ;;  %v724_v49 = vor.u32 %v723_v28, %v720_v14  ;;  %v4967_v14 = vld [vmem:[%s6072_s1 + $0x1f0] sm:$0xff]  }
  0x9e   : > { %v734_v40 = vsel %vm600_vm3, %v724_v49, %v733_v33 }
  0x9f   : > { %4293 = vmatpush3.bf16.msra.mxu1 %v4960_v39  ;;  %v745_v39 = vshrl.u32 %v5372_v59, 16  ;;  %v4965_v59 = vld [vmem:[%s6072_s1 + $0x1e8] sm:$0xff]  }
  0xa0   : > { %4326 = vmatprep.subr.bf16.mxu1 %v5630_v2 }
  0xa1   : > { %4263 = vmatmul.mubr.bf16.gmra.mrb[16].mxu1 %v698_v35  ;;  %v4963_v35 = vld [vmem:[%s6072_s1 + $0x1e0] sm:$0xff]   ;;  %v747_v53 = vrot.slane %v745_v39, 2  ;;  %v2627_v39 = vrot.slane %v2625_v29, 5 }
  0xa2   : > { %4487 = vmatmul.mubr.bf16.vlgmr.msra.gmra.mrb[0].mxu0 %v5364_v52  ;;  %4266 = vmatprep.mubr.bf16.mxu1 %v707_v4  ;;  %v725_v52 = vsel %vm600_vm3, %v715_v30, %v724_v49  ;;  %v750_v4 = vrot.slane %v748_v12, 3  ;;  %v1014_v30 = vrot.slane %v5222_v19, 4  ;;  %v1017_v19 = vrot.slane %v5244_v36, 3  ;;  %v4968_v12 = vld [vmem:[%s6072_s1 + $0xd8] sm:$0xff]  }
  0xa3   : > { %4519 = vmatpush3.bf16.msra.mxu0 %v5514_v16  ;;  %4490 = vmatprep.mubr.bf16.mxu0 %v5369_v56  ;;  %v741_v16 = vrot.slane %v5509_v44, 3  ;;  %v4961_v56 = vld [vmem:[%s6072_s1 + $0x1d8] sm:$0xff]   ;;  %v1018_v49 = vrot.slane %v5247_v37, 4 }
  0xa4   : > { %4520 = vmatprep.subr.bf16.mxu0 %v4957_v6 }
  0xa5   : > { %v742_v45 = vor.u32 %v741_v16, %v738_v26  ;;  %v1019_v36 = vor.u32 %v1018_v49, %v1017_v19  ;;  %v6113_v26 = vld [vmem:[#allocation9_spill] sm:$0xff]  ;;  %v4972_v49 = vld [vmem:[%s6072_s1 + $0xe8] sm:$0xff]  }
  0xa6   : > { %v1030_v16 = vrot.slane %v6113_v26, 4 }
  0xa7   : > { %4521 = vmatpush3.bf16.msra.mxu0 %v4957_v6  ;;  %v1013_v6 = vrot.slane %v5216_v15, 3  ;;  %v5688_v15 = vld [vmem:[%s6072_s1 + $0x200] sm:$0xff]  }
  0xa8   : > { %4522 = vmatprep.subr.bf16.mxu0 %v4959_v5 }
  0xa9   : > { %4267 = vmatmul.mubr.bf16.gmra.mrb[20].mxu1 %v716_v22  ;;  %v2622_v22 = vshrl.u32 %v5596_v9, 16 }
  0xaa   : > { %4491 = vmatmul.mubr.bf16.gmra.mrb[4].mxu0 %v5401_v31  ;;  %4270 = vmatprep.mubr.bf16.mxu1 %v725_v52  ;;  %v743_v31 = vsel %vm600_vm3, %v733_v33, %v742_v45 }
  0xab   : > { %4494 = vmatprep.mubr.bf16.mxu0 %v5408_v58  ;;  %4523 = vmatpush3.bf16.msra.mxu0 %v4959_v5  ;;  %v751_v58 = vor.u32 %v750_v4, %v747_v53  ;;  %v1021_v5 = vrot.slane %v5256_v42, 3  ;;  %v2624_v33 = vrot.slane %v2622_v22, 4  ;;  %v2634_v53 = vshll.u32 %v5607_v8, 16 }
  0xac   : > { %4524 = vmatprep.subr.bf16.mxu0 %v4961_v56 }
  0xad   : > { %v752_v28 = vsel %vm600_vm3, %v742_v45, %v751_v58  ;;  %v2628_v4 = vor.u32 %v2627_v39, %v2624_v33  ;;  %v1033_v58 = vrot.slane %v5328_v23, 3  ;;  %v1042_v33 = vrot.slane %v5358_v48, 4 }
  0xaf   : > { %4525 = vmatpush3.bf16.msra.mxu0 %v4961_v56 }
  0xb0   : > { %4526 = vmatprep.subr.bf16.mxu0 %v4963_v35 }
  0xb1   : > { %4271 = vmatmul.mubr.bf16.gmra.mrb[24].mxu1 %v734_v40  ;;  %v2631_v40 = vshrl.u32 %v5607_v8, 16  ;;  %v1037_v8 = vrot.slane %v5334_v25, 3 }
  0xb2   : > { %4495 = vmatmul.mubr.bf16.gmra.mrb[8].mxu0 %v5476_v13  ;;  %4274 = vmatprep.mubr.bf16.mxu1 %v743_v31  ;;  %v4969_v13 = vld [vmem:[%s6072_s1 + $0x1f8] sm:$0xff]   ;;  %v4970_v31 = vld [vmem:[%s6072_s1 + $0xe0] sm:$0xff]  }
  0xb3   : > { %4498 = vmatprep.mubr.bf16.mxu0 %v5483_v47  ;;  %4527 = vmatpush3.bf16.msra.mxu0 %v4963_v35  ;;  %v5683_v47 = vor.u32 %v1014_v30, %v1013_v6  ;;  %v6114_v6 = vld [vmem:[#allocation10_spill] sm:$0xff] }
  0xb4   : > { %4528 = vmatprep.subr.bf16.mxu0 %v4965_v59  ;;  %v1038_v30 = vrot.slane %v6114_v6, 4 }
  0xb7   : > { %4529 = vmatpush3.bf16.msra.mxu0 %v4965_v59 }
  0xb8   : > { %4530 = vmatprep.subr.bf16.mxu0 %v4967_v14 }
  0xb9   : > { %4275 = vmatmul.mubr.bf16.gmra.mrb[28].mxu1 %v752_v28  ;;  %v2636_v28 = vrot.slane %v2634_v53, 5 }
  0xba   : > { %4499 = vmatmul.mubr.bf16.gmra.mrb[12].mxu0 %v5528_v54  ;;  %4294 = vmatprep.mubr.bf16.mxu1 %v5463_v60  ;;  %v1022_v54 = vrot.slane %v5259_v43, 4  ;;  %v1016_v60 = vsel %vm996_vm4, %v5448_v27, %v5683_v47  ;;  %v4966_v27 = vld [vmem:[%s6072_s1 + $0xd0] sm:$0xff]  }
  0xbb   : > { %4502 = vmatprep.mubr.bf16.mxu0 %v5539_v57  ;;  %4531 = vmatpush3.bf16.msra.mxu0 %v4967_v14  ;;  %v4964_v57 = vld [vmem:[%s6072_s1 + $0xc8] sm:$0xff]   ;;  %v2633_v14 = vrot.slane %v2631_v40, 4  ;;  %v1046_v40 = vrot.slane %v5393_v20, 4 }
  0xbc   : > { %4532 = vmatprep.subr.bf16.mxu0 %v4969_v13  ;;  %v1023_v37 = vor.u32 %v1022_v54, %v1021_v5  ;;  %v5753_v5 = vld [vmem:[#allocation2 + $0x20] sm:$0xe0]  ;;  %v6116_v54 = vld [vmem:[#allocation15_spill] sm:$0xff] }
  0xbe   : > { %v5719_v56 = vsel %vm996_vm4, %v1019_v36, %v1023_v37 }
  0xbf   : > { %4533 = vmatpush3.bf16.msra.mxu0 %v4969_v13  ;;  %v6115_v13 = vld [vmem:[#allocation14_spill] sm:$0xff] }
  0xc0   : > { %4566 = vmatprep.subr.bf16.mxu0 %v5688_v15  ;;  %v2629_v19 = vsel %vm2118_vm2, %v6115_v13, %v2628_v4  ;;  %v1050_v13 = vrot.slane %v5441_v18, 4 }
  0xc1   : > { %4295 = vmatmul.mubr.bf16.vlgmr.msra.gmra.mrb[0].mxu1 %v5467_v41  ;;  %v1025_v41 = vrot.slane %v5293_v3, 3 }
  0xc2   : > { %4503 = vmatmul.mubr.bf16.gmra.mrb[16].mxu0 %v5562_v63  ;;  %4327 = vmatpush3.bf16.msra.mxu1 %v5630_v2  ;;  %v5713_v63 = vsel %vm996_vm4, %v5683_v47, %v1019_v36  ;;  %v6111_v2 = vld [vmem:[#allocation7_spill] sm:$0xff]  ;;  %v1039_v36 = vor.u32 %v1038_v30, %v1037_v8  ;;  %v1049_v30 = vrot.slane %v5421_v50, 3 }
  0xc3   : > { %4298 = vmatprep.mubr.bf16.mxu1 %v1016_v60  ;;  %4506 = vmatprep.mubr.bf16.mxu0 %v5568_v10  ;;  %v1026_v32 = vrot.slane %v6111_v2, 4  ;;  %v6112_v10 = vld [vmem:[#allocation8_spill] sm:$0xff] }
  0xc4   : > { %4328 = vmatprep.subr.bf16.mxu1 %v4964_v57  ;;  %v1029_v52 = vrot.slane %v6112_v10, 3 }
  0xc5   : > { %v1027_v45 = vor.u32 %v1026_v32, %v1025_v41  ;;  %v4974_v32 = vld [vmem:[%s6072_s1 + $0xf0] sm:$0xff]  }
  0xc6   : > { %4329 = vmatpush3.bf16.msra.mxu1 %v4964_v57  ;;  %v1031_v35 = vor.u32 %v1030_v16, %v1029_v52  ;;  %v2637_v57 = vor.u32 %v2636_v28, %v2633_v14  ;;  %v1041_v16 = vrot.slane %v5355_v46, 3  ;;  %v4984_v14 = vld [vmem:[#allocation2 + $0x38] sm:$0xff] }
  0xc7   : > { %4330 = vmatprep.subr.bf16.mxu1 %v4966_v27  ;;  %v5738_v59 = vsel %vm996_vm4, %v1023_v37, %v1027_v45  ;;  %v2932_v37 = vrot.slane %v5753_v5, 5  ;;  %v2937_v28 = vrot.slane %v4984_v14, 5  ;;  %v978_v14 = vld [vmem:[#allocation2 + $0x80] sm:$0xf] }
  0xc8   : > { %v2638_v39 = vsel %vm2118_vm2, %v2628_v4, %v2637_v57  ;;  %v1043_v4 = vor.u32 %v1042_v33, %v1041_v16  ;;  %v4987_v33 = vld [vmem:[#allocation2 + $0x48] sm:$0xff] }
  0xc9   : > { %4299 = vmatmul.mubr.bf16.gmra.mrb[4].mxu1 %v5713_v63 }
  0xca   : > { %4507 = vmatmul.mubr.bf16.gmra.mrb[20].mxu0 %v5584_v34  ;;  %4302 = vmatprep.mubr.bf16.mxu1 %v5719_v56  ;;  %v5741_v34 = vsel %vm996_vm4, %v1027_v45, %v1031_v35  ;;  %v1045_v45 = vrot.slane %v5389_v17, 3  ;;  %v5779_v8 = vsel %vm996_vm4, %v1039_v36, %v1043_v4 }
  0xcb   : > { %4510 = vmatprep.mubr.bf16.mxu0 %v5589_v0  ;;  %4331 = vmatpush3.bf16.msra.mxu1 %v4966_v27  ;;  %v1034_v0 = vrot.slane %v5331_v24, 4  ;;  %v4982_v27 = vld [vmem:[#allocation2 + $0x28] sm:$0xff] }
  0xcc   : > { %4332 = vmatprep.subr.bf16.mxu1 %v4968_v12  ;;  %v2933_v41 = vrot.slane %v4982_v27, 5  ;;  %v1051_v27 = vor.u32 %v1050_v13, %v1049_v30  ;;  %v1331_v13 = vld [vmem:[#allocation2 + $0x10] sm:$0xf8] }
  0xcd   : > { %v1035_v60 = vor.u32 %v1034_v0, %v1033_v58  ;;  %v1047_v0 = vor.u32 %v1046_v40, %v1045_v45  ;;  %v4975_v45 = vld [vmem:[%s6072_s1 + $0x210] sm:$0xff]   ;;  %v1057_v40 = vrot.slane %v5500_v55, 3 }
  0xce   : > { %v2934_v53 = vsel %vm2931_vm5, %v2932_v37, %v2933_v41  ;;  %v5796_v37 = vld [vmem:[%s6072_s1 + $0x100] sm:$0xff]  }
  0xcf   : > { %4333 = vmatpush3.bf16.msra.mxu1 %v4968_v12  ;;  %v5762_v52 = vsel %vm996_vm4, %v1031_v35, %v1035_v60  ;;  %v5768_v12 = vsel %vm996_vm4, %v1035_v60, %v1039_v36  ;;  %v4976_v35 = vld [vmem:[%s6072_s1 + $0xf8] sm:$0xff]   ;;  %v1054_v60 = vrot.slane %v5455_v38, 4  ;;  %v4973_v36 = vld [vmem:[%s6072_s1 + $0x208] sm:$0xff]  }
  0xd0   : > { %4334 = vmatprep.subr.bf16.mxu1 %v4970_v31 }
  0xd1   : > { %4303 = vmatmul.mubr.bf16.gmra.mrb[8].mxu1 %v5738_v59 }
  0xd2   : > { %4511 = vmatmul.mubr.bf16.gmra.mrb[24].mxu0 %v6116_v54  ;;  %4306 = vmatprep.mubr.bf16.mxu1 %v5741_v34  ;;  %v1053_v54 = vrot.slane %v5446_v61, 3 }
  0xd3   : > { %4514 = vmatprep.mubr.bf16.mxu0 %v2629_v19  ;;  %4335 = vmatpush3.bf16.msra.mxu1 %v4970_v31  ;;  %v4983_v31 = vld [vmem:[#allocation2 + $0x30] sm:$0xff] }
  0xd4   : > { %4336 = vmatprep.subr.bf16.mxu1 %v4972_v49  ;;  %v2935_v58 = vrot.slane %v4983_v31, 5  ;;  %v1055_v16 = vor.u32 %v1054_v60, %v1053_v54 }
  0xd6   : > { %v2936_v19 = vsel %vm2931_vm5, %v2933_v41, %v2935_v58  ;;  %v2938_v57 = vsel %vm2931_vm5, %v2935_v58, %v2937_v28  ;;  %v4986_v41 = vld [vmem:[#allocation2 + $0x40] sm:$0xff]  ;;  %v5814_v58 = vsel %vm996_vm4, %v1051_v27, %v1055_v16 }
  0xd7   : > { %4337 = vmatpush3.bf16.msra.mxu1 %v4972_v49  ;;  %v5785_v49 = vsel %vm996_vm4, %v1043_v4, %v1047_v0  ;;  %v1062_v4 = vrot.slane %v5509_v44, 4 }
  0xd8   : > { %4338 = vmatprep.subr.bf16.mxu1 %v4974_v32 }
  0xd9   : > { %4307 = vmatmul.mubr.bf16.gmra.mrb[12].mxu1 %v5762_v52 }
  0xda   : > { %4515 = vmatmul.mubr.bf16.gmra.mrb[28].mxu0 %v2638_v39  ;;  %4310 = vmatprep.mubr.bf16.mxu1 %v5768_v12  ;;  %v2941_v39 = vrot.slane %v4987_v33, 5 }
  0xdb   : > { %4534 = vmatprep.mubr.bf16.mxu0 %v2934_v53  ;;  %4339 = vmatpush3.bf16.msra.mxu1 %v4974_v32  ;;  %v2939_v32 = vrot.slane %v4986_v41, 5  ;;  %v5807_v53 = vsel %vm996_vm4, %v1047_v0, %v1051_v27  ;;  %v4977_v0 = vld [vmem:[%s6072_s1 + $0x218] sm:$0xff]   ;;  %v1366_v27 = vshrl.u32 %v1331_v13, 16  ;;  %v1369_v41 = vshll.u32 %v1331_v13, 16  ;;  %v4979_v13 = vld [vmem:[%s6072_s1 + $0x228] sm:$0xff]  }
  0xdc   : > { %4340 = vmatprep.subr.bf16.mxu1 %v4976_v35 }
  0xdd   : > { %v2940_v31 = vsel %vm2931_vm5, %v2937_v28, %v2939_v32  ;;  %v2942_v30 = vsel %vm2931_vm5, %v2939_v32, %v2941_v39  ;;  %v5824_v32 = vld [vmem:[#allocation2 + $0x58] sm:$0xff] }
  0xde   : > { %v2945_v33 = vrot.slane %v5824_v32, 5 }
  0xdf   : > { %4341 = vmatpush3.bf16.msra.mxu1 %v4976_v35  ;;  %v1058_v35 = vrot.slane %v5503_v51, 4 }
  0xe0   : > { %4614 = vmatprep.subr.bf16.mxu1 %v5796_v37 }
  0xe1   : > { %4311 = vmatmul.mubr.bf16.gmra.mrb[16].mxu1 %v5779_v8  ;;  %v1059_v28 = vor.u32 %v1058_v35, %v1057_v40 }
  0xe2   : > { %4535 = vmatmul.mubr.bf16.vlgmr.msra.gmra.mrb[0].mxu0 %v2936_v19  ;;  %4314 = vmatprep.mubr.bf16.mxu1 %v5785_v49  ;;  %v4988_v19 = vld [vmem:[#allocation2 + $0x50] sm:$0xff] }
  0xe3   : > { %4567 = vmatpush3.bf16.msra.mxu0 %v5688_v15  ;;  %4538 = vmatprep.mubr.bf16.mxu0 %v2938_v57  ;;  %v1061_v15 = vrot.slane %v5506_v1, 3  ;;  %v2943_v54 = vrot.slane %v4988_v19, 5  ;;  %v1066_v57 = vshrl.u32 %v978_v14, 16  ;;  %v5832_v40 = vsel %vm996_vm4, %v1055_v16, %v1059_v28 }
  0xe4   : > { %4568 = vmatprep.subr.bf16.mxu0 %v4973_v36 }
  0xe5   : > { %v5822_v60 = vor.u32 %v1062_v4, %v1061_v15  ;;  %v2944_v19 = vsel %vm2931_vm5, %v2941_v39, %v2943_v54  ;;  %v1368_v4 = vrot.slane %v1366_v27, 3  ;;  %v5844_v39 = vld [vmem:[#allocation2 + $0x60] sm:$0xff] }
  0xe7   : > { %4569 = vmatpush3.bf16.msra.mxu0 %v4973_v36  ;;  %v1069_v36 = vshll.u32 %v978_v14, 16  ;;  %v5836_v35 = vsel %vm996_vm4, %v1059_v28, %v5822_v60  ;;  %v1371_v14 = vrot.slane %v1369_v41, 4 }
  0xe8   : > { %4570 = vmatprep.subr.bf16.mxu0 %v4975_v45 }
  0xe9   : > { %4315 = vmatmul.mubr.bf16.gmra.mrb[20].mxu1 %v5807_v53  ;;  %v1071_v15 = vrot.slane %v1069_v36, 4  ;;  %v1372_v28 = vor.u32 %v1371_v14, %v1368_v4  ;;  %v4980_v36 = vld [vmem:[%s6072_s1 + $0x230] sm:$0xff]  }
  0xea   : > { %4539 = vmatmul.mubr.bf16.gmra.mrb[4].mxu0 %v2940_v31  ;;  %4318 = vmatprep.mubr.bf16.mxu1 %v5814_v58  ;;  %v4978_v31 = vld [vmem:[%s6072_s1 + $0x220] sm:$0xff]  }
  0xeb   : > { %4542 = vmatprep.mubr.bf16.mxu0 %v2942_v30  ;;  %4571 = vmatpush3.bf16.msra.mxu0 %v4975_v45  ;;  %v1068_v45 = vrot.slane %v1066_v57, 3  ;;  %v2946_v30 = vsel %vm2931_vm5, %v2943_v54, %v2945_v33  ;;  %v5847_v57 = vld [vmem:[#allocation2 + $0x68] sm:$0xff] }
  0xec   : > { %4572 = vmatprep.subr.bf16.mxu0 %v4977_v0  ;;  %v2949_v54 = vrot.slane %v5847_v57, 5 }
  0xed   : > { %v1072_v16 = vor.u32 %v1071_v15, %v1068_v45  ;;  %v4981_v45 = vld [vmem:[%s6072_s1 + $0x238] sm:$0xff]   ;;  %v5862_v15 = vld [vmem:[#allocation2 + $0x70] sm:$0xff] }
  0xee   : > { %v2951_v4 = vrot.slane %v5862_v15, 5 }
  0xef   : > { %4573 = vmatpush3.bf16.msra.mxu0 %v4977_v0  ;;  %v2947_v0 = vrot.slane %v5844_v39, 5  ;;  %v1073_v27 = vsel %vm996_vm4, %v5822_v60, %v1072_v16 }
  0xf0   : > { %4574 = vmatprep.subr.bf16.mxu0 %v4978_v31  ;;  %v2952_v14 = vsel %vm2931_vm5, %v2949_v54, %v2951_v4 }
  0xf1   : > { %4319 = vmatmul.mubr.bf16.gmra.mrb[24].mxu1 %v5832_v40  ;;  %v2948_v41 = vsel %vm2931_vm5, %v2945_v33, %v2947_v0  ;;  %v5865_v33 = vld [vmem:[#allocation2 + $0x78] sm:$0xff] }
  0xf2   : > { %4543 = vmatmul.mubr.bf16.gmra.mrb[8].mxu0 %v2944_v19  ;;  %4322 = vmatprep.mubr.bf16.mxu1 %v5836_v35  ;;  %v1381_v19 = vsel %vm996_vm4, %v1372_v28, %v5683_v47  ;;  %v2953_v47 = vrot.slane %v5865_v33, 5  ;;  %v6118_v28 = vld [vmem:[#allocation11_spill] sm:$0xff] }
  0xf3   : > { %4546 = vmatprep.mubr.bf16.mxu0 %v2946_v30  ;;  %4575 = vmatpush3.bf16.msra.mxu0 %v4978_v31  ;;  %v2950_v31 = vsel %vm2931_vm5, %v2947_v0, %v2949_v54  ;;  %v4994_v0 = vld [vmem:[%s6072_s1 + $0x108] sm:$0xff]   ;;  %v2957_v54 = vrot.slane %v6118_v28, 5 }
  0xf4   : > { %4576 = vmatprep.subr.bf16.mxu0 %v4979_v13  ;;  %v2954_v30 = vsel %vm2931_vm5, %v2951_v4, %v2953_v47  ;;  %v4997_v4 = vld [vmem:[%s6072_s1 + $0x120] sm:$0xff]  }
  0xf7   : > { %4577 = vmatpush3.bf16.msra.mxu0 %v4979_v13  ;;  %v6117_v13 = vld [vmem:[#allocation16_spill] sm:$0xff] }
  0xf8   : > { %4578 = vmatprep.subr.bf16.mxu0 %v4980_v36  ;;  %v2955_v16 = vrot.slane %v6117_v13, 5 }
  0xf9   : > { %4323 = vmatmul.mubr.bf16.gmra.mrb[28].mxu1 %v1073_v27  ;;  %v3242_v27 = vshrl.u32 %v5753_v5, 16 }
  0xfa   : > { %4547 = vmatmul.mubr.bf16.gmra.mrb[12].mxu0 %v2948_v41  ;;  %4342 = vmatprep.mubr.bf16.mxu1 %v1381_v19  ;;  %v3245_v41 = vshll.u32 %v5753_v5, 16  ;;  %v2960_v19 = vsel %vm2931_vm5, %v2957_v54, %v2959_v62 }
  0xfb   : > { %4550 = vmatprep.mubr.bf16.mxu0 %v2950_v31  ;;  %4579 = vmatpush3.bf16.msra.mxu0 %v4980_v36  ;;  %v2956_v36 = vsel %vm2931_vm5, %v2953_v47, %v2955_v16  ;;  %v3254_v47 = vrot.slane %v6111_v2, 6 }
  0xfc   : > { %4580 = vmatprep.subr.bf16.mxu0 %v4981_v45  ;;  %v3247_v31 = vrot.slane %v3245_v41, 6  ;;  %v3273_v41 = vrot.slane %v5389_v17, 5 }
  0xff   : > { %4581 = vmatpush3.bf16.msra.mxu0 %v4981_v45  ;;  %v3250_v45 = vrot.slane %v5259_v43, 6  ;;  %v3253_v43 = vrot.slane %v5293_v3, 5 }
 0x101   : > { %4343 = vmatmul.mubr.bf16.vlgmr.msra.gmra.mrb[0].mxu1 %v5713_v63  ;;  %v4995_v63 = vld [vmem:[%s6072_s1 + $0x110] sm:$0xff]   ;;  %v3255_v3 = vor.u32 %v3254_v47, %v3253_v43  ;;  %v3281_v43 = vrot.slane %v5446_v61, 5  ;;  %v3282_v47 = vrot.slane %v5455_v38, 6  ;;  %v3285_v61 = vrot.slane %v5500_v55, 5 }
 0x102   : > { %4551 = vmatmul.mubr.bf16.gmra.mrb[16].mxu0 %v2952_v14  ;;  %4622 = vmatpush3.bf16.msra.mxu1 %v5796_v37  ;;  %v4996_v37 = vld [vmem:[%s6072_s1 + $0x118] sm:$0xff]   ;;  %v4999_v14 = vld [vmem:[%s6072_s1 + $0x130] sm:$0xff]   ;;  %v3286_v38 = vrot.slane %v5503_v51, 6 }
 0x103   : > { %4346 = vmatprep.mubr.bf16.mxu1 %v5719_v56  ;;  %4554 = vmatprep.mubr.bf16.mxu0 %v2954_v30  ;;  %v2958_v56 = vsel %vm2931_vm5, %v2955_v16, %v2957_v54  ;;  %v3262_v30 = vrot.slane %v5331_v24, 6  ;;  %v6119_v24 = vld [vmem:[#allocation17_spill] sm:$0xff]  ;;  %v6120_v54 = vld [vmem:[#allocation18_spill] sm:$0xff] }
 0x104   : > { %4615 = vmatprep.subr.bf16.mxu1 %v4994_v0  ;;  %v1493_v28 = vrot.slane %v6119_v24, 3 }
 0x106   : > { %4623 = vmatpush3.bf16.msra.mxu1 %v4994_v0 }
 0x107   : > { %4616 = vmatprep.subr.bf16.mxu1 %v4995_v63 }
 0x109   : > { %4347 = vmatmul.mubr.bf16.gmra.mrb[4].mxu1 %v5738_v59  ;;  %v3244_v59 = vrot.slane %v3242_v27, 5  ;;  %v5933_v27 = vld [vmem:[#allocation2 + $0x90] sm:$0xf] }
 0x10a   : > { %4555 = vmatmul.mubr.bf16.gmra.mrb[20].mxu0 %v2956_v36  ;;  %4350 = vmatprep.mubr.bf16.mxu1 %v5741_v34  ;;  %v3249_v34 = vrot.slane %v5256_v42, 5  ;;  %v4998_v42 = vld [vmem:[%s6072_s1 + $0x128] sm:$0xff]   ;;  %v1496_v36 = vrot.slane %v6120_v54, 4 }
 0x10b   : > { %4558 = vmatprep.mubr.bf16.mxu0 %v2958_v56  ;;  %4624 = vmatpush3.bf16.msra.mxu1 %v4995_v63  ;;  %v3248_v62 = vor.u32 %v3247_v31, %v3244_v59  ;;  %v3269_v63 = vrot.slane %v5355_v46, 5  ;;  %v6121_v56 = vld [vmem:[#allocation12_spill] sm:$0xff]  ;;  %v1512_v59 = vshll.u32 %v5933_v27, 16 }
 0x10c   : > { %4617 = vmatprep.subr.bf16.mxu1 %v4996_v37  ;;  %v3251_v5 = vor.u32 %v3250_v45, %v3249_v34  ;;  %v1497_v46 = vor.u32 %v1496_v36, %v1493_v28  ;;  %v1835_v28 = vrot.slane %v5865_v33, 4  ;;  %v3306_v33 = vrot.slane %v2625_v29, 6 }
 0x10e   : > { %v3256_v13 = vsel %vm3240_vm6, %v3251_v5, %v3255_v3 }
 0x10f   : > { %4625 = vmatpush3.bf16.msra.mxu1 %v4996_v37  ;;  %v6122_v37 = vld [vmem:[#allocation13_spill] sm:$0xff] }
 0x110   : > { %4618 = vmatprep.subr.bf16.mxu1 %v4997_v4 }
 0x111   : > { %4351 = vmatmul.mubr.bf16.gmra.mrb[8].mxu1 %v5762_v52  ;;  %v3252_v52 = vsel %vm3240_vm6, %v3248_v62, %v3251_v5  ;;  %v1514_v62 = vrot.slane %v1512_v59, 4  ;;  %v3278_v5 = vrot.slane %v5441_v18, 6  ;;  %v6123_v18 = vld [vmem:[#allocation6_spill] sm:$0xff] }
 0x112   : > { %4559 = vmatmul.mubr.bf16.gmra.mrb[24].mxu0 %v2960_v19  ;;  %4354 = vmatprep.mubr.bf16.mxu1 %v5768_v12  ;;  %v3257_v12 = vrot.slane %v6112_v10, 5  ;;  %v5000_v10 = vld [vmem:[%s6072_s1 + $0x138] sm:$0xff]   ;;  %v3274_v19 = vrot.slane %v5393_v20, 6 }
 0x113   : > { %4562 = vmatprep.mubr.bf16.mxu0 %v5612_v7  ;;  %4626 = vmatpush3.bf16.msra.mxu1 %v4997_v4  ;;  %v3258_v7 = vrot.slane %v6113_v26, 6  ;;  %v3261_v26 = vrot.slane %v5328_v23, 5  ;;  %v1498_v4 = vsel %vm996_vm4, %v5822_v60, %v1497_v46 }
 0x114   : > { %4619 = vmatprep.subr.bf16.mxu1 %v4998_v42  ;;  %v3275_v45 = vor.u32 %v3274_v19, %v3273_v41  ;;  %v5001_v41 = vld [vmem:[#allocation2 + $0x80] sm:$0xff] }
 0x115   : > { %v3259_v2 = vor.u32 %v3258_v7, %v3257_v12  ;;  %v3263_v16 = vor.u32 %v3262_v30, %v3261_v26  ;;  %v1827_v12 = vrot.slane %v5824_v32, 4  ;;  %v3283_v7 = vor.u32 %v3282_v47, %v3281_v43 }
 0x116   : > { %v3289_v26 = vrot.slane %v5506_v1, 5  ;;  %v3290_v30 = vrot.slane %v5509_v44, 6  ;;  %v1829_v32 = vrot.slane %v5844_v39, 4  ;;  %v3293_v1 = vrot.slane %v6119_v24, 5 }
 0x117   : > { %4627 = vmatpush3.bf16.msra.mxu1 %v4998_v42  ;;  %v3264_v23 = vsel %vm3240_vm6, %v3259_v2, %v3263_v16  ;;  %v3294_v44 = vrot.slane %v6120_v54, 6  ;;  %v3298_v39 = vrot.slane %v6122_v37, 6  ;;  %v1837_v19 = vrot.slane %v5001_v41, 4 }
 0x118   : > { %4620 = vmatprep.subr.bf16.mxu1 %v4999_v14  ;;  %v1830_v55 = vsel %vm1809_vm1, %v1827_v12, %v1829_v32 }
 0x119   : > { %4355 = vmatmul.mubr.bf16.gmra.mrb[12].mxu1 %v5779_v8  ;;  %v3265_v8 = vrot.slane %v5334_v25, 5  ;;  %v3270_v25 = vrot.slane %v5358_v48, 6  ;;  %v1509_v48 = vshrl.u32 %v5933_v27, 16 }
 0x11a   : > { %4563 = vmatmul.mubr.bf16.gmra.mrb[28].mxu0 %v5625_v11  ;;  %4358 = vmatprep.mubr.bf16.mxu1 %v5785_v49  ;;  %v3260_v11 = vsel %vm3240_vm6, %v3255_v3, %v3259_v2  ;;  %v3266_v49 = vrot.slane %v6114_v6, 6  ;;  %v1502_v6 = vrot.slane %v6121_v56, 3  ;;  %v6124_v3 = vrot.slane %v6123_v18, 4 }
 0x11b   : > { %4582 = vmatprep.mubr.bf16.mxu0 %v3252_v52  ;;  %4628 = vmatpush3.bf16.msra.mxu1 %v4999_v14  ;;  %v3271_v31 = vor.u32 %v3270_v25, %v3269_v63  ;;  %v1511_v17 = vrot.slane %v1509_v48, 3  ;;  %v6125_v25 = vshrl.u32 %v5450_v21, 16  ;;  %v5002_v48 = vld [vmem:[#allocation2 + $0x88] sm:$0xff] }
 0x11c   : > { %4621 = vmatprep.subr.bf16.mxu1 %v5000_v10  ;;  %v3267_v0 = vor.u32 %v3266_v49, %v3265_v8  ;;  %v1828_v2 = vsel %vm1809_vm1, %v6124_v3, %v1827_v12  ;;  %v3291_v8 = vor.u32 %v3290_v30, %v3289_v26  ;;  %v1839_v59 = vrot.slane %v5002_v48, 4  ;;  %v5996_v26 = vld [vmem:[%s6073_s2] ss:$0 sm:$0xff] }
 0x11d   : > { %v3276_v42 = vsel %vm3240_vm6, %v3271_v31, %v3275_v45  ;;  %v1515_v60 = vor.u32 %v1514_v62, %v1511_v17  ;;  %v1841_v62 = vrot.slane %v5933_v27, 4 }
 0x11e   : > { %v3272_v20 = vsel %vm3240_vm6, %v3267_v0, %v3271_v31  ;;  %v1840_v9 = vsel %vm1809_vm1, %v1837_v19, %v1839_v59 }
 0x11f   : > { %4629 = vmatpush3.bf16.msra.mxu1 %v5000_v10 }
 0x121   : > { %4359 = vmatmul.mubr.bf16.gmra.mrb[16].mxu1 %v5807_v53  ;;  %v1505_v53 = vrot.slane %v6122_v37, 4 }
 0x122   : > { %4583 = vmatmul.mubr.bf16.vlgmr.msra.gmra.mrb[0].mxu0 %v3256_v13  ;;  %4362 = vmatprep.mubr.bf16.mxu1 %v5814_v58  ;;  %v3268_v58 = vsel %vm3240_vm6, %v3263_v16, %v3267_v0  ;;  %v3287_v13 = vor.u32 %v3286_v38, %v3285_v61  ;;  %v3297_v0 = vrot.slane %v6121_v56, 5  ;;  %v3301_v56 = vrot.slane %v6125_v25, 5 }
 0x123   : > { %4586 = vmatprep.mubr.bf16.mxu0 %v3260_v11  ;;  %v1506_v34 = vor.u32 %v1505_v53, %v1502_v6  ;;  %v1831_v11 = vrot.slane %v5847_v57, 4  ;;  %v1833_v57 = vrot.slane %v5862_v15, 4  ;;  %v6126_v6 = vshll.u32 %v5450_v21, 16 }
 0x124   : > { %v3288_v51 = vsel %vm3240_vm6, %v3283_v7, %v3287_v13  ;;  %v3292_v16 = vsel %vm3240_vm6, %v3287_v13, %v3291_v8  ;;  %v3299_v36 = vor.u32 %v3298_v39, %v3297_v0  ;;  %v3305_v15 = vrot.slane %v2622_v22, 5 }
 0x125   : > { %v1516_v14 = vsel %vm996_vm4, %v1506_v34, %v1515_v60  ;;  %v1832_v49 = vsel %vm1809_vm1, %v1829_v32, %v1831_v11  ;;  %v1834_v24 = vsel %vm1809_vm1, %v1831_v11, %v1833_v57  ;;  %v1836_v63 = vsel %vm1809_vm1, %v1833_v57, %v1835_v28 }
 0x126   : > { %v3302_v37 = vrot.slane %v6126_v6, 6 }
 0x129   : > { %4363 = vmatmul.mubr.bf16.gmra.mrb[20].mxu1 %v5832_v40  ;;  %v1507_v40 = vsel %vm996_vm4, %v1497_v46, %v1506_v34  ;;  %v3303_v46 = vor.u32 %v3302_v37, %v3301_v56  ;;  %v3307_v34 = vor.u32 %v3306_v33, %v3305_v15 }
 0x12a   : > { %4587 = vmatmul.mubr.bf16.gmra.mrb[4].mxu0 %v3264_v23  ;;  %4366 = vmatprep.mubr.bf16.mxu1 %v5836_v35  ;;  %v3277_v35 = vrot.slane %v5421_v50, 5  ;;  %v3295_v23 = vor.u32 %v3294_v44, %v3293_v1 }
 0x12b   : > { %4590 = vmatprep.mubr.bf16.mxu0 %v3268_v58  ;;  %v3222_v58 = vld [vmem:[#allocation2 + $0xa0] sm:$0x3f]  ;;  %v3304_v22 = vsel %vm3240_vm6, %v3299_v36, %v3303_v46  ;;  %v3308_v17 = vsel %vm3240_vm6, %v3303_v46, %v3307_v34 }
 0x12c   : > { %v3279_v52 = vor.u32 %v3278_v5, %v3277_v35  ;;  %v3296_v54 = vsel %vm3240_vm6, %v3291_v8, %v3295_v23  ;;  %v3300_v53 = vsel %vm3240_vm6, %v3295_v23, %v3299_v36  ;;  %v3310_v21 = vshrl.u32 %v3222_v58, 16 }
 0x12d   : > { %v3313_v31 = vshll.u32 %v3222_v58, 16 }
 0x12e   : > { %v3280_v50 = vsel %vm3240_vm6, %v3275_v45, %v3279_v52  ;;  %v3284_v10 = vsel %vm3240_vm6, %v3279_v52, %v3283_v7  ;;  %v1838_v45 = vsel %vm1809_vm1, %v1835_v28, %v1837_v19  ;;  %v3312_v29 = vrot.slane %v3310_v21, 5 }
 0x131   : > { %4367 = vmatmul.mubr.bf16.gmra.mrb[24].mxu1 %v1498_v4  ;;  %v3315_v4 = vrot.slane %v3313_v31, 6 }
 0x132   : > { %4591 = vmatmul.mubr.bf16.gmra.mrb[8].mxu0 %v3272_v20  ;;  %4370 = vmatprep.mubr.bf16.mxu1 %v1507_v40  ;;  %v1842_v40 = vsel %vm1809_vm1, %v1839_v59, %v1841_v62 }
 0x133   : > { %4594 = vmatprep.mubr.bf16.mxu0 %v3276_v42  ;;  %v3316_v20 = vor.u32 %v3315_v4, %v3312_v29 }
 0x135   : > { %v3317_v35 = vsel %vm3240_vm6, %v3307_v34, %v3316_v20 }
 0x139   : > { %4371 = vmatmul.mubr.bf16.gmra.mrb[28].mxu1 %v1516_v14 }
 0x13a   : > { %4595 = vmatmul.mubr.bf16.gmra.mrb[12].mxu0 %v3280_v50  ;;  %4406 = vmatprep.mubr.bf16.mxu1 %v1828_v2 }
 0x13b   : > { %4598 = vmatprep.mubr.bf16.mxu0 %v3284_v10 }
 0x141   : > { %4407 = vmatmul.mubr.bf16.vlgmr.msra.gmra.mrb[16].mxu1 %v1830_v55 }
 0x142   : > { %4599 = vmatmul.mubr.bf16.gmra.mrb[16].mxu0 %v3288_v51  ;;  %4410 = vmatprep.mubr.bf16.mxu1 %v1832_v49 }
 0x143   : > { %4602 = vmatprep.mubr.bf16.mxu0 %v3292_v16 }
 0x149   : > { %4411 = vmatmul.mubr.bf16.gmra.mrb[20].mxu1 %v1834_v24 }
 0x14a   : > { %4603 = vmatmul.mubr.bf16.gmra.mrb[20].mxu0 %v3296_v54  ;;  %4414 = vmatprep.mubr.bf16.mxu1 %v1836_v63 }
 0x14b   : > { %4606 = vmatprep.mubr.bf16.mxu0 %v3300_v53 }
 0x151   : > { %4415 = vmatmul.mubr.bf16.gmra.mrb[24].mxu1 %v1838_v45 }
 0x152   : > { %4607 = vmatmul.mubr.bf16.gmra.mrb[24].mxu0 %v3304_v22  ;;  %4418 = vmatprep.mubr.bf16.mxu1 %v1840_v9 }
 0x153   : > { %4610 = vmatprep.mubr.bf16.mxu0 %v3308_v17 }
 0x159   : > { %4419 = vmatmul.mubr.bf16.gmra.mrb[28].mxu1 %v1842_v40 }
 0x15a   : > { %4611 = vmatmul.mubr.bf16.gmra.mrb[28].mxu0 %v3317_v35 }
 0x1d4   : > { %v4344_v5 = vpop.f32.mrb[0].mxu1 }
 0x1d5   : > { %v1615_v42 = vpop.f32.mrb[1].mxu1 }
 0x1d6   : > { %v4345_v43 = vpop.f32.mrb[2].mxu1 }
 0x1d7   : > { %v1618_v47 = vpop.f32.mrb[3].mxu1 }
 0x1dc   : > { %v4348_v60 = vpop.f32.mrb[4].mxu1 }
 0x1dd   : > { %v1631_v52 = vpop.f32.mrb[5].mxu1 }
 0x1de   : > { %v4349_v12 = vpop.f32.mrb[6].mxu1 }
 0x1df   : > { %v1634_v7 = vpop.f32.mrb[7].mxu1 }
 0x1e4   : > { %v4352_v14 = vpop.f32.mrb[8].mxu1 }
 0x1e5   : > { %v1647_v50 = vpop.f32.mrb[9].mxu1 }
 0x1e6   : > { %v4353_v18 = vpop.f32.mrb[10].mxu1 }
 0x1e7   : > { %v1650_v27 = vpop.f32.mrb[11].mxu1 }
 0x1ec   : > { %v4356_v3 = vpop.f32.mrb[12].mxu1 }
 0x1ed   : > { %v1663_v2 = vpop.f32.mrb[13].mxu1 }
 0x1ee   : > { %v4357_v61 = vpop.f32.mrb[14].mxu1 }
 0x1ef   : > { %v1666_v38 = vpop.f32.mrb[15].mxu1 }
 0x1f5   : > { %v4584_v10 = vpop.f32.mrb[0].mxu0 }
 0x1f6   : > { %v4630_v30 = vadd.f32 %v4584_v10, %v4344_v5  ;;  %v3416_v32 = vpop.f32.mrb[1].mxu0 }
 0x1f7   : > { %v4631_v13 = vadd.f32 %v3416_v32, %v1615_v42  ;;  %v4585_v11 = vpop.f32.mrb[2].mxu0 }
 0x1f8   : > { %v3584_v8 = vadd.f32 %v4630_v30, %v5996_v26  ;;  %v4632_v55 = vadd.f32 %v4585_v11, %v4345_v43  ;;  %v3419_v51 = vpop.f32.mrb[3].mxu0 }
 0x1f9   : > { %v3582_v49 = vadd.f32 %v4631_v13, %v5996_v26  ;;  %v4633_v1 = vadd.f32 %v3419_v51, %v1618_v47 }
 0x1fa   : > { %3616 = vst [vmem:[%s5078_s26 + $0x10] sm:$0xff] %v3584_v8  ;;  %v3585_v44 = vadd.f32 %v4632_v55, %v5996_v26 }
 0x1fb   : > { %3614 = vst [vmem:[%s5078_s26] sm:$0xff] %v3582_v49  ;;  %v3583_v16 = vadd.f32 %v4633_v1, %v5996_v26 }
 0x1fc   : > { %3617 = vst [vmem:[%s5078_s26 + $0x18] sm:$0xff] %v3585_v44 }
 0x1fd   : > { %3615 = vst [vmem:[%s5078_s26 + $0x8] sm:$0xff] %v3583_v16  ;;  %v4588_v0 = vpop.f32.mrb[4].mxu0 }
 0x1fe   : > { %v4634_v39 = vadd.f32 %v4588_v0, %v4348_v60  ;;  %v3432_v57 = vpop.f32.mrb[5].mxu0 }
 0x1ff   : > { %v4635_v23 = vadd.f32 %v3432_v57, %v1631_v52  ;;  %v4589_v28 = vpop.f32.mrb[6].mxu0 }
 0x200   : > { %v3588_v36 = vadd.f32 %v4634_v39, %v5996_v26  ;;  %v4636_v24 = vadd.f32 %v4589_v28, %v4349_v12  ;;  %v3435_v54 = vpop.f32.mrb[7].mxu0 }
 0x201   : > { %v3586_v63 = vadd.f32 %v4635_v23, %v5996_v26  ;;  %v4637_v25 = vadd.f32 %v3435_v54, %v1634_v7 }
 0x202   : > { %3620 = vst [vmem:[%s5078_s26 + $0x30] sm:$0xff] %v3588_v36  ;;  %v3589_v56 = vadd.f32 %v4636_v24, %v5996_v26 }
 0x203   : > { %3618 = vst [vmem:[%s5078_s26 + $0x20] sm:$0xff] %v3586_v63  ;;  %v3587_v6 = vadd.f32 %v4637_v25, %v5996_v26 }
 0x204   : > { %3621 = vst [vmem:[%s5078_s26 + $0x38] sm:$0xff] %v3589_v56 }
 0x205   : > { %3619 = vst [vmem:[%s5078_s26 + $0x28] sm:$0xff] %v3587_v6  ;;  %v4592_v37 = vpop.f32.mrb[8].mxu0 }
 0x206   : > { %v4638_v53 = vadd.f32 %v4592_v37, %v4352_v14  ;;  %v3448_v15 = vpop.f32.mrb[9].mxu0 }
 0x207   : > { %v4639_v33 = vadd.f32 %v3448_v15, %v1647_v50  ;;  %v4593_v58 = vpop.f32.mrb[10].mxu0 }
 0x208   : > { %v3592_v41 = vadd.f32 %v4638_v53, %v5996_v26  ;;  %v4640_v19 = vadd.f32 %v4593_v58, %v4353_v18  ;;  %v3451_v46 = vpop.f32.mrb[11].mxu0 }
 0x209   : > { %v3590_v48 = vadd.f32 %v4639_v33, %v5996_v26  ;;  %v4641_v59 = vadd.f32 %v3451_v46, %v1650_v27 }
 0x20a   : > { %3624 = vst [vmem:[%s5078_s26 + $0x50] sm:$0xff] %v3592_v41  ;;  %v3593_v21 = vadd.f32 %v4640_v19, %v5996_v26 }
 0x20b   : > { %3622 = vst [vmem:[%s5078_s26 + $0x40] sm:$0xff] %v3590_v48  ;;  %v3591_v31 = vadd.f32 %v4641_v59, %v5996_v26 }
 0x20c   : > { %3625 = vst [vmem:[%s5078_s26 + $0x58] sm:$0xff] %v3593_v21 }
 0x20d   : > { %3623 = vst [vmem:[%s5078_s26 + $0x48] sm:$0xff] %v3591_v31  ;;  %v4596_v34 = vpop.f32.mrb[12].mxu0 }
 0x20e   : > { %v4642_v45 = vadd.f32 %v4596_v34, %v4356_v3  ;;  %v3464_v22 = vpop.f32.mrb[13].mxu0 }
 0x20f   : > { %v4643_v9 = vadd.f32 %v3464_v22, %v1663_v2  ;;  %v4597_v29 = vpop.f32.mrb[14].mxu0 }
 0x210   : > { %v3596_v4 = vadd.f32 %v4642_v45, %v5996_v26  ;;  %v4644_v17 = vadd.f32 %v4597_v29, %v4357_v61  ;;  %v3467_v62 = vpop.f32.mrb[15].mxu0 }
 0x211   : > { %v3594_v20 = vadd.f32 %v4643_v9, %v5996_v26  ;;  %v4645_v40 = vadd.f32 %v3467_v62, %v1666_v38 }
 0x212   : > { %3628 = vst [vmem:[%s5078_s26 + $0x70] sm:$0xff] %v3596_v4  ;;  %v3597_v35 = vadd.f32 %v4644_v17, %v5996_v26 }
 0x213   : > { %3626 = vst [vmem:[%s5078_s26 + $0x60] sm:$0xff] %v3594_v20  ;;  %v3595_v5 = vadd.f32 %v4645_v40, %v5996_v26 }
 0x214   : > { %3629 = vst [vmem:[%s5078_s26 + $0x78] sm:$0xff] %v3597_v35  ;;  %v4408_v42 = vpop.f32.mrb[16].mxu1 }
 0x215   : > { %3627 = vst [vmem:[%s5078_s26 + $0x68] sm:$0xff] %v3595_v5  ;;  %v4600_v43 = vpop.f32.mrb[16].mxu0  ;;  %v2005_v47 = vpop.f32.mrb[17].mxu1 }
 0x216   : > { %v4646_v60 = vadd.f32 %v4600_v43, %v4408_v42  ;;  %v3480_v52 = vpop.f32.mrb[17].mxu0  ;;  %v4409_v12 = vpop.f32.mrb[18].mxu1 }
 0x217   : > { %v4647_v7 = vadd.f32 %v3480_v52, %v2005_v47  ;;  %v4601_v14 = vpop.f32.mrb[18].mxu0  ;;  %v2008_v50 = vpop.f32.mrb[19].mxu1 }
 0x218   : > { %v3600_v18 = vadd.f32 %v4646_v60, %v5996_v26  ;;  %v4648_v27 = vadd.f32 %v4601_v14, %v4409_v12  ;;  %v3483_v3 = vpop.f32.mrb[19].mxu0 }
 0x219   : > { %v3598_v2 = vadd.f32 %v4647_v7, %v5996_v26  ;;  %v4649_v61 = vadd.f32 %v3483_v3, %v2008_v50 }
 0x21a   : > { %3632 = vst [vmem:[%s5078_s26 + $0x90] sm:$0xff] %v3600_v18  ;;  %v3601_v38 = vadd.f32 %v4648_v27, %v5996_v26 }
 0x21b   : > { %3630 = vst [vmem:[%s5078_s26 + $0x80] sm:$0xff] %v3598_v2  ;;  %v3599_v10 = vadd.f32 %v4649_v61, %v5996_v26 }
 0x21c   : > { %3633 = vst [vmem:[%s5078_s26 + $0x98] sm:$0xff] %v3601_v38  ;;  %v4412_v30 = vpop.f32.mrb[20].mxu1 }
 0x21d   : > { %3631 = vst [vmem:[%s5078_s26 + $0x88] sm:$0xff] %v3599_v10  ;;  %v4604_v32 = vpop.f32.mrb[20].mxu0  ;;  %v2021_v13 = vpop.f32.mrb[21].mxu1 }
 0x21e   : > { %v4650_v11 = vadd.f32 %v4604_v32, %v4412_v30  ;;  %v3496_v8 = vpop.f32.mrb[21].mxu0  ;;  %v4413_v55 = vpop.f32.mrb[22].mxu1 }
 0x21f   : > { %v4651_v51 = vadd.f32 %v3496_v8, %v2021_v13  ;;  %v4605_v49 = vpop.f32.mrb[22].mxu0  ;;  %v2024_v1 = vpop.f32.mrb[23].mxu1 }
 0x220   : > { %v3604_v44 = vadd.f32 %v4650_v11, %v5996_v26  ;;  %v4652_v16 = vadd.f32 %v4605_v49, %v4413_v55  ;;  %v3499_v0 = vpop.f32.mrb[23].mxu0 }
 0x221   : > { %v3602_v39 = vadd.f32 %v4651_v51, %v5996_v26  ;;  %v4653_v57 = vadd.f32 %v3499_v0, %v2024_v1 }
 0x222   : > { %3636 = vst [vmem:[%s5078_s26 + $0xb0] sm:$0xff] %v3604_v44  ;;  %v3605_v23 = vadd.f32 %v4652_v16, %v5996_v26 }
 0x223   : > { %3634 = vst [vmem:[%s5078_s26 + $0xa0] sm:$0xff] %v3602_v39  ;;  %v3603_v28 = vadd.f32 %v4653_v57, %v5996_v26 }
 0x224   : > { %3637 = vst [vmem:[%s5078_s26 + $0xb8] sm:$0xff] %v3605_v23  ;;  %v4416_v36 = vpop.f32.mrb[24].mxu1 }
 0x225   : > { %3635 = vst [vmem:[%s5078_s26 + $0xa8] sm:$0xff] %v3603_v28  ;;  %v4608_v24 = vpop.f32.mrb[24].mxu0  ;;  %v2037_v54 = vpop.f32.mrb[25].mxu1 }
 0x226   : > { %v4654_v63 = vadd.f32 %v4608_v24, %v4416_v36  ;;  %v3512_v25 = vpop.f32.mrb[25].mxu0  ;;  %v4417_v56 = vpop.f32.mrb[26].mxu1 }
 0x227   : > { %v4655_v6 = vadd.f32 %v3512_v25, %v2037_v54  ;;  %v4609_v37 = vpop.f32.mrb[26].mxu0  ;;  %v2040_v53 = vpop.f32.mrb[27].mxu1 }
 0x228   : > { %v3608_v15 = vadd.f32 %v4654_v63, %v5996_v26  ;;  %v4656_v33 = vadd.f32 %v4609_v37, %v4417_v56  ;;  %v3515_v58 = vpop.f32.mrb[27].mxu0 }
 0x229   : > { %v3606_v41 = vadd.f32 %v4655_v6, %v5996_v26  ;;  %v4657_v19 = vadd.f32 %v3515_v58, %v2040_v53 }
 0x22a   : > { %3640 = vst [vmem:[%s5078_s26 + $0xd0] sm:$0xff] %v3608_v15  ;;  %v3609_v46 = vadd.f32 %v4656_v33, %v5996_v26 }
 0x22b   : > { %3638 = vst [vmem:[%s5078_s26 + $0xc0] sm:$0xff] %v3606_v41  ;;  %v3607_v48 = vadd.f32 %v4657_v19, %v5996_v26 }
 0x22c   : > { %3641 = vst [vmem:[%s5078_s26 + $0xd8] sm:$0xff] %v3609_v46  ;;  %v4420_v59 = vpop.f32.mrb[28].mxu1 }
 0x22d   : > { %3639 = vst [vmem:[%s5078_s26 + $0xc8] sm:$0xff] %v3607_v48  ;;  %v4612_v21 = vpop.f32.mrb[28].mxu0  ;;  %v2053_v31 = vpop.f32.mrb[29].mxu1 }
 0x22e   : > { %v4658_v34 = vadd.f32 %v4612_v21, %v4420_v59  ;;  %v3528_v45 = vpop.f32.mrb[29].mxu0  ;;  %v4421_v22 = vpop.f32.mrb[30].mxu1 }
 0x22f   : > { %v4659_v9 = vadd.f32 %v3528_v45, %v2053_v31  ;;  %v4613_v29 = vpop.f32.mrb[30].mxu0  ;;  %v2056_v4 = vpop.f32.mrb[31].mxu1 }
 0x230   : > { %v3612_v17 = vadd.f32 %v4658_v34, %v5996_v26  ;;  %v4660_v62 = vadd.f32 %v4613_v29, %v4421_v22  ;;  %v3531_v20 = vpop.f32.mrb[31].mxu0 }
 0x231   : > { %v3610_v40 = vadd.f32 %v4659_v9, %v5996_v26  ;;  %v4661_v35 = vadd.f32 %v3531_v20, %v2056_v4 }
 0x232   : > { %3644 = vst [vmem:[%s5078_s26 + $0xf0] sm:$0xff] %v3612_v17  ;;  %v3613_v5 = vadd.f32 %v4660_v62, %v5996_v26 }
 0x233   : > { %3642 = vst [vmem:[%s5078_s26 + $0xe0] sm:$0xff] %v3610_v40  ;;  %v3611_v42 = vadd.f32 %v4661_v35, %v5996_v26 }
 0x234   : > { %3645 = vst [vmem:[%s5078_s26 + $0xf8] sm:$0xff] %v3613_v5 }
 0x235   : > { %3643 = vst [vmem:[%s5078_s26 + $0xe8] sm:$0xff] %v3611_v42 }
 0x236 PF: > { %s13_s14 = sadd.s32 1, %s5027_s14   ;;  %s6127_s12 = smov %s5023_s13 }
 0x237   : > { %p10_p5 = scmp.ge.s32.totalorder %s13_s14, 12   ;;  %s6128_s13 = smov %s6130_s15 }
 0x239   :  { %12 = sbr.rel (!%p10_p5) target bundleno = 2 (0x2), region = 116 }
 0x240   :  { %3674 = vsyncmov [#allocation3] }
 0x243   :  { %s3675_s28 = vpop.sfrf %3674 }
 0x244   :  { %p3965_p6 = scmp.ne.s32.totalorder %s3675_s28, 0 }
 0x246   :  { %3679 = shalt.err (%p3965_p6)  }

// kernel: wideresnet_forward.24
= control target key start
LH: loop header
LB: loop body
LE: loop exit
PB: predicated region body
PF: predicated region fallthrough
CT: control target
= control target key end

     0   :  { %s1188_s12 = smov 0   ;;  %s1447_s0 = inlined_call_operand.vmem [shape: f32[2048,128], index: 0, kind: input, shape index: {}]   ;;  %s1448_s1 = inlined_call_operand.vmem [shape: f32[1,128], index: 1, kind: input, shape index: {}]   ;;  %s1449_s2 = inlined_call_operand.vmem [shape: f32[1,128], index: 2, kind: input, shape index: {}]   ;;  %s1450_s3 = inlined_call_operand.vmem [shape: bf16[2048,128], index: 3, kind: output, shape index: {}]  }
   0x1 LB: > { %s820_s13 = sadd.s32 4294967295, %s1166_s12   ;;  %p824_p0 = scmp.ge.s32.totalorder %s1166_s12, 1  ;;  %s1166_s12 = sphi %s1188_s12, %s13_s12  }
   0x2   : > { %p138_p1 = scmp.lt.s32.totalorder %s1166_s12, 5 }
   0x4   : > { %p139_p2 = pnand %p824_p0, %p138_p1 }
   0x5   : > { %s825_s14 = sshll.u32 (!%p139_p2), %s820_s13, 6  ;;  %v1202_v0 = vld [vmem:[%s1448_s1] ss:$0 sm:$0xff] (!%p139_p2) }
   0x6   : > { %142 = sbr.rel (%p139_p2) target bundleno = 79 (0x4f), region = 32  ;;  %p163_p3 = scmp.lt.s32.totalorder (!%p139_p2), %s825_s14, 255  ;;  %v1212_v1 = vld [vmem:[%s1449_s2] ss:$0 sm:$0xff] (!%p139_p2) }
   0xd   : > { %s1452_s14 = smov (!%p163_p3, %s825_s14), 255 }
   0xe   : > { %s826_s15 = sshll.u32 %s1452_s14, 3  ;;  %s828_s23 = sshll.u32 %s1452_s14, 2 }
   0xf   : > { %s1207_s20 = scalar_lea.vmem %s1447_s0, %s826_s15  ;;  %s1244_s26 = scalar_lea.vmem %s1450_s3, %s828_s23 }
  0x10   : > { %v174_v2 = vld [vmem:[%s1207_s20] sm:$0xff]  ;;  %v175_v3 = vld [vmem:[%s1207_s20 + $0x8] sm:$0xff]  ;;  %v176_v4 = vld [vmem:[%s1207_s20 + $0x10] sm:$0xff] }
  0x11   : > { %v245_v5 = vmul.f32 %v1202_v0, %v174_v2  ;;  %v246_v6 = vmul.f32 %v1202_v0, %v175_v3  ;;  %v177_v7 = vld [vmem:[%s1207_s20 + $0x18] sm:$0xff]  ;;  %v247_v8 = vmul.f32 %v1202_v0, %v176_v4  ;;  %v178_v9 = vld [vmem:[%s1207_s20 + $0x20] sm:$0xff]  ;;  %v179_v10 = vld [vmem:[%s1207_s20 + $0x28] sm:$0xff] }
  0x12   : > { %v248_v11 = vmul.f32 %v1202_v0, %v177_v7  ;;  %v249_v12 = vmul.f32 %v1202_v0, %v178_v9  ;;  %v250_v13 = vmul.f32 %v1202_v0, %v179_v10  ;;  %v180_v14 = vld [vmem:[%s1207_s20 + $0x30] sm:$0xff]  ;;  %v181_v15 = vld [vmem:[%s1207_s20 + $0x38] sm:$0xff]  ;;  %v182_v24 = vld [vmem:[%s1207_s20 + $0x40] sm:$0xff] }
  0x13   : > { %v316_v16 = vadd.f32 %v1212_v1, %v245_v5  ;;  %v317_v17 = vadd.f32 %v1212_v1, %v246_v6  ;;  %v318_v18 = vadd.f32 %v1212_v1, %v247_v8  ;;  %v251_v19 = vmul.f32 %v1202_v0, %v180_v14  ;;  %v183_v25 = vld [vmem:[%s1207_s20 + $0x48] sm:$0xff]  ;;  %v184_v30 = vld [vmem:[%s1207_s20 + $0x50] sm:$0xff]  ;;  %v185_v35 = vld [vmem:[%s1207_s20 + $0x58] sm:$0xff] }
  0x14   : > { %v319_v20 = vadd.f32 %v1212_v1, %v248_v11  ;;  %v320_v21 = vadd.f32 %v1212_v1, %v249_v12  ;;  %v321_v22 = vadd.f32 %v1212_v1, %v250_v13  ;;  %v252_v23 = vmul.f32 %v1202_v0, %v181_v15  ;;  %v186_v36 = vld [vmem:[%s1207_s20 + $0x60] sm:$0xff]  ;;  %v187_v41 = vld [vmem:[%s1207_s20 + $0x68] sm:$0xff]  ;;  %v188_v42 = vld [vmem:[%s1207_s20 + $0x70] sm:$0xff] }
  0x15   : > { %v380_v26 = vmax.f32 %v316_v16, 0.0  ;;  %v381_v27 = vmax.f32 %v317_v17, 0.0  ;;  %v382_v28 = vmax.f32 %v318_v18, 0.0  ;;  %v322_v29 = vadd.f32 %v1212_v1, %v251_v19  ;;  %v189_v51 = vld [vmem:[%s1207_s20 + $0x78] sm:$0xff]  ;;  %v190_v56 = vld [vmem:[%s1207_s20 + $0x80] sm:$0xff]  ;;  %v191_v61 = vld [vmem:[%s1207_s20 + $0x88] sm:$0xff] }
  0x16   : > { %v383_v31 = vmax.f32 %v319_v20, 0.0  ;;  %v384_v32 = vmax.f32 %v320_v21, 0.0  ;;  %v385_v33 = vmax.f32 %v321_v22, 0.0  ;;  %v323_v34 = vadd.f32 %v1212_v1, %v252_v23  ;;  %v192_v4 = vld [vmem:[%s1207_s20 + $0x90] sm:$0xff]  ;;  %v193_v5 = vld [vmem:[%s1207_s20 + $0x98] sm:$0xff]  ;;  %v194_v10 = vld [vmem:[%s1207_s20 + $0xa0] sm:$0xff] }
  0x17   : > { %v964_v37 = vpack.c.bf16 %v381_v27, %v380_v26  ;;  %v386_v38 = vmax.f32 %v322_v29, 0.0  ;;  %v253_v39 = vmul.f32 %v1202_v0, %v182_v24  ;;  %v254_v40 = vmul.f32 %v1202_v0, %v183_v25  ;;  %v195_v15 = vld [vmem:[%s1207_s20 + $0xa8] sm:$0xff]  ;;  %v196_v20 = vld [vmem:[%s1207_s20 + $0xb0] sm:$0xff]  ;;  %v197_v25 = vld [vmem:[%s1207_s20 + $0xb8] sm:$0xff] }
  0x18   : > { %v969_v43 = vpack.c.bf16 %v383_v31, %v382_v28  ;;  %v974_v44 = vpack.c.bf16 %v385_v33, %v384_v32  ;;  %v387_v45 = vmax.f32 %v323_v34, 0.0  ;;  %v255_v46 = vmul.f32 %v1202_v0, %v184_v30  ;;  %v198_v30 = vld [vmem:[%s1207_s20 + $0xc0] sm:$0xff] }
  0x19   : > { %965 = vst [vmem:[%s1244_s26] sm:$0xff] %v964_v37   ;;  %v324_v47 = vadd.f32 %v1212_v1, %v253_v39  ;;  %v325_v48 = vadd.f32 %v1212_v1, %v254_v40  ;;  %v256_v49 = vmul.f32 %v1202_v0, %v185_v35  ;;  %v257_v50 = vmul.f32 %v1202_v0, %v186_v36  ;;  %v199_v35 = vld [vmem:[%s1207_s20 + $0xc8] sm:$0xff]  ;;  %v200_v40 = vld [vmem:[%s1207_s20 + $0xd0] sm:$0xff] }
  0x1a   : > { %1121 = vst [vmem:[%s1244_s26 + $0x8] sm:$0xff] %v969_v43   ;;  %1122 = vst [vmem:[%s1244_s26 + $0x10] sm:$0xff] %v974_v44   ;;  %v979_v52 = vpack.c.bf16 %v387_v45, %v386_v38  ;;  %v326_v53 = vadd.f32 %v1212_v1, %v255_v46  ;;  %v258_v54 = vmul.f32 %v1202_v0, %v187_v41  ;;  %v201_v41 = vld [vmem:[%s1207_s20 + $0xd8] sm:$0xff]  ;;  %v202_v46 = vld [vmem:[%s1207_s20 + $0xe0] sm:$0xff] }
  0x1b   : > { %v259_v55 = vmul.f32 %v1202_v0, %v188_v42  ;;  %v388_v57 = vmax.f32 %v324_v47, 0.0  ;;  %v389_v58 = vmax.f32 %v325_v48, 0.0  ;;  %v327_v59 = vadd.f32 %v1212_v1, %v256_v49 }
  0x1c   : > { %v328_v60 = vadd.f32 %v1212_v1, %v257_v50  ;;  %1123 = vst [vmem:[%s1244_s26 + $0x18] sm:$0xff] %v979_v52   ;;  %v390_v62 = vmax.f32 %v326_v53, 0.0  ;;  %v329_v63 = vadd.f32 %v1212_v1, %v258_v54  ;;  %v260_v2 = vmul.f32 %v1202_v0, %v189_v51  ;;  %v203_v51 = vld [vmem:[%s1207_s20 + $0xe8] sm:$0xff] }
  0x1d   : > { %v330_v3 = vadd.f32 %v1212_v1, %v259_v55  ;;  %v984_v6 = vpack.c.bf16 %v389_v58, %v388_v57  ;;  %v391_v7 = vmax.f32 %v327_v59, 0.0  ;;  %v261_v9 = vmul.f32 %v1202_v0, %v190_v56  ;;  %v204_v56 = vld [vmem:[%s1207_s20 + $0xf0] sm:$0xff] }
  0x1e   : > { %v392_v8 = vmax.f32 %v328_v60, 0.0  ;;  %v393_v11 = vmax.f32 %v329_v63, 0.0  ;;  %v331_v12 = vadd.f32 %v1212_v1, %v260_v2  ;;  %v262_v14 = vmul.f32 %v1202_v0, %v191_v61  ;;  %v205_v61 = vld [vmem:[%s1207_s20 + $0xf8] sm:$0xff] }
  0x1f   : > { %v394_v13 = vmax.f32 %v330_v3, 0.0  ;;  %1124 = vst [vmem:[%s1244_s26 + $0x20] sm:$0xff] %v984_v6   ;;  %v989_v16 = vpack.c.bf16 %v391_v7, %v390_v62  ;;  %v332_v17 = vadd.f32 %v1212_v1, %v261_v9  ;;  %v263_v18 = vmul.f32 %v1202_v0, %v192_v4  ;;  %v206_v4 = vld [vmem:[%s1207_s20 + $0x100] sm:$0xff]  ;;  %v207_v9 = vld [vmem:[%s1207_s20 + $0x108] sm:$0xff] }
  0x20   : > { %v264_v19 = vmul.f32 %v1202_v0, %v193_v5  ;;  %v994_v21 = vpack.c.bf16 %v393_v11, %v392_v8  ;;  %v395_v22 = vmax.f32 %v331_v12, 0.0  ;;  %v333_v23 = vadd.f32 %v1212_v1, %v262_v14  ;;  %v208_v14 = vld [vmem:[%s1207_s20 + $0x110] sm:$0xff] }
  0x21   : > { %v265_v24 = vmul.f32 %v1202_v0, %v194_v10  ;;  %1125 = vst [vmem:[%s1244_s26 + $0x28] sm:$0xff] %v989_v16   ;;  %v396_v26 = vmax.f32 %v332_v17, 0.0  ;;  %v334_v27 = vadd.f32 %v1212_v1, %v263_v18  ;;  %v266_v29 = vmul.f32 %v1202_v0, %v195_v15  ;;  %v209_v15 = vld [vmem:[%s1207_s20 + $0x118] sm:$0xff] }
  0x22   : > { %v335_v28 = vadd.f32 %v1212_v1, %v264_v19  ;;  %1126 = vst [vmem:[%s1244_s26 + $0x30] sm:$0xff] %v994_v21   ;;  %v999_v31 = vpack.c.bf16 %v395_v22, %v394_v13  ;;  %v397_v32 = vmax.f32 %v333_v23, 0.0  ;;  %v267_v34 = vmul.f32 %v1202_v0, %v196_v20  ;;  %v210_v20 = vld [vmem:[%s1207_s20 + $0x120] sm:$0xff] }
  0x23   : > { %v336_v33 = vadd.f32 %v1212_v1, %v265_v24  ;;  %v398_v36 = vmax.f32 %v334_v27, 0.0  ;;  %v337_v38 = vadd.f32 %v1212_v1, %v266_v29  ;;  %v268_v39 = vmul.f32 %v1202_v0, %v197_v25  ;;  %v211_v25 = vld [vmem:[%s1207_s20 + $0x128] sm:$0xff] }
  0x24   : > { %v399_v37 = vmax.f32 %v335_v28, 0.0  ;;  %1127 = vst [vmem:[%s1244_s26 + $0x38] sm:$0xff] %v999_v31   ;;  %v1004_v42 = vpack.c.bf16 %v397_v32, %v396_v26  ;;  %v338_v44 = vadd.f32 %v1212_v1, %v267_v34  ;;  %v269_v45 = vmul.f32 %v1202_v0, %v198_v30  ;;  %v212_v30 = vld [vmem:[%s1207_s20 + $0x130] sm:$0xff] }
  0x25   : > { %v400_v43 = vmax.f32 %v336_v33, 0.0  ;;  %v401_v48 = vmax.f32 %v337_v38, 0.0  ;;  %v339_v49 = vadd.f32 %v1212_v1, %v268_v39  ;;  %v270_v50 = vmul.f32 %v1202_v0, %v199_v35  ;;  %v213_v35 = vld [vmem:[%s1207_s20 + $0x138] sm:$0xff] }
  0x26   : > { %v1009_v47 = vpack.c.bf16 %v399_v37, %v398_v36  ;;  %1128 = vst [vmem:[%s1244_s26 + $0x40] sm:$0xff] %v1004_v42   ;;  %v402_v52 = vmax.f32 %v338_v44, 0.0  ;;  %v340_v53 = vadd.f32 %v1212_v1, %v269_v45  ;;  %v271_v54 = vmul.f32 %v1202_v0, %v200_v40  ;;  %v214_v40 = vld [vmem:[%s1207_s20 + $0x140] sm:$0xff]  ;;  %v215_v45 = vld [vmem:[%s1207_s20 + $0x148] sm:$0xff] }
  0x27   : > { %v272_v55 = vmul.f32 %v1202_v0, %v201_v41  ;;  %v1014_v57 = vpack.c.bf16 %v401_v48, %v400_v43  ;;  %v403_v58 = vmax.f32 %v339_v49, 0.0  ;;  %v341_v59 = vadd.f32 %v1212_v1, %v270_v50  ;;  %v216_v50 = vld [vmem:[%s1207_s20 + $0x150] sm:$0xff] }
  0x28   : > { %1129 = vst [vmem:[%s1244_s26 + $0x48] sm:$0xff] %v1009_v47   ;;  %v273_v60 = vmul.f32 %v1202_v0, %v202_v46  ;;  %v404_v62 = vmax.f32 %v340_v53, 0.0  ;;  %v342_v63 = vadd.f32 %v1212_v1, %v271_v54  ;;  %v274_v3 = vmul.f32 %v1202_v0, %v203_v51  ;;  %v217_v51 = vld [vmem:[%s1207_s20 + $0x158] sm:$0xff] }
  0x29   : > { %v343_v2 = vadd.f32 %v1212_v1, %v272_v55  ;;  %1130 = vst [vmem:[%s1244_s26 + $0x50] sm:$0xff] %v1014_v57   ;;  %v1019_v5 = vpack.c.bf16 %v403_v58, %v402_v52  ;;  %v405_v6 = vmax.f32 %v341_v59, 0.0  ;;  %v275_v8 = vmul.f32 %v1202_v0, %v204_v56  ;;  %v218_v56 = vld [vmem:[%s1207_s20 + $0x160] sm:$0xff] }
  0x2a   : > { %v344_v7 = vadd.f32 %v1212_v1, %v273_v60  ;;  %v406_v10 = vmax.f32 %v342_v63, 0.0  ;;  %v345_v12 = vadd.f32 %v1212_v1, %v274_v3  ;;  %v276_v13 = vmul.f32 %v1202_v0, %v205_v61  ;;  %v219_v61 = vld [vmem:[%s1207_s20 + $0x168] sm:$0xff] }
  0x2b   : > { %v407_v11 = vmax.f32 %v343_v2, 0.0  ;;  %1131 = vst [vmem:[%s1244_s26 + $0x58] sm:$0xff] %v1019_v5   ;;  %v1024_v16 = vpack.c.bf16 %v405_v6, %v404_v62  ;;  %v346_v18 = vadd.f32 %v1212_v1, %v275_v8  ;;  %v277_v19 = vmul.f32 %v1202_v0, %v206_v4  ;;  %v220_v4 = vld [vmem:[%s1207_s20 + $0x170] sm:$0xff] }
  0x2c   : > { %v408_v17 = vmax.f32 %v344_v7, 0.0  ;;  %v409_v22 = vmax.f32 %v345_v12, 0.0  ;;  %v347_v23 = vadd.f32 %v1212_v1, %v276_v13  ;;  %v278_v24 = vmul.f32 %v1202_v0, %v207_v9  ;;  %v221_v9 = vld [vmem:[%s1207_s20 + $0x178] sm:$0xff] }
  0x2d   : > { %v1029_v21 = vpack.c.bf16 %v407_v11, %v406_v10  ;;  %1132 = vst [vmem:[%s1244_s26 + $0x60] sm:$0xff] %v1024_v16   ;;  %v410_v26 = vmax.f32 %v346_v18, 0.0  ;;  %v348_v27 = vadd.f32 %v1212_v1, %v277_v19  ;;  %v279_v28 = vmul.f32 %v1202_v0, %v208_v14  ;;  %v222_v14 = vld [vmem:[%s1207_s20 + $0x180] sm:$0xff]  ;;  %v223_v19 = vld [vmem:[%s1207_s20 + $0x188] sm:$0xff] }
  0x2e   : > { %v280_v29 = vmul.f32 %v1202_v0, %v209_v15  ;;  %v1034_v31 = vpack.c.bf16 %v409_v22, %v408_v17  ;;  %v411_v32 = vmax.f32 %v347_v23, 0.0  ;;  %v349_v33 = vadd.f32 %v1212_v1, %v278_v24  ;;  %v224_v24 = vld [vmem:[%s1207_s20 + $0x190] sm:$0xff] }
  0x2f   : > { %1133 = vst [vmem:[%s1244_s26 + $0x68] sm:$0xff] %v1029_v21   ;;  %v281_v34 = vmul.f32 %v1202_v0, %v210_v20  ;;  %v412_v36 = vmax.f32 %v348_v27, 0.0  ;;  %v350_v37 = vadd.f32 %v1212_v1, %v279_v28  ;;  %v282_v39 = vmul.f32 %v1202_v0, %v211_v25  ;;  %v225_v25 = vld [vmem:[%s1207_s20 + $0x198] sm:$0xff] }
  0x30   : > { %v351_v38 = vadd.f32 %v1212_v1, %v280_v29  ;;  %1134 = vst [vmem:[%s1244_s26 + $0x70] sm:$0xff] %v1034_v31   ;;  %v1039_v41 = vpack.c.bf16 %v411_v32, %v410_v26  ;;  %v413_v42 = vmax.f32 %v349_v33, 0.0  ;;  %v283_v44 = vmul.f32 %v1202_v0, %v212_v30  ;;  %v226_v30 = vld [vmem:[%s1207_s20 + $0x1a0] sm:$0xff] }
  0x31   : > { %v352_v43 = vadd.f32 %v1212_v1, %v281_v34  ;;  %v414_v46 = vmax.f32 %v350_v37, 0.0  ;;  %v353_v48 = vadd.f32 %v1212_v1, %v282_v39  ;;  %v284_v49 = vmul.f32 %v1202_v0, %v213_v35  ;;  %v227_v35 = vld [vmem:[%s1207_s20 + $0x1a8] sm:$0xff] }
  0x32   : > { %v415_v47 = vmax.f32 %v351_v38, 0.0  ;;  %1135 = vst [vmem:[%s1244_s26 + $0x78] sm:$0xff] %v1039_v41   ;;  %v1044_v52 = vpack.c.bf16 %v413_v42, %v412_v36  ;;  %v354_v54 = vadd.f32 %v1212_v1, %v283_v44  ;;  %v285_v55 = vmul.f32 %v1202_v0, %v214_v40  ;;  %v228_v40 = vld [vmem:[%s1207_s20 + $0x1b0] sm:$0xff] }
  0x33   : > { %v416_v53 = vmax.f32 %v352_v43, 0.0  ;;  %v417_v58 = vmax.f32 %v353_v48, 0.0  ;;  %v355_v59 = vadd.f32 %v1212_v1, %v284_v49  ;;  %v286_v60 = vmul.f32 %v1202_v0, %v215_v45  ;;  %v229_v45 = vld [vmem:[%s1207_s20 + $0x1b8] sm:$0xff] }
  0x34   : > { %v1049_v57 = vpack.c.bf16 %v415_v47, %v414_v46  ;;  %1136 = vst [vmem:[%s1244_s26 + $0x80] sm:$0xff] %v1044_v52   ;;  %v418_v62 = vmax.f32 %v354_v54, 0.0  ;;  %v356_v63 = vadd.f32 %v1212_v1, %v285_v55  ;;  %v287_v2 = vmul.f32 %v1202_v0, %v216_v50  ;;  %v230_v50 = vld [vmem:[%s1207_s20 + $0x1c0] sm:$0xff]  ;;  %v231_v55 = vld [vmem:[%s1207_s20 + $0x1c8] sm:$0xff] }
  0x35   : > { %v288_v3 = vmul.f32 %v1202_v0, %v217_v51  ;;  %v1054_v5 = vpack.c.bf16 %v417_v58, %v416_v53  ;;  %v419_v6 = vmax.f32 %v355_v59, 0.0  ;;  %v357_v7 = vadd.f32 %v1212_v1, %v286_v60  ;;  %v232_v60 = vld [vmem:[%s1207_s20 + $0x1d0] sm:$0xff] }
  0x36   : > { %1137 = vst [vmem:[%s1244_s26 + $0x88] sm:$0xff] %v1049_v57   ;;  %v289_v8 = vmul.f32 %v1202_v0, %v218_v56  ;;  %v420_v10 = vmax.f32 %v356_v63, 0.0  ;;  %v358_v11 = vadd.f32 %v1212_v1, %v287_v2  ;;  %v290_v13 = vmul.f32 %v1202_v0, %v219_v61  ;;  %v233_v61 = vld [vmem:[%s1207_s20 + $0x1d8] sm:$0xff] }
  0x37   : > { %v359_v12 = vadd.f32 %v1212_v1, %v288_v3  ;;  %1138 = vst [vmem:[%s1244_s26 + $0x90] sm:$0xff] %v1054_v5   ;;  %v1059_v15 = vpack.c.bf16 %v419_v6, %v418_v62  ;;  %v421_v16 = vmax.f32 %v357_v7, 0.0  ;;  %v291_v18 = vmul.f32 %v1202_v0, %v220_v4  ;;  %v234_v4 = vld [vmem:[%s1207_s20 + $0x1e0] sm:$0xff] }
  0x38   : > { %v360_v17 = vadd.f32 %v1212_v1, %v289_v8  ;;  %v422_v20 = vmax.f32 %v358_v11, 0.0  ;;  %v361_v22 = vadd.f32 %v1212_v1, %v290_v13  ;;  %v292_v23 = vmul.f32 %v1202_v0, %v221_v9  ;;  %v235_v9 = vld [vmem:[%s1207_s20 + $0x1e8] sm:$0xff] }
  0x39   : > { %v423_v21 = vmax.f32 %v359_v12, 0.0  ;;  %1139 = vst [vmem:[%s1244_s26 + $0x98] sm:$0xff] %v1059_v15   ;;  %v1064_v26 = vpack.c.bf16 %v421_v16, %v420_v10  ;;  %v362_v28 = vadd.f32 %v1212_v1, %v291_v18  ;;  %v293_v29 = vmul.f32 %v1202_v0, %v222_v14  ;;  %v236_v14 = vld [vmem:[%s1207_s20 + $0x1f0] sm:$0xff] }
  0x3a   : > { %v424_v27 = vmax.f32 %v360_v17, 0.0  ;;  %v425_v32 = vmax.f32 %v361_v22, 0.0  ;;  %v363_v33 = vadd.f32 %v1212_v1, %v292_v23  ;;  %v294_v34 = vmul.f32 %v1202_v0, %v223_v19  ;;  %v237_v19 = vld [vmem:[%s1207_s20 + $0x1f8] sm:$0xff] }
  0x3b   : > { %v1069_v31 = vpack.c.bf16 %v423_v21, %v422_v20  ;;  %1140 = vst [vmem:[%s1244_s26 + $0xa0] sm:$0xff] %v1064_v26   ;;  %v426_v36 = vmax.f32 %v362_v28, 0.0  ;;  %v364_v37 = vadd.f32 %v1212_v1, %v293_v29  ;;  %v295_v38 = vmul.f32 %v1202_v0, %v224_v24 }
  0x3c   : > { %v296_v39 = vmul.f32 %v1202_v0, %v225_v25  ;;  %v1074_v41 = vpack.c.bf16 %v425_v32, %v424_v27  ;;  %v427_v42 = vmax.f32 %v363_v33, 0.0  ;;  %v365_v43 = vadd.f32 %v1212_v1, %v294_v34 }
  0x3d   : > { %1141 = vst [vmem:[%s1244_s26 + $0xa8] sm:$0xff] %v1069_v31   ;;  %v297_v44 = vmul.f32 %v1202_v0, %v226_v30  ;;  %v428_v46 = vmax.f32 %v364_v37, 0.0  ;;  %v366_v47 = vadd.f32 %v1212_v1, %v295_v38  ;;  %v298_v49 = vmul.f32 %v1202_v0, %v227_v35 }
  0x3e   : > { %v367_v48 = vadd.f32 %v1212_v1, %v296_v39  ;;  %1142 = vst [vmem:[%s1244_s26 + $0xb0] sm:$0xff] %v1074_v41   ;;  %v1079_v51 = vpack.c.bf16 %v427_v42, %v426_v36  ;;  %v429_v52 = vmax.f32 %v365_v43, 0.0  ;;  %v299_v54 = vmul.f32 %v1202_v0, %v228_v40 }
  0x3f   : > { %v368_v53 = vadd.f32 %v1212_v1, %v297_v44  ;;  %v430_v56 = vmax.f32 %v366_v47, 0.0  ;;  %v369_v58 = vadd.f32 %v1212_v1, %v298_v49  ;;  %v300_v59 = vmul.f32 %v1202_v0, %v229_v45 }
  0x40   : > { %v431_v57 = vmax.f32 %v367_v48, 0.0  ;;  %1143 = vst [vmem:[%s1244_s26 + $0xb8] sm:$0xff] %v1079_v51   ;;  %v1084_v62 = vpack.c.bf16 %v429_v52, %v428_v46  ;;  %v370_v2 = vadd.f32 %v1212_v1, %v299_v54  ;;  %v301_v3 = vmul.f32 %v1202_v0, %v230_v50 }
  0x41   : > { %v432_v63 = vmax.f32 %v368_v53, 0.0  ;;  %v433_v6 = vmax.f32 %v369_v58, 0.0  ;;  %v371_v7 = vadd.f32 %v1212_v1, %v300_v59  ;;  %v302_v8 = vmul.f32 %v1202_v0, %v231_v55 }
  0x42   : > { %v1089_v5 = vpack.c.bf16 %v431_v57, %v430_v56  ;;  %1144 = vst [vmem:[%s1244_s26 + $0xc0] sm:$0xff] %v1084_v62   ;;  %v434_v10 = vmax.f32 %v370_v2, 0.0  ;;  %v372_v11 = vadd.f32 %v1212_v1, %v301_v3  ;;  %v303_v12 = vmul.f32 %v1202_v0, %v232_v60 }
  0x43   : > { %v304_v13 = vmul.f32 %v1202_v0, %v233_v61  ;;  %v1094_v15 = vpack.c.bf16 %v433_v6, %v432_v63  ;;  %v435_v16 = vmax.f32 %v371_v7, 0.0  ;;  %v373_v17 = vadd.f32 %v1212_v1, %v302_v8 }
  0x44   : > { %1145 = vst [vmem:[%s1244_s26 + $0xc8] sm:$0xff] %v1089_v5   ;;  %v305_v18 = vmul.f32 %v1202_v0, %v234_v4  ;;  %v436_v20 = vmax.f32 %v372_v11, 0.0  ;;  %v374_v21 = vadd.f32 %v1212_v1, %v303_v12  ;;  %v306_v23 = vmul.f32 %v1202_v0, %v235_v9 }
  0x45   : > { %v375_v22 = vadd.f32 %v1212_v1, %v304_v13  ;;  %1146 = vst [vmem:[%s1244_s26 + $0xd0] sm:$0xff] %v1094_v15   ;;  %v1099_v24 = vpack.c.bf16 %v435_v16, %v434_v10  ;;  %v437_v25 = vmax.f32 %v373_v17, 0.0  ;;  %v307_v27 = vmul.f32 %v1202_v0, %v236_v14 }
  0x46   : > { %v376_v26 = vadd.f32 %v1212_v1, %v305_v18  ;;  %v438_v28 = vmax.f32 %v374_v21, 0.0  ;;  %v377_v30 = vadd.f32 %v1212_v1, %v306_v23  ;;  %v308_v31 = vmul.f32 %v1202_v0, %v237_v19 }
  0x47   : > { %v439_v29 = vmax.f32 %v375_v22, 0.0  ;;  %1147 = vst [vmem:[%s1244_s26 + $0xd8] sm:$0xff] %v1099_v24   ;;  %v1104_v32 = vpack.c.bf16 %v437_v25, %v436_v20  ;;  %v378_v34 = vadd.f32 %v1212_v1, %v307_v27 }
  0x48   : > { %v440_v33 = vmax.f32 %v376_v26, 0.0  ;;  %v441_v36 = vmax.f32 %v377_v30, 0.0  ;;  %v379_v37 = vadd.f32 %v1212_v1, %v308_v31 }
  0x49   : > { %v1109_v35 = vpack.c.bf16 %v439_v29, %v438_v28  ;;  %1148 = vst [vmem:[%s1244_s26 + $0xe0] sm:$0xff] %v1104_v32   ;;  %v442_v38 = vmax.f32 %v378_v34, 0.0 }
  0x4a   : > { %v1114_v39 = vpack.c.bf16 %v441_v36, %v440_v33  ;;  %v443_v40 = vmax.f32 %v379_v37, 0.0 }
  0x4b   : > { %1149 = vst [vmem:[%s1244_s26 + $0xe8] sm:$0xff] %v1109_v35  }
  0x4c   : > { %1150 = vst [vmem:[%s1244_s26 + $0xf0] sm:$0xff] %v1114_v39   ;;  %v1119_v41 = vpack.c.bf16 %v443_v40, %v442_v38 }
  0x4e   : > { %1151 = vst [vmem:[%s1244_s26 + $0xf8] sm:$0xff] %v1119_v41  }
  0x4f PF: > { %s13_s12 = sadd.s32 1, %s1166_s12  }
  0x50   : > { %p10_p4 = scmp.ge.s32.totalorder %s13_s12, 6  }
  0x52   :  { %12 = sbr.rel (!%p10_p4) target bundleno = 1 (0x1), region = 62 }

// kernel: wideresnet_forward.32
= control target key start
LH: loop header
LB: loop body
LE: loop exit
PB: predicated region body
PF: predicated region fallthrough
CT: control target
= control target key end

     0   :  { %v297_v0 = vmov 0.0   ;;  %s523_s0 = inlined_call_operand.vmem [shape: f32[512,128], index: 0, kind: input, shape index: {}]   ;;  %s524_s1 = inlined_call_operand.vmem [shape: f32[1,128], index: 1, kind: output, shape index: {0}]   ;;  %s525_s2 = inlined_call_operand.vmem [shape: f32[1,128], index: 2, kind: output, shape index: {1}]  }
   0x1   :  { %14 = vst [vmem:[%s524_s1] sm:$0x1] %v297_v0  ;;  %15 = vst [vmem:[%s525_s2] sm:$0x1] %v297_v0  ;;  %v16_v1 = vld [vmem:[%s523_s0] sm:$0xff]  ;;  %v17_v2 = vld [vmem:[%s523_s0 + $0x8] sm:$0xff] }
   0x2   :  { %v18_v3 = vld [vmem:[%s523_s0 + $0x10] sm:$0xff]  ;;  %v19_v4 = vld [vmem:[%s523_s0 + $0x18] sm:$0xff]  ;;  %v81_v5 = vadd.f32 %v17_v2, %v16_v1  ;;  %v153_v6 = vmul.f32 %v16_v1, %v16_v1  ;;  %v154_v7 = vmul.f32 %v17_v2, %v17_v2  ;;  %v20_v9 = vld [vmem:[%s523_s0 + $0x20] sm:$0xff] }
   0x3   :  { %v155_v8 = vmul.f32 %v18_v3, %v18_v3  ;;  %v156_v11 = vmul.f32 %v19_v4, %v19_v4  ;;  %v21_v13 = vld [vmem:[%s523_s0 + $0x28] sm:$0xff]  ;;  %v157_v15 = vmul.f32 %v20_v9, %v20_v9  ;;  %v22_v17 = vld [vmem:[%s523_s0 + $0x30] sm:$0xff]  ;;  %v23_v21 = vld [vmem:[%s523_s0 + $0x38] sm:$0xff] }
   0x4   :  { %v82_v10 = vadd.f32 %v81_v5, %v18_v3  ;;  %v217_v12 = vadd.f32 %v154_v7, %v153_v6  ;;  %v158_v19 = vmul.f32 %v21_v13, %v21_v13  ;;  %v159_v23 = vmul.f32 %v22_v17, %v22_v17  ;;  %v24_v25 = vld [vmem:[%s523_s0 + $0x40] sm:$0xff]  ;;  %v25_v29 = vld [vmem:[%s523_s0 + $0x48] sm:$0xff]  ;;  %v26_v33 = vld [vmem:[%s523_s0 + $0x50] sm:$0xff] }
   0x5   :  { %v160_v27 = vmul.f32 %v23_v21, %v23_v21  ;;  %v161_v31 = vmul.f32 %v24_v25, %v24_v25  ;;  %v162_v35 = vmul.f32 %v25_v29, %v25_v29  ;;  %v27_v37 = vld [vmem:[%s523_s0 + $0x58] sm:$0xff]  ;;  %v163_v39 = vmul.f32 %v26_v33, %v26_v33  ;;  %v28_v41 = vld [vmem:[%s523_s0 + $0x60] sm:$0xff]  ;;  %v29_v45 = vld [vmem:[%s523_s0 + $0x68] sm:$0xff] }
   0x6   :  { %v83_v14 = vadd.f32 %v82_v10, %v19_v4  ;;  %v218_v16 = vadd.f32 %v217_v12, %v155_v8  ;;  %v164_v43 = vmul.f32 %v27_v37, %v27_v37  ;;  %v165_v47 = vmul.f32 %v28_v41, %v28_v41  ;;  %v30_v49 = vld [vmem:[%s523_s0 + $0x70] sm:$0xff]  ;;  %v31_v53 = vld [vmem:[%s523_s0 + $0x78] sm:$0xff]  ;;  %v32_v57 = vld [vmem:[%s523_s0 + $0x80] sm:$0xff] }
   0x7   :  { %v166_v51 = vmul.f32 %v29_v45, %v29_v45  ;;  %v167_v55 = vmul.f32 %v30_v49, %v30_v49  ;;  %v168_v59 = vmul.f32 %v31_v53, %v31_v53  ;;  %v33_v61 = vld [vmem:[%s523_s0 + $0x88] sm:$0xff]  ;;  %v169_v63 = vmul.f32 %v32_v57, %v32_v57  ;;  %v34_v1 = vld [vmem:[%s523_s0 + $0x90] sm:$0xff]  ;;  %v35_v5 = vld [vmem:[%s523_s0 + $0x98] sm:$0xff] }
   0x8   :  { %v84_v18 = vadd.f32 %v83_v14, %v20_v9  ;;  %v219_v20 = vadd.f32 %v218_v16, %v156_v11  ;;  %v170_v3 = vmul.f32 %v33_v61, %v33_v61  ;;  %v171_v7 = vmul.f32 %v34_v1, %v34_v1  ;;  %v36_v9 = vld [vmem:[%s523_s0 + $0xa0] sm:$0xff] }
   0x9   :  { %v172_v11 = vmul.f32 %v35_v5, %v35_v5 }
   0xa   :  { %v85_v22 = vadd.f32 %v84_v18, %v21_v13  ;;  %v220_v24 = vadd.f32 %v219_v20, %v157_v15  ;;  %v37_v13 = vld [vmem:[%s523_s0 + $0xa8] sm:$0xff]  ;;  %v173_v15 = vmul.f32 %v36_v9, %v36_v9 }
   0xc   :  { %v86_v26 = vadd.f32 %v85_v22, %v22_v17  ;;  %v221_v28 = vadd.f32 %v220_v24, %v158_v19  ;;  %v38_v17 = vld [vmem:[%s523_s0 + $0xb0] sm:$0xff]  ;;  %v174_v19 = vmul.f32 %v37_v13, %v37_v13 }
   0xe   :  { %v87_v30 = vadd.f32 %v86_v26, %v23_v21  ;;  %v222_v32 = vadd.f32 %v221_v28, %v159_v23  ;;  %v39_v21 = vld [vmem:[%s523_s0 + $0xb8] sm:$0xff]  ;;  %v175_v23 = vmul.f32 %v38_v17, %v38_v17 }
  0x10   :  { %v88_v34 = vadd.f32 %v87_v30, %v24_v25  ;;  %v223_v36 = vadd.f32 %v222_v32, %v160_v27  ;;  %v40_v25 = vld [vmem:[%s523_s0 + $0xc0] sm:$0xff]  ;;  %v176_v27 = vmul.f32 %v39_v21, %v39_v21 }
  0x12   :  { %v89_v38 = vadd.f32 %v88_v34, %v25_v29  ;;  %v224_v40 = vadd.f32 %v223_v36, %v161_v31  ;;  %v41_v29 = vld [vmem:[%s523_s0 + $0xc8] sm:$0xff]  ;;  %v177_v31 = vmul.f32 %v40_v25, %v40_v25 }
  0x14   :  { %v90_v42 = vadd.f32 %v89_v38, %v26_v33  ;;  %v225_v44 = vadd.f32 %v224_v40, %v162_v35  ;;  %v42_v33 = vld [vmem:[%s523_s0 + $0xd0] sm:$0xff]  ;;  %v178_v35 = vmul.f32 %v41_v29, %v41_v29 }
  0x16   :  { %v91_v46 = vadd.f32 %v90_v42, %v27_v37  ;;  %v226_v48 = vadd.f32 %v225_v44, %v163_v39  ;;  %v43_v37 = vld [vmem:[%s523_s0 + $0xd8] sm:$0xff]  ;;  %v179_v39 = vmul.f32 %v42_v33, %v42_v33 }
  0x18   :  { %v92_v50 = vadd.f32 %v91_v46, %v28_v41  ;;  %v227_v52 = vadd.f32 %v226_v48, %v164_v43  ;;  %v44_v41 = vld [vmem:[%s523_s0 + $0xe0] sm:$0xff]  ;;  %v180_v43 = vmul.f32 %v43_v37, %v43_v37 }
  0x1a   :  { %v93_v54 = vadd.f32 %v92_v50, %v29_v45  ;;  %v228_v56 = vadd.f32 %v227_v52, %v165_v47  ;;  %v45_v45 = vld [vmem:[%s523_s0 + $0xe8] sm:$0xff]  ;;  %v181_v47 = vmul.f32 %v44_v41, %v44_v41 }
  0x1c   :  { %v94_v58 = vadd.f32 %v93_v54, %v30_v49  ;;  %v229_v60 = vadd.f32 %v228_v56, %v166_v51  ;;  %v46_v49 = vld [vmem:[%s523_s0 + $0xf0] sm:$0xff]  ;;  %v182_v51 = vmul.f32 %v45_v45, %v45_v45 }
  0x1e   :  { %v95_v62 = vadd.f32 %v94_v58, %v31_v53  ;;  %v230_v0 = vadd.f32 %v229_v60, %v167_v55  ;;  %v47_v53 = vld [vmem:[%s523_s0 + $0xf8] sm:$0xff]  ;;  %v183_v55 = vmul.f32 %v46_v49, %v46_v49 }
  0x20   :  { %v96_v2 = vadd.f32 %v95_v62, %v32_v57  ;;  %v231_v4 = vadd.f32 %v230_v0, %v168_v59  ;;  %v48_v57 = vld [vmem:[%s523_s0 + $0x100] sm:$0xff]  ;;  %v184_v59 = vmul.f32 %v47_v53, %v47_v53 }
  0x22   :  { %v97_v6 = vadd.f32 %v96_v2, %v33_v61  ;;  %v232_v8 = vadd.f32 %v231_v4, %v169_v63  ;;  %v49_v61 = vld [vmem:[%s523_s0 + $0x108] sm:$0xff]  ;;  %v185_v63 = vmul.f32 %v48_v57, %v48_v57 }
  0x24   :  { %v98_v10 = vadd.f32 %v97_v6, %v34_v1  ;;  %v233_v12 = vadd.f32 %v232_v8, %v170_v3  ;;  %v50_v1 = vld [vmem:[%s523_s0 + $0x110] sm:$0xff]  ;;  %v186_v3 = vmul.f32 %v49_v61, %v49_v61 }
  0x26   :  { %v99_v14 = vadd.f32 %v98_v10, %v35_v5  ;;  %v234_v16 = vadd.f32 %v233_v12, %v171_v7  ;;  %v51_v5 = vld [vmem:[%s523_s0 + $0x118] sm:$0xff]  ;;  %v187_v7 = vmul.f32 %v50_v1, %v50_v1 }
  0x28   :  { %v100_v18 = vadd.f32 %v99_v14, %v36_v9  ;;  %v235_v20 = vadd.f32 %v234_v16, %v172_v11  ;;  %v52_v9 = vld [vmem:[%s523_s0 + $0x120] sm:$0xff]  ;;  %v188_v11 = vmul.f32 %v51_v5, %v51_v5 }
  0x2a   :  { %v101_v22 = vadd.f32 %v100_v18, %v37_v13  ;;  %v236_v24 = vadd.f32 %v235_v20, %v173_v15  ;;  %v53_v13 = vld [vmem:[%s523_s0 + $0x128] sm:$0xff]  ;;  %v189_v15 = vmul.f32 %v52_v9, %v52_v9 }
  0x2c   :  { %v102_v26 = vadd.f32 %v101_v22, %v38_v17  ;;  %v237_v28 = vadd.f32 %v236_v24, %v174_v19  ;;  %v54_v17 = vld [vmem:[%s523_s0 + $0x130] sm:$0xff]  ;;  %v190_v19 = vmul.f32 %v53_v13, %v53_v13 }
  0x2e   :  { %v103_v30 = vadd.f32 %v102_v26, %v39_v21  ;;  %v238_v32 = vadd.f32 %v237_v28, %v175_v23  ;;  %v55_v21 = vld [vmem:[%s523_s0 + $0x138] sm:$0xff]  ;;  %v191_v23 = vmul.f32 %v54_v17, %v54_v17 }
  0x30   :  { %v104_v34 = vadd.f32 %v103_v30, %v40_v25  ;;  %v239_v36 = vadd.f32 %v238_v32, %v176_v27  ;;  %v56_v25 = vld [vmem:[%s523_s0 + $0x140] sm:$0xff]  ;;  %v192_v27 = vmul.f32 %v55_v21, %v55_v21 }
  0x32   :  { %v105_v38 = vadd.f32 %v104_v34, %v41_v29  ;;  %v240_v40 = vadd.f32 %v239_v36, %v177_v31  ;;  %v57_v29 = vld [vmem:[%s523_s0 + $0x148] sm:$0xff]  ;;  %v193_v31 = vmul.f32 %v56_v25, %v56_v25 }
  0x34   :  { %v106_v42 = vadd.f32 %v105_v38, %v42_v33  ;;  %v241_v44 = vadd.f32 %v240_v40, %v178_v35  ;;  %v58_v33 = vld [vmem:[%s523_s0 + $0x150] sm:$0xff]  ;;  %v194_v35 = vmul.f32 %v57_v29, %v57_v29 }
  0x36   :  { %v107_v46 = vadd.f32 %v106_v42, %v43_v37  ;;  %v242_v48 = vadd.f32 %v241_v44, %v179_v39  ;;  %v59_v37 = vld [vmem:[%s523_s0 + $0x158] sm:$0xff]  ;;  %v195_v39 = vmul.f32 %v58_v33, %v58_v33 }
  0x38   :  { %v108_v50 = vadd.f32 %v107_v46, %v44_v41  ;;  %v243_v52 = vadd.f32 %v242_v48, %v180_v43  ;;  %v60_v41 = vld [vmem:[%s523_s0 + $0x160] sm:$0xff]  ;;  %v196_v43 = vmul.f32 %v59_v37, %v59_v37 }
  0x3a   :  { %v109_v54 = vadd.f32 %v108_v50, %v45_v45  ;;  %v244_v56 = vadd.f32 %v243_v52, %v181_v47  ;;  %v61_v45 = vld [vmem:[%s523_s0 + $0x168] sm:$0xff]  ;;  %v197_v47 = vmul.f32 %v60_v41, %v60_v41 }
  0x3c   :  { %v110_v58 = vadd.f32 %v109_v54, %v46_v49  ;;  %v245_v60 = vadd.f32 %v244_v56, %v182_v51  ;;  %v62_v49 = vld [vmem:[%s523_s0 + $0x170] sm:$0xff]  ;;  %v198_v51 = vmul.f32 %v61_v45, %v61_v45 }
  0x3e   :  { %v111_v62 = vadd.f32 %v110_v58, %v47_v53  ;;  %v246_v0 = vadd.f32 %v245_v60, %v183_v55  ;;  %v63_v53 = vld [vmem:[%s523_s0 + $0x178] sm:$0xff]  ;;  %v199_v55 = vmul.f32 %v62_v49, %v62_v49 }
  0x40   :  { %v112_v2 = vadd.f32 %v111_v62, %v48_v57  ;;  %v247_v4 = vadd.f32 %v246_v0, %v184_v59  ;;  %v64_v57 = vld [vmem:[%s523_s0 + $0x180] sm:$0xff]  ;;  %v200_v59 = vmul.f32 %v63_v53, %v63_v53 }
  0x42   :  { %v113_v6 = vadd.f32 %v112_v2, %v49_v61  ;;  %v248_v8 = vadd.f32 %v247_v4, %v185_v63  ;;  %v65_v61 = vld [vmem:[%s523_s0 + $0x188] sm:$0xff]  ;;  %v201_v63 = vmul.f32 %v64_v57, %v64_v57 }
  0x44   :  { %v114_v10 = vadd.f32 %v113_v6, %v50_v1  ;;  %v249_v12 = vadd.f32 %v248_v8, %v186_v3  ;;  %v66_v1 = vld [vmem:[%s523_s0 + $0x190] sm:$0xff]  ;;  %v202_v3 = vmul.f32 %v65_v61, %v65_v61 }
  0x46   :  { %v115_v14 = vadd.f32 %v114_v10, %v51_v5  ;;  %v250_v16 = vadd.f32 %v249_v12, %v187_v7  ;;  %v67_v5 = vld [vmem:[%s523_s0 + $0x198] sm:$0xff]  ;;  %v203_v7 = vmul.f32 %v66_v1, %v66_v1 }
  0x48   :  { %v116_v18 = vadd.f32 %v115_v14, %v52_v9  ;;  %v251_v20 = vadd.f32 %v250_v16, %v188_v11  ;;  %v68_v9 = vld [vmem:[%s523_s0 + $0x1a0] sm:$0xff]  ;;  %v204_v11 = vmul.f32 %v67_v5, %v67_v5 }
  0x4a   :  { %v117_v22 = vadd.f32 %v116_v18, %v53_v13  ;;  %v252_v24 = vadd.f32 %v251_v20, %v189_v15  ;;  %v69_v13 = vld [vmem:[%s523_s0 + $0x1a8] sm:$0xff]  ;;  %v205_v15 = vmul.f32 %v68_v9, %v68_v9 }
  0x4c   :  { %v118_v26 = vadd.f32 %v117_v22, %v54_v17  ;;  %v253_v28 = vadd.f32 %v252_v24, %v190_v19  ;;  %v70_v17 = vld [vmem:[%s523_s0 + $0x1b0] sm:$0xff]  ;;  %v206_v19 = vmul.f32 %v69_v13, %v69_v13 }
  0x4e   :  { %v119_v30 = vadd.f32 %v118_v26, %v55_v21  ;;  %v254_v32 = vadd.f32 %v253_v28, %v191_v23  ;;  %v71_v21 = vld [vmem:[%s523_s0 + $0x1b8] sm:$0xff]  ;;  %v207_v23 = vmul.f32 %v70_v17, %v70_v17 }
  0x50   :  { %v120_v34 = vadd.f32 %v119_v30, %v56_v25  ;;  %v255_v36 = vadd.f32 %v254_v32, %v192_v27  ;;  %v72_v25 = vld [vmem:[%s523_s0 + $0x1c0] sm:$0xff]  ;;  %v208_v27 = vmul.f32 %v71_v21, %v71_v21 }
  0x52   :  { %v121_v38 = vadd.f32 %v120_v34, %v57_v29  ;;  %v256_v40 = vadd.f32 %v255_v36, %v193_v31  ;;  %v73_v29 = vld [vmem:[%s523_s0 + $0x1c8] sm:$0xff]  ;;  %v209_v31 = vmul.f32 %v72_v25, %v72_v25 }
  0x54   :  { %v122_v42 = vadd.f32 %v121_v38, %v58_v33  ;;  %v257_v44 = vadd.f32 %v256_v40, %v194_v35  ;;  %v74_v33 = vld [vmem:[%s523_s0 + $0x1d0] sm:$0xff]  ;;  %v210_v35 = vmul.f32 %v73_v29, %v73_v29 }
  0x56   :  { %v123_v46 = vadd.f32 %v122_v42, %v59_v37  ;;  %v258_v48 = vadd.f32 %v257_v44, %v195_v39  ;;  %v75_v37 = vld [vmem:[%s523_s0 + $0x1d8] sm:$0xff]  ;;  %v211_v39 = vmul.f32 %v74_v33, %v74_v33 }
  0x58   :  { %v124_v50 = vadd.f32 %v123_v46, %v60_v41  ;;  %v259_v52 = vadd.f32 %v258_v48, %v196_v43  ;;  %v76_v41 = vld [vmem:[%s523_s0 + $0x1e0] sm:$0xff]  ;;  %v212_v43 = vmul.f32 %v75_v37, %v75_v37 }
  0x5a   :  { %v125_v54 = vadd.f32 %v124_v50, %v61_v45  ;;  %v260_v56 = vadd.f32 %v259_v52, %v197_v47  ;;  %v77_v45 = vld [vmem:[%s523_s0 + $0x1e8] sm:$0xff]  ;;  %v213_v47 = vmul.f32 %v76_v41, %v76_v41 }
  0x5c   :  { %v126_v58 = vadd.f32 %v125_v54, %v62_v49  ;;  %v261_v60 = vadd.f32 %v260_v56, %v198_v51  ;;  %v78_v49 = vld [vmem:[%s523_s0 + $0x1f0] sm:$0xff]  ;;  %v214_v51 = vmul.f32 %v77_v45, %v77_v45 }
  0x5e   :  { %v127_v62 = vadd.f32 %v126_v58, %v63_v53  ;;  %v262_v0 = vadd.f32 %v261_v60, %v199_v55  ;;  %v79_v53 = vld [vmem:[%s523_s0 + $0x1f8] sm:$0xff]  ;;  %v215_v55 = vmul.f32 %v78_v49, %v78_v49 }
  0x5f   :  { %v216_v58 = vmul.f32 %v79_v53, %v79_v53 }
  0x60   :  { %v128_v2 = vadd.f32 %v127_v62, %v64_v57  ;;  %v263_v4 = vadd.f32 %v262_v0, %v200_v59 }
  0x62   :  { %v129_v6 = vadd.f32 %v128_v2, %v65_v61  ;;  %v264_v8 = vadd.f32 %v263_v4, %v201_v63 }
  0x64   :  { %v130_v10 = vadd.f32 %v129_v6, %v66_v1  ;;  %v265_v12 = vadd.f32 %v264_v8, %v202_v3 }
  0x66   :  { %v131_v14 = vadd.f32 %v130_v10, %v67_v5  ;;  %v266_v16 = vadd.f32 %v265_v12, %v203_v7  ;;  %v80_v7 = vld [vmem:[%s524_s1] sm:$0x1] }
  0x67   :  { %v152_v12 = vld [vmem:[%s525_s2] sm:$0x1] }
  0x68   :  { %v132_v18 = vadd.f32 %v131_v14, %v68_v9  ;;  %v267_v20 = vadd.f32 %v266_v16, %v204_v11 }
  0x6a   :  { %v133_v22 = vadd.f32 %v132_v18, %v69_v13  ;;  %v268_v24 = vadd.f32 %v267_v20, %v205_v15 }
  0x6c   :  { %v134_v26 = vadd.f32 %v133_v22, %v70_v17  ;;  %v269_v28 = vadd.f32 %v268_v24, %v206_v19 }
  0x6e   :  { %v135_v30 = vadd.f32 %v134_v26, %v71_v21  ;;  %v270_v32 = vadd.f32 %v269_v28, %v207_v23 }
  0x70   :  { %v136_v34 = vadd.f32 %v135_v30, %v72_v25  ;;  %v271_v36 = vadd.f32 %v270_v32, %v208_v27 }
  0x72   :  { %v137_v38 = vadd.f32 %v136_v34, %v73_v29  ;;  %v272_v40 = vadd.f32 %v271_v36, %v209_v31 }
  0x74   :  { %v138_v42 = vadd.f32 %v137_v38, %v74_v33  ;;  %v273_v44 = vadd.f32 %v272_v40, %v210_v35 }
  0x76   :  { %v139_v46 = vadd.f32 %v138_v42, %v75_v37  ;;  %v274_v48 = vadd.f32 %v273_v44, %v211_v39 }
  0x78   :  { %v140_v50 = vadd.f32 %v139_v46, %v76_v41  ;;  %v275_v52 = vadd.f32 %v274_v48, %v212_v43 }
  0x7a   :  { %v141_v54 = vadd.f32 %v140_v50, %v77_v45  ;;  %v276_v56 = vadd.f32 %v275_v52, %v213_v47 }
  0x7c   :  { %v142_v57 = vadd.f32 %v141_v54, %v78_v49  ;;  %v277_v59 = vadd.f32 %v276_v56, %v214_v51 }
  0x7e   :  { %v143_v60 = vadd.f32 %v142_v57, %v79_v53  ;;  %v278_v61 = vadd.f32 %v277_v59, %v215_v55 }
  0x80   :  { %v144_v62 = vrot.slane %v143_v60, 4  ;;  %v279_v63 = vadd.f32 %v278_v61, %v216_v58 }
  0x82   :  { %v145_v0 = vadd.f32 %v144_v62, %v143_v60  ;;  %v280_v1 = vrot.slane %v279_v63, 4 }
  0x84   :  { %v146_v2 = vrot.slane %v145_v0, 2  ;;  %v281_v3 = vadd.f32 %v280_v1, %v279_v63 }
  0x86   :  { %v147_v4 = vadd.f32 %v146_v2, %v145_v0  ;;  %v282_v5 = vrot.slane %v281_v3, 2 }
  0x88   :  { %v148_v6 = vrot.slane %v147_v4, 1  ;;  %v283_v8 = vadd.f32 %v282_v5, %v281_v3 }
  0x8a   :  { %v149_v9 = vadd.f32 %v148_v6, %v147_v4  ;;  %v284_v10 = vrot.slane %v283_v8, 1 }
  0x8c   :  { %v150_v11 = vadd.f32 %v149_v9, %v80_v7  ;;  %v285_v13 = vadd.f32 %v284_v10, %v283_v8 }
  0x8e   :  { %151 = vst [vmem:[%s524_s1] sm:$0x1] %v150_v11  ;;  %v286_v14 = vadd.f32 %v285_v13, %v152_v12 }
  0x90   :  { %287 = vst [vmem:[%s525_s2] sm:$0x1] %v286_v14 }

// kernel: wideresnet_forward.33
= control target key start
LH: loop header
LB: loop body
LE: loop exit
PB: predicated region body
PF: predicated region fallthrough
CT: control target
= control target key end

     0   :  { %s1375_s0 = inlined_call_operand.vmem [shape: f32[512,128], index: 0, kind: input, shape index: {}]   ;;  %s1376_s1 = inlined_call_operand.vmem [shape: f32[1,128], index: 1, kind: input, shape index: {}]   ;;  %s1377_s2 = inlined_call_operand.vmem [shape: f32[1,128], index: 2, kind: input, shape index: {}]   ;;  %s1378_s3 = inlined_call_operand.vmem [shape: bf16[512,128], index: 3, kind: output, shape index: {}]  }
   0x1   :  { %v14_v0 = vld [vmem:[%s1375_s0] sm:$0xff]  ;;  %v15_v1 = vld [vmem:[%s1375_s0 + $0x8] sm:$0xff]  ;;  %v16_v6 = vld [vmem:[%s1375_s0 + $0x10] sm:$0xff] }
   0x2   :  { %v958_v2 = vld [vmem:[%s1376_s1] ss:$0 sm:$0xff]  ;;  %v17_v7 = vld [vmem:[%s1375_s0 + $0x18] sm:$0xff]  ;;  %v19_v11 = vld [vmem:[%s1375_s0 + $0x28] sm:$0xff] }
   0x3   :  { %v85_v3 = vmul.f32 %v958_v2, %v14_v0  ;;  %v86_v4 = vmul.f32 %v958_v2, %v15_v1  ;;  %v965_v5 = vld [vmem:[%s1377_s2] ss:$0 sm:$0xff]  ;;  %v87_v8 = vmul.f32 %v958_v2, %v16_v6  ;;  %v88_v9 = vmul.f32 %v958_v2, %v17_v7  ;;  %v20_v12 = vld [vmem:[%s1375_s0 + $0x30] sm:$0xff]  ;;  %v21_v17 = vld [vmem:[%s1375_s0 + $0x38] sm:$0xff] }
   0x4   :  { %v18_v10 = vld [vmem:[%s1375_s0 + $0x20] sm:$0xff]  ;;  %v90_v16 = vmul.f32 %v958_v2, %v19_v11  ;;  %v91_v20 = vmul.f32 %v958_v2, %v20_v12  ;;  %v92_v21 = vmul.f32 %v958_v2, %v21_v17  ;;  %v23_v27 = vld [vmem:[%s1375_s0 + $0x48] sm:$0xff]  ;;  %v24_v32 = vld [vmem:[%s1375_s0 + $0x50] sm:$0xff] }
   0x5   :  { %v156_v13 = vadd.f32 %v965_v5, %v85_v3  ;;  %v157_v14 = vadd.f32 %v965_v5, %v86_v4  ;;  %v89_v15 = vmul.f32 %v958_v2, %v18_v10  ;;  %v158_v18 = vadd.f32 %v965_v5, %v87_v8  ;;  %v22_v22 = vld [vmem:[%s1375_s0 + $0x40] sm:$0xff]  ;;  %v25_v33 = vld [vmem:[%s1375_s0 + $0x58] sm:$0xff]  ;;  %v27_v39 = vld [vmem:[%s1375_s0 + $0x68] sm:$0xff] }
   0x6   :  { %v159_v19 = vadd.f32 %v965_v5, %v88_v9  ;;  %v161_v26 = vadd.f32 %v965_v5, %v90_v16  ;;  %v162_v30 = vadd.f32 %v965_v5, %v91_v20  ;;  %v163_v31 = vadd.f32 %v965_v5, %v92_v21  ;;  %v26_v38 = vld [vmem:[%s1375_s0 + $0x60] sm:$0xff]  ;;  %v28_v44 = vld [vmem:[%s1375_s0 + $0x70] sm:$0xff]  ;;  %v29_v49 = vld [vmem:[%s1375_s0 + $0x78] sm:$0xff] }
   0x7   :  { %v220_v23 = vmax.f32 %v156_v13, 0.0  ;;  %v221_v24 = vmax.f32 %v157_v14, 0.0  ;;  %v160_v25 = vadd.f32 %v965_v5, %v89_v15  ;;  %v222_v28 = vmax.f32 %v158_v18, 0.0  ;;  %v30_v54 = vld [vmem:[%s1375_s0 + $0x80] sm:$0xff]  ;;  %v31_v63 = vld [vmem:[%s1375_s0 + $0x88] sm:$0xff]  ;;  %v32_v6 = vld [vmem:[%s1375_s0 + $0x90] sm:$0xff] }
   0x8   :  { %v223_v29 = vmax.f32 %v159_v19, 0.0  ;;  %v225_v36 = vmax.f32 %v161_v26, 0.0  ;;  %v93_v37 = vmul.f32 %v958_v2, %v22_v22  ;;  %v226_v41 = vmax.f32 %v162_v30, 0.0  ;;  %v33_v7 = vld [vmem:[%s1375_s0 + $0x98] sm:$0xff]  ;;  %v34_v12 = vld [vmem:[%s1375_s0 + $0xa0] sm:$0xff]  ;;  %v35_v13 = vld [vmem:[%s1375_s0 + $0xa8] sm:$0xff] }
   0x9   :  { %v741_v34 = vpack.c.bf16 %v221_v24, %v220_v23  ;;  %v224_v35 = vmax.f32 %v160_v25, 0.0  ;;  %v227_v42 = vmax.f32 %v163_v31, 0.0  ;;  %v94_v43 = vmul.f32 %v958_v2, %v23_v27  ;;  %v36_v18 = vld [vmem:[%s1375_s0 + $0xb0] sm:$0xff]  ;;  %v37_v23 = vld [vmem:[%s1375_s0 + $0xb8] sm:$0xff] }
   0xa   :  { %v746_v40 = vpack.c.bf16 %v223_v29, %v222_v28  ;;  %v164_v46 = vadd.f32 %v965_v5, %v93_v37  ;;  %v95_v47 = vmul.f32 %v958_v2, %v24_v32  ;;  %v96_v48 = vmul.f32 %v958_v2, %v25_v33  ;;  %v38_v28 = vld [vmem:[%s1375_s0 + $0xc0] sm:$0xff]  ;;  %v39_v37 = vld [vmem:[%s1375_s0 + $0xc8] sm:$0xff] }
   0xb   :  { %742 = vst [vmem:[%s1378_s3] sm:$0xff] %v741_v34   ;;  %v751_v45 = vpack.c.bf16 %v225_v36, %v224_v35  ;;  %v756_v50 = vpack.c.bf16 %v227_v42, %v226_v41  ;;  %v165_v51 = vadd.f32 %v965_v5, %v94_v43  ;;  %v97_v52 = vmul.f32 %v958_v2, %v26_v38  ;;  %v40_v42 = vld [vmem:[%s1375_s0 + $0xd0] sm:$0xff]  ;;  %v41_v43 = vld [vmem:[%s1375_s0 + $0xd8] sm:$0xff] }
   0xc   :  { %898 = vst [vmem:[%s1378_s3 + $0x8] sm:$0xff] %v746_v40   ;;  %v98_v53 = vmul.f32 %v958_v2, %v27_v39  ;;  %v228_v55 = vmax.f32 %v164_v46, 0.0  ;;  %v166_v56 = vadd.f32 %v965_v5, %v95_v47  ;;  %v167_v57 = vadd.f32 %v965_v5, %v96_v48  ;;  %v42_v48 = vld [vmem:[%s1375_s0 + $0xe0] sm:$0xff] }
   0xd   :  { %899 = vst [vmem:[%s1378_s3 + $0x10] sm:$0xff] %v751_v45   ;;  %v99_v58 = vmul.f32 %v958_v2, %v28_v44  ;;  %900 = vst [vmem:[%s1378_s3 + $0x18] sm:$0xff] %v756_v50   ;;  %v229_v59 = vmax.f32 %v165_v51, 0.0  ;;  %v168_v60 = vadd.f32 %v965_v5, %v97_v52  ;;  %v100_v62 = vmul.f32 %v958_v2, %v29_v49  ;;  %v43_v49 = vld [vmem:[%s1375_s0 + $0xe8] sm:$0xff] }
   0xe   :  { %v169_v61 = vadd.f32 %v965_v5, %v98_v53  ;;  %v230_v0 = vmax.f32 %v166_v56, 0.0  ;;  %v231_v1 = vmax.f32 %v167_v57, 0.0  ;;  %v101_v4 = vmul.f32 %v958_v2, %v30_v54  ;;  %v44_v54 = vld [vmem:[%s1375_s0 + $0xf0] sm:$0xff] }
   0xf   :  { %v170_v3 = vadd.f32 %v965_v5, %v99_v58  ;;  %v761_v8 = vpack.c.bf16 %v229_v59, %v228_v55  ;;  %v232_v9 = vmax.f32 %v168_v60, 0.0  ;;  %v171_v11 = vadd.f32 %v965_v5, %v100_v62  ;;  %v45_v59 = vld [vmem:[%s1375_s0 + $0xf8] sm:$0xff] }
  0x10   :  { %v233_v10 = vmax.f32 %v169_v61, 0.0  ;;  %v766_v14 = vpack.c.bf16 %v231_v1, %v230_v0  ;;  %v102_v16 = vmul.f32 %v958_v2, %v31_v63  ;;  %v172_v17 = vadd.f32 %v965_v5, %v101_v4  ;;  %v46_v0 = vld [vmem:[%s1375_s0 + $0x100] sm:$0xff] }
  0x11   :  { %v234_v15 = vmax.f32 %v170_v3, 0.0  ;;  %901 = vst [vmem:[%s1378_s3 + $0x20] sm:$0xff] %v761_v8   ;;  %v235_v20 = vmax.f32 %v171_v11, 0.0  ;;  %v103_v21 = vmul.f32 %v958_v2, %v32_v6  ;;  %v104_v22 = vmul.f32 %v958_v2, %v33_v7  ;;  %v47_v11 = vld [vmem:[%s1375_s0 + $0x108] sm:$0xff] }
  0x12   :  { %v771_v19 = vpack.c.bf16 %v233_v10, %v232_v9  ;;  %902 = vst [vmem:[%s1378_s3 + $0x28] sm:$0xff] %v766_v14   ;;  %v173_v24 = vadd.f32 %v965_v5, %v102_v16  ;;  %v236_v25 = vmax.f32 %v172_v17, 0.0  ;;  %v105_v26 = vmul.f32 %v958_v2, %v34_v12  ;;  %v48_v16 = vld [vmem:[%s1375_s0 + $0x110] sm:$0xff]  ;;  %v49_v17 = vld [vmem:[%s1375_s0 + $0x118] sm:$0xff] }
  0x13   :  { %v106_v27 = vmul.f32 %v958_v2, %v35_v13  ;;  %v776_v29 = vpack.c.bf16 %v235_v20, %v234_v15  ;;  %v174_v30 = vadd.f32 %v965_v5, %v103_v21  ;;  %v175_v31 = vadd.f32 %v965_v5, %v104_v22  ;;  %v50_v22 = vld [vmem:[%s1375_s0 + $0x120] sm:$0xff] }
  0x14   :  { %903 = vst [vmem:[%s1378_s3 + $0x30] sm:$0xff] %v771_v19   ;;  %v107_v32 = vmul.f32 %v958_v2, %v36_v18  ;;  %v237_v33 = vmax.f32 %v173_v24, 0.0  ;;  %v176_v34 = vadd.f32 %v965_v5, %v105_v26  ;;  %v108_v36 = vmul.f32 %v958_v2, %v37_v23  ;;  %v51_v23 = vld [vmem:[%s1375_s0 + $0x128] sm:$0xff] }
  0x15   :  { %v177_v35 = vadd.f32 %v965_v5, %v106_v27  ;;  %904 = vst [vmem:[%s1378_s3 + $0x38] sm:$0xff] %v776_v29   ;;  %v238_v38 = vmax.f32 %v174_v30, 0.0  ;;  %v239_v39 = vmax.f32 %v175_v31, 0.0  ;;  %v109_v41 = vmul.f32 %v958_v2, %v38_v28  ;;  %v52_v28 = vld [vmem:[%s1375_s0 + $0x130] sm:$0xff] }
  0x16   :  { %v178_v40 = vadd.f32 %v965_v5, %v107_v32  ;;  %v781_v44 = vpack.c.bf16 %v237_v33, %v236_v25  ;;  %v240_v45 = vmax.f32 %v176_v34, 0.0  ;;  %v179_v47 = vadd.f32 %v965_v5, %v108_v36  ;;  %v53_v33 = vld [vmem:[%s1375_s0 + $0x138] sm:$0xff] }
  0x17   :  { %v241_v46 = vmax.f32 %v177_v35, 0.0  ;;  %v786_v50 = vpack.c.bf16 %v239_v39, %v238_v38  ;;  %v110_v52 = vmul.f32 %v958_v2, %v39_v37  ;;  %v180_v53 = vadd.f32 %v965_v5, %v109_v41  ;;  %v54_v38 = vld [vmem:[%s1375_s0 + $0x140] sm:$0xff] }
  0x18   :  { %v242_v51 = vmax.f32 %v178_v40, 0.0  ;;  %905 = vst [vmem:[%s1378_s3 + $0x40] sm:$0xff] %v781_v44   ;;  %v243_v56 = vmax.f32 %v179_v47, 0.0  ;;  %v111_v57 = vmul.f32 %v958_v2, %v40_v42  ;;  %v112_v58 = vmul.f32 %v958_v2, %v41_v43  ;;  %v55_v47 = vld [vmem:[%s1375_s0 + $0x148] sm:$0xff] }
  0x19   :  { %v791_v55 = vpack.c.bf16 %v241_v46, %v240_v45  ;;  %906 = vst [vmem:[%s1378_s3 + $0x48] sm:$0xff] %v786_v50   ;;  %v181_v60 = vadd.f32 %v965_v5, %v110_v52  ;;  %v244_v61 = vmax.f32 %v180_v53, 0.0  ;;  %v113_v62 = vmul.f32 %v958_v2, %v42_v48  ;;  %v56_v52 = vld [vmem:[%s1375_s0 + $0x150] sm:$0xff]  ;;  %v57_v53 = vld [vmem:[%s1375_s0 + $0x158] sm:$0xff] }
  0x1a   :  { %v114_v63 = vmul.f32 %v958_v2, %v43_v49  ;;  %v796_v1 = vpack.c.bf16 %v243_v56, %v242_v51  ;;  %v182_v3 = vadd.f32 %v965_v5, %v111_v57  ;;  %v183_v4 = vadd.f32 %v965_v5, %v112_v58  ;;  %v58_v58 = vld [vmem:[%s1375_s0 + $0x160] sm:$0xff] }
  0x1b   :  { %907 = vst [vmem:[%s1378_s3 + $0x50] sm:$0xff] %v791_v55   ;;  %v115_v6 = vmul.f32 %v958_v2, %v44_v54  ;;  %v245_v7 = vmax.f32 %v181_v60, 0.0  ;;  %v184_v8 = vadd.f32 %v965_v5, %v113_v62  ;;  %v116_v10 = vmul.f32 %v958_v2, %v45_v59  ;;  %v59_v59 = vld [vmem:[%s1375_s0 + $0x168] sm:$0xff] }
  0x1c   :  { %v185_v9 = vadd.f32 %v965_v5, %v114_v63  ;;  %908 = vst [vmem:[%s1378_s3 + $0x58] sm:$0xff] %v796_v1   ;;  %v246_v12 = vmax.f32 %v182_v3, 0.0  ;;  %v247_v13 = vmax.f32 %v183_v4, 0.0  ;;  %v117_v15 = vmul.f32 %v958_v2, %v46_v0  ;;  %v60_v0 = vld [vmem:[%s1375_s0 + $0x170] sm:$0xff] }
  0x1d   :  { %v186_v14 = vadd.f32 %v965_v5, %v115_v6  ;;  %v801_v18 = vpack.c.bf16 %v245_v7, %v244_v61  ;;  %v248_v19 = vmax.f32 %v184_v8, 0.0  ;;  %v187_v21 = vadd.f32 %v965_v5, %v116_v10  ;;  %v61_v7 = vld [vmem:[%s1375_s0 + $0x178] sm:$0xff] }
  0x1e   :  { %v249_v20 = vmax.f32 %v185_v9, 0.0  ;;  %v806_v24 = vpack.c.bf16 %v247_v13, %v246_v12  ;;  %v118_v26 = vmul.f32 %v958_v2, %v47_v11  ;;  %v188_v27 = vadd.f32 %v965_v5, %v117_v15  ;;  %v62_v12 = vld [vmem:[%s1375_s0 + $0x180] sm:$0xff] }
  0x1f   :  { %v250_v25 = vmax.f32 %v186_v14, 0.0  ;;  %909 = vst [vmem:[%s1378_s3 + $0x60] sm:$0xff] %v801_v18   ;;  %v251_v30 = vmax.f32 %v187_v21, 0.0  ;;  %v119_v31 = vmul.f32 %v958_v2, %v48_v16  ;;  %v120_v32 = vmul.f32 %v958_v2, %v49_v17  ;;  %v63_v21 = vld [vmem:[%s1375_s0 + $0x188] sm:$0xff] }
  0x20   :  { %v811_v29 = vpack.c.bf16 %v249_v20, %v248_v19  ;;  %910 = vst [vmem:[%s1378_s3 + $0x68] sm:$0xff] %v806_v24   ;;  %v189_v34 = vadd.f32 %v965_v5, %v118_v26  ;;  %v252_v35 = vmax.f32 %v188_v27, 0.0  ;;  %v121_v36 = vmul.f32 %v958_v2, %v50_v22  ;;  %v64_v26 = vld [vmem:[%s1375_s0 + $0x190] sm:$0xff]  ;;  %v65_v27 = vld [vmem:[%s1375_s0 + $0x198] sm:$0xff] }
  0x21   :  { %v122_v37 = vmul.f32 %v958_v2, %v51_v23  ;;  %v816_v39 = vpack.c.bf16 %v251_v30, %v250_v25  ;;  %v190_v40 = vadd.f32 %v965_v5, %v119_v31  ;;  %v191_v41 = vadd.f32 %v965_v5, %v120_v32  ;;  %v66_v32 = vld [vmem:[%s1375_s0 + $0x1a0] sm:$0xff] }
  0x22   :  { %911 = vst [vmem:[%s1378_s3 + $0x70] sm:$0xff] %v811_v29   ;;  %v123_v42 = vmul.f32 %v958_v2, %v52_v28  ;;  %v253_v43 = vmax.f32 %v189_v34, 0.0  ;;  %v192_v44 = vadd.f32 %v965_v5, %v121_v36  ;;  %v124_v46 = vmul.f32 %v958_v2, %v53_v33  ;;  %v67_v33 = vld [vmem:[%s1375_s0 + $0x1a8] sm:$0xff] }
  0x23   :  { %v193_v45 = vadd.f32 %v965_v5, %v122_v37  ;;  %912 = vst [vmem:[%s1378_s3 + $0x78] sm:$0xff] %v816_v39   ;;  %v254_v48 = vmax.f32 %v190_v40, 0.0  ;;  %v255_v49 = vmax.f32 %v191_v41, 0.0  ;;  %v125_v51 = vmul.f32 %v958_v2, %v54_v38  ;;  %v68_v38 = vld [vmem:[%s1375_s0 + $0x1b0] sm:$0xff] }
  0x24   :  { %v194_v50 = vadd.f32 %v965_v5, %v123_v42  ;;  %v821_v54 = vpack.c.bf16 %v253_v43, %v252_v35  ;;  %v256_v55 = vmax.f32 %v192_v44, 0.0  ;;  %v195_v57 = vadd.f32 %v965_v5, %v124_v46  ;;  %v69_v43 = vld [vmem:[%s1375_s0 + $0x1b8] sm:$0xff] }
  0x25   :  { %v257_v56 = vmax.f32 %v193_v45, 0.0  ;;  %v826_v60 = vpack.c.bf16 %v255_v49, %v254_v48  ;;  %v126_v62 = vmul.f32 %v958_v2, %v55_v47  ;;  %v196_v63 = vadd.f32 %v965_v5, %v125_v51  ;;  %v70_v48 = vld [vmem:[%s1375_s0 + $0x1c0] sm:$0xff] }
  0x26   :  { %v258_v61 = vmax.f32 %v194_v50, 0.0  ;;  %913 = vst [vmem:[%s1378_s3 + $0x80] sm:$0xff] %v821_v54   ;;  %v259_v3 = vmax.f32 %v195_v57, 0.0  ;;  %v127_v4 = vmul.f32 %v958_v2, %v56_v52  ;;  %v128_v6 = vmul.f32 %v958_v2, %v57_v53  ;;  %v71_v57 = vld [vmem:[%s1375_s0 + $0x1c8] sm:$0xff] }
  0x27   :  { %v831_v1 = vpack.c.bf16 %v257_v56, %v256_v55  ;;  %914 = vst [vmem:[%s1378_s3 + $0x88] sm:$0xff] %v826_v60   ;;  %v197_v8 = vadd.f32 %v965_v5, %v126_v62  ;;  %v260_v9 = vmax.f32 %v196_v63, 0.0  ;;  %v129_v10 = vmul.f32 %v958_v2, %v58_v58  ;;  %v72_v62 = vld [vmem:[%s1375_s0 + $0x1d0] sm:$0xff]  ;;  %v73_v63 = vld [vmem:[%s1375_s0 + $0x1d8] sm:$0xff] }
  0x28   :  { %v130_v11 = vmul.f32 %v958_v2, %v59_v59  ;;  %v836_v13 = vpack.c.bf16 %v259_v3, %v258_v61  ;;  %v198_v14 = vadd.f32 %v965_v5, %v127_v4  ;;  %v199_v15 = vadd.f32 %v965_v5, %v128_v6  ;;  %v74_v6 = vld [vmem:[%s1375_s0 + $0x1e0] sm:$0xff] }
  0x29   :  { %915 = vst [vmem:[%s1378_s3 + $0x90] sm:$0xff] %v831_v1   ;;  %v131_v16 = vmul.f32 %v958_v2, %v60_v0  ;;  %v261_v17 = vmax.f32 %v197_v8, 0.0  ;;  %v200_v18 = vadd.f32 %v965_v5, %v129_v10  ;;  %v132_v20 = vmul.f32 %v958_v2, %v61_v7  ;;  %v75_v7 = vld [vmem:[%s1375_s0 + $0x1e8] sm:$0xff] }
  0x2a   :  { %v201_v19 = vadd.f32 %v965_v5, %v130_v11  ;;  %916 = vst [vmem:[%s1378_s3 + $0x98] sm:$0xff] %v836_v13   ;;  %v262_v22 = vmax.f32 %v198_v14, 0.0  ;;  %v263_v23 = vmax.f32 %v199_v15, 0.0  ;;  %v133_v25 = vmul.f32 %v958_v2, %v62_v12  ;;  %v76_v12 = vld [vmem:[%s1375_s0 + $0x1f0] sm:$0xff] }
  0x2b   :  { %v202_v24 = vadd.f32 %v965_v5, %v131_v16  ;;  %v841_v28 = vpack.c.bf16 %v261_v17, %v260_v9  ;;  %v264_v29 = vmax.f32 %v200_v18, 0.0  ;;  %v203_v31 = vadd.f32 %v965_v5, %v132_v20  ;;  %v77_v17 = vld [vmem:[%s1375_s0 + $0x1f8] sm:$0xff] }
  0x2c   :  { %v265_v30 = vmax.f32 %v201_v19, 0.0  ;;  %v846_v34 = vpack.c.bf16 %v263_v23, %v262_v22  ;;  %v134_v36 = vmul.f32 %v958_v2, %v63_v21  ;;  %v204_v37 = vadd.f32 %v965_v5, %v133_v25 }
  0x2d   :  { %v266_v35 = vmax.f32 %v202_v24, 0.0  ;;  %917 = vst [vmem:[%s1378_s3 + $0xa0] sm:$0xff] %v841_v28   ;;  %v267_v40 = vmax.f32 %v203_v31, 0.0  ;;  %v135_v41 = vmul.f32 %v958_v2, %v64_v26  ;;  %v136_v42 = vmul.f32 %v958_v2, %v65_v27 }
  0x2e   :  { %v851_v39 = vpack.c.bf16 %v265_v30, %v264_v29  ;;  %918 = vst [vmem:[%s1378_s3 + $0xa8] sm:$0xff] %v846_v34   ;;  %v205_v44 = vadd.f32 %v965_v5, %v134_v36  ;;  %v268_v45 = vmax.f32 %v204_v37, 0.0  ;;  %v137_v46 = vmul.f32 %v958_v2, %v66_v32 }
  0x2f   :  { %v138_v47 = vmul.f32 %v958_v2, %v67_v33  ;;  %v856_v49 = vpack.c.bf16 %v267_v40, %v266_v35  ;;  %v206_v50 = vadd.f32 %v965_v5, %v135_v41  ;;  %v207_v51 = vadd.f32 %v965_v5, %v136_v42 }
  0x30   :  { %919 = vst [vmem:[%s1378_s3 + $0xb0] sm:$0xff] %v851_v39   ;;  %v139_v52 = vmul.f32 %v958_v2, %v68_v38  ;;  %v269_v53 = vmax.f32 %v205_v44, 0.0  ;;  %v208_v54 = vadd.f32 %v965_v5, %v137_v46  ;;  %v140_v56 = vmul.f32 %v958_v2, %v69_v43 }
  0x31   :  { %v209_v55 = vadd.f32 %v965_v5, %v138_v47  ;;  %920 = vst [vmem:[%s1378_s3 + $0xb8] sm:$0xff] %v856_v49   ;;  %v270_v58 = vmax.f32 %v206_v50, 0.0  ;;  %v271_v59 = vmax.f32 %v207_v51, 0.0  ;;  %v141_v61 = vmul.f32 %v958_v2, %v70_v48 }
  0x32   :  { %v210_v60 = vadd.f32 %v965_v5, %v139_v52  ;;  %v861_v0 = vpack.c.bf16 %v269_v53, %v268_v45  ;;  %v272_v1 = vmax.f32 %v208_v54, 0.0  ;;  %v211_v4 = vadd.f32 %v965_v5, %v140_v56 }
  0x33   :  { %v273_v3 = vmax.f32 %v209_v55, 0.0  ;;  %v866_v8 = vpack.c.bf16 %v271_v59, %v270_v58  ;;  %v142_v10 = vmul.f32 %v958_v2, %v71_v57  ;;  %v212_v11 = vadd.f32 %v965_v5, %v141_v61 }
  0x34   :  { %v274_v9 = vmax.f32 %v210_v60, 0.0  ;;  %921 = vst [vmem:[%s1378_s3 + $0xc0] sm:$0xff] %v861_v0   ;;  %v275_v14 = vmax.f32 %v211_v4, 0.0  ;;  %v143_v15 = vmul.f32 %v958_v2, %v72_v62  ;;  %v144_v16 = vmul.f32 %v958_v2, %v73_v63 }
  0x35   :  { %v871_v13 = vpack.c.bf16 %v273_v3, %v272_v1  ;;  %922 = vst [vmem:[%s1378_s3 + $0xc8] sm:$0xff] %v866_v8   ;;  %v213_v18 = vadd.f32 %v965_v5, %v142_v10  ;;  %v276_v19 = vmax.f32 %v212_v11, 0.0  ;;  %v145_v20 = vmul.f32 %v958_v2, %v74_v6 }
  0x36   :  { %v146_v21 = vmul.f32 %v958_v2, %v75_v7  ;;  %v876_v22 = vpack.c.bf16 %v275_v14, %v274_v9  ;;  %v214_v23 = vadd.f32 %v965_v5, %v143_v15  ;;  %v215_v24 = vadd.f32 %v965_v5, %v144_v16 }
  0x37   :  { %923 = vst [vmem:[%s1378_s3 + $0xd0] sm:$0xff] %v871_v13   ;;  %v147_v25 = vmul.f32 %v958_v2, %v76_v12  ;;  %v277_v26 = vmax.f32 %v213_v18, 0.0  ;;  %v216_v27 = vadd.f32 %v965_v5, %v145_v20  ;;  %v148_v29 = vmul.f32 %v958_v2, %v77_v17 }
  0x38   :  { %v217_v28 = vadd.f32 %v965_v5, %v146_v21  ;;  %924 = vst [vmem:[%s1378_s3 + $0xd8] sm:$0xff] %v876_v22   ;;  %v278_v30 = vmax.f32 %v214_v23, 0.0  ;;  %v279_v31 = vmax.f32 %v215_v24, 0.0 }
  0x39   :  { %v218_v32 = vadd.f32 %v965_v5, %v147_v25  ;;  %v881_v33 = vpack.c.bf16 %v277_v26, %v276_v19  ;;  %v280_v34 = vmax.f32 %v216_v27, 0.0  ;;  %v219_v36 = vadd.f32 %v965_v5, %v148_v29 }
  0x3a   :  { %v281_v35 = vmax.f32 %v217_v28, 0.0  ;;  %v886_v37 = vpack.c.bf16 %v279_v31, %v278_v30 }
  0x3b   :  { %v282_v38 = vmax.f32 %v218_v32, 0.0  ;;  %925 = vst [vmem:[%s1378_s3 + $0xe0] sm:$0xff] %v881_v33   ;;  %v283_v39 = vmax.f32 %v219_v36, 0.0 }
  0x3c   :  { %v891_v2 = vpack.c.bf16 %v281_v35, %v280_v34  ;;  %926 = vst [vmem:[%s1378_s3 + $0xe8] sm:$0xff] %v886_v37  }
  0x3d   :  { %v896_v40 = vpack.c.bf16 %v283_v39, %v282_v38 }
  0x3e   :  { %927 = vst [vmem:[%s1378_s3 + $0xf0] sm:$0xff] %v891_v2  }
  0x3f   :  { %928 = vst [vmem:[%s1378_s3 + $0xf8] sm:$0xff] %v896_v40  }

// kernel: wideresnet_forward.38
= control target key start
LH: loop header
LB: loop body
LE: loop exit
PB: predicated region body
PF: predicated region fallthrough
CT: control target
= control target key end

     0   :  { %v105_v0 = vmov 0.0   ;;  %s187_s1 = inlined_call_operand.vmem [shape: f32[1,128], index: 1, kind: output, shape index: {0}]   ;;  %s188_s2 = inlined_call_operand.vmem [shape: f32[1,128], index: 2, kind: output, shape index: {1}]   ;;  %s189_s0 = inlined_call_operand.vmem [shape: f32[128,128], index: 0, kind: input, shape index: {}]  }
   0x1   :  { %14 = vst [vmem:[%s187_s1] sm:$0x1] %v105_v0  ;;  %15 = vst [vmem:[%s188_s2] sm:$0x1] %v105_v0  ;;  %v16_v1 = vld [vmem:[%s189_s0] sm:$0xff]  ;;  %v17_v2 = vld [vmem:[%s189_s0 + $0x8] sm:$0xff] }
   0x2   :  { %v18_v3 = vld [vmem:[%s189_s0 + $0x10] sm:$0xff]  ;;  %v19_v4 = vld [vmem:[%s189_s0 + $0x18] sm:$0xff]  ;;  %v33_v5 = vadd.f32 %v17_v2, %v16_v1  ;;  %v57_v6 = vmul.f32 %v16_v1, %v16_v1  ;;  %v58_v7 = vmul.f32 %v17_v2, %v17_v2  ;;  %v20_v9 = vld [vmem:[%s189_s0 + $0x20] sm:$0xff] }
   0x3   :  { %v59_v8 = vmul.f32 %v18_v3, %v18_v3  ;;  %v60_v11 = vmul.f32 %v19_v4, %v19_v4  ;;  %v21_v13 = vld [vmem:[%s189_s0 + $0x28] sm:$0xff]  ;;  %v61_v15 = vmul.f32 %v20_v9, %v20_v9  ;;  %v22_v17 = vld [vmem:[%s189_s0 + $0x30] sm:$0xff]  ;;  %v23_v21 = vld [vmem:[%s189_s0 + $0x38] sm:$0xff] }
   0x4   :  { %v34_v10 = vadd.f32 %v33_v5, %v18_v3  ;;  %v73_v12 = vadd.f32 %v58_v7, %v57_v6  ;;  %v62_v19 = vmul.f32 %v21_v13, %v21_v13  ;;  %v63_v23 = vmul.f32 %v22_v17, %v22_v17  ;;  %v24_v25 = vld [vmem:[%s189_s0 + $0x40] sm:$0xff]  ;;  %v25_v29 = vld [vmem:[%s189_s0 + $0x48] sm:$0xff]  ;;  %v26_v33 = vld [vmem:[%s189_s0 + $0x50] sm:$0xff] }
   0x5   :  { %v64_v27 = vmul.f32 %v23_v21, %v23_v21  ;;  %v65_v31 = vmul.f32 %v24_v25, %v24_v25  ;;  %v66_v35 = vmul.f32 %v25_v29, %v25_v29  ;;  %v27_v37 = vld [vmem:[%s189_s0 + $0x58] sm:$0xff]  ;;  %v67_v39 = vmul.f32 %v26_v33, %v26_v33  ;;  %v28_v41 = vld [vmem:[%s189_s0 + $0x60] sm:$0xff]  ;;  %v29_v45 = vld [vmem:[%s189_s0 + $0x68] sm:$0xff] }
   0x6   :  { %v35_v14 = vadd.f32 %v34_v10, %v19_v4  ;;  %v74_v16 = vadd.f32 %v73_v12, %v59_v8  ;;  %v68_v43 = vmul.f32 %v27_v37, %v27_v37  ;;  %v69_v47 = vmul.f32 %v28_v41, %v28_v41  ;;  %v30_v49 = vld [vmem:[%s189_s0 + $0x70] sm:$0xff]  ;;  %v31_v53 = vld [vmem:[%s189_s0 + $0x78] sm:$0xff] }
   0x7   :  { %v70_v51 = vmul.f32 %v29_v45, %v29_v45  ;;  %v71_v55 = vmul.f32 %v30_v49, %v30_v49  ;;  %v72_v58 = vmul.f32 %v31_v53, %v31_v53 }
   0x8   :  { %v36_v18 = vadd.f32 %v35_v14, %v20_v9  ;;  %v75_v20 = vadd.f32 %v74_v16, %v60_v11  ;;  %v32_v7 = vld [vmem:[%s187_s1] sm:$0x1] }
   0x9   :  { %v56_v12 = vld [vmem:[%s188_s2] sm:$0x1] }
   0xa   :  { %v37_v22 = vadd.f32 %v36_v18, %v21_v13  ;;  %v76_v24 = vadd.f32 %v75_v20, %v61_v15 }
   0xc   :  { %v38_v26 = vadd.f32 %v37_v22, %v22_v17  ;;  %v77_v28 = vadd.f32 %v76_v24, %v62_v19 }
   0xe   :  { %v39_v30 = vadd.f32 %v38_v26, %v23_v21  ;;  %v78_v32 = vadd.f32 %v77_v28, %v63_v23 }
  0x10   :  { %v40_v34 = vadd.f32 %v39_v30, %v24_v25  ;;  %v79_v36 = vadd.f32 %v78_v32, %v64_v27 }
  0x12   :  { %v41_v38 = vadd.f32 %v40_v34, %v25_v29  ;;  %v80_v40 = vadd.f32 %v79_v36, %v65_v31 }
  0x14   :  { %v42_v42 = vadd.f32 %v41_v38, %v26_v33  ;;  %v81_v44 = vadd.f32 %v80_v40, %v66_v35 }
  0x16   :  { %v43_v46 = vadd.f32 %v42_v42, %v27_v37  ;;  %v82_v48 = vadd.f32 %v81_v44, %v67_v39 }
  0x18   :  { %v44_v50 = vadd.f32 %v43_v46, %v28_v41  ;;  %v83_v52 = vadd.f32 %v82_v48, %v68_v43 }
  0x1a   :  { %v45_v54 = vadd.f32 %v44_v50, %v29_v45  ;;  %v84_v56 = vadd.f32 %v83_v52, %v69_v47 }
  0x1c   :  { %v46_v57 = vadd.f32 %v45_v54, %v30_v49  ;;  %v85_v59 = vadd.f32 %v84_v56, %v70_v51 }
  0x1e   :  { %v47_v60 = vadd.f32 %v46_v57, %v31_v53  ;;  %v86_v61 = vadd.f32 %v85_v59, %v71_v55 }
  0x20   :  { %v48_v62 = vrot.slane %v47_v60, 4  ;;  %v87_v63 = vadd.f32 %v86_v61, %v72_v58 }
  0x22   :  { %v49_v0 = vadd.f32 %v48_v62, %v47_v60  ;;  %v88_v1 = vrot.slane %v87_v63, 4 }
  0x24   :  { %v50_v2 = vrot.slane %v49_v0, 2  ;;  %v89_v3 = vadd.f32 %v88_v1, %v87_v63 }
  0x26   :  { %v51_v4 = vadd.f32 %v50_v2, %v49_v0  ;;  %v90_v5 = vrot.slane %v89_v3, 2 }
  0x28   :  { %v52_v6 = vrot.slane %v51_v4, 1  ;;  %v91_v8 = vadd.f32 %v90_v5, %v89_v3 }
  0x2a   :  { %v53_v9 = vadd.f32 %v52_v6, %v51_v4  ;;  %v92_v10 = vrot.slane %v91_v8, 1 }
  0x2c   :  { %v54_v11 = vadd.f32 %v53_v9, %v32_v7  ;;  %v93_v13 = vadd.f32 %v92_v10, %v91_v8 }
  0x2e   :  { %55 = vst [vmem:[%s187_s1] sm:$0x1] %v54_v11  ;;  %v94_v14 = vadd.f32 %v93_v13, %v56_v12 }
  0x30   :  { %95 = vst [vmem:[%s188_s2] sm:$0x1] %v94_v14 }

// kernel: wideresnet_forward.34
= control target key start
LH: loop header
LB: loop body
LE: loop exit
PB: predicated region body
PF: predicated region fallthrough
CT: control target
= control target key end

     0   :  { %s5046_s12 = smov 0   ;;  %s5048_s13 = smov 0   ;;  %s6041_s0 = inlined_call_operand.vmem [shape: bf16[816,128], index: 0, kind: input, shape index: {}]   ;;  %s6042_s1 = inlined_call_operand.vmem [shape: bf16[9,128,128], index: 1, kind: input, shape index: {}]   ;;  %s6043_s2 = inlined_call_operand.vmem [shape: f32[1,128], index: 2, kind: input, shape index: {}]   ;;  %s6044_s3 = inlined_call_operand.vmem [shape: f32[768,128], index: 3, kind: output, shape index: {}]  }
   0x1   :  { %s5050_s14 = smov 0  }
   0x2 LB: > { %s25_s15 = sadd.s32 1, %s5020_s13  ;;  %p3753_p0 = scmp.ge.s32.totalorder %s5024_s14, 1  ;;  %s5024_s14 = sphi %s5050_s14, %s13_s14   ;;  %s5020_s13 = sphi %s5048_s13, %s6096_s13   ;;  %s5016_s12 = sphi %s5046_s12, %s6095_s12  }
   0x3   : > { %p27_p1 = scmp.ge.s32.totalorder %s25_s15, 3  ;;  %p134_p2 = scmp.lt.s32.totalorder %s5024_s14, 4 }
   0x5   : > { %s6098_s15 = smov (%p27_p1, %s25_s15), 0  ;;  %p135_p3 = pnand %p3753_p0, %p134_p2 }
   0x7   : > { %138 = sbr.rel (%p135_p3) target bundleno = 565 (0x235), region = 28 }
   0xe   : > { %s3754_s16 = sshll.u32 %s5016_s12, 5  ;;  %s3756_s17 = sshll.u32 %s5016_s12, 8 }
   0xf   : > { %p169_p4 = scmp.lt.s32.totalorder %s3754_s16, 95  ;;  %s183_s18 = sshra.s32 %s3756_s17, 3 }
  0x10   : > { %s3757_s19 = sshll.u32 %s183_s18, 2 }
  0x11   : > { %s6100_s16 = smov (!%p169_p4, %s3754_s16), 95  ;;  %s5067_s22 = scalar_lea.vmem %s6041_s0, %s3757_s19 }
  0x12   : > { %s3755_s23 = sshll.u32 %s6100_s16, 3  ;;  %v219_v0 = vld [vmem:[%s5067_s22] sm:$0xff]  ;;  %v221_v1 = vld [vmem:[%s5067_s22 + $0x8] sm:$0xff]  ;;  %v223_v2 = vld [vmem:[%s5067_s22 + $0x10] sm:$0xff] }
  0x13   : > { %s5075_s26 = scalar_lea.vmem %s6044_s3, %s3755_s23  ;;  %220 = vst [vmem:[#allocation2] sm:$0xff] %v219_v0  ;;  %222 = vst [vmem:[#allocation2 + $0x8] sm:$0xff] %v221_v1  ;;  %v225_v3 = vld [vmem:[%s5067_s22 + $0x18] sm:$0xff]  ;;  %v227_v4 = vld [vmem:[%s5067_s22 + $0x20] sm:$0xff] }
  0x14   : > { %224 = vst [vmem:[#allocation2 + $0x10] sm:$0xff] %v223_v2  ;;  %v229_v5 = vld [vmem:[%s5067_s22 + $0x28] sm:$0xff]  ;;  %226 = vst [vmem:[#allocation2 + $0x18] sm:$0xff] %v225_v3  ;;  %v231_v6 = vld [vmem:[%s5067_s22 + $0x30] sm:$0xff] }
  0x15   : > { %228 = vst [vmem:[#allocation2 + $0x20] sm:$0xff] %v227_v4  ;;  %230 = vst [vmem:[#allocation2 + $0x28] sm:$0xff] %v229_v5  ;;  %v233_v7 = vld [vmem:[%s5067_s22 + $0x38] sm:$0xff]  ;;  %v235_v8 = vld [vmem:[%s5067_s22 + $0x40] sm:$0xff] }
  0x16   : > { %232 = vst [vmem:[#allocation2 + $0x30] sm:$0xff] %v231_v6  ;;  %234 = vst [vmem:[#allocation2 + $0x38] sm:$0xff] %v233_v7  ;;  %v237_v9 = vld [vmem:[%s5067_s22 + $0x48] sm:$0xff]  ;;  %v239_v10 = vld [vmem:[%s5067_s22 + $0x50] sm:$0xff] }
  0x17   : > { %236 = vst [vmem:[#allocation2 + $0x40] sm:$0xff] %v235_v8  ;;  %v241_v11 = vld [vmem:[%s5067_s22 + $0x58] sm:$0xff]  ;;  %238 = vst [vmem:[#allocation2 + $0x48] sm:$0xff] %v237_v9  ;;  %v243_v12 = vld [vmem:[%s5067_s22 + $0x60] sm:$0xff] }
  0x18   : > { %240 = vst [vmem:[#allocation2 + $0x50] sm:$0xff] %v239_v10  ;;  %242 = vst [vmem:[#allocation2 + $0x58] sm:$0xff] %v241_v11  ;;  %v245_v13 = vld [vmem:[%s5067_s22 + $0x68] sm:$0xff]  ;;  %v247_v14 = vld [vmem:[%s5067_s22 + $0x70] sm:$0xff] }
  0x19   : > { %244 = vst [vmem:[#allocation2 + $0x60] sm:$0xff] %v243_v12  ;;  %246 = vst [vmem:[#allocation2 + $0x68] sm:$0xff] %v245_v13  ;;  %v249_v15 = vld [vmem:[%s5067_s22 + $0x78] sm:$0xff]  ;;  %v251_v16 = vld [vmem:[%s5067_s22 + $0x80] sm:$0xff] }
  0x1a   : > { %248 = vst [vmem:[#allocation2 + $0x70] sm:$0xff] %v247_v14  ;;  %v253_v17 = vld [vmem:[%s5067_s22 + $0x88] sm:$0xff]  ;;  %250 = vst [vmem:[#allocation2 + $0x78] sm:$0xff] %v249_v15  ;;  %v255_v18 = vld [vmem:[%s5067_s22 + $0x90] sm:$0xff] }
  0x1b   : > { %252 = vst [vmem:[#allocation2 + $0x80] sm:$0xff] %v251_v16  ;;  %254 = vst [vmem:[#allocation2 + $0x88] sm:$0xff] %v253_v17 }
  0x1c   : > { %256 = vst [vmem:[#allocation2 + $0x90] sm:$0xff] %v255_v18 }
  0x1d   : > { %264 = vsyncadd [#allocation3], 2432 }
  0x1e   : > { %5012 = dma.done.wait [#allocation3], 2432 }
  0x1f   : > { %5013 = vsyncadd [#allocation3], 4294964864  ;;  %v4906_v19 = vld [vmem:[%s6042_s1 + $0x40] sm:$0xff]   ;;  %v4908_v21 = vld [vmem:[%s6042_s1 + $0x48] sm:$0xff]   ;;  %vm337_vm0 = vcmask 1044480   ;;  %vm1805_vm1 = vcmask 1043456  }
  0x20   : > { %v4907_v20 = vld [vmem:[%s6042_s1 + $0x100] sm:$0xff]   ;;  %4178 = vmatprep.subr.bf16.mxu1 %v4906_v19  ;;  %v4909_v22 = vld [vmem:[%s6042_s1 + $0x108] sm:$0xff]   ;;  %v4910_v23 = vld [vmem:[%s6042_s1 + $0x50] sm:$0xff]   ;;  %vm2114_vm2 = vsmask.f32 3328  ;;  %vm2927_vm5 = vcmask 1042432  }
  0x21   : > { %4370 = vmatprep.subr.bf16.mxu0 %v4907_v20  ;;  %4179 = vmatpush3.bf16.msra.mxu1 %v4906_v19  ;;  %v4911_v24 = vld [vmem:[%s6042_s1 + $0x110] sm:$0xff]   ;;  %v4912_v25 = vld [vmem:[%s6042_s1 + $0x58] sm:$0xff]   ;;  %v4914_v27 = vld [vmem:[%s6042_s1 + $0x60] sm:$0xff]   ;;  %vm596_vm3 = vsmask.f32 5376 }
  0x22   : > { %4371 = vmatpush3.bf16.msra.mxu0 %v4907_v20  ;;  %4180 = vmatprep.subr.bf16.mxu1 %v4908_v21  ;;  %v4913_v26 = vld [vmem:[%s6042_s1 + $0x118] sm:$0xff]   ;;  %v4915_v28 = vld [vmem:[%s6042_s1 + $0x120] sm:$0xff]   ;;  %v4916_v29 = vld [vmem:[%s6042_s1 + $0x68] sm:$0xff]   ;;  %vm992_vm4 = vsmask.f32 4352 }
  0x23   : > { %4372 = vmatprep.subr.bf16.mxu0 %v4909_v22  ;;  %v5126_v30 = vld [vmem:[#allocation2 + $0x8] sm:$0xff]  ;;  %v5128_v31 = vld [vmem:[#allocation2] sm:$0xf8]  ;;  %v5130_v32 = vld [vmem:[#allocation2 + $0x10] sm:$0xff]  ;;  %vm3236_vm6 = vsmask.f32 2304 }
  0x24   : > { %v4917_v33 = vld [vmem:[%s6042_s1 + $0x128] sm:$0xff]   ;;  %v338_v34 = vrot.slane %v5128_v31, 3  ;;  %v339_v35 = vrot.slane %v5126_v30, 3  ;;  %v1807_v38 = vrot.slane %v5130_v32, 4  ;;  %v4918_v40 = vld [vmem:[%s6042_s1 + $0x70] sm:$0xff]   ;;  %v4920_v43 = vld [vmem:[%s6042_s1 + $0x78] sm:$0xff]  }
  0x25   : > { %4181 = vmatpush3.bf16.msra.mxu1 %v4908_v21  ;;  %v5137_v36 = vld [vmem:[#allocation2 + $0x8] sm:$0xf0]  ;;  %v4919_v41 = vld [vmem:[%s6042_s1 + $0x130] sm:$0xff]   ;;  %v4921_v44 = vld [vmem:[%s6042_s1 + $0x138] sm:$0xff]   ;;  %v341_v46 = vrot.slane %v5130_v32, 3  ;;  %v5208_v11 = vshrl.u32 %v5130_v32, 16 }
  0x26   : > { %4373 = vmatpush3.bf16.msra.mxu0 %v4909_v22  ;;  %4182 = vmatprep.subr.bf16.mxu1 %v4910_v23  ;;  %v1806_v37 = vrot.slane %v5137_v36, 4  ;;  %v340_v39 = vsel %vm337_vm0, %v338_v34, %v339_v35  ;;  %v5155_v45 = vld [vmem:[#allocation2 + $0x18] sm:$0xff]  ;;  %v5158_v47 = vld [vmem:[#allocation2 + $0x20] sm:$0xff]  ;;  %v4924_v55 = vld [vmem:[%s6042_s1 + $0x148] sm:$0xff]   ;;  %v5211_v12 = vshll.u32 %v5130_v32, 16  ;;  %v2116_v16 = vshrl.u32 %v5137_v36, 16 }
  0x27   : > { %4374 = vmatprep.subr.bf16.mxu0 %v4911_v24  ;;  %4194 = vmatprep.mubr.bf16.mxu1 %v340_v39  ;;  %v4922_v48 = vld [vmem:[%s6042_s1] sm:$0xff]   ;;  %v1809_v49 = vrot.slane %v5155_v45, 4  ;;  %v343_v51 = vrot.slane %v5155_v45, 3  ;;  %v1811_v52 = vrot.slane %v5158_v47, 4  ;;  %v342_v53 = vsel %vm337_vm0, %v339_v35, %v341_v46  ;;  %v4925_v57 = vld [vmem:[%s6042_s1 + $0x8] sm:$0xff]   ;;  %v5181_v60 = vld [vmem:[#allocation2 + $0x30] sm:$0xff] }
  0x28   : > { %v1808_v42 = vsel %vm1805_vm1, %v1806_v37, %v1807_v38  ;;  %v4923_v50 = vld [vmem:[%s6042_s1 + $0x140] sm:$0xff]   ;;  %v5178_v58 = vld [vmem:[#allocation2 + $0x28] sm:$0xff]  ;;  %v345_v61 = vrot.slane %v5158_v47, 3  ;;  %v4928_v0 = vld [vmem:[%s6042_s1 + $0x10] sm:$0xff]   ;;  %v1815_v2 = vrot.slane %v5181_v60, 4  ;;  %v349_v13 = vrot.slane %v5181_v60, 3 }
  0x29   : > { %4183 = vmatpush3.bf16.msra.mxu1 %v4910_v23  ;;  %4386 = vmatprep.mubr.bf16.mxu0 %v1808_v42  ;;  %v1810_v54 = vsel %vm1805_vm1, %v1807_v38, %v1809_v49  ;;  %v344_v56 = vsel %vm337_vm0, %v341_v46, %v343_v51  ;;  %v1812_v59 = vsel %vm1805_vm1, %v1809_v49, %v1811_v52  ;;  %v1813_v62 = vrot.slane %v5178_v58, 4  ;;  %v4926_v1 = vld [vmem:[%s6042_s1 + $0x150] sm:$0xff]   ;;  %v4927_v5 = vld [vmem:[%s6042_s1 + $0x158] sm:$0xff]   ;;  %v5202_v9 = vld [vmem:[#allocation2 + $0x40] sm:$0xff] }
  0x2a   : > { %4375 = vmatpush3.bf16.msra.mxu0 %v4911_v24  ;;  %4184 = vmatprep.subr.bf16.mxu1 %v4912_v25  ;;  %v347_v63 = vrot.slane %v5178_v58, 3  ;;  %v346_v3 = vsel %vm337_vm0, %v343_v51, %v345_v61  ;;  %v5200_v8 = vld [vmem:[#allocation2 + $0x38] sm:$0xff]  ;;  %v2119_v17 = vshll.u32 %v5137_v36, 16  ;;  %v4929_v18 = vld [vmem:[%s6042_s1 + $0x160] sm:$0xff]   ;;  %v1819_v19 = vrot.slane %v5202_v9, 4  ;;  %v4930_v23 = vld [vmem:[%s6042_s1 + $0x168] sm:$0xff]  }
  0x2b   : > { %4376 = vmatprep.subr.bf16.mxu0 %v4913_v26  ;;  %v1814_v4 = vsel %vm1805_vm1, %v1811_v52, %v1813_v62  ;;  %v1816_v7 = vsel %vm1805_vm1, %v1813_v62, %v1815_v2  ;;  %v4931_v10 = vld [vmem:[%s6042_s1 + $0x18] sm:$0xff]   ;;  %v1817_v14 = vrot.slane %v5200_v8, 4  ;;  %v351_v15 = vrot.slane %v5200_v8, 3  ;;  %v4934_v20 = vld [vmem:[%s6042_s1 + $0x20] sm:$0xff]   ;;  %v4932_v39 = vld [vmem:[%s6042_s1 + $0x170] sm:$0xff]  }
  0x2c   : > { %v348_v6 = vsel %vm337_vm0, %v345_v61, %v347_v63  ;;  %v350_v21 = vsel %vm337_vm0, %v347_v63, %v349_v13  ;;  %v2124_v32 = vrot.slane %v5211_v12, 5  ;;  %v5240_v34 = vshrl.u32 %v5155_v45, 16  ;;  %v5265_v49 = vld [vmem:[#allocation2 + $0x50] sm:$0xff]  ;;  %v4933_v51 = vld [vmem:[%s6042_s1 + $0x178] sm:$0xff]  }
  0x2d   : > { %4185 = vmatpush3.bf16.msra.mxu1 %v4912_v25  ;;  %v1818_v22 = vsel %vm1805_vm1, %v1815_v2, %v1817_v14  ;;  %v352_v24 = vsel %vm337_vm0, %v349_v13, %v351_v15  ;;  %v2118_v25 = vrot.slane %v2116_v16, 4  ;;  %v5243_v35 = vshll.u32 %v5155_v45, 16  ;;  %v5322_v16 = vld [vmem:[#allocation2 + $0x68] sm:$0xff] }
  0x2e   : > { %4377 = vmatpush3.bf16.msra.mxu0 %v4913_v26  ;;  %4186 = vmatprep.subr.bf16.mxu1 %v4914_v27  ;;  %v1820_v26 = vsel %vm1805_vm1, %v1817_v14, %v1819_v19  ;;  %v353_v36 = vrot.slane %v5202_v9, 3  ;;  %v5252_v42 = vshrl.u32 %v5158_v47, 16  ;;  %v5288_v63 = vshll.u32 %v5178_v58, 16 }
  0x2f   : > { %4378 = vmatprep.subr.bf16.mxu0 %v4915_v28  ;;  %v5294_v2 = vshrl.u32 %v5181_v60, 16  ;;  %v5316_v14 = vshrl.u32 %v5200_v8, 16 }
  0x30   : > { %v354_v45 = vsel %vm337_vm0, %v351_v15, %v353_v36  ;;  %v2136_v13 = vrot.slane %v5288_v63, 5 }
  0x31   : > { %4187 = vmatpush3.bf16.msra.mxu1 %v4914_v27  ;;  %v5232_v27 = vld [vmem:[#allocation2 + $0x48] sm:$0xff]  ;;  %6068 = vst [vmem:[#allocation7_spill] sm:$0xff] %v5294_v2  ;;  %6070 = vst [vmem:[#allocation9_spill] sm:$0xff] %v5316_v14 }
  0x32   : > { %4379 = vmatpush3.bf16.msra.mxu0 %v4915_v28  ;;  %4188 = vmatprep.subr.bf16.mxu1 %v4916_v29  ;;  %6067 = vst [vmem:[#allocation6_spill] sm:$0xff] %v5232_v27  ;;  %v2121_v28 = vrot.slane %v2119_v17, 5  ;;  %v6045_v37 = vrot.slane %v5232_v27, 4  ;;  %v355_v38 = vrot.slane %v5232_v27, 3  ;;  %v2139_v17 = vrot.slane %v5294_v2, 4 }
  0x33   : > { %4380 = vmatprep.subr.bf16.mxu0 %v4917_v33 }
  0x34   : > { %v1822_v46 = vsel %vm1805_vm1, %v1819_v19, %v6045_v37  ;;  %v5327_v19 = vshll.u32 %v5200_v8, 16  ;;  %v363_v8 = vrot.slane %v5322_v16, 3 }
  0x35   : > { %4189 = vmatpush3.bf16.msra.mxu1 %v4916_v29  ;;  %v2123_v29 = vrot.slane %v5208_v11, 4 }
  0x36   : > { %4381 = vmatpush3.bf16.msra.mxu0 %v4917_v33  ;;  %4190 = vmatprep.subr.bf16.mxu1 %v4918_v40  ;;  %v4936_v33 = vld [vmem:[%s6042_s1 + $0x28] sm:$0xff]   ;;  %6071 = vst [vmem:[#allocation10_spill] sm:$0xff] %v5327_v19 }
  0x37   : > { %4382 = vmatprep.subr.bf16.mxu0 %v4919_v41 }
  0x39   : > { %4191 = vmatpush3.bf16.msra.mxu1 %v4918_v40  ;;  %v2122_v40 = vor.u32 %v2121_v28, %v2118_v25  ;;  %v2143_v25 = vrot.slane %v5316_v14, 4  ;;  %v2144_v28 = vrot.slane %v5327_v19, 5 }
  0x3a   : > { %4383 = vmatpush3.bf16.msra.mxu0 %v4919_v41  ;;  %4192 = vmatprep.subr.bf16.mxu1 %v4920_v43  ;;  %v2125_v41 = vor.u32 %v2124_v32, %v2123_v29  ;;  %v5347_v29 = vshrl.u32 %v5232_v27, 16 }
  0x3b   : > { %4384 = vmatprep.subr.bf16.mxu0 %v4921_v44 }
  0x3c   : > { %v2126_v52 = vsel %vm2114_vm2, %v2122_v40, %v2125_v41  ;;  %6072 = vst [vmem:[#allocation11_spill] sm:$0xff] %v5347_v29  ;;  %v609_v40 = vshll.u32 %v5126_v30, 16 }
  0x3d   : > { %4193 = vmatpush3.bf16.msra.mxu1 %v4920_v43  ;;  %v5255_v43 = vshll.u32 %v5158_v47, 16  ;;  %v2127_v47 = vrot.slane %v5240_v34, 4 }
  0x3e   : > { %4385 = vmatpush3.bf16.msra.mxu0 %v4921_v44  ;;  %4226 = vmatprep.subr.bf16.mxu1 %v4922_v48  ;;  %v4938_v44 = vld [vmem:[%s6042_s1 + $0x30] sm:$0xff]  }
  0x3f   : > { %4418 = vmatprep.subr.bf16.mxu0 %v4923_v50 }
  0x40   : > { %4195 = vmatmul.mubr.bf16.vlgmr.msra.gmra.mrb[0].mxu1 %v342_v53  ;;  %v5273_v53 = vld [vmem:[#allocation2 + $0x58] sm:$0xff] }
  0x41   : > { %4387 = vmatmul.mubr.bf16.vlgmr.msra.gmra.mrb[0].mxu0 %v1810_v54  ;;  %4227 = vmatpush3.bf16.msra.mxu1 %v4922_v48  ;;  %v356_v48 = vsel %vm337_vm0, %v353_v36, %v355_v38  ;;  %v2131_v54 = vrot.slane %v5252_v42, 4  ;;  %v359_v62 = vrot.slane %v5273_v53, 3  ;;  %v606_v36 = vshrl.u32 %v5126_v30, 16  ;;  %v4941_v30 = vld [vmem:[%s6042_s1 + $0x198] sm:$0xff]  }
  0x42   : > { %4419 = vmatpush3.bf16.msra.mxu0 %v4923_v50  ;;  %4198 = vmatprep.mubr.bf16.mxu1 %v344_v56  ;;  %v2128_v50 = vrot.slane %v5243_v35, 5  ;;  %v4940_v56 = vld [vmem:[%s6042_s1 + $0x38] sm:$0xff]  }
  0x43   : > { %4420 = vmatprep.subr.bf16.mxu0 %v4924_v55  ;;  %4390 = vmatprep.mubr.bf16.mxu0 %v1812_v59  ;;  %v5282_v59 = vshrl.u32 %v5178_v58, 16 }
  0x44   : > { %4228 = vmatprep.subr.bf16.mxu1 %v4925_v57  ;;  %v5284_v61 = vor.u32 %v2128_v50, %v2127_v47  ;;  %v5364_v47 = vld [vmem:[#allocation2 + $0x80] sm:$0x7]  ;;  %v5367_v50 = vshll.u32 %v5232_v27, 16  ;;  %v5475_v27 = vshrl.u32 %v5322_v16, 16 }
  0x45   : > { %4229 = vmatpush3.bf16.msra.mxu1 %v4925_v57  ;;  %v357_v57 = vrot.slane %v5265_v49, 3 }
  0x46   : > { %4421 = vmatpush3.bf16.msra.mxu0 %v4924_v55  ;;  %4230 = vmatprep.subr.bf16.mxu1 %v4928_v0  ;;  %v2132_v55 = vrot.slane %v5255_v43, 5 }
  0x47   : > { %4422 = vmatprep.subr.bf16.mxu0 %v4926_v1  ;;  %v358_v58 = vsel %vm337_vm0, %v355_v38, %v357_v57 }
  0x48   : > { %4199 = vmatmul.mubr.bf16.gmra.mrb[4].mxu1 %v346_v3  ;;  %v5297_v3 = vshll.u32 %v5181_v60, 16  ;;  %v2130_v60 = vsel %vm2114_vm2, %v2125_v41, %v5284_v61 }
  0x49   : > { %4391 = vmatmul.mubr.bf16.gmra.mrb[4].mxu0 %v1814_v4  ;;  %4202 = vmatprep.mubr.bf16.mxu1 %v348_v6  ;;  %v5302_v4 = vld [vmem:[%s6042_s1 + $0x80] sm:$0xff]   ;;  %v2135_v6 = vrot.slane %v5282_v59, 4 }
  0x4a   : > { %4423 = vmatpush3.bf16.msra.mxu0 %v4926_v1  ;;  %4394 = vmatprep.mubr.bf16.mxu0 %v1816_v7  ;;  %v2133_v1 = vor.u32 %v2132_v55, %v2131_v54  ;;  %6069 = vst [vmem:[#allocation8_spill] sm:$0xff] %v5297_v3  ;;  %v4937_v7 = vld [vmem:[%s6042_s1 + $0x188] sm:$0xff]   ;;  %v2151_v55 = vrot.slane %v5347_v29, 4 }
  0x4b   : > { %4424 = vmatprep.subr.bf16.mxu0 %v4927_v5  ;;  %4231 = vmatpush3.bf16.msra.mxu1 %v4928_v0  ;;  %v4935_v0 = vld [vmem:[%s6042_s1 + $0x180] sm:$0xff]  }
  0x4c   : > { %4232 = vmatprep.subr.bf16.mxu1 %v4931_v10  ;;  %v5320_v15 = vsel %vm2114_vm2, %v5284_v61, %v2133_v1 }
  0x4e   : > { %4425 = vmatpush3.bf16.msra.mxu0 %v4927_v5  ;;  %v5305_v5 = vld [vmem:[#allocation2 + $0x60] sm:$0xff] }
  0x4f   : > { %4426 = vmatprep.subr.bf16.mxu0 %v4929_v18  ;;  %4233 = vmatpush3.bf16.msra.mxu1 %v4931_v10  ;;  %v360_v10 = vsel %vm337_vm0, %v357_v57, %v359_v62 }
  0x50   : > { %4203 = vmatmul.mubr.bf16.gmra.mrb[8].mxu1 %v350_v21  ;;  %4234 = vmatprep.subr.bf16.mxu1 %v4934_v20  ;;  %v5333_v21 = vshll.u32 %v5202_v9, 16 }
  0x51   : > { %4395 = vmatmul.mubr.bf16.gmra.mrb[8].mxu0 %v1818_v22  ;;  %4206 = vmatprep.mubr.bf16.mxu1 %v352_v24  ;;  %v361_v22 = vrot.slane %v5305_v5, 3  ;;  %v5339_v24 = vld [vmem:[#allocation2 + $0x70] sm:$0xff] }
  0x52   : > { %4427 = vmatpush3.bf16.msra.mxu0 %v4929_v18  ;;  %4398 = vmatprep.mubr.bf16.mxu0 %v1820_v26  ;;  %v2140_v18 = vrot.slane %v5297_v3, 5 }
  0x53   : > { %4428 = vmatprep.subr.bf16.mxu0 %v4930_v23  ;;  %4235 = vmatpush3.bf16.msra.mxu1 %v4934_v20  ;;  %v5330_v20 = vshrl.u32 %v5202_v9, 16  ;;  %v4939_v9 = vld [vmem:[%s6042_s1 + $0x190] sm:$0xff]   ;;  %v362_v38 = vsel %vm337_vm0, %v359_v62, %v361_v22  ;;  %v5379_v62 = vshrl.u32 %v5265_v49, 16 }
  0x54   : > { %4236 = vmatprep.subr.bf16.mxu1 %v4936_v33  ;;  %v2141_v26 = vor.u32 %v2140_v18, %v2139_v17  ;;  %v369_v17 = vrot.slane %v5364_v47, 3 }
  0x55   : > { %v2147_v32 = vrot.slane %v5330_v20, 4 }
  0x56   : > { %4429 = vmatpush3.bf16.msra.mxu0 %v4930_v23  ;;  %v2137_v23 = vor.u32 %v2136_v13, %v2135_v6  ;;  %v608_v6 = vrot.slane %v606_v36, 2 }
  0x57   : > { %4430 = vmatprep.subr.bf16.mxu0 %v4932_v39  ;;  %4237 = vmatpush3.bf16.msra.mxu1 %v4936_v33  ;;  %v2148_v33 = vrot.slane %v5333_v21, 5 }
  0x58   : > { %4207 = vmatmul.mubr.bf16.gmra.mrb[12].mxu1 %v354_v45  ;;  %4238 = vmatprep.subr.bf16.mxu1 %v4938_v44  ;;  %v5357_v41 = vsel %vm2114_vm2, %v2133_v1, %v2137_v23  ;;  %v365_v45 = vrot.slane %v5339_v24, 3 }
  0x59   : > { %4399 = vmatmul.mubr.bf16.gmra.mrb[12].mxu0 %v1822_v46  ;;  %4210 = vmatprep.mubr.bf16.mxu1 %v356_v48  ;;  %v269_v46 = vld [vmem:[#allocation2] sm:$0xfc]  ;;  %v5362_v48 = vsel %vm2114_vm2, %v2137_v23, %v2141_v26  ;;  %v5373_v54 = vor.u32 %v2148_v33, %v2147_v32  ;;  %v994_v23 = vshrl.u32 %v5128_v31, 16 }
  0x5a   : > { %4431 = vmatpush3.bf16.msra.mxu0 %v4932_v39  ;;  %4434 = vmatprep.mubr.bf16.mxu0 %v2126_v52  ;;  %v5353_v39 = vld [vmem:[#allocation2 + $0x78] sm:$0xff]  ;;  %v601_v57 = vshll.u32 %v269_v46, 16  ;;  %v366_v1 = vsel %vm337_vm0, %v363_v8, %v365_v45 }
  0x5b   : > { %4432 = vmatprep.subr.bf16.mxu0 %v4933_v51  ;;  %4239 = vmatpush3.bf16.msra.mxu1 %v4938_v44  ;;  %v364_v44 = vsel %vm337_vm0, %v361_v22, %v363_v8  ;;  %v367_v52 = vrot.slane %v5353_v39, 3  ;;  %v997_v8 = vshll.u32 %v5128_v31, 16  ;;  %v617_v31 = vrot.slane %v5208_v11, 2 }
  0x5c   : > { %4240 = vmatprep.subr.bf16.mxu1 %v4940_v56  ;;  %v603_v22 = vrot.slane %v601_v57, 3 }
  0x5e   : > { %4433 = vmatpush3.bf16.msra.mxu0 %v4933_v51  ;;  %v2145_v51 = vor.u32 %v2144_v28, %v2143_v25  ;;  %v2155_v25 = vrot.slane %v5379_v62, 4  ;;  %v1002_v28 = vrot.slane %v609_v40, 4 }
  0x5f   : > { %4466 = vmatprep.subr.bf16.mxu0 %v4935_v0  ;;  %4241 = vmatpush3.bf16.msra.mxu1 %v4940_v56  ;;  %v598_v56 = vshrl.u32 %v269_v46, 16  ;;  %v999_v46 = vrot.slane %v997_v8, 4  ;;  %v370_v8 = vsel %vm337_vm0, %v367_v52, %v369_v17 }
  0x60   : > { %4211 = vmatmul.mubr.bf16.gmra.mrb[16].mxu1 %v358_v58  ;;  %4274 = vmatprep.subr.bf16.mxu1 %v5302_v4  ;;  %v2152_v58 = vrot.slane %v5367_v50, 5  ;;  %v5397_v13 = vsel %vm2114_vm2, %v2145_v51, %v5373_v54 }
  0x61   : > { %4435 = vmatmul.mubr.bf16.vlgmr.msra.gmra.mrb[0].mxu0 %v2130_v60  ;;  %4214 = vmatprep.mubr.bf16.mxu1 %v360_v10  ;;  %v4943_v60 = vld [vmem:[%s6042_s1 + $0x1a0] sm:$0xff]   ;;  %v5390_v10 = vsel %vm2114_vm2, %v2141_v26, %v2145_v51  ;;  %v600_v18 = vrot.slane %v598_v56, 2  ;;  %v1001_v26 = vrot.slane %v606_v36, 3  ;;  %v5420_v51 = vshll.u32 %v5273_v53, 16 }
  0x62   : > { %4467 = vmatpush3.bf16.msra.mxu0 %v4935_v0  ;;  %4438 = vmatprep.mubr.bf16.mxu0 %v5320_v15  ;;  %v5382_v0 = vshll.u32 %v5265_v49, 16  ;;  %v368_v49 = vsel %vm337_vm0, %v365_v45, %v367_v52  ;;  %v2153_v32 = vor.u32 %v2152_v58, %v2151_v55  ;;  %v996_v45 = vrot.slane %v994_v23, 3 }
  0x63   : > { %4468 = vmatprep.subr.bf16.mxu0 %v4937_v7  ;;  %v5415_v36 = vor.u32 %v1002_v28, %v1001_v26  ;;  %v626_v55 = vrot.slane %v5240_v34, 2  ;;  %v604_v57 = vor.u32 %v603_v22, %v600_v18  ;;  %v629_v23 = vrot.slane %v5243_v35, 3 }
  0x64   : > { %v1000_v56 = vor.u32 %v999_v46, %v996_v45 }
  0x66   : > { %4469 = vmatpush3.bf16.msra.mxu0 %v4937_v7  ;;  %v611_v7 = vrot.slane %v609_v40, 3  ;;  %v620_v40 = vrot.slane %v5211_v12, 3  ;;  %v5443_v18 = vsel %vm992_vm4, %v1000_v56, %v5415_v36  ;;  %v4949_v56 = vld [vmem:[%s6042_s1 + $0x1b8] sm:$0xff]  }
  0x67   : > { %4470 = vmatprep.subr.bf16.mxu0 %v4939_v9 }
  0x68   : > { %4215 = vmatmul.mubr.bf16.gmra.mrb[20].mxu1 %v362_v38  ;;  %v5404_v33 = vor.u32 %v611_v7, %v608_v6  ;;  %v4945_v38 = vld [vmem:[%s6042_s1 + $0x1a8] sm:$0xff]  }
  0x69   : > { %4439 = vmatmul.mubr.bf16.gmra.mrb[4].mxu0 %v5357_v41  ;;  %4218 = vmatprep.mubr.bf16.mxu1 %v364_v44  ;;  %v5409_v44 = vld [vmem:[#allocation2 + $0x80] sm:$0xff]  ;;  %v5433_v7 = vld [vmem:[#allocation2 + $0x88] sm:$0xff] }
  0x6a   : > { %4442 = vmatprep.mubr.bf16.mxu0 %v5362_v48  ;;  %4471 = vmatpush3.bf16.msra.mxu0 %v4939_v9  ;;  %v2156_v9 = vrot.slane %v5382_v0, 5  ;;  %6073 = vst [vmem:[#allocation12_spill] sm:$0xff] %v5409_v44  ;;  %v5428_v58 = vshrl.u32 %v5409_v44, 16  ;;  %v5431_v6 = vshll.u32 %v5409_v44, 16  ;;  %v613_v26 = vsel %vm596_vm3, %v604_v57, %v5404_v33 }
  0x6b   : > { %4472 = vmatprep.subr.bf16.mxu0 %v4941_v30  ;;  %v6051_v46 = vshll.u32 %v5433_v7, 16  ;;  %v621_v57 = vor.u32 %v620_v40, %v617_v31  ;;  %v5529_v44 = vshrl.u32 %v5353_v39, 16 }
  0x6c   : > { %6074 = vst [vmem:[#allocation13_spill] sm:$0xff] %v5428_v58  ;;  %6075 = vst [vmem:[#allocation14_spill] sm:$0xff] %v5431_v6  ;;  %v2179_v28 = vrot.slane %v5428_v58, 4  ;;  %v2180_v45 = vrot.slane %v5431_v6, 5  ;;  %v5479_v6 = vshll.u32 %v5322_v16, 16  ;;  %v5482_v58 = vshrl.u32 %v5339_v24, 16 }
  0x6d   : > { %v2623_v37 = vrot.slane %v6051_v46, 5  ;;  %v622_v16 = vsel %vm596_vm3, %v5404_v33, %v621_v57 }
  0x6e   : > { %4473 = vmatpush3.bf16.msra.mxu0 %v4941_v30  ;;  %v5413_v30 = vshrl.u32 %v5273_v53, 16  ;;  %v2157_v53 = vor.u32 %v2156_v9, %v2155_v25  ;;  %v2160_v25 = vrot.slane %v5420_v51, 5  ;;  %v6052_v9 = vshrl.u32 %v5433_v7, 16 }
  0x6f   : > { %4474 = vmatprep.subr.bf16.mxu0 %v4943_v60  ;;  %v5484_v31 = vor.u32 %v2180_v45, %v2179_v28  ;;  %v2167_v28 = vrot.slane %v5475_v27, 4  ;;  %v2168_v33 = vrot.slane %v5479_v6, 5 }
  0x70   : > { %4219 = vmatmul.mubr.bf16.gmra.mrb[24].mxu1 %v366_v1  ;;  %v5425_v1 = vshrl.u32 %v5305_v5, 16  ;;  %v2159_v22 = vrot.slane %v5413_v30, 4  ;;  %v5462_v52 = vsel %vm2114_vm2, %v2153_v32, %v2157_v53 }
  0x71   : > { %4443 = vmatmul.mubr.bf16.gmra.mrb[8].mxu0 %v5390_v10  ;;  %4222 = vmatprep.mubr.bf16.mxu1 %v368_v49  ;;  %v5436_v49 = vshll.u32 %v5305_v5, 16  ;;  %v5452_v5 = vsel %vm2114_vm2, %v5373_v54, %v2153_v32 }
  0x72   : > { %4446 = vmatprep.mubr.bf16.mxu0 %v5397_v13  ;;  %4475 = vmatpush3.bf16.msra.mxu0 %v4943_v60  ;;  %v4947_v60 = vld [vmem:[%s6042_s1 + $0x1b0] sm:$0xff]   ;;  %v2163_v54 = vrot.slane %v5425_v1, 4  ;;  %v2161_v32 = vor.u32 %v2160_v25, %v2159_v22  ;;  %v5489_v22 = vshll.u32 %v5339_v24, 16  ;;  %v5494_v25 = vld [vmem:[%s6042_s1 + $0x1c0] sm:$0xff]   ;;  %v644_v24 = vrot.slane %v5282_v59, 2 }
  0x73   : > { %4476 = vmatprep.subr.bf16.mxu0 %v4945_v38  ;;  %v2164_v17 = vrot.slane %v5436_v49, 5 }
  0x75   : > { %v2165_v46 = vor.u32 %v2164_v17, %v2163_v54  ;;  %v4944_v17 = vld [vmem:[%s6042_s1 + $0x88] sm:$0xff]  }
  0x76   : > { %4477 = vmatpush3.bf16.msra.mxu0 %v4945_v38  ;;  %v2620_v38 = vrot.slane %v6052_v9, 4  ;;  %v2172_v9 = vrot.slane %v5489_v22, 5 }
  0x77   : > { %4478 = vmatprep.subr.bf16.mxu0 %v4947_v60  ;;  %v5514_v54 = vsel %vm2114_vm2, %v2161_v32, %v2165_v46 }
  0x78   : > { %4223 = vmatmul.mubr.bf16.gmra.mrb[28].mxu1 %v370_v8  ;;  %v5486_v40 = vor.u32 %v2623_v37, %v2620_v38  ;;  %v630_v8 = vor.u32 %v629_v23, %v626_v55  ;;  %v635_v37 = vrot.slane %v5252_v42, 2  ;;  %v638_v55 = vrot.slane %v5255_v43, 3 }
  0x79   : > { %4447 = vmatmul.mubr.bf16.gmra.mrb[12].mxu0 %v5452_v5  ;;  %4242 = vmatprep.mubr.bf16.mxu1 %v613_v26  ;;  %v647_v23 = vrot.slane %v5288_v63, 3  ;;  %v5508_v26 = vsel %vm2114_vm2, %v2157_v53, %v2161_v32  ;;  %v2171_v38 = vrot.slane %v5482_v58, 4  ;;  %v4946_v32 = vld [vmem:[%s6042_s1 + $0x90] sm:$0xff]  }
  0x7a   : > { %4450 = vmatprep.mubr.bf16.mxu0 %v5462_v52  ;;  %4479 = vmatpush3.bf16.msra.mxu0 %v4947_v60  ;;  %6076 = vst [vmem:[#allocation15_spill] sm:$0xff] %v5486_v40  ;;  %v5501_v60 = vsel %vm2114_vm2, %v5484_v31, %v5486_v40  ;;  %v631_v45 = vsel %vm596_vm3, %v621_v57, %v630_v8  ;;  %v5532_v40 = vshll.u32 %v5353_v39, 16  ;;  %v2175_v39 = vrot.slane %v5529_v44, 4 }
  0x7b   : > { %4480 = vmatprep.subr.bf16.mxu0 %v4949_v56  ;;  %6077 = vst [vmem:[#allocation16_spill] sm:$0xff] %v5501_v60  ;;  %v639_v53 = vor.u32 %v638_v55, %v635_v37  ;;  %v2169_v57 = vor.u32 %v2168_v33, %v2167_v28  ;;  %v656_v37 = vrot.slane %v5297_v3, 3 }
  0x7c   : > { %6078 = vst [vmem:[#allocation17_spill] sm:$0xff] %v5532_v40  ;;  %v2176_v33 = vrot.slane %v5532_v40, 5 }
  0x7d   : > { %v640_v55 = vsel %vm596_vm3, %v630_v8, %v639_v53  ;;  %v5540_v28 = vsel %vm2114_vm2, %v2165_v46, %v2169_v57  ;;  %v4948_v8 = vld [vmem:[%s6042_s1 + $0x98] sm:$0xff]  }
  0x7e   : > { %4481 = vmatpush3.bf16.msra.mxu0 %v4949_v56  ;;  %v648_v56 = vor.u32 %v647_v23, %v644_v24  ;;  %v662_v23 = vrot.slane %v5316_v14, 2  ;;  %v2177_v46 = vor.u32 %v2176_v33, %v2175_v39 }
  0x7f   : > { %4514 = vmatprep.subr.bf16.mxu0 %v5494_v25 }
  0x80   : > { %4243 = vmatmul.mubr.bf16.vlgmr.msra.gmra.mrb[0].mxu1 %v622_v16  ;;  %v2173_v16 = vor.u32 %v2172_v9, %v2171_v38  ;;  %v649_v24 = vsel %vm596_vm3, %v639_v53, %v648_v56  ;;  %v665_v9 = vrot.slane %v5327_v19, 3  ;;  %v2449_v53 = vld [vmem:[#allocation2 + $0x10] sm:$0xf0] }
  0x81   : > { %4451 = vmatmul.mubr.bf16.gmra.mrb[16].mxu0 %v5508_v26  ;;  %4275 = vmatpush3.bf16.msra.mxu1 %v5302_v4  ;;  %v653_v4 = vrot.slane %v5294_v2, 2  ;;  %v2487_v3 = vshll.u32 %v2449_v53, 16  ;;  %v4950_v2 = vld [vmem:[%s6042_s1 + $0xa0] sm:$0xff]  }
  0x82   : > { %4246 = vmatprep.mubr.bf16.mxu1 %v631_v45  ;;  %4454 = vmatprep.mubr.bf16.mxu0 %v5514_v54  ;;  %v5546_v45 = vsel %vm2114_vm2, %v2169_v57, %v2173_v16  ;;  %v666_v60 = vor.u32 %v665_v9, %v662_v23  ;;  %v2484_v57 = vshrl.u32 %v2449_v53, 16  ;;  %v5562_v23 = vsel %vm2114_vm2, %v2173_v16, %v2177_v46 }
  0x83   : > { %4276 = vmatprep.subr.bf16.mxu1 %v4944_v17  ;;  %v657_v38 = vor.u32 %v656_v37, %v653_v4  ;;  %v671_v37 = vrot.slane %v5330_v20, 2  ;;  %v2489_v53 = vrot.slane %v2487_v3, 5  ;;  %v4954_v3 = vld [vmem:[%s6042_s1 + $0xb0] sm:$0xff]  }
  0x85   : > { %4277 = vmatpush3.bf16.msra.mxu1 %v4944_v17  ;;  %v2096_v17 = vld [vmem:[#allocation2 + $0x88] sm:$0x1f]  ;;  %v658_v4 = vsel %vm596_vm3, %v648_v56, %v657_v38  ;;  %v667_v39 = vsel %vm596_vm3, %v657_v38, %v666_v60  ;;  %v2486_v56 = vrot.slane %v2484_v57, 4 }
  0x86   : > { %4278 = vmatprep.subr.bf16.mxu1 %v4946_v32  ;;  %v2184_v19 = vshrl.u32 %v2096_v17, 16  ;;  %v2187_v14 = vshll.u32 %v2096_v17, 16  ;;  %v5567_v17 = vsel %vm2114_vm2, %v2177_v46, %v5484_v31 }
  0x88   : > { %4247 = vmatmul.mubr.bf16.gmra.mrb[4].mxu1 %v640_v55  ;;  %v674_v55 = vrot.slane %v5333_v21, 3  ;;  %v2186_v33 = vrot.slane %v2184_v19, 4  ;;  %v2189_v9 = vrot.slane %v2187_v14, 5  ;;  %v2490_v19 = vor.u32 %v2489_v53, %v2486_v56 }
  0x89   : > { %4455 = vmatmul.mubr.bf16.gmra.mrb[20].mxu0 %v5540_v28  ;;  %4250 = vmatprep.mubr.bf16.mxu1 %v649_v24  ;;  %v680_v24 = vrot.slane %v5347_v29, 2  ;;  %v4952_v29 = vld [vmem:[%s6042_s1 + $0xa8] sm:$0xff]   ;;  %v707_v53 = vrot.slane %v5425_v1, 2 }
  0x8a   : > { %4458 = vmatprep.mubr.bf16.mxu0 %v5546_v45  ;;  %4279 = vmatpush3.bf16.msra.mxu1 %v4946_v32  ;;  %v683_v32 = vrot.slane %v5367_v50, 3  ;;  %v675_v16 = vor.u32 %v674_v55, %v671_v37  ;;  %v2190_v14 = vor.u32 %v2189_v9, %v2186_v33  ;;  %v692_v37 = vrot.slane %v5382_v0, 3  ;;  %v5582_v55 = vld [vmem:[#allocation2 + $0x90] sm:$0x1f]  ;;  %v4956_v33 = vld [vmem:[%s6042_s1 + $0xb8] sm:$0xff]  }
  0x8b   : > { %4280 = vmatprep.subr.bf16.mxu1 %v4948_v8 }
  0x8c   : > { %v684_v38 = vor.u32 %v683_v32, %v680_v24  ;;  %v676_v46 = vsel %vm596_vm3, %v666_v60, %v675_v16  ;;  %v698_v24 = vrot.slane %v5413_v30, 2  ;;  %v701_v32 = vrot.slane %v5420_v51, 3 }
  0x8d   : > { %v2499_v60 = vsel %vm2114_vm2, %v2490_v19, %v5284_v61  ;;  %v5602_v61 = vld [vmem:[%s6042_s1 + $0xc0] sm:$0xff]   ;;  %v716_v19 = vrot.slane %v5475_v27, 2 }
  0x8e   : > { %4281 = vmatpush3.bf16.msra.mxu1 %v4948_v8  ;;  %v6065_v8 = vrot.slane %v5433_v7, 5  ;;  %v685_v57 = vsel %vm596_vm3, %v675_v16, %v684_v38  ;;  %v702_v9 = vor.u32 %v701_v32, %v698_v24  ;;  %v710_v16 = vrot.slane %v5436_v49, 3 }
  0x8f   : > { %4282 = vmatprep.subr.bf16.mxu1 %v4950_v2  ;;  %v728_v24 = vrot.slane %v5489_v22, 3  ;;  %v734_v32 = vrot.slane %v5529_v44, 2 }
  0x90   : > { %4251 = vmatmul.mubr.bf16.gmra.mrb[8].mxu1 %v658_v4  ;;  %v689_v4 = vrot.slane %v5379_v62, 2 }
  0x91   : > { %4459 = vmatmul.mubr.bf16.gmra.mrb[24].mxu0 %v5562_v23  ;;  %4254 = vmatprep.mubr.bf16.mxu1 %v667_v39  ;;  %v2959_v39 = vrot.slane %v5582_v55, 5 }
  0x92   : > { %4462 = vmatprep.mubr.bf16.mxu0 %v5567_v17  ;;  %4283 = vmatpush3.bf16.msra.mxu1 %v4950_v2  ;;  %v2191_v2 = vsel %vm2114_vm2, %v5484_v31, %v2190_v14 }
  0x93   : > { %4284 = vmatprep.subr.bf16.mxu1 %v4952_v29  ;;  %v5597_v31 = vsel %vm2927_vm5, %v6065_v8, %v2959_v39 }
  0x96   : > { %4285 = vmatpush3.bf16.msra.mxu1 %v4952_v29  ;;  %v693_v29 = vor.u32 %v692_v37, %v689_v4  ;;  %v4955_v4 = vld [vmem:[%s6042_s1 + $0x1d0] sm:$0xff]  }
  0x97   : > { %4286 = vmatprep.subr.bf16.mxu1 %v4954_v3 }
  0x98   : > { %4255 = vmatmul.mubr.bf16.gmra.mrb[12].mxu1 %v676_v46  ;;  %v694_v56 = vsel %vm596_vm3, %v684_v38, %v693_v29  ;;  %v703_v14 = vsel %vm596_vm3, %v693_v29, %v702_v9  ;;  %v719_v46 = vrot.slane %v5479_v6, 3  ;;  %v711_v38 = vor.u32 %v710_v16, %v707_v53 }
  0x99   : > { %4463 = vmatmul.mubr.bf16.gmra.mrb[28].mxu0 %v2191_v2  ;;  %4258 = vmatprep.mubr.bf16.mxu1 %v685_v57  ;;  %v725_v2 = vrot.slane %v5482_v58, 2 }
  0x9a   : > { %4482 = vmatprep.mubr.bf16.mxu0 %v2499_v60  ;;  %4287 = vmatpush3.bf16.msra.mxu1 %v4954_v3  ;;  %v4953_v3 = vld [vmem:[%s6042_s1 + $0x1c8] sm:$0xff]   ;;  %v720_v57 = vor.u32 %v719_v46, %v716_v19  ;;  %v712_v37 = vsel %vm596_vm3, %v702_v9, %v711_v38  ;;  %v741_v60 = vshrl.u32 %v5364_v47, 16  ;;  %v4959_v9 = vld [vmem:[%s6042_s1 + $0x1e0] sm:$0xff]   ;;  %v1005_v46 = vrot.slane %v5208_v11, 3 }
  0x9b   : > { %4288 = vmatprep.subr.bf16.mxu1 %v4956_v33  ;;  %v729_v39 = vor.u32 %v728_v24, %v725_v2  ;;  %v4960_v24 = vld [vmem:[%s6042_s1 + $0xc8] sm:$0xff]  }
  0x9c   : > { %v743_v53 = vrot.slane %v741_v60, 2 }
  0x9e   : > { %4289 = vmatpush3.bf16.msra.mxu1 %v4956_v33  ;;  %v744_v33 = vshll.u32 %v5364_v47, 16  ;;  %v4961_v47 = vld [vmem:[%s6042_s1 + $0x1e8] sm:$0xff]  }
  0x9f   : > { %4322 = vmatprep.subr.bf16.mxu1 %v5602_v61 }
  0xa0   : > { %4259 = vmatmul.mubr.bf16.gmra.mrb[16].mxu1 %v694_v56  ;;  %v730_v56 = vsel %vm596_vm3, %v720_v57, %v729_v39  ;;  %v746_v16 = vrot.slane %v744_v33, 3  ;;  %v6081_v33 = vld [vmem:[#allocation9_spill] sm:$0xff] }
  0xa1   : > { %4483 = vmatmul.mubr.bf16.vlgmr.msra.gmra.mrb[0].mxu0 %v5320_v15  ;;  %4262 = vmatprep.mubr.bf16.mxu1 %v703_v14  ;;  %v721_v15 = vsel %vm596_vm3, %v711_v38, %v720_v57  ;;  %v4963_v14 = vld [vmem:[%s6042_s1 + $0x1f0] sm:$0xff]   ;;  %v1009_v38 = vrot.slane %v5240_v34, 3 }
  0xa2   : > { %4515 = vmatpush3.bf16.msra.mxu0 %v5494_v25  ;;  %4486 = vmatprep.mubr.bf16.mxu0 %v5357_v41  ;;  %v737_v25 = vrot.slane %v5532_v40, 3  ;;  %v4957_v41 = vld [vmem:[%s6042_s1 + $0x1d8] sm:$0xff]  }
  0xa3   : > { %4516 = vmatprep.subr.bf16.mxu0 %v4953_v3 }
  0xa4   : > { %v738_v29 = vor.u32 %v737_v25, %v734_v32  ;;  %v4962_v32 = vld [vmem:[%s6042_s1 + $0xd0] sm:$0xff]  }
  0xa6   : > { %4517 = vmatpush3.bf16.msra.mxu0 %v4953_v3  ;;  %v1006_v3 = vrot.slane %v5211_v12, 4  ;;  %v5662_v12 = vld [vmem:[%s6042_s1 + $0x200] sm:$0xff]  }
  0xa7   : > { %4518 = vmatprep.subr.bf16.mxu0 %v4955_v4 }
  0xa8   : > { %4263 = vmatmul.mubr.bf16.gmra.mrb[20].mxu1 %v712_v37  ;;  %v5656_v57 = vor.u32 %v1006_v3, %v1005_v46  ;;  %v1017_v37 = vrot.slane %v5282_v59, 3  ;;  %v6083_v46 = vld [vmem:[#allocation11_spill] sm:$0xff] }
  0xa9   : > { %4487 = vmatmul.mubr.bf16.gmra.mrb[4].mxu0 %v5362_v48  ;;  %4266 = vmatprep.mubr.bf16.mxu1 %v721_v15  ;;  %v739_v48 = vsel %vm596_vm3, %v729_v39, %v738_v29 }
  0xaa   : > { %4490 = vmatprep.mubr.bf16.mxu0 %v5390_v10  ;;  %4519 = vmatpush3.bf16.msra.mxu0 %v4955_v4  ;;  %v747_v10 = vor.u32 %v746_v16, %v743_v53  ;;  %v1008_v4 = vsel %vm992_vm4, %v5415_v36, %v5656_v57 }
  0xab   : > { %4520 = vmatprep.subr.bf16.mxu0 %v4957_v41 }
  0xac   : > { %v748_v19 = vsel %vm596_vm3, %v738_v29, %v747_v10  ;;  %v6082_v29 = vld [vmem:[#allocation10_spill] sm:$0xff]  ;;  %v4966_v10 = vld [vmem:[%s6042_s1 + $0xe0] sm:$0xff]  }
  0xae   : > { %4521 = vmatpush3.bf16.msra.mxu0 %v4957_v41  ;;  %v6079_v41 = vld [vmem:[#allocation7_spill] sm:$0xff] }
  0xaf   : > { %4522 = vmatprep.subr.bf16.mxu0 %v4959_v9  ;;  %v1021_v39 = vrot.slane %v6079_v41, 3 }
  0xb0   : > { %4267 = vmatmul.mubr.bf16.gmra.mrb[24].mxu1 %v730_v56  ;;  %v4964_v56 = vld [vmem:[%s6042_s1 + $0xd8] sm:$0xff]  }
  0xb1   : > { %4491 = vmatmul.mubr.bf16.gmra.mrb[8].mxu0 %v5397_v13  ;;  %4270 = vmatprep.mubr.bf16.mxu1 %v739_v48  ;;  %v1010_v13 = vrot.slane %v5243_v35, 4  ;;  %v2627_v48 = vshrl.u32 %v5582_v55, 16 }
  0xb2   : > { %4494 = vmatprep.mubr.bf16.mxu0 %v5452_v5  ;;  %4523 = vmatpush3.bf16.msra.mxu0 %v4959_v9  ;;  %v4965_v5 = vld [vmem:[%s6042_s1 + $0x1f8] sm:$0xff]   ;;  %v1026_v9 = vrot.slane %v6082_v29, 4 }
  0xb3   : > { %4524 = vmatprep.subr.bf16.mxu0 %v4961_v47  ;;  %v1011_v11 = vor.u32 %v1010_v13, %v1009_v38  ;;  %v2629_v38 = vrot.slane %v2627_v48, 4 }
  0xb5   : > { %v5673_v2 = vsel %vm992_vm4, %v5656_v57, %v1011_v11 }
  0xb6   : > { %4525 = vmatpush3.bf16.msra.mxu0 %v4961_v47  ;;  %v2630_v47 = vshll.u32 %v5582_v55, 16  ;;  %v1034_v55 = vrot.slane %v5367_v50, 4 }
  0xb7   : > { %4526 = vmatprep.subr.bf16.mxu0 %v4963_v14 }
  0xb8   : > { %4271 = vmatmul.mubr.bf16.gmra.mrb[28].mxu1 %v748_v19  ;;  %v1030_v19 = vrot.slane %v5333_v21, 4  ;;  %v2632_v13 = vrot.slane %v2630_v47, 5 }
  0xb9   : > { %4495 = vmatmul.mubr.bf16.gmra.mrb[12].mxu0 %v5462_v52  ;;  %4290 = vmatprep.mubr.bf16.mxu1 %v5443_v18  ;;  %v1013_v52 = vrot.slane %v5252_v42, 3  ;;  %v1014_v18 = vrot.slane %v5255_v43, 4 }
  0xba   : > { %4498 = vmatprep.mubr.bf16.mxu0 %v5508_v26  ;;  %4527 = vmatpush3.bf16.msra.mxu0 %v4963_v14  ;;  %v1018_v26 = vrot.slane %v5288_v63, 4 }
  0xbb   : > { %4528 = vmatprep.subr.bf16.mxu0 %v4965_v5  ;;  %v1015_v36 = vor.u32 %v1014_v18, %v1013_v52  ;;  %v6084_v52 = vld [vmem:[#allocation16_spill] sm:$0xff]  ;;  %v2633_v18 = vor.u32 %v2632_v13, %v2629_v38 }
  0xbc   : > { %v1019_v15 = vor.u32 %v1018_v26, %v1017_v37 }
  0xbd   : > { %v5687_v25 = vsel %vm992_vm4, %v1011_v11, %v1015_v36  ;;  %v5722_v11 = vld [vmem:[#allocation2 + $0x10] sm:$0xe0] }
  0xbe   : > { %4529 = vmatpush3.bf16.msra.mxu0 %v4965_v5  ;;  %v4968_v5 = vld [vmem:[%s6042_s1 + $0xe8] sm:$0xff]   ;;  %v2928_v26 = vrot.slane %v5722_v11, 5 }
  0xbf   : > { %4562 = vmatprep.subr.bf16.mxu0 %v5662_v12 }
  0xc0   : > { %4291 = vmatmul.mubr.bf16.vlgmr.msra.gmra.mrb[0].mxu1 %v1008_v4 }
  0xc1   : > { %4499 = vmatmul.mubr.bf16.gmra.mrb[16].mxu0 %v5514_v54  ;;  %4323 = vmatpush3.bf16.msra.mxu1 %v5602_v61  ;;  %v6080_v54 = vld [vmem:[#allocation8_spill] sm:$0xff]  ;;  %v5692_v61 = vsel %vm992_vm4, %v1015_v36, %v1019_v15 }
  0xc2   : > { %4294 = vmatprep.mubr.bf16.mxu1 %v5673_v2  ;;  %4502 = vmatprep.mubr.bf16.mxu0 %v5540_v28  ;;  %v1022_v60 = vrot.slane %v6080_v54, 4  ;;  %v1025_v28 = vrot.slane %v6081_v33, 3 }
  0xc3   : > { %4324 = vmatprep.subr.bf16.mxu1 %v4960_v24 }
  0xc4   : > { %v1023_v53 = vor.u32 %v1022_v60, %v1021_v39  ;;  %v1027_v16 = vor.u32 %v1026_v9, %v1025_v28  ;;  %v1038_v39 = vrot.slane %v5382_v0, 4  ;;  %v6085_v60 = vld [vmem:[#allocation15_spill] sm:$0xff] }
  0xc5   : > { %4325 = vmatpush3.bf16.msra.mxu1 %v4960_v24  ;;  %v4978_v24 = vld [vmem:[#allocation2 + $0x18] sm:$0xff]  ;;  %v2634_v28 = vsel %vm2114_vm2, %v6085_v60, %v2633_v18  ;;  %v1049_v18 = vrot.slane %v5475_v27, 3 }
  0xc6   : > { %4326 = vmatprep.subr.bf16.mxu1 %v4962_v32  ;;  %v5709_v14 = vsel %vm992_vm4, %v1019_v15, %v1023_v53  ;;  %v5715_v3 = vsel %vm992_vm4, %v1023_v53, %v1027_v16  ;;  %v2929_v36 = vrot.slane %v4978_v24, 5  ;;  %v4970_v15 = vld [vmem:[%s6042_s1 + $0xf0] sm:$0xff]   ;;  %v1042_v53 = vrot.slane %v5420_v51, 4 }
  0xc8   : > { %4295 = vmatmul.mubr.bf16.gmra.mrb[4].mxu1 %v5687_v25  ;;  %v2930_v48 = vsel %vm2927_vm5, %v2928_v26, %v2929_v36  ;;  %v1050_v26 = vrot.slane %v5479_v6, 4 }
  0xc9   : > { %4503 = vmatmul.mubr.bf16.gmra.mrb[20].mxu0 %v5546_v45  ;;  %4298 = vmatprep.mubr.bf16.mxu1 %v5692_v61  ;;  %v1029_v45 = vrot.slane %v5330_v20, 3 }
  0xca   : > { %4506 = vmatprep.mubr.bf16.mxu0 %v5562_v23  ;;  %4327 = vmatpush3.bf16.msra.mxu1 %v4962_v32  ;;  %v1033_v23 = vrot.slane %v6083_v46, 3  ;;  %v1051_v60 = vor.u32 %v1050_v26, %v1049_v18  ;;  %v4984_v18 = vld [vmem:[#allocation2 + $0x40] sm:$0xff] }
  0xcb   : > { %4328 = vmatprep.subr.bf16.mxu1 %v4964_v56  ;;  %v1031_v4 = vor.u32 %v1030_v19, %v1029_v45  ;;  %v2939_v26 = vrot.slane %v4984_v18, 5 }
  0xcc   : > { %v1035_v37 = vor.u32 %v1034_v55, %v1033_v23  ;;  %v4980_v23 = vld [vmem:[#allocation2 + $0x28] sm:$0xff]  ;;  %v1045_v55 = vrot.slane %v5425_v1, 3 }
  0xcd   : > { %v5732_v32 = vsel %vm992_vm4, %v1027_v16, %v1031_v4  ;;  %v4972_v16 = vld [vmem:[%s6042_s1 + $0xf8] sm:$0xff]   ;;  %v2933_v38 = vrot.slane %v4980_v23, 5 }
  0xce   : > { %4329 = vmatpush3.bf16.msra.mxu1 %v4964_v56  ;;  %v5739_v9 = vsel %vm992_vm4, %v1031_v4, %v1035_v37  ;;  %v1041_v56 = vrot.slane %v5413_v30, 3 }
  0xcf   : > { %4330 = vmatprep.subr.bf16.mxu1 %v4966_v10 }
  0xd0   : > { %4299 = vmatmul.mubr.bf16.gmra.mrb[8].mxu1 %v5709_v14  ;;  %v1043_v19 = vor.u32 %v1042_v53, %v1041_v56  ;;  %v4971_v53 = vld [vmem:[%s6042_s1 + $0x210] sm:$0xff]  }
  0xd1   : > { %4507 = vmatmul.mubr.bf16.gmra.mrb[24].mxu0 %v5567_v17  ;;  %4302 = vmatprep.mubr.bf16.mxu1 %v5715_v3  ;;  %v1037_v17 = vrot.slane %v5379_v62, 3 }
  0xd2   : > { %4510 = vmatprep.mubr.bf16.mxu0 %v6084_v52  ;;  %4331 = vmatpush3.bf16.msra.mxu1 %v4966_v10  ;;  %v4979_v10 = vld [vmem:[#allocation2 + $0x20] sm:$0xff] }
  0xd3   : > { %4332 = vmatprep.subr.bf16.mxu1 %v4968_v5  ;;  %v1039_v47 = vor.u32 %v1038_v39, %v1037_v17  ;;  %v2931_v45 = vrot.slane %v4979_v10, 5  ;;  %v4982_v17 = vld [vmem:[#allocation2 + $0x30] sm:$0xff]  ;;  %v1058_v10 = vrot.slane %v5532_v40, 4  ;;  %v4974_v40 = vld [vmem:[%s6042_s1 + $0x220] sm:$0xff]  }
  0xd4   : > { %v2935_v39 = vrot.slane %v4982_v17, 5 }
  0xd5   : > { %v5750_v13 = vsel %vm992_vm4, %v1035_v37, %v1039_v47  ;;  %v2932_v4 = vsel %vm2927_vm5, %v2929_v36, %v2931_v45  ;;  %v5756_v52 = vsel %vm992_vm4, %v1039_v47, %v1043_v19  ;;  %v2934_v24 = vsel %vm2927_vm5, %v2931_v45, %v2933_v38  ;;  %v4969_v37 = vld [vmem:[%s6042_s1 + $0x208] sm:$0xff]  }
  0xd6   : > { %4333 = vmatpush3.bf16.msra.mxu1 %v4968_v5  ;;  %v1046_v5 = vrot.slane %v5436_v49, 4  ;;  %v1054_v47 = vrot.slane %v5489_v22, 4  ;;  %v2936_v45 = vsel %vm2927_vm5, %v2933_v38, %v2935_v39 }
  0xd7   : > { %4334 = vmatprep.subr.bf16.mxu1 %v4970_v15 }
  0xd8   : > { %4303 = vmatmul.mubr.bf16.gmra.mrb[12].mxu1 %v5732_v32  ;;  %v1047_v36 = vor.u32 %v1046_v5, %v1045_v55  ;;  %v974_v55 = vld [vmem:[#allocation2 + $0x80] sm:$0xf] }
  0xd9   : > { %4511 = vmatmul.mubr.bf16.gmra.mrb[28].mxu0 %v2634_v28  ;;  %4306 = vmatprep.mubr.bf16.mxu1 %v5739_v9  ;;  %v4983_v28 = vld [vmem:[#allocation2 + $0x38] sm:$0xff] }
  0xda   : > { %4530 = vmatprep.mubr.bf16.mxu0 %v2930_v48  ;;  %4335 = vmatpush3.bf16.msra.mxu1 %v4970_v15  ;;  %v5767_v15 = vld [vmem:[%s6042_s1 + $0x100] sm:$0xff]   ;;  %v2937_v56 = vrot.slane %v4983_v28, 5  ;;  %v1053_v48 = vrot.slane %v5482_v58, 3  ;;  %v5785_v23 = vsel %vm992_vm4, %v1047_v36, %v1051_v60  ;;  %v4985_v28 = vld [vmem:[#allocation2 + $0x48] sm:$0xff] }
  0xdb   : > { %4336 = vmatprep.subr.bf16.mxu1 %v4972_v16  ;;  %v2941_v8 = vrot.slane %v4985_v28, 5  ;;  %v4977_v28 = vld [vmem:[%s6042_s1 + $0x238] sm:$0xff]  }
  0xdc   : > { %v2938_v5 = vsel %vm2927_vm5, %v2935_v39, %v2937_v56  ;;  %v1055_v38 = vor.u32 %v1054_v47, %v1053_v48 }
  0xde   : > { %4337 = vmatpush3.bf16.msra.mxu1 %v4972_v16  ;;  %v5778_v16 = vsel %vm992_vm4, %v1043_v19, %v1047_v36  ;;  %v4973_v19 = vld [vmem:[%s6042_s1 + $0x218] sm:$0xff]   ;;  %v1065_v36 = vshll.u32 %v974_v55, 16  ;;  %v5800_v18 = vsel %vm992_vm4, %v1051_v60, %v1055_v38 }
  0xdf   : > { %4610 = vmatprep.subr.bf16.mxu1 %v5767_v15 }
  0xe0   : > { %4307 = vmatmul.mubr.bf16.gmra.mrb[16].mxu1 %v5750_v13 }
  0xe1   : > { %4531 = vmatmul.mubr.bf16.vlgmr.msra.gmra.mrb[0].mxu0 %v2932_v4  ;;  %4310 = vmatprep.mubr.bf16.mxu1 %v5756_v52  ;;  %v1327_v4 = vld [vmem:[#allocation2 + $0x8] sm:$0xf8] }
  0xe2   : > { %4563 = vmatpush3.bf16.msra.mxu0 %v5662_v12  ;;  %4534 = vmatprep.mubr.bf16.mxu0 %v2934_v24  ;;  %v1057_v12 = vrot.slane %v5529_v44, 3  ;;  %v1362_v17 = vshrl.u32 %v1327_v4, 16  ;;  %v1365_v39 = vshll.u32 %v1327_v4, 16 }
  0xe3   : > { %4564 = vmatprep.subr.bf16.mxu0 %v4969_v37 }
  0xe4   : > { %v5793_v24 = vor.u32 %v1058_v10, %v1057_v12  ;;  %v1364_v12 = vrot.slane %v1362_v17, 3  ;;  %v1367_v10 = vrot.slane %v1365_v39, 4 }
  0xe6   : > { %4565 = vmatpush3.bf16.msra.mxu0 %v4969_v37  ;;  %v1062_v37 = vshrl.u32 %v974_v55, 16  ;;  %v5804_v48 = vsel %vm992_vm4, %v1055_v38, %v5793_v24  ;;  %v2942_v55 = vsel %vm2927_vm5, %v2939_v26, %v2941_v8  ;;  %v1368_v4 = vor.u32 %v1367_v10, %v1364_v12  ;;  %v5815_v38 = vld [vmem:[#allocation2 + $0x58] sm:$0xff]  ;;  %v5841_v10 = vld [vmem:[#allocation2 + $0x70] sm:$0xff] }
  0xe7   : > { %4566 = vmatprep.subr.bf16.mxu0 %v4971_v53 }
  0xe8   : > { %4311 = vmatmul.mubr.bf16.gmra.mrb[20].mxu1 %v5778_v16  ;;  %v1064_v47 = vrot.slane %v1062_v37, 3  ;;  %v4976_v37 = vld [vmem:[%s6042_s1 + $0x230] sm:$0xff]   ;;  %v1377_v39 = vsel %vm992_vm4, %v1368_v4, %v5656_v57  ;;  %v6086_v4 = vld [vmem:[#allocation12_spill] sm:$0xff] }
  0xe9   : > { %4535 = vmatmul.mubr.bf16.gmra.mrb[4].mxu0 %v2936_v45  ;;  %4314 = vmatprep.mubr.bf16.mxu1 %v5785_v23  ;;  %v2940_v45 = vsel %vm2927_vm5, %v2937_v56, %v2939_v26  ;;  %v5812_v56 = vld [vmem:[#allocation2 + $0x50] sm:$0xff]  ;;  %v2945_v26 = vrot.slane %v5815_v38, 5 }
  0xea   : > { %4538 = vmatprep.mubr.bf16.mxu0 %v2938_v5  ;;  %4567 = vmatpush3.bf16.msra.mxu0 %v4971_v53  ;;  %v1067_v53 = vrot.slane %v1065_v36, 4  ;;  %v4975_v5 = vld [vmem:[%s6042_s1 + $0x228] sm:$0xff]  }
  0xeb   : > { %4568 = vmatprep.subr.bf16.mxu0 %v4973_v19 }
  0xec   : > { %v1068_v60 = vor.u32 %v1067_v53, %v1064_v47 }
  0xee   : > { %4569 = vmatpush3.bf16.msra.mxu0 %v4973_v19  ;;  %v2943_v19 = vrot.slane %v5812_v56, 5  ;;  %v1069_v36 = vsel %vm992_vm4, %v5793_v24, %v1068_v60  ;;  %v5847_v60 = vld [vmem:[#allocation2 + $0x78] sm:$0xff] }
  0xef   : > { %4570 = vmatprep.subr.bf16.mxu0 %v4974_v40 }
  0xf0   : > { %4315 = vmatmul.mubr.bf16.gmra.mrb[24].mxu1 %v5800_v18  ;;  %v2944_v17 = vsel %vm2927_vm5, %v2941_v8, %v2943_v19  ;;  %v5833_v8 = vld [vmem:[#allocation2 + $0x68] sm:$0xff] }
  0xf1   : > { %4539 = vmatmul.mubr.bf16.gmra.mrb[8].mxu0 %v2940_v45  ;;  %4318 = vmatprep.mubr.bf16.mxu1 %v5804_v48  ;;  %v5830_v45 = vld [vmem:[#allocation2 + $0x60] sm:$0xff]  ;;  %v2949_v57 = vrot.slane %v5833_v8, 5 }
  0xf2   : > { %4542 = vmatprep.mubr.bf16.mxu0 %v2942_v55  ;;  %4571 = vmatpush3.bf16.msra.mxu0 %v4974_v40  ;;  %v2946_v40 = vsel %vm2927_vm5, %v2943_v19, %v2945_v26  ;;  %v2947_v47 = vrot.slane %v5830_v45, 5  ;;  %v2951_v55 = vrot.slane %v5841_v10, 5  ;;  %v2953_v19 = vrot.slane %v5847_v60, 5 }
  0xf3   : > { %4572 = vmatprep.subr.bf16.mxu0 %v4975_v5 }
  0xf4   : > { %v2948_v53 = vsel %vm2927_vm5, %v2945_v26, %v2947_v47  ;;  %v2950_v12 = vsel %vm2927_vm5, %v2947_v47, %v2949_v57  ;;  %v2955_v26 = vrot.slane %v6086_v4, 5  ;;  %v3245_v47 = vrot.slane %v5240_v34, 5  ;;  %v4996_v34 = vld [vmem:[%s6042_s1 + $0x128] sm:$0xff]  }
  0xf6   : > { %4573 = vmatpush3.bf16.msra.mxu0 %v4975_v5  ;;  %v4991_v5 = vld [vmem:[%s6042_s1 + $0x108] sm:$0xff]  }
  0xf7   : > { %4574 = vmatprep.subr.bf16.mxu0 %v4976_v37 }
  0xf8   : > { %4319 = vmatmul.mubr.bf16.gmra.mrb[28].mxu1 %v1069_v36  ;;  %v3238_v36 = vshrl.u32 %v5722_v11, 16 }
  0xf9   : > { %4543 = vmatmul.mubr.bf16.gmra.mrb[12].mxu0 %v2944_v17  ;;  %4338 = vmatprep.mubr.bf16.mxu1 %v1377_v39  ;;  %v3241_v17 = vshll.u32 %v5722_v11, 16  ;;  %v2956_v39 = vsel %vm2927_vm5, %v2953_v19, %v2955_v26 }
  0xfa   : > { %4546 = vmatprep.mubr.bf16.mxu0 %v2946_v40  ;;  %4575 = vmatpush3.bf16.msra.mxu0 %v4976_v37  ;;  %v4994_v37 = vld [vmem:[%s6042_s1 + $0x118] sm:$0xff]  }
  0xfb   : > { %4576 = vmatprep.subr.bf16.mxu0 %v4977_v28 }
  0xfe   : > { %4577 = vmatpush3.bf16.msra.mxu0 %v4977_v28  ;;  %v3243_v28 = vrot.slane %v3241_v17, 6  ;;  %v6089_v17 = vld [vmem:[#allocation14_spill] sm:$0xff] }
 0x100   : > { %4339 = vmatmul.mubr.bf16.vlgmr.msra.gmra.mrb[0].mxu1 %v5673_v2  ;;  %v2952_v2 = vsel %vm2927_vm5, %v2949_v57, %v2951_v55  ;;  %v3246_v57 = vrot.slane %v5243_v35, 6  ;;  %v3249_v35 = vrot.slane %v5252_v42, 5 }
 0x101   : > { %4547 = vmatmul.mubr.bf16.gmra.mrb[16].mxu0 %v2948_v53  ;;  %4618 = vmatpush3.bf16.msra.mxu1 %v5767_v15  ;;  %v2954_v15 = vsel %vm2927_vm5, %v2951_v55, %v2953_v19  ;;  %v4995_v53 = vld [vmem:[%s6042_s1 + $0x120] sm:$0xff]   ;;  %v3250_v55 = vrot.slane %v5255_v43, 6  ;;  %v4997_v19 = vld [vmem:[%s6042_s1 + $0x130] sm:$0xff]  }
 0x102   : > { %4342 = vmatprep.mubr.bf16.mxu1 %v5687_v25  ;;  %4550 = vmatprep.mubr.bf16.mxu0 %v2950_v12  ;;  %v4993_v25 = vld [vmem:[%s6042_s1 + $0x110] sm:$0xff]   ;;  %v3247_v12 = vor.u32 %v3246_v57, %v3245_v47 }
 0x103   : > { %4611 = vmatprep.subr.bf16.mxu1 %v4991_v5  ;;  %v3251_v42 = vor.u32 %v3250_v55, %v3249_v35  ;;  %v1823_v35 = vrot.slane %v5812_v56, 4  ;;  %v6090_v55 = vld [vmem:[#allocation6_spill] sm:$0xff]  ;;  %v1825_v56 = vrot.slane %v5815_v38, 4  ;;  %v6092_v38 = vld [vmem:[#allocation17_spill] sm:$0xff] }
 0x105   : > { %4619 = vmatpush3.bf16.msra.mxu1 %v4991_v5  ;;  %v3253_v5 = vrot.slane %v5282_v59, 5  ;;  %v4998_v59 = vld [vmem:[%s6042_s1 + $0x138] sm:$0xff]  }
 0x106   : > { %4612 = vmatprep.subr.bf16.mxu1 %v4993_v25 }
 0x108   : > { %4343 = vmatmul.mubr.bf16.gmra.mrb[4].mxu1 %v5692_v61  ;;  %v6087_v61 = vrot.slane %v5433_v7, 5 }
 0x109   : > { %4551 = vmatmul.mubr.bf16.gmra.mrb[20].mxu0 %v2952_v2  ;;  %4346 = vmatprep.mubr.bf16.mxu1 %v5709_v14  ;;  %v3240_v14 = vrot.slane %v3238_v36, 5  ;;  %v3258_v2 = vrot.slane %v6080_v54, 6  ;;  %v3265_v54 = vrot.slane %v5330_v20, 5 }
 0x10a   : > { %4554 = vmatprep.mubr.bf16.mxu0 %v2954_v15  ;;  %4620 = vmatpush3.bf16.msra.mxu1 %v4993_v25  ;;  %v2958_v40 = vsel %vm2927_vm5, %v2955_v26, %v6087_v61  ;;  %v3252_v25 = vsel %vm3236_vm6, %v3247_v12, %v3251_v42  ;;  %v3266_v26 = vrot.slane %v5333_v21, 6 }
 0x10b   : > { %4613 = vmatprep.subr.bf16.mxu1 %v4994_v37  ;;  %v3244_v11 = vor.u32 %v3243_v28, %v3240_v14 }
 0x10c   : > { %v3267_v61 = vor.u32 %v3266_v26, %v3265_v54  ;;  %v6093_v26 = vshrl.u32 %v5433_v7, 16 }
 0x10e   : > { %4621 = vmatpush3.bf16.msra.mxu1 %v4994_v37  ;;  %v6088_v37 = vld [vmem:[#allocation13_spill] sm:$0xff] }
 0x10f   : > { %4614 = vmatprep.subr.bf16.mxu1 %v4995_v53  ;;  %v1498_v36 = vrot.slane %v6088_v37, 3 }
 0x110   : > { %4347 = vmatmul.mubr.bf16.gmra.mrb[8].mxu1 %v5715_v3  ;;  %v3248_v3 = vsel %vm3236_vm6, %v3244_v11, %v3247_v12  ;;  %v3278_v11 = vrot.slane %v5420_v51, 6  ;;  %v3281_v51 = vrot.slane %v5425_v1, 5  ;;  %v1826_v1 = vsel %vm1805_vm1, %v1823_v35, %v1825_v56 }
 0x111   : > { %4555 = vmatmul.mubr.bf16.gmra.mrb[24].mxu0 %v2956_v39  ;;  %4350 = vmatprep.mubr.bf16.mxu1 %v5732_v32  ;;  %v3254_v32 = vrot.slane %v5288_v63, 6  ;;  %v3257_v63 = vrot.slane %v6079_v41, 5  ;;  %v5904_v39 = vld [vmem:[#allocation2 + $0x88] sm:$0xf] }
 0x112   : > { %4558 = vmatprep.mubr.bf16.mxu0 %v2958_v40  ;;  %4622 = vmatpush3.bf16.msra.mxu1 %v4995_v53  ;;  %v1505_v20 = vshrl.u32 %v5904_v39, 16  ;;  %v1508_v21 = vshll.u32 %v5904_v39, 16  ;;  %v3277_v53 = vrot.slane %v5413_v30, 5 }
 0x113   : > { %4615 = vmatprep.subr.bf16.mxu1 %v4996_v34  ;;  %v3255_v43 = vor.u32 %v3254_v32, %v3253_v5  ;;  %v3259_v15 = vor.u32 %v3258_v2, %v3257_v63  ;;  %v3285_v32 = vrot.slane %v5475_v27, 5  ;;  %v3289_v27 = vrot.slane %v5482_v58, 5 }
 0x114   : > { %v1507_v28 = vrot.slane %v1505_v20, 3  ;;  %v1510_v47 = vrot.slane %v1508_v21, 4 }
 0x115   : > { %v3260_v41 = vsel %vm3236_vm6, %v3255_v43, %v3259_v15 }
 0x116   : > { %4623 = vmatpush3.bf16.msra.mxu1 %v4996_v34  ;;  %v1511_v12 = vor.u32 %v1510_v47, %v1507_v28 }
 0x117   : > { %4616 = vmatprep.subr.bf16.mxu1 %v4997_v19 }
 0x118   : > { %4351 = vmatmul.mubr.bf16.gmra.mrb[12].mxu1 %v5739_v9  ;;  %v3261_v9 = vrot.slane %v6081_v33, 5  ;;  %v1501_v33 = vrot.slane %v6089_v17, 4 }
 0x119   : > { %4559 = vmatmul.mubr.bf16.gmra.mrb[28].mxu0 %v5597_v31  ;;  %4354 = vmatprep.mubr.bf16.mxu1 %v5750_v13  ;;  %v3256_v31 = vsel %vm3236_vm6, %v3251_v42, %v3255_v43  ;;  %v3262_v13 = vrot.slane %v6082_v29, 6  ;;  %v1827_v43 = vrot.slane %v5830_v45, 4  ;;  %v1829_v45 = vrot.slane %v5833_v8, 4 }
 0x11a   : > { %4578 = vmatprep.mubr.bf16.mxu0 %v3248_v3  ;;  %4624 = vmatpush3.bf16.msra.mxu1 %v4997_v19  ;;  %v1502_v40 = vor.u32 %v1501_v33, %v1498_v36  ;;  %v6091_v3 = vrot.slane %v6090_v55, 4  ;;  %v3286_v19 = vrot.slane %v5479_v6, 6  ;;  %v3290_v6 = vrot.slane %v5489_v22, 6 }
 0x11b   : > { %4617 = vmatprep.subr.bf16.mxu1 %v4998_v59  ;;  %v3263_v4 = vor.u32 %v3262_v13, %v3261_v9  ;;  %v1828_v63 = vsel %vm1805_vm1, %v1825_v56, %v1827_v43  ;;  %v1831_v13 = vrot.slane %v5841_v10, 4  ;;  %v1830_v58 = vsel %vm1805_vm1, %v1827_v43, %v1829_v45  ;;  %v3218_v10 = vld [vmem:[#allocation2 + $0x90] sm:$0x3f] }
 0x11c   : > { %v1824_v30 = vsel %vm1805_vm1, %v6091_v3, %v1823_v35  ;;  %v3291_v9 = vor.u32 %v3290_v6, %v3289_v27  ;;  %v3301_v8 = vrot.slane %v6093_v26, 5  ;;  %v6094_v36 = vshll.u32 %v5433_v7, 16 }
 0x11d   : > { %v3264_v29 = vsel %vm3236_vm6, %v3259_v15, %v3263_v4  ;;  %v3268_v57 = vsel %vm3236_vm6, %v3263_v4, %v3267_v61  ;;  %v1832_v4 = vsel %vm1805_vm1, %v1829_v45, %v1831_v13  ;;  %v3306_v20 = vshrl.u32 %v3218_v10, 16 }
 0x11e   : > { %4625 = vmatpush3.bf16.msra.mxu1 %v4998_v59  ;;  %v3287_v59 = vor.u32 %v3286_v19, %v3285_v32  ;;  %v3302_v33 = vrot.slane %v6094_v36, 6  ;;  %v5966_v32 = vld [vmem:[%s6043_s2] ss:$0 sm:$0xff] }
 0x120   : > { %4355 = vmatmul.mubr.bf16.gmra.mrb[16].mxu1 %v5756_v52  ;;  %v3269_v52 = vrot.slane %v6083_v46, 5  ;;  %v3273_v46 = vrot.slane %v5379_v62, 5  ;;  %v1512_v62 = vsel %vm992_vm4, %v1502_v40, %v1511_v12  ;;  %v3292_v22 = vsel %vm3236_vm6, %v3287_v59, %v3291_v9 }
 0x121   : > { %4579 = vmatmul.mubr.bf16.vlgmr.msra.gmra.mrb[0].mxu0 %v3252_v25  ;;  %4358 = vmatprep.mubr.bf16.mxu1 %v5778_v16  ;;  %v3270_v16 = vrot.slane %v5367_v50, 6  ;;  %v1503_v50 = vsel %vm992_vm4, %v5793_v24, %v1502_v40  ;;  %v3279_v24 = vor.u32 %v3278_v11, %v3277_v53  ;;  %v3293_v25 = vrot.slane %v5529_v44, 5 }
 0x122   : > { %4582 = vmatprep.mubr.bf16.mxu0 %v3256_v31  ;;  %v3294_v31 = vrot.slane %v6092_v38, 6  ;;  %v3297_v44 = vrot.slane %v6088_v37, 5  ;;  %v3303_v21 = vor.u32 %v3302_v33, %v3301_v8 }
 0x123   : > { %v3271_v14 = vor.u32 %v3270_v16, %v3269_v52  ;;  %v4999_v16 = vld [vmem:[#allocation2 + $0x80] sm:$0xff] }
 0x124   : > { %v3295_v15 = vor.u32 %v3294_v31, %v3293_v25  ;;  %v1835_v37 = vrot.slane %v4999_v16, 4 }
 0x126   : > { %v3296_v54 = vsel %vm3236_vm6, %v3291_v9, %v3295_v15 }
 0x128   : > { %4359 = vmatmul.mubr.bf16.gmra.mrb[20].mxu1 %v5785_v23  ;;  %v3274_v23 = vrot.slane %v5382_v0, 6 }
 0x129   : > { %4583 = vmatmul.mubr.bf16.gmra.mrb[4].mxu0 %v3260_v41  ;;  %4362 = vmatprep.mubr.bf16.mxu1 %v5800_v18  ;;  %v3272_v18 = vsel %vm3236_vm6, %v3267_v61, %v3271_v14  ;;  %v3298_v41 = vrot.slane %v6089_v17, 6  ;;  %v3309_v17 = vshll.u32 %v3218_v10, 16 }
 0x12a   : > { %4586 = vmatprep.mubr.bf16.mxu0 %v3264_v29  ;;  %v3275_v34 = vor.u32 %v3274_v23, %v3273_v46  ;;  %v1833_v29 = vrot.slane %v5847_v60, 4  ;;  %v1837_v60 = vrot.slane %v5904_v39, 4 }
 0x12b   : > { %v3299_v52 = vor.u32 %v3298_v41, %v3297_v44  ;;  %v3311_v28 = vrot.slane %v3309_v17, 6 }
 0x12c   : > { %v3276_v0 = vsel %vm3236_vm6, %v3271_v14, %v3275_v34  ;;  %v3280_v5 = vsel %vm3236_vm6, %v3275_v34, %v3279_v24  ;;  %v1834_v61 = vsel %vm1805_vm1, %v1831_v13, %v1833_v29  ;;  %v1836_v7 = vsel %vm1805_vm1, %v1833_v29, %v1835_v37 }
 0x12d   : > { %v3300_v40 = vsel %vm3236_vm6, %v3295_v15, %v3299_v52  ;;  %v3308_v14 = vrot.slane %v3306_v20, 5  ;;  %v3304_v47 = vsel %vm3236_vm6, %v3299_v52, %v3303_v21 }
 0x130   : > { %4363 = vmatmul.mubr.bf16.gmra.mrb[24].mxu1 %v5804_v48  ;;  %v3282_v48 = vrot.slane %v5436_v49, 6 }
 0x131   : > { %4587 = vmatmul.mubr.bf16.gmra.mrb[8].mxu0 %v3268_v57  ;;  %4366 = vmatprep.mubr.bf16.mxu1 %v1503_v50  ;;  %v3312_v57 = vor.u32 %v3311_v28, %v3308_v14  ;;  %v1838_v50 = vsel %vm1805_vm1, %v1835_v37, %v1837_v60 }
 0x132   : > { %4590 = vmatprep.mubr.bf16.mxu0 %v3272_v18  ;;  %v3283_v42 = vor.u32 %v3282_v48, %v3281_v51 }
 0x133   : > { %v3313_v46 = vsel %vm3236_vm6, %v3303_v21, %v3312_v57 }
 0x134   : > { %v3284_v49 = vsel %vm3236_vm6, %v3279_v24, %v3283_v42  ;;  %v3288_v2 = vsel %vm3236_vm6, %v3283_v42, %v3287_v59 }
 0x138   : > { %4367 = vmatmul.mubr.bf16.gmra.mrb[28].mxu1 %v1512_v62 }
 0x139   : > { %4591 = vmatmul.mubr.bf16.gmra.mrb[12].mxu0 %v3276_v0  ;;  %4402 = vmatprep.mubr.bf16.mxu1 %v1824_v30 }
 0x13a   : > { %4594 = vmatprep.mubr.bf16.mxu0 %v3280_v5 }
 0x140   : > { %4403 = vmatmul.mubr.bf16.vlgmr.msra.gmra.mrb[16].mxu1 %v1826_v1 }
 0x141   : > { %4595 = vmatmul.mubr.bf16.gmra.mrb[16].mxu0 %v3284_v49  ;;  %4406 = vmatprep.mubr.bf16.mxu1 %v1828_v63 }
 0x142   : > { %4598 = vmatprep.mubr.bf16.mxu0 %v3288_v2 }
 0x148   : > { %4407 = vmatmul.mubr.bf16.gmra.mrb[20].mxu1 %v1830_v58 }
 0x149   : > { %4599 = vmatmul.mubr.bf16.gmra.mrb[20].mxu0 %v3292_v22  ;;  %4410 = vmatprep.mubr.bf16.mxu1 %v1832_v4 }
 0x14a   : > { %4602 = vmatprep.mubr.bf16.mxu0 %v3296_v54 }
 0x150   : > { %4411 = vmatmul.mubr.bf16.gmra.mrb[24].mxu1 %v1834_v61 }
 0x151   : > { %4603 = vmatmul.mubr.bf16.gmra.mrb[24].mxu0 %v3300_v40  ;;  %4414 = vmatprep.mubr.bf16.mxu1 %v1836_v7 }
 0x152   : > { %4606 = vmatprep.mubr.bf16.mxu0 %v3304_v47 }
 0x158   : > { %4415 = vmatmul.mubr.bf16.gmra.mrb[28].mxu1 %v1838_v50 }
 0x159   : > { %4607 = vmatmul.mubr.bf16.gmra.mrb[28].mxu0 %v3313_v46 }
 0x1d3   : > { %v4340_v23 = vpop.f32.mrb[0].mxu1 }
 0x1d4   : > { %v1611_v18 = vpop.f32.mrb[1].mxu1 }
 0x1d5   : > { %v4341_v53 = vpop.f32.mrb[2].mxu1 }
 0x1d6   : > { %v1614_v11 = vpop.f32.mrb[3].mxu1 }
 0x1db   : > { %v4344_v12 = vpop.f32.mrb[4].mxu1 }
 0x1dc   : > { %v1627_v34 = vpop.f32.mrb[5].mxu1 }
 0x1dd   : > { %v4345_v35 = vpop.f32.mrb[6].mxu1 }
 0x1de   : > { %v1630_v24 = vpop.f32.mrb[7].mxu1 }
 0x1e3   : > { %v4348_v62 = vpop.f32.mrb[8].mxu1 }
 0x1e4   : > { %v1643_v0 = vpop.f32.mrb[9].mxu1 }
 0x1e5   : > { %v4349_v55 = vpop.f32.mrb[10].mxu1 }
 0x1e6   : > { %v1646_v39 = vpop.f32.mrb[11].mxu1 }
 0x1eb   : > { %v4352_v3 = vpop.f32.mrb[12].mxu1 }
 0x1ec   : > { %v1659_v30 = vpop.f32.mrb[13].mxu1 }
 0x1ed   : > { %v4353_v51 = vpop.f32.mrb[14].mxu1 }
 0x1ee   : > { %v1662_v48 = vpop.f32.mrb[15].mxu1 }
 0x1f4   : > { %v4580_v5 = vpop.f32.mrb[0].mxu0 }
 0x1f5   : > { %v4626_v19 = vadd.f32 %v4580_v5, %v4340_v23  ;;  %v3412_v56 = vpop.f32.mrb[1].mxu0 }
 0x1f6   : > { %v4627_v42 = vadd.f32 %v3412_v56, %v1611_v18  ;;  %v4581_v43 = vpop.f32.mrb[2].mxu0 }
 0x1f7   : > { %v3580_v59 = vadd.f32 %v4626_v19, %v5966_v32  ;;  %v4628_v1 = vadd.f32 %v4581_v43, %v4341_v53  ;;  %v3415_v49 = vpop.f32.mrb[3].mxu0 }
 0x1f8   : > { %v3578_v63 = vadd.f32 %v4627_v42, %v5966_v32  ;;  %v4629_v27 = vadd.f32 %v3415_v49, %v1614_v11 }
 0x1f9   : > { %3612 = vst [vmem:[%s5075_s26 + $0x10] sm:$0xff] %v3580_v59  ;;  %v3581_v6 = vadd.f32 %v4628_v1, %v5966_v32 }
 0x1fa   : > { %3610 = vst [vmem:[%s5075_s26] sm:$0xff] %v3578_v63  ;;  %v3579_v2 = vadd.f32 %v4629_v27, %v5966_v32 }
 0x1fb   : > { %3613 = vst [vmem:[%s5075_s26 + $0x18] sm:$0xff] %v3581_v6 }
 0x1fc   : > { %3611 = vst [vmem:[%s5075_s26 + $0x8] sm:$0xff] %v3579_v2  ;;  %v4584_v25 = vpop.f32.mrb[4].mxu0 }
 0x1fd   : > { %v4630_v38 = vadd.f32 %v4584_v25, %v4344_v12  ;;  %v3428_v31 = vpop.f32.mrb[5].mxu0 }
 0x1fe   : > { %v4631_v45 = vadd.f32 %v3428_v31, %v1627_v34  ;;  %v4585_v9 = vpop.f32.mrb[6].mxu0 }
 0x1ff   : > { %v3584_v13 = vadd.f32 %v4630_v38, %v5966_v32  ;;  %v4632_v15 = vadd.f32 %v4585_v9, %v4345_v35  ;;  %v3431_v58 = vpop.f32.mrb[7].mxu0 }
 0x200   : > { %v3582_v22 = vadd.f32 %v4631_v45, %v5966_v32  ;;  %v4633_v4 = vadd.f32 %v3431_v58, %v1630_v24 }
 0x201   : > { %3616 = vst [vmem:[%s5075_s26 + $0x30] sm:$0xff] %v3584_v13  ;;  %v3585_v44 = vadd.f32 %v4632_v15, %v5966_v32 }
 0x202   : > { %3614 = vst [vmem:[%s5075_s26 + $0x20] sm:$0xff] %v3582_v22  ;;  %v3583_v41 = vadd.f32 %v4633_v4, %v5966_v32 }
 0x203   : > { %3617 = vst [vmem:[%s5075_s26 + $0x38] sm:$0xff] %v3585_v44 }
 0x204   : > { %3615 = vst [vmem:[%s5075_s26 + $0x28] sm:$0xff] %v3583_v41  ;;  %v4588_v54 = vpop.f32.mrb[8].mxu0 }
 0x205   : > { %v4634_v26 = vadd.f32 %v4588_v54, %v4348_v62  ;;  %v3444_v8 = vpop.f32.mrb[9].mxu0 }
 0x206   : > { %v4635_v36 = vadd.f32 %v3444_v8, %v1643_v0  ;;  %v4589_v33 = vpop.f32.mrb[10].mxu0 }
 0x207   : > { %v3588_v10 = vadd.f32 %v4634_v26, %v5966_v32  ;;  %v4636_v29 = vadd.f32 %v4589_v33, %v4349_v55  ;;  %v3447_v52 = vpop.f32.mrb[11].mxu0 }
 0x208   : > { %v3586_v16 = vadd.f32 %v4635_v36, %v5966_v32  ;;  %v4637_v37 = vadd.f32 %v3447_v52, %v1646_v39 }
 0x209   : > { %3620 = vst [vmem:[%s5075_s26 + $0x50] sm:$0xff] %v3588_v10  ;;  %v3589_v20 = vadd.f32 %v4636_v29, %v5966_v32 }
 0x20a   : > { %3618 = vst [vmem:[%s5075_s26 + $0x40] sm:$0xff] %v3586_v16  ;;  %v3587_v17 = vadd.f32 %v4637_v37, %v5966_v32 }
 0x20b   : > { %3621 = vst [vmem:[%s5075_s26 + $0x58] sm:$0xff] %v3589_v20 }
 0x20c   : > { %3619 = vst [vmem:[%s5075_s26 + $0x48] sm:$0xff] %v3587_v17  ;;  %v4592_v21 = vpop.f32.mrb[12].mxu0 }
 0x20d   : > { %v4638_v61 = vadd.f32 %v4592_v21, %v4352_v3  ;;  %v3460_v40 = vpop.f32.mrb[13].mxu0 }
 0x20e   : > { %v4639_v7 = vadd.f32 %v3460_v40, %v1659_v30  ;;  %v4593_v14 = vpop.f32.mrb[14].mxu0 }
 0x20f   : > { %v3592_v28 = vadd.f32 %v4638_v61, %v5966_v32  ;;  %v4640_v47 = vadd.f32 %v4593_v14, %v4353_v51  ;;  %v3463_v60 = vpop.f32.mrb[15].mxu0 }
 0x210   : > { %v3590_v57 = vadd.f32 %v4639_v7, %v5966_v32  ;;  %v4641_v50 = vadd.f32 %v3463_v60, %v1662_v48 }
 0x211   : > { %3624 = vst [vmem:[%s5075_s26 + $0x70] sm:$0xff] %v3592_v28  ;;  %v3593_v46 = vadd.f32 %v4640_v47, %v5966_v32 }
 0x212   : > { %3622 = vst [vmem:[%s5075_s26 + $0x60] sm:$0xff] %v3590_v57  ;;  %v3591_v23 = vadd.f32 %v4641_v50, %v5966_v32 }
 0x213   : > { %3625 = vst [vmem:[%s5075_s26 + $0x78] sm:$0xff] %v3593_v46  ;;  %v4404_v18 = vpop.f32.mrb[16].mxu1 }
 0x214   : > { %3623 = vst [vmem:[%s5075_s26 + $0x68] sm:$0xff] %v3591_v23  ;;  %v4596_v53 = vpop.f32.mrb[16].mxu0  ;;  %v2001_v11 = vpop.f32.mrb[17].mxu1 }
 0x215   : > { %v4642_v12 = vadd.f32 %v4596_v53, %v4404_v18  ;;  %v3476_v34 = vpop.f32.mrb[17].mxu0  ;;  %v4405_v35 = vpop.f32.mrb[18].mxu1 }
 0x216   : > { %v4643_v24 = vadd.f32 %v3476_v34, %v2001_v11  ;;  %v4597_v62 = vpop.f32.mrb[18].mxu0  ;;  %v2004_v0 = vpop.f32.mrb[19].mxu1 }
 0x217   : > { %v3596_v55 = vadd.f32 %v4642_v12, %v5966_v32  ;;  %v4644_v39 = vadd.f32 %v4597_v62, %v4405_v35  ;;  %v3479_v3 = vpop.f32.mrb[19].mxu0 }
 0x218   : > { %v3594_v30 = vadd.f32 %v4643_v24, %v5966_v32  ;;  %v4645_v51 = vadd.f32 %v3479_v3, %v2004_v0 }
 0x219   : > { %3628 = vst [vmem:[%s5075_s26 + $0x90] sm:$0xff] %v3596_v55  ;;  %v3597_v48 = vadd.f32 %v4644_v39, %v5966_v32 }
 0x21a   : > { %3626 = vst [vmem:[%s5075_s26 + $0x80] sm:$0xff] %v3594_v30  ;;  %v3595_v5 = vadd.f32 %v4645_v51, %v5966_v32 }
 0x21b   : > { %3629 = vst [vmem:[%s5075_s26 + $0x98] sm:$0xff] %v3597_v48  ;;  %v4408_v19 = vpop.f32.mrb[20].mxu1 }
 0x21c   : > { %3627 = vst [vmem:[%s5075_s26 + $0x88] sm:$0xff] %v3595_v5  ;;  %v4600_v56 = vpop.f32.mrb[20].mxu0  ;;  %v2017_v42 = vpop.f32.mrb[21].mxu1 }
 0x21d   : > { %v4646_v43 = vadd.f32 %v4600_v56, %v4408_v19  ;;  %v3492_v59 = vpop.f32.mrb[21].mxu0  ;;  %v4409_v1 = vpop.f32.mrb[22].mxu1 }
 0x21e   : > { %v4647_v49 = vadd.f32 %v3492_v59, %v2017_v42  ;;  %v4601_v63 = vpop.f32.mrb[22].mxu0  ;;  %v2020_v27 = vpop.f32.mrb[23].mxu1 }
 0x21f   : > { %v3600_v6 = vadd.f32 %v4646_v43, %v5966_v32  ;;  %v4648_v2 = vadd.f32 %v4601_v63, %v4409_v1  ;;  %v3495_v25 = vpop.f32.mrb[23].mxu0 }
 0x220   : > { %v3598_v38 = vadd.f32 %v4647_v49, %v5966_v32  ;;  %v4649_v31 = vadd.f32 %v3495_v25, %v2020_v27 }
 0x221   : > { %3632 = vst [vmem:[%s5075_s26 + $0xb0] sm:$0xff] %v3600_v6  ;;  %v3601_v45 = vadd.f32 %v4648_v2, %v5966_v32 }
 0x222   : > { %3630 = vst [vmem:[%s5075_s26 + $0xa0] sm:$0xff] %v3598_v38  ;;  %v3599_v9 = vadd.f32 %v4649_v31, %v5966_v32 }
 0x223   : > { %3633 = vst [vmem:[%s5075_s26 + $0xb8] sm:$0xff] %v3601_v45  ;;  %v4412_v13 = vpop.f32.mrb[24].mxu1 }
 0x224   : > { %3631 = vst [vmem:[%s5075_s26 + $0xa8] sm:$0xff] %v3599_v9  ;;  %v4604_v15 = vpop.f32.mrb[24].mxu0  ;;  %v2033_v58 = vpop.f32.mrb[25].mxu1 }
 0x225   : > { %v4650_v22 = vadd.f32 %v4604_v15, %v4412_v13  ;;  %v3508_v4 = vpop.f32.mrb[25].mxu0  ;;  %v4413_v44 = vpop.f32.mrb[26].mxu1 }
 0x226   : > { %v4651_v41 = vadd.f32 %v3508_v4, %v2033_v58  ;;  %v4605_v54 = vpop.f32.mrb[26].mxu0  ;;  %v2036_v26 = vpop.f32.mrb[27].mxu1 }
 0x227   : > { %v3604_v8 = vadd.f32 %v4650_v22, %v5966_v32  ;;  %v4652_v36 = vadd.f32 %v4605_v54, %v4413_v44  ;;  %v3511_v33 = vpop.f32.mrb[27].mxu0 }
 0x228   : > { %v3602_v10 = vadd.f32 %v4651_v41, %v5966_v32  ;;  %v4653_v29 = vadd.f32 %v3511_v33, %v2036_v26 }
 0x229   : > { %3636 = vst [vmem:[%s5075_s26 + $0xd0] sm:$0xff] %v3604_v8  ;;  %v3605_v52 = vadd.f32 %v4652_v36, %v5966_v32 }
 0x22a   : > { %3634 = vst [vmem:[%s5075_s26 + $0xc0] sm:$0xff] %v3602_v10  ;;  %v3603_v16 = vadd.f32 %v4653_v29, %v5966_v32 }
 0x22b   : > { %3637 = vst [vmem:[%s5075_s26 + $0xd8] sm:$0xff] %v3605_v52  ;;  %v4416_v37 = vpop.f32.mrb[28].mxu1 }
 0x22c   : > { %3635 = vst [vmem:[%s5075_s26 + $0xc8] sm:$0xff] %v3603_v16  ;;  %v4608_v20 = vpop.f32.mrb[28].mxu0  ;;  %v2049_v17 = vpop.f32.mrb[29].mxu1 }
 0x22d   : > { %v4654_v21 = vadd.f32 %v4608_v20, %v4416_v37  ;;  %v3524_v61 = vpop.f32.mrb[29].mxu0  ;;  %v4417_v40 = vpop.f32.mrb[30].mxu1 }
 0x22e   : > { %v4655_v7 = vadd.f32 %v3524_v61, %v2049_v17  ;;  %v4609_v14 = vpop.f32.mrb[30].mxu0  ;;  %v2052_v28 = vpop.f32.mrb[31].mxu1 }
 0x22f   : > { %v3608_v47 = vadd.f32 %v4654_v21, %v5966_v32  ;;  %v4656_v60 = vadd.f32 %v4609_v14, %v4417_v40  ;;  %v3527_v57 = vpop.f32.mrb[31].mxu0 }
 0x230   : > { %v3606_v50 = vadd.f32 %v4655_v7, %v5966_v32  ;;  %v4657_v46 = vadd.f32 %v3527_v57, %v2052_v28 }
 0x231   : > { %3640 = vst [vmem:[%s5075_s26 + $0xf0] sm:$0xff] %v3608_v47  ;;  %v3609_v23 = vadd.f32 %v4656_v60, %v5966_v32 }
 0x232   : > { %3638 = vst [vmem:[%s5075_s26 + $0xe0] sm:$0xff] %v3606_v50  ;;  %v3607_v18 = vadd.f32 %v4657_v46, %v5966_v32 }
 0x233   : > { %3641 = vst [vmem:[%s5075_s26 + $0xf8] sm:$0xff] %v3609_v23 }
 0x234   : > { %3639 = vst [vmem:[%s5075_s26 + $0xe8] sm:$0xff] %v3607_v18 }
 0x235 PF: > { %s13_s14 = sadd.s32 1, %s5024_s14   ;;  %s6095_s12 = smov %s5020_s13 }
 0x236   : > { %p10_p5 = scmp.ge.s32.totalorder %s13_s14, 5   ;;  %s6096_s13 = smov %s6098_s15 }
 0x238   :  { %12 = sbr.rel (!%p10_p5) target bundleno = 2 (0x2), region = 116 }
 0x23f   :  { %3670 = vsyncmov [#allocation3] }
 0x242   :  { %s3671_s28 = vpop.sfrf %3670 }
 0x243   :  { %p3961_p6 = scmp.ne.s32.totalorder %s3671_s28, 0 }
 0x245   :  { %3675 = shalt.err (%p3961_p6)  }

// kernel: wideresnet_forward.39
= control target key start
LH: loop header
LB: loop body
LE: loop exit
PB: predicated region body
PF: predicated region fallthrough
CT: control target
= control target key end

     0   :  { %s391_s0 = inlined_call_operand.vmem [shape: f32[128,128], index: 0, kind: input, shape index: {}]   ;;  %s392_s1 = inlined_call_operand.vmem [shape: f32[1,128], index: 1, kind: input, shape index: {}]   ;;  %s393_s2 = inlined_call_operand.vmem [shape: f32[1,128], index: 2, kind: input, shape index: {}]   ;;  %s394_s3 = inlined_call_operand.vmem [shape: bf16[128,128], index: 3, kind: output, shape index: {}]  }
   0x1   :  { %v14_v0 = vld [vmem:[%s391_s0] sm:$0xff]  ;;  %v15_v1 = vld [vmem:[%s391_s0 + $0x8] sm:$0xff]  ;;  %v16_v6 = vld [vmem:[%s391_s0 + $0x10] sm:$0xff] }
   0x2   :  { %v286_v2 = vld [vmem:[%s392_s1] ss:$0 sm:$0xff]  ;;  %v17_v7 = vld [vmem:[%s391_s0 + $0x18] sm:$0xff]  ;;  %v19_v11 = vld [vmem:[%s391_s0 + $0x28] sm:$0xff] }
   0x3   :  { %v37_v3 = vmul.f32 %v286_v2, %v14_v0  ;;  %v38_v4 = vmul.f32 %v286_v2, %v15_v1  ;;  %v293_v5 = vld [vmem:[%s393_s2] ss:$0 sm:$0xff]  ;;  %v39_v8 = vmul.f32 %v286_v2, %v16_v6  ;;  %v40_v9 = vmul.f32 %v286_v2, %v17_v7  ;;  %v20_v12 = vld [vmem:[%s391_s0 + $0x30] sm:$0xff]  ;;  %v21_v17 = vld [vmem:[%s391_s0 + $0x38] sm:$0xff] }
   0x4   :  { %v18_v10 = vld [vmem:[%s391_s0 + $0x20] sm:$0xff]  ;;  %v42_v16 = vmul.f32 %v286_v2, %v19_v11  ;;  %v43_v20 = vmul.f32 %v286_v2, %v20_v12  ;;  %v44_v21 = vmul.f32 %v286_v2, %v21_v17  ;;  %v23_v27 = vld [vmem:[%s391_s0 + $0x48] sm:$0xff]  ;;  %v24_v32 = vld [vmem:[%s391_s0 + $0x50] sm:$0xff] }
   0x5   :  { %v60_v13 = vadd.f32 %v293_v5, %v37_v3  ;;  %v61_v14 = vadd.f32 %v293_v5, %v38_v4  ;;  %v41_v15 = vmul.f32 %v286_v2, %v18_v10  ;;  %v62_v18 = vadd.f32 %v293_v5, %v39_v8  ;;  %v22_v22 = vld [vmem:[%s391_s0 + $0x40] sm:$0xff]  ;;  %v25_v33 = vld [vmem:[%s391_s0 + $0x58] sm:$0xff]  ;;  %v27_v39 = vld [vmem:[%s391_s0 + $0x68] sm:$0xff] }
   0x6   :  { %v63_v19 = vadd.f32 %v293_v5, %v40_v9  ;;  %v65_v26 = vadd.f32 %v293_v5, %v42_v16  ;;  %v66_v30 = vadd.f32 %v293_v5, %v43_v20  ;;  %v67_v31 = vadd.f32 %v293_v5, %v44_v21  ;;  %v26_v38 = vld [vmem:[%s391_s0 + $0x60] sm:$0xff]  ;;  %v28_v44 = vld [vmem:[%s391_s0 + $0x70] sm:$0xff]  ;;  %v29_v49 = vld [vmem:[%s391_s0 + $0x78] sm:$0xff] }
   0x7   :  { %v76_v23 = vmax.f32 %v60_v13, 0.0  ;;  %v77_v24 = vmax.f32 %v61_v14, 0.0  ;;  %v64_v25 = vadd.f32 %v293_v5, %v41_v15  ;;  %v78_v28 = vmax.f32 %v62_v18, 0.0 }
   0x8   :  { %v79_v29 = vmax.f32 %v63_v19, 0.0  ;;  %v81_v36 = vmax.f32 %v65_v26, 0.0  ;;  %v45_v37 = vmul.f32 %v286_v2, %v22_v22  ;;  %v82_v41 = vmax.f32 %v66_v30, 0.0 }
   0x9   :  { %v213_v34 = vpack.c.bf16 %v77_v24, %v76_v23  ;;  %v80_v35 = vmax.f32 %v64_v25, 0.0  ;;  %v83_v42 = vmax.f32 %v67_v31, 0.0  ;;  %v46_v43 = vmul.f32 %v286_v2, %v23_v27 }
   0xa   :  { %v218_v40 = vpack.c.bf16 %v79_v29, %v78_v28  ;;  %v68_v46 = vadd.f32 %v293_v5, %v45_v37  ;;  %v47_v47 = vmul.f32 %v286_v2, %v24_v32  ;;  %v48_v48 = vmul.f32 %v286_v2, %v25_v33 }
   0xb   :  { %214 = vst [vmem:[%s394_s3] sm:$0xff] %v213_v34   ;;  %v223_v45 = vpack.c.bf16 %v81_v36, %v80_v35  ;;  %v228_v50 = vpack.c.bf16 %v83_v42, %v82_v41  ;;  %v69_v51 = vadd.f32 %v293_v5, %v46_v43  ;;  %v49_v52 = vmul.f32 %v286_v2, %v26_v38 }
   0xc   :  { %250 = vst [vmem:[%s394_s3 + $0x8] sm:$0xff] %v218_v40   ;;  %v50_v53 = vmul.f32 %v286_v2, %v27_v39  ;;  %v84_v54 = vmax.f32 %v68_v46, 0.0  ;;  %v70_v55 = vadd.f32 %v293_v5, %v47_v47  ;;  %v71_v56 = vadd.f32 %v293_v5, %v48_v48 }
   0xd   :  { %251 = vst [vmem:[%s394_s3 + $0x10] sm:$0xff] %v223_v45   ;;  %v51_v57 = vmul.f32 %v286_v2, %v28_v44  ;;  %252 = vst [vmem:[%s394_s3 + $0x18] sm:$0xff] %v228_v50   ;;  %v85_v58 = vmax.f32 %v69_v51, 0.0  ;;  %v72_v59 = vadd.f32 %v293_v5, %v49_v52  ;;  %v52_v61 = vmul.f32 %v286_v2, %v29_v49 }
   0xe   :  { %v73_v60 = vadd.f32 %v293_v5, %v50_v53  ;;  %v86_v62 = vmax.f32 %v70_v55, 0.0  ;;  %v87_v63 = vmax.f32 %v71_v56, 0.0 }
   0xf   :  { %v74_v0 = vadd.f32 %v293_v5, %v51_v57  ;;  %v233_v1 = vpack.c.bf16 %v85_v58, %v84_v54  ;;  %v88_v3 = vmax.f32 %v72_v59, 0.0  ;;  %v75_v6 = vadd.f32 %v293_v5, %v52_v61 }
  0x10   :  { %v89_v4 = vmax.f32 %v73_v60, 0.0  ;;  %v238_v7 = vpack.c.bf16 %v87_v63, %v86_v62 }
  0x11   :  { %v90_v8 = vmax.f32 %v74_v0, 0.0  ;;  %253 = vst [vmem:[%s394_s3 + $0x20] sm:$0xff] %v233_v1   ;;  %v91_v10 = vmax.f32 %v75_v6, 0.0 }
  0x12   :  { %v243_v9 = vpack.c.bf16 %v89_v4, %v88_v3  ;;  %254 = vst [vmem:[%s394_s3 + $0x28] sm:$0xff] %v238_v7  }
  0x13   :  { %v248_v2 = vpack.c.bf16 %v91_v10, %v90_v8 }
  0x14   :  { %255 = vst [vmem:[%s394_s3 + $0x30] sm:$0xff] %v243_v9  }
  0x15   :  { %256 = vst [vmem:[%s394_s3 + $0x38] sm:$0xff] %v248_v2  }

// kernel: wideresnet_forward.43
= control target key start
LH: loop header
LB: loop body
LE: loop exit
PB: predicated region body
PF: predicated region fallthrough
CT: control target
= control target key end

     0   :  { %v180_v0 = vmov 0.0   ;;  %vm181_vm0 = vmmov 0   ;;  %s235_s1 = inlined_call_operand.vmem [shape: bf16[128,128], index: 1, kind: input, shape index: {}]   ;;  %s236_s0 = inlined_call_operand.vmem [shape: bf16[8,128], index: 0, kind: input, shape index: {}]   ;;  %s237_s2 = inlined_call_operand.vmem [shape: f32[1,128], index: 2, kind: input, shape index: {}]   ;;  %s238_s3 = inlined_call_operand.vmem [shape: f32[8,128], index: 3, kind: output, shape index: {}]  }
   0x1   :  { %150 = vmatprep.subr.bf16.mxu0 %v180_v0  ;;  %v172_v1 = vld [vmem:[%s235_s1] sm:$0xff]   ;;  %166 = vmatprep.mubr.msk.bf16.mxu0 %vm181_vm0, %v180_v0  ;;  %v173_v2 = vld [vmem:[%s235_s1 + $0x8] sm:$0xff]   ;;  %v174_v3 = vld [vmem:[%s235_s1 + $0x10] sm:$0xff]  }
   0x2   :  { %151 = vmatpush3.bf16.msra.mxu0 %v172_v1  ;;  %v175_v4 = vld [vmem:[%s235_s1 + $0x18] sm:$0xff]   ;;  %v176_v5 = vld [vmem:[%s235_s1 + $0x20] sm:$0xff]   ;;  %v177_v6 = vld [vmem:[%s235_s1 + $0x28] sm:$0xff]  }
   0x3   :  { %152 = vmatprep.subr.bf16.mxu0 %v180_v0  ;;  %v178_v7 = vld [vmem:[%s235_s1 + $0x30] sm:$0xff]   ;;  %v179_v8 = vld [vmem:[%s235_s1 + $0x38] sm:$0xff]   ;;  %v15_v9 = vld [vmem:[%s236_s0] sm:$0xf] }
   0x4   :  { %v132_v10 = vld [vmem:[%s237_s2] ss:$0 sm:$0xff] }
   0x6   :  { %153 = vmatpush3.bf16.msra.mxu0 %v173_v2 }
   0x7   :  { %154 = vmatprep.subr.bf16.mxu0 %v180_v0 }
   0xa   :  { %155 = vmatpush3.bf16.msra.mxu0 %v174_v3 }
   0xb   :  { %156 = vmatprep.subr.bf16.mxu0 %v180_v0 }
   0xe   :  { %157 = vmatpush3.bf16.msra.mxu0 %v175_v4 }
   0xf   :  { %158 = vmatprep.subr.bf16.mxu0 %v180_v0 }
  0x12   :  { %159 = vmatpush3.bf16.msra.mxu0 %v176_v5 }
  0x13   :  { %160 = vmatprep.subr.bf16.mxu0 %v180_v0 }
  0x16   :  { %161 = vmatpush3.bf16.msra.mxu0 %v177_v6 }
  0x17   :  { %162 = vmatprep.subr.bf16.mxu0 %v180_v0 }
  0x1a   :  { %163 = vmatpush3.bf16.msra.mxu0 %v178_v7 }
  0x1b   :  { %164 = vmatprep.subr.bf16.mxu0 %v180_v0 }
  0x1e   :  { %165 = vmatpush3.bf16.msra.mxu0 %v179_v8 }
  0x21   :  { %167 = vmatmul.mubr.bf16.vlgmr.msra.gmra.mrb[0].mxu0 %v15_v9 }
  0xf4   :  { %v121_v11 = vpop.f32.mrb[0].mxu0 }
  0xf5   :  { %v122_v12 = vadd.f32 %v132_v10, %v121_v11  ;;  %v168_v13 = vpop.f32.mrb[1].mxu0 }
  0xf6   :  { %v124_v14 = vpop.f32.mrb[2].mxu0 }
  0xf7   :  { %127 = vst [vmem:[%s238_s3] sm:$0xff] %v122_v12  ;;  %v169_v15 = vpop.f32.mrb[3].mxu0 }

// kernel: wideresnet_forward.42
= control target key start
LH: loop header
LB: loop body
LE: loop exit
PB: predicated region body
PF: predicated region fallthrough
CT: control target
= control target key end

     0   :  { %s254_s0 = inlined_call_operand.vmem [shape: f32[128,128], index: 0, kind: input, shape index: {}]   ;;  %s255_s1 = inlined_call_operand.vmem [shape: f32[1,128], index: 1, kind: input, shape index: {}]   ;;  %s256_s2 = inlined_call_operand.vmem [shape: f32[1,128], index: 2, kind: input, shape index: {}]   ;;  %s257_s3 = inlined_call_operand.vmem [shape: f32[128,128], index: 3, kind: output, shape index: {}]  }
   0x1   :  { %v14_v0 = vld [vmem:[%s254_s0] sm:$0xff]  ;;  %v15_v4 = vld [vmem:[%s254_s0 + $0x8] sm:$0xff]  ;;  %v16_v5 = vld [vmem:[%s254_s0 + $0x10] sm:$0xff] }
   0x2   :  { %v112_v1 = vld [vmem:[%s255_s1] ss:$0 sm:$0xff]  ;;  %v17_v6 = vld [vmem:[%s254_s0 + $0x18] sm:$0xff]  ;;  %v19_v11 = vld [vmem:[%s254_s0 + $0x28] sm:$0xff] }
   0x3   :  { %v143_v2 = vld [vmem:[%s256_s2] ss:$0 sm:$0xff]  ;;  %v37_v3 = vmul.f32 %v112_v1, %v14_v0  ;;  %v38_v7 = vmul.f32 %v112_v1, %v15_v4  ;;  %v39_v8 = vmul.f32 %v112_v1, %v16_v5  ;;  %v40_v9 = vmul.f32 %v112_v1, %v17_v6  ;;  %v20_v12 = vld [vmem:[%s254_s0 + $0x30] sm:$0xff]  ;;  %v21_v17 = vld [vmem:[%s254_s0 + $0x38] sm:$0xff] }
   0x4   :  { %v18_v10 = vld [vmem:[%s254_s0 + $0x20] sm:$0xff]  ;;  %v42_v15 = vmul.f32 %v112_v1, %v19_v11  ;;  %v43_v16 = vmul.f32 %v112_v1, %v20_v12  ;;  %v44_v21 = vmul.f32 %v112_v1, %v21_v17  ;;  %v23_v27 = vld [vmem:[%s254_s0 + $0x48] sm:$0xff]  ;;  %v24_v28 = vld [vmem:[%s254_s0 + $0x50] sm:$0xff] }
   0x5   :  { %v60_v13 = vadd.f32 %v143_v2, %v37_v3  ;;  %v41_v14 = vmul.f32 %v112_v1, %v18_v10  ;;  %v61_v18 = vadd.f32 %v143_v2, %v38_v7  ;;  %v62_v19 = vadd.f32 %v143_v2, %v39_v8  ;;  %v22_v22 = vld [vmem:[%s254_s0 + $0x40] sm:$0xff]  ;;  %v25_v29 = vld [vmem:[%s254_s0 + $0x58] sm:$0xff]  ;;  %v27_v35 = vld [vmem:[%s254_s0 + $0x68] sm:$0xff] }
   0x6   :  { %v63_v20 = vadd.f32 %v143_v2, %v40_v9  ;;  %v65_v25 = vadd.f32 %v143_v2, %v42_v15  ;;  %v66_v26 = vadd.f32 %v143_v2, %v43_v16  ;;  %v67_v33 = vadd.f32 %v143_v2, %v44_v21  ;;  %v26_v34 = vld [vmem:[%s254_s0 + $0x60] sm:$0xff]  ;;  %v28_v36 = vld [vmem:[%s254_s0 + $0x70] sm:$0xff]  ;;  %v29_v41 = vld [vmem:[%s254_s0 + $0x78] sm:$0xff] }
   0x7   :  { %v76_v23 = vmax.f32 %v60_v13, 0.0  ;;  %v64_v24 = vadd.f32 %v143_v2, %v41_v14  ;;  %v77_v30 = vmax.f32 %v61_v18, 0.0  ;;  %v78_v31 = vmax.f32 %v62_v19, 0.0 }
   0x8   :  { %v79_v32 = vmax.f32 %v63_v20, 0.0  ;;  %v81_v38 = vmax.f32 %v65_v25, 0.0  ;;  %v82_v39 = vmax.f32 %v66_v26, 0.0  ;;  %v45_v40 = vmul.f32 %v112_v1, %v22_v22 }
   0x9   :  { %92 = vst [vmem:[%s257_s3] sm:$0xff] %v76_v23  ;;  %v80_v37 = vmax.f32 %v64_v24, 0.0  ;;  %93 = vst [vmem:[%s257_s3 + $0x8] sm:$0xff] %v77_v30  ;;  %v83_v42 = vmax.f32 %v67_v33, 0.0  ;;  %v46_v43 = vmul.f32 %v112_v1, %v23_v27  ;;  %v47_v44 = vmul.f32 %v112_v1, %v24_v28 }
   0xa   :  { %94 = vst [vmem:[%s257_s3 + $0x10] sm:$0xff] %v78_v31  ;;  %95 = vst [vmem:[%s257_s3 + $0x18] sm:$0xff] %v79_v32  ;;  %v48_v45 = vmul.f32 %v112_v1, %v25_v29  ;;  %v68_v46 = vadd.f32 %v143_v2, %v45_v40  ;;  %v49_v47 = vmul.f32 %v112_v1, %v26_v34 }
   0xb   :  { %96 = vst [vmem:[%s257_s3 + $0x20] sm:$0xff] %v80_v37  ;;  %97 = vst [vmem:[%s257_s3 + $0x28] sm:$0xff] %v81_v38  ;;  %v50_v48 = vmul.f32 %v112_v1, %v27_v35  ;;  %v51_v49 = vmul.f32 %v112_v1, %v28_v36  ;;  %v69_v50 = vadd.f32 %v143_v2, %v46_v43 }
   0xc   :  { %98 = vst [vmem:[%s257_s3 + $0x30] sm:$0xff] %v82_v39  ;;  %99 = vst [vmem:[%s257_s3 + $0x38] sm:$0xff] %v83_v42  ;;  %v70_v51 = vadd.f32 %v143_v2, %v47_v44  ;;  %v71_v52 = vadd.f32 %v143_v2, %v48_v45  ;;  %v52_v53 = vmul.f32 %v112_v1, %v29_v41  ;;  %v84_v54 = vmax.f32 %v68_v46, 0.0 }
   0xd   :  { %v72_v55 = vadd.f32 %v143_v2, %v49_v47  ;;  %v73_v56 = vadd.f32 %v143_v2, %v50_v48  ;;  %v74_v57 = vadd.f32 %v143_v2, %v51_v49  ;;  %v85_v58 = vmax.f32 %v69_v50, 0.0 }
   0xe   :  { %v86_v59 = vmax.f32 %v70_v51, 0.0  ;;  %v87_v60 = vmax.f32 %v71_v52, 0.0  ;;  %v75_v61 = vadd.f32 %v143_v2, %v52_v53  ;;  %100 = vst [vmem:[%s257_s3 + $0x40] sm:$0xff] %v84_v54 }
   0xf   :  { %v88_v62 = vmax.f32 %v72_v55, 0.0  ;;  %v89_v63 = vmax.f32 %v73_v56, 0.0  ;;  %v90_v0 = vmax.f32 %v74_v57, 0.0  ;;  %101 = vst [vmem:[%s257_s3 + $0x48] sm:$0xff] %v85_v58 }
  0x10   :  { %102 = vst [vmem:[%s257_s3 + $0x50] sm:$0xff] %v86_v59  ;;  %103 = vst [vmem:[%s257_s3 + $0x58] sm:$0xff] %v87_v60  ;;  %v91_v1 = vmax.f32 %v75_v61, 0.0 }
  0x11   :  { %104 = vst [vmem:[%s257_s3 + $0x60] sm:$0xff] %v88_v62  ;;  %105 = vst [vmem:[%s257_s3 + $0x68] sm:$0xff] %v89_v63 }
  0x12   :  { %106 = vst [vmem:[%s257_s3 + $0x70] sm:$0xff] %v90_v0  ;;  %107 = vst [vmem:[%s257_s3 + $0x78] sm:$0xff] %v91_v1 }

// kernel: wideresnet_forward.40
= control target key start
LH: loop header
LB: loop body
LE: loop exit
PB: predicated region body
PF: predicated region fallthrough
CT: control target
= control target key end

     0   :  { %s6042_s0 = inlined_call_operand.vmem [shape: bf16[232,128], index: 0, kind: input, shape index: {}]   ;;  %s6043_s1 = inlined_call_operand.vmem [shape: bf16[9,128,128], index: 1, kind: input, shape index: {}]   ;;  %s6044_s2 = inlined_call_operand.vmem [shape: f32[1,128], index: 2, kind: input, shape index: {}]   ;;  %s6045_s3 = inlined_call_operand.vmem [shape: f32[200,128], index: 3, kind: output, shape index: {}]  }
   0x1   :  { %v59_v0 = vld [vmem:[%s6042_s0] sm:$0xff]  ;;  %v61_v1 = vld [vmem:[%s6042_s0 + $0x8] sm:$0xff]  ;;  %v63_v2 = vld [vmem:[%s6042_s0 + $0x10] sm:$0xff] }
   0x2   :  { %60 = vst [vmem:[#allocation2] sm:$0xff] %v59_v0  ;;  %62 = vst [vmem:[#allocation2 + $0x8] sm:$0xff] %v61_v1  ;;  %v65_v3 = vld [vmem:[%s6042_s0 + $0x18] sm:$0xff]  ;;  %v67_v4 = vld [vmem:[%s6042_s0 + $0x20] sm:$0xff] }
   0x3   :  { %64 = vst [vmem:[#allocation2 + $0x10] sm:$0xff] %v63_v2  ;;  %v69_v5 = vld [vmem:[%s6042_s0 + $0x28] sm:$0xff]  ;;  %66 = vst [vmem:[#allocation2 + $0x18] sm:$0xff] %v65_v3  ;;  %v71_v6 = vld [vmem:[%s6042_s0 + $0x30] sm:$0xff] }
   0x4   :  { %68 = vst [vmem:[#allocation2 + $0x20] sm:$0xff] %v67_v4  ;;  %70 = vst [vmem:[#allocation2 + $0x28] sm:$0xff] %v69_v5  ;;  %v73_v7 = vld [vmem:[%s6042_s0 + $0x38] sm:$0xff]  ;;  %v75_v8 = vld [vmem:[%s6042_s0 + $0x40] sm:$0xff] }
   0x5   :  { %72 = vst [vmem:[#allocation2 + $0x30] sm:$0xff] %v71_v6  ;;  %74 = vst [vmem:[#allocation2 + $0x38] sm:$0xff] %v73_v7  ;;  %v77_v9 = vld [vmem:[%s6042_s0 + $0x48] sm:$0xff]  ;;  %v79_v10 = vld [vmem:[%s6042_s0 + $0x50] sm:$0xff] }
   0x6   :  { %76 = vst [vmem:[#allocation2 + $0x40] sm:$0xff] %v75_v8  ;;  %v81_v11 = vld [vmem:[%s6042_s0 + $0x58] sm:$0xff]  ;;  %78 = vst [vmem:[#allocation2 + $0x48] sm:$0xff] %v77_v9  ;;  %v83_v12 = vld [vmem:[%s6042_s0 + $0x60] sm:$0xff] }
   0x7   :  { %80 = vst [vmem:[#allocation2 + $0x50] sm:$0xff] %v79_v10  ;;  %82 = vst [vmem:[#allocation2 + $0x58] sm:$0xff] %v81_v11  ;;  %v85_v13 = vld [vmem:[%s6042_s0 + $0x68] sm:$0xff]  ;;  %v3298_v14 = vld [vmem:[%s6042_s0 + $0x70] sm:$0xf] }
   0x8   :  { %84 = vst [vmem:[#allocation2 + $0x60] sm:$0xff] %v83_v12  ;;  %86 = vst [vmem:[#allocation2 + $0x68] sm:$0xff] %v85_v13 }
   0x9   :  { %97 = vst [vmem:[#allocation2 + $0x70] sm:$0xf] %v3298_v14 }
   0xa   :  { %101 = vsyncadd [#allocation3], 1856 }
   0xb   :  { %4530 = dma.done.wait [#allocation3], 1856 }
   0xc   :  { %4531 = vsyncadd [#allocation3], 4294965440  ;;  %v4532_v15 = vmov 0.0   ;;  %vm4533_vm0 = vmmov 0   ;;  %v4389_v16 = vld [vmem:[%s6043_s1 + $0x40] sm:$0xff]   ;;  %v4390_v17 = vld [vmem:[%s6043_s1 + $0x48] sm:$0xff]  }
   0xd   :  { %3759 = vmatprep.subr.bf16.mxu0 %v4532_v15  ;;  %4371 = vmatprep.subr.bf16.mxu1 %v4532_v15  ;;  %v4391_v18 = vld [vmem:[%s6043_s1 + $0x50] sm:$0xff]   ;;  %v4392_v19 = vld [vmem:[%s6043_s1 + $0x58] sm:$0xff]   ;;  %v4393_v20 = vld [vmem:[%s6043_s1 + $0x60] sm:$0xff]   ;;  %vm231_vm1 = vcmask 1044480   ;;  %vm457_vm2 = vsmask.f32 5376 }
   0xe   :  { %3775 = vmatprep.mubr.msk.bf16.mxu0 %vm4533_vm0, %v4532_v15  ;;  %3803 = vmatprep.mubr.msk.bf16.mxu1 %vm4533_vm0, %v4532_v15  ;;  %v4394_v21 = vld [vmem:[%s6043_s1 + $0x68] sm:$0xff]   ;;  %v4631_v22 = vld [vmem:[#allocation2 + $0x4] sm:$0xf]  ;;  %v148_v23 = vld [vmem:[#allocation2] sm:$0x8]  ;;  %vm2662_vm5 = vcmask 1046528  }
   0xf   :  { %3760 = vmatpush3.bf16.msra.mxu0 %v4389_v16  ;;  %4379 = vmatpush3.bf16.msra.mxu1 %v4389_v16  ;;  %v4395_v24 = vld [vmem:[%s6043_s1 + $0x70] sm:$0xff]   ;;  %v4638_v25 = vld [vmem:[#allocation2 + $0x8] sm:$0xff]   ;;  %v4641_v26 = vcombine.low %v148_v23, %v4631_v22  ;;  %v4643_v27 = vld [vmem:[#allocation2 + $0x38] sm:$0xff]   ;;  %vm792_vm3 = vsmask.f32 4352 }
  0x10   :  { %3761 = vmatprep.subr.bf16.mxu0 %v4532_v15  ;;  %4372 = vmatprep.subr.bf16.mxu1 %v4532_v15  ;;  %v4645_v28 = vld [vmem:[#allocation2 + $0x40] sm:$0xff]   ;;  %v4396_v29 = vld [vmem:[%s6043_s1 + $0x78] sm:$0xff]   ;;  %v233_v31 = vrot.slane %v4638_v25, 3  ;;  %v245_v32 = vrot.slane %v4643_v27, 3  ;;  %v4661_v35 = vld [vmem:[#allocation2 + $0x10] sm:$0xff]   ;;  %v521_v4 = vshrl.u32 %v4643_v27, 16 }
  0x11   :  { %v232_v30 = vrot.slane %v4641_v26, 3  ;;  %v247_v33 = vrot.slane %v4645_v28, 3  ;;  %v4402_v34 = vld [vmem:[%s6043_s1 + $0x80] sm:$0xff]   ;;  %v4667_v38 = vld [vmem:[#allocation2 + $0x48] sm:$0xff]   ;;  %v235_v40 = vrot.slane %v4661_v35, 3  ;;  %v4688_v44 = vld [vmem:[#allocation2 + $0x18] sm:$0xff]  }
  0x12   :  { %v4403_v39 = vld [vmem:[%s6043_s1] sm:$0xff]   ;;  %v249_v41 = vrot.slane %v4667_v38, 3  ;;  %v4406_v42 = vld [vmem:[%s6043_s1 + $0x88] sm:$0xff]   ;;  %v4692_v47 = vld [vmem:[#allocation2 + $0x50] sm:$0xff]   ;;  %v237_v51 = vrot.slane %v4688_v44, 3  ;;  %v524_v8 = vshll.u32 %v4643_v27, 16 }
  0x13   :  { %3762 = vmatpush3.bf16.msra.mxu0 %v4390_v17  ;;  %4380 = vmatpush3.bf16.msra.mxu1 %v4390_v17  ;;  %v234_v36 = vsel %vm231_vm1, %v232_v30, %v233_v31  ;;  %v248_v37 = vsel %vm231_vm1, %v245_v32, %v247_v33  ;;  %v4407_v43 = vld [vmem:[%s6043_s1 + $0x8] sm:$0xff]   ;;  %v236_v45 = vsel %vm231_vm1, %v233_v31, %v235_v40  ;;  %v106_v48 = vld [vmem:[#allocation2] sm:$0xc]  ;;  %v4408_v49 = vld [vmem:[%s6043_s1 + $0x90] sm:$0xff]   ;;  %v251_v53 = vrot.slane %v4692_v47, 3 }
  0x14   :  { %3763 = vmatprep.subr.bf16.mxu0 %v4532_v15  ;;  %4373 = vmatprep.subr.bf16.mxu1 %v4532_v15  ;;  %v250_v46 = vsel %vm231_vm1, %v247_v33, %v249_v41  ;;  %v4411_v50 = vld [vmem:[%s6043_s1 + $0x10] sm:$0xff]   ;;  %v4412_v52 = vld [vmem:[%s6043_s1 + $0x98] sm:$0xff]   ;;  %v4714_v55 = vld [vmem:[#allocation2 + $0x60] sm:$0xf]  ;;  %v4717_v56 = vcombine.low %v106_v48, %v4631_v22  ;;  %v238_v61 = vsel %vm231_vm1, %v235_v40, %v237_v51  ;;  %v523_v11 = vrot.slane %v521_v4, 2 }
  0x15   :  { %v4415_v54 = vld [vmem:[%s6043_s1 + $0x18] sm:$0xff]   ;;  %v131_v57 = vld [vmem:[#allocation2 + $0x64] sm:$0x7]  ;;  %v4725_v60 = vld [vmem:[#allocation2 + $0x28] sm:$0xff]   ;;  %v252_v62 = vsel %vm231_vm1, %v249_v41, %v251_v53  ;;  %v526_v12 = vrot.slane %v524_v8, 3  ;;  %v530_v13 = vshrl.u32 %v4645_v28, 16 }
  0x16   :  { %v4720_v58 = vld [vmem:[#allocation2 + $0x20] sm:$0xff]   ;;  %v4723_v59 = vld [vmem:[#allocation2 + $0x58] sm:$0xff]   ;;  %v4730_v63 = vcombine.low %v4714_v55, %v131_v57  ;;  %v459_v2 = vshrl.u32 %v4717_v56, 16  ;;  %v241_v6 = vrot.slane %v4725_v60, 3  ;;  %v4420_v7 = vld [vmem:[%s6043_s1 + $0xa8] sm:$0xff]   ;;  %v533_v14 = vshll.u32 %v4645_v28, 16 }
  0x17   :  { %3764 = vmatpush3.bf16.msra.mxu0 %v4391_v18  ;;  %4381 = vmatpush3.bf16.msra.mxu1 %v4391_v18  ;;  %v4416_v0 = vld [vmem:[%s6043_s1 + $0xa0] sm:$0xff]   ;;  %v239_v3 = vrot.slane %v4720_v58, 3  ;;  %v253_v5 = vrot.slane %v4723_v59, 3  ;;  %v4421_v10 = vld [vmem:[%s6043_s1 + $0x28] sm:$0xff]   ;;  %v825_v17 = vrot.slane %v521_v4, 3  ;;  %v826_v18 = vrot.slane %v524_v8, 4 }
  0x18   :  { %3765 = vmatprep.subr.bf16.mxu0 %v4532_v15  ;;  %4374 = vmatprep.subr.bf16.mxu1 %v4532_v15  ;;  %v4417_v1 = vld [vmem:[%s6043_s1 + $0x20] sm:$0xff]   ;;  %v255_v9 = vrot.slane %v4730_v63, 3  ;;  %v539_v22 = vshrl.u32 %v4667_v38, 16  ;;  %v4423_v28 = vld [vmem:[%s6043_s1 + $0x30] sm:$0xff]   ;;  %v542_v30 = vshll.u32 %v4667_v38, 16  ;;  %v829_v31 = vrot.slane %v530_v13, 3 }
  0x19   :  { %v240_v16 = vsel %vm231_vm1, %v237_v51, %v239_v3  ;;  %v4767_v23 = vsel %vm231_vm1, %v239_v3, %v241_v6  ;;  %v4781_v33 = vor.u32 %v526_v12, %v523_v11  ;;  %v548_v41 = vshrl.u32 %v4692_v47, 16  ;;  %v4425_v51 = vld [vmem:[%s6043_s1 + $0x38] sm:$0xff]   ;;  %v771_v4 = vld [vmem:[#allocation2 + $0x64] sm:$0xf] }
  0x1a   :  { %v544_v40 = vrot.slane %v542_v30, 3  ;;  %v560_v57 = vshll.u32 %v4723_v59, 16  ;;  %vm1882_vm4 = vsmask.f32 7424  ;;  %vm2931_vm6 = vsmask.f32 6400 }
  0x1b   :  { %3766 = vmatpush3.bf16.msra.mxu0 %v4392_v19  ;;  %4382 = vmatpush3.bf16.msra.mxu1 %v4392_v19  ;;  %v254_v19 = vsel %vm231_vm1, %v251_v53, %v253_v5 }
  0x1c   :  { %3767 = vmatprep.subr.bf16.mxu0 %v4532_v15  ;;  %4375 = vmatprep.subr.bf16.mxu1 %v4532_v15  ;;  %v562_v8 = vrot.slane %v560_v57, 3 }
  0x1f   :  { %3768 = vmatpush3.bf16.msra.mxu0 %v4393_v20  ;;  %4383 = vmatpush3.bf16.msra.mxu1 %v4393_v20  ;;  %v532_v20 = vrot.slane %v530_v13, 2 }
  0x20   :  { %3769 = vmatprep.subr.bf16.mxu0 %v4532_v15  ;;  %4376 = vmatprep.subr.bf16.mxu1 %v4532_v15 }
  0x23   :  { %3770 = vmatpush3.bf16.msra.mxu0 %v4394_v21  ;;  %4384 = vmatpush3.bf16.msra.mxu1 %v4394_v21  ;;  %v535_v21 = vrot.slane %v533_v14, 3 }
  0x24   :  { %3771 = vmatprep.subr.bf16.mxu0 %v4532_v15  ;;  %4377 = vmatprep.subr.bf16.mxu1 %v4532_v15 }
  0x27   :  { %3772 = vmatpush3.bf16.msra.mxu0 %v4395_v24  ;;  %4385 = vmatpush3.bf16.msra.mxu1 %v4395_v24  ;;  %v4772_v24 = vsel %vm231_vm1, %v253_v5, %v255_v9  ;;  %v4814_v5 = vld [vmem:[#allocation2 + $0x30] sm:$0xff]  }
  0x28   :  { %3773 = vmatprep.subr.bf16.mxu0 %v4532_v15  ;;  %4378 = vmatprep.subr.bf16.mxu1 %v4532_v15 }
  0x2b   :  { %3774 = vmatpush3.bf16.msra.mxu0 %v4396_v29  ;;  %4386 = vmatpush3.bf16.msra.mxu1 %v4396_v29  ;;  %v4424_v29 = vld [vmem:[%s6043_s1 + $0xb0] sm:$0xff]  }
  0x2c   :  { %3895 = vmatprep.subr.bf16.mxu0 %v4532_v15  ;;  %3827 = vmatprep.subr.bf16.mxu1 %v4532_v15 }
  0x2e   :  { %3776 = vmatmul.mubr.bf16.vlgmr.msra.gmra.mrb[0].mxu0 %v234_v36  ;;  %3804 = vmatmul.mubr.bf16.vlgmr.msra.gmra.mrb[0].mxu1 %v248_v37  ;;  %v541_v36 = vrot.slane %v539_v22, 2  ;;  %v830_v37 = vrot.slane %v533_v14, 4  ;;  %v842_v14 = vrot.slane %v560_v57, 4 }
  0x2f   :  { %3896 = vmatpush3.bf16.msra.mxu0 %v4402_v34  ;;  %3779 = vmatprep.mubr.msk.bf16.mxu0 %vm4533_vm0, %v4532_v15  ;;  %v536_v34 = vor.u32 %v535_v21, %v532_v20  ;;  %v462_v20 = vshll.u32 %v4717_v56, 16  ;;  %v467_v21 = vshrl.u32 %v4638_v25, 16  ;;  %v797_v56 = vshll.u32 %v4641_v26, 16 }
  0x30   :  { %3807 = vmatprep.mubr.msk.bf16.mxu1 %vm4533_vm0, %v4532_v15  ;;  %3828 = vmatpush3.bf16.msra.mxu1 %v4403_v39  ;;  %v4785_v39 = vor.u32 %v826_v18, %v825_v17  ;;  %v545_v48 = vor.u32 %v544_v40, %v541_v36  ;;  %v470_v36 = vshll.u32 %v4638_v25, 16 }
  0x31   :  { %3897 = vmatprep.subr.bf16.mxu0 %v4532_v15  ;;  %3829 = vmatprep.subr.bf16.mxu1 %v4532_v15  ;;  %v4791_v38 = vsel %vm457_vm2, %v4781_v33, %v536_v34  ;;  %v801_v57 = vrot.slane %v467_v21, 3 }
  0x33   :  { %3898 = vmatpush3.bf16.msra.mxu0 %v4406_v42  ;;  %v551_v42 = vshll.u32 %v4692_v47, 16  ;;  %v557_v47 = vshrl.u32 %v4723_v59, 16  ;;  %v566_v59 = vshrl.u32 %v4730_v63, 16 }
  0x34   :  { %3830 = vmatpush3.bf16.msra.mxu1 %v4407_v43  ;;  %3899 = vmatprep.subr.bf16.mxu0 %v4532_v15  ;;  %v831_v43 = vor.u32 %v830_v37, %v829_v31 }
  0x35   :  { %3831 = vmatprep.subr.bf16.mxu1 %v4532_v15  ;;  %v838_v3 = vrot.slane %v551_v42, 4  ;;  %v841_v13 = vrot.slane %v557_v47, 3  ;;  %v568_v17 = vrot.slane %v566_v59, 2 }
  0x36   :  { %3780 = vmatmul.mubr.bf16.gmra.mrb[4].mxu0 %v236_v45  ;;  %3808 = vmatmul.mubr.bf16.gmra.mrb[4].mxu1 %v250_v46  ;;  %v833_v45 = vrot.slane %v539_v22, 3  ;;  %v834_v46 = vrot.slane %v542_v30, 4  ;;  %v4806_v53 = vsel %vm792_vm3, %v4785_v39, %v831_v43 }
  0x37   :  { %3783 = vmatprep.mubr.msk.bf16.mxu0 %vm4533_vm0, %v4532_v15  ;;  %3811 = vmatprep.mubr.msk.bf16.mxu1 %vm4533_vm0, %v4532_v15 }
  0x38   :  { %3900 = vmatpush3.bf16.msra.mxu0 %v4408_v49  ;;  %3832 = vmatpush3.bf16.msra.mxu1 %v4411_v50  ;;  %v550_v49 = vrot.slane %v548_v41, 2  ;;  %v553_v50 = vrot.slane %v551_v42, 3  ;;  %v464_v42 = vrot.slane %v462_v20, 3 }
  0x39   :  { %3901 = vmatprep.subr.bf16.mxu0 %v4532_v15  ;;  %3833 = vmatprep.subr.bf16.mxu1 %v4532_v15 }
  0x3c   :  { %3902 = vmatpush3.bf16.msra.mxu0 %v4412_v52  ;;  %3834 = vmatpush3.bf16.msra.mxu1 %v4415_v54  ;;  %v4426_v52 = vld [vmem:[%s6043_s1 + $0xb8] sm:$0xff]   ;;  %v835_v54 = vor.u32 %v834_v46, %v833_v45  ;;  %v472_v46 = vrot.slane %v470_v36, 3 }
  0x3d   :  { %3903 = vmatprep.subr.bf16.mxu0 %v4532_v15  ;;  %3835 = vmatprep.subr.bf16.mxu1 %v4532_v15 }
  0x3e   :  { %3784 = vmatmul.mubr.bf16.gmra.mrb[8].mxu0 %v238_v61  ;;  %3812 = vmatmul.mubr.bf16.gmra.mrb[8].mxu1 %v252_v62  ;;  %v837_v61 = vrot.slane %v548_v41, 3  ;;  %v4812_v62 = vsel %vm457_vm2, %v536_v34, %v545_v48  ;;  %v243_v34 = vrot.slane %v4814_v5, 3  ;;  %v461_v41 = vrot.slane %v459_v2, 2 }
  0x3f   :  { %3787 = vmatprep.mubr.msk.bf16.mxu0 %vm4533_vm0, %v4532_v15  ;;  %3815 = vmatprep.mubr.msk.bf16.mxu1 %vm4533_vm0, %v4532_v15 }
  0x40   :  { %3904 = vmatpush3.bf16.msra.mxu0 %v4416_v0  ;;  %3836 = vmatpush3.bf16.msra.mxu1 %v4417_v1  ;;  %v554_v0 = vor.u32 %v553_v50, %v550_v49  ;;  %v559_v1 = vrot.slane %v557_v47, 2  ;;  %v839_v12 = vor.u32 %v838_v3, %v837_v61  ;;  %v244_v25 = vsel %vm231_vm1, %v241_v6, %v243_v34 }
  0x41   :  { %3905 = vmatprep.subr.bf16.mxu0 %v4532_v15  ;;  %3837 = vmatprep.subr.bf16.mxu1 %v4532_v15  ;;  %v479_v49 = vshll.u32 %v4661_v35, 16  ;;  %v794_v50 = vshrl.u32 %v4641_v26, 16  ;;  %v465_v2 = vor.u32 %v464_v42, %v461_v41  ;;  %v802_v61 = vrot.slane %v470_v36, 4  ;;  %v4433_v36 = vld [vmem:[%s6043_s1 + $0xd8] sm:$0xff]  }
  0x42   :  { %v4822_v11 = vsel %vm457_vm2, %v545_v48, %v554_v0  ;;  %v4830_v22 = vsel %vm792_vm3, %v835_v54, %v839_v12  ;;  %v476_v48 = vshrl.u32 %v4661_v35, 16  ;;  %v485_v26 = vshrl.u32 %v4688_v44, 16 }
  0x43   :  { %v506_v41 = vshll.u32 %v4725_v60, 16 }
  0x44   :  { %3906 = vmatpush3.bf16.msra.mxu0 %v4420_v7  ;;  %3838 = vmatpush3.bf16.msra.mxu1 %v4421_v10  ;;  %v4817_v7 = vsel %vm792_vm3, %v831_v43, %v835_v54  ;;  %v569_v10 = vshll.u32 %v4730_v63, 16  ;;  %v469_v43 = vrot.slane %v467_v21, 2  ;;  %v478_v6 = vrot.slane %v476_v48, 2 }
  0x45   :  { %3839 = vmatprep.subr.bf16.mxu1 %v4532_v15  ;;  %3907 = vmatprep.subr.bf16.mxu0 %v4532_v15  ;;  %v799_v54 = vrot.slane %v797_v56, 4  ;;  %v246_v63 = vsel %vm231_vm1, %v243_v34, %v245_v32  ;;  %v805_v3 = vrot.slane %v476_v48, 3  ;;  %v487_v59 = vrot.slane %v485_v26, 2  ;;  %v4434_v56 = vld [vmem:[%s6043_s1 + $0x118] sm:$0xff]  }
  0x46   :  { %3788 = vmatmul.mubr.bf16.gmra.mrb[12].mxu0 %v240_v16  ;;  %3816 = vmatmul.mubr.bf16.gmra.mrb[12].mxu1 %v254_v19  ;;  %v563_v16 = vor.u32 %v562_v8, %v559_v1  ;;  %v571_v18 = vrot.slane %v569_v10, 3  ;;  %v3361_v19 = vcombine.low %v4714_v55, %v771_v4  ;;  %v473_v35 = vor.u32 %v472_v46, %v469_v43  ;;  %v4429_v10 = vld [vmem:[%s6043_s1 + $0xc8] sm:$0xff]   ;;  %v4432_v43 = vld [vmem:[%s6043_s1 + $0x110] sm:$0xff]  }
  0x47   :  { %3791 = vmatprep.mubr.msk.bf16.mxu0 %vm4533_vm0, %v4532_v15  ;;  %3819 = vmatprep.mubr.msk.bf16.mxu1 %vm4533_vm0, %v4532_v15  ;;  %v488_v1 = vshll.u32 %v4688_v44, 16  ;;  %v806_v4 = vrot.slane %v479_v49, 4  ;;  %v803_v8 = vor.u32 %v802_v61, %v801_v57  ;;  %v4428_v44 = vld [vmem:[%s6043_s1 + $0x100] sm:$0xff]   ;;  %v809_v20 = vrot.slane %v485_v26, 3  ;;  %v4439_v57 = vld [vmem:[%s6043_s1 + $0xf0] sm:$0xff]  }
  0x48   :  { %3840 = vmatpush3.bf16.msra.mxu1 %v4423_v28  ;;  %3908 = vmatpush3.bf16.msra.mxu0 %v4424_v29  ;;  %v843_v28 = vor.u32 %v842_v14, %v841_v13  ;;  %v4835_v29 = vsel %vm457_vm2, %v554_v0, %v563_v16  ;;  %v4837_v55 = vor.u32 %v571_v18, %v568_v17  ;;  %v846_v30 = vshrl.u32 %v3361_v19, 16  ;;  %v4427_v0 = vld [vmem:[%s6043_s1 + $0xc0] sm:$0xff]   ;;  %v4431_v18 = vld [vmem:[%s6043_s1 + $0xd0] sm:$0xff]  }
  0x49   :  { %3841 = vmatprep.subr.bf16.mxu1 %v4532_v15  ;;  %3909 = vmatprep.subr.bf16.mxu0 %v4532_v15  ;;  %v849_v31 = vshll.u32 %v3361_v19, 16  ;;  %v494_v13 = vshrl.u32 %v4720_v58, 16  ;;  %v497_v17 = vshll.u32 %v4720_v58, 16  ;;  %v4430_v19 = vld [vmem:[%s6043_s1 + $0x108] sm:$0xff]   ;;  %v810_v21 = vrot.slane %v488_v1, 4 }
  0x4a   :  { %v848_v37 = vrot.slane %v846_v30, 3  ;;  %v807_v58 = vor.u32 %v806_v4, %v805_v3  ;;  %v4442_v3 = vld [vmem:[%s6043_s1 + $0xf8] sm:$0xff]  }
  0x4b   :  { %v851_v40 = vrot.slane %v849_v31, 4  ;;  %v496_v30 = vrot.slane %v494_v13, 2  ;;  %v503_v31 = vshrl.u32 %v4725_v60, 16  ;;  %v499_v34 = vrot.slane %v497_v17, 3 }
  0x4c   :  { %3842 = vmatpush3.bf16.msra.mxu1 %v4425_v51  ;;  %3910 = vmatpush3.bf16.msra.mxu0 %v4426_v52  ;;  %v481_v51 = vrot.slane %v479_v49, 3  ;;  %v796_v52 = vrot.slane %v794_v50, 3  ;;  %v813_v42 = vrot.slane %v494_v13, 3  ;;  %v814_v48 = vrot.slane %v497_v17, 4 }
  0x4d   :  { %3963 = vmatprep.subr.bf16.mxu1 %v4532_v15  ;;  %4031 = vmatprep.subr.bf16.mxu0 %v4532_v15  ;;  %v4854_v45 = vor.u32 %v851_v40, %v848_v37  ;;  %v808_v40 = vsel %vm792_vm3, %v803_v8, %v807_v58  ;;  %v505_v46 = vrot.slane %v503_v31, 2  ;;  %v500_v60 = vor.u32 %v499_v34, %v496_v30 }
  0x4e   :  { %3792 = vmatmul.mubr.bf16.gmra.mrb[16].mxu0 %v4767_v23  ;;  %3820 = vmatmul.mubr.bf16.gmra.mrb[16].mxu1 %v4772_v24  ;;  %v4846_v23 = vsel %vm792_vm3, %v839_v12, %v843_v28  ;;  %v4850_v24 = vsel %vm457_vm2, %v563_v16, %v4837_v55  ;;  %v482_v27 = vor.u32 %v481_v51, %v478_v6  ;;  %v490_v12 = vrot.slane %v488_v1, 3 }
  0x4f   :  { %3795 = vmatprep.mubr.msk.bf16.mxu0 %vm4533_vm0, %v4532_v15  ;;  %3823 = vmatprep.mubr.msk.bf16.mxu1 %vm4533_vm0, %v4532_v15  ;;  %v4864_v47 = vsel %vm792_vm3, %v843_v28, %v4854_v45  ;;  %v800_v32 = vor.u32 %v799_v54, %v796_v52  ;;  %v811_v49 = vor.u32 %v810_v21, %v809_v20  ;;  %v512_v50 = vshrl.u32 %v4814_v5, 16  ;;  %v4436_v54 = vld [vmem:[%s6043_s1 + $0x120] sm:$0xff]  }
  0x50   :  { %v483_v14 = vsel %vm457_vm2, %v473_v35, %v482_v27  ;;  %v491_v28 = vor.u32 %v490_v12, %v487_v59  ;;  %v515_v52 = vshll.u32 %v4814_v5, 16  ;;  %v817_v26 = vrot.slane %v503_v31, 3 }
  0x51   :  { %v804_v16 = vsel %vm792_vm3, %v800_v32, %v803_v8  ;;  %v812_v51 = vsel %vm792_vm3, %v807_v58, %v811_v49  ;;  %v514_v61 = vrot.slane %v512_v50, 2  ;;  %v4440_v32 = vld [vmem:[%s6043_s1 + $0x130] sm:$0xff]   ;;  %v821_v13 = vrot.slane %v512_v50, 3  ;;  %v4452_v50 = vld [vmem:[%s6043_s1 + $0x148] sm:$0xff]  }
  0x52   :  { %v492_v37 = vsel %vm457_vm2, %v482_v27, %v491_v28  ;;  %v501_v6 = vsel %vm457_vm2, %v491_v28, %v500_v60  ;;  %v517_v1 = vrot.slane %v515_v52, 3  ;;  %v5026_v28 = vld [vmem:[#allocation2 + $0x18] sm:$0xf] }
  0x54   :  { %v518_v8 = vor.u32 %v517_v1, %v514_v61  ;;  %v4462_v1 = vld [vmem:[%s6043_s1 + $0x158] sm:$0xff]  }
  0x56   :  { %3796 = vmatmul.mubr.bf16.gmra.mrb[20].mxu0 %v244_v25  ;;  %3824 = vmatmul.mubr.bf16.gmra.mrb[20].mxu1 %v255_v9  ;;  %v474_v9 = vsel %vm457_vm2, %v465_v2, %v473_v35  ;;  %v4435_v25 = vld [vmem:[%s6043_s1 + $0xe0] sm:$0xff]   ;;  %v508_v2 = vrot.slane %v506_v41, 3  ;;  %v4437_v35 = vld [vmem:[%s6043_s1 + $0xe8] sm:$0xff]   ;;  %v528_v17 = vsel %vm457_vm2, %v518_v8, %v4781_v33 }
  0x57   :  { %3799 = vmatprep.mubr.msk.bf16.mxu0 %vm4533_vm0, %v4532_v15  ;;  %3843 = vmatprep.mubr.msk.bf16.mxu1 %vm4533_vm0, %v4532_v15  ;;  %v1076_v33 = vld [vmem:[#allocation2 + $0x4] sm:$0x8] }
  0x58   :  { %v509_v5 = vor.u32 %v508_v2, %v505_v46  ;;  %v4446_v46 = vld [vmem:[%s6043_s1 + $0x140] sm:$0xff]   ;;  %v5056_v2 = vld [vmem:[#allocation2 + $0x28] sm:$0xf] }
  0x5a   :  { %v510_v4 = vsel %vm457_vm2, %v500_v60, %v509_v5 }
  0x5e   :  { %3800 = vmatmul.mubr.bf16.gmra.mrb[24].mxu0 %v246_v63  ;;  %3844 = vmatmul.mubr.bf16.vlgmr.msra.gmra.mrb[24].mxu1 %v474_v9  ;;  %v815_v63 = vor.u32 %v814_v48, %v813_v42  ;;  %v818_v9 = vrot.slane %v506_v41, 4  ;;  %v5036_v41 = vld [vmem:[#allocation2 + $0x1c] sm:$0xf]  ;;  %v5038_v42 = vld [vmem:[#allocation2 + $0x20] sm:$0xf] }
  0x5f   :  { %3847 = vmatprep.mubr.msk.bf16.mxu1 %vm4533_vm0, %v4532_v15  ;;  %3911 = vmatprep.mubr.msk.bf16.mxu0 %vm4533_vm0, %v4532_v15 }
  0x60   :  { %3964 = vmatpush3.bf16.msra.mxu1 %v4427_v0  ;;  %v4438_v0 = vld [vmem:[%s6043_s1 + $0x128] sm:$0xff]   ;;  %v816_v27 = vsel %vm792_vm3, %v811_v49, %v815_v63  ;;  %v819_v59 = vor.u32 %v818_v9, %v817_v26 }
  0x61   :  { %3965 = vmatprep.subr.bf16.mxu1 %v4532_v15  ;;  %v4453_v26 = vld [vmem:[%s6043_s1 + $0x188] sm:$0xff]  }
  0x62   :  { %v820_v12 = vsel %vm792_vm3, %v815_v63, %v819_v59  ;;  %v5077_v9 = vld [vmem:[#allocation2 + $0x2c] sm:$0xf] }
  0x64   :  { %3966 = vmatpush3.bf16.msra.mxu1 %v4429_v10  ;;  %v4443_v10 = vld [vmem:[%s6043_s1 + $0x138] sm:$0xff]  }
  0x65   :  { %3967 = vmatprep.subr.bf16.mxu1 %v4532_v15 }
  0x66   :  { %3848 = vmatmul.mubr.bf16.gmra.mrb[28].mxu1 %v483_v14  ;;  %3912 = vmatmul.mubr.bf16.vlgmr.msra.gmra.mrb[28].mxu0 %v804_v16  ;;  %v822_v14 = vrot.slane %v515_v52, 4 }
  0x67   :  { %4032 = vmatpush3.bf16.msra.mxu0 %v4428_v44  ;;  %3851 = vmatprep.mubr.msk.bf16.mxu1 %vm4533_vm0, %v4532_v15  ;;  %v519_v44 = vsel %vm457_vm2, %v509_v5, %v518_v8 }
  0x68   :  { %3915 = vmatprep.mubr.msk.bf16.mxu0 %vm4533_vm0, %v4532_v15  ;;  %4033 = vmatprep.subr.bf16.mxu0 %v4532_v15  ;;  %v823_v16 = vor.u32 %v822_v14, %v821_v13  ;;  %v5101_v14 = vld [vmem:[#allocation2 + $0x34] sm:$0xf] }
  0x69   :  { %3968 = vmatpush3.bf16.msra.mxu1 %v4431_v18 }
  0x6a   :  { %3969 = vmatprep.subr.bf16.mxu1 %v4532_v15  ;;  %v824_v18 = vsel %vm792_vm3, %v819_v59, %v823_v16  ;;  %v4459_v59 = vld [vmem:[%s6043_s1 + $0x190] sm:$0xff]  }
  0x6b   :  { %4034 = vmatpush3.bf16.msra.mxu0 %v4430_v19  ;;  %v828_v19 = vsel %vm792_vm3, %v823_v16, %v4785_v39  ;;  %v1077_v39 = vld [vmem:[#allocation2 + $0x8] sm:$0xf]  ;;  %v5103_v16 = vld [vmem:[#allocation2 + $0x38] sm:$0xf] }
  0x6c   :  { %4035 = vmatprep.subr.bf16.mxu0 %v4532_v15 }
  0x6d   :  { %3970 = vmatpush3.bf16.msra.mxu1 %v4433_v36 }
  0x6e   :  { %3852 = vmatmul.mubr.bf16.gmra.mrb[32].mxu1 %v492_v37  ;;  %3916 = vmatmul.mubr.bf16.gmra.mrb[32].mxu0 %v808_v40 }
  0x6f   :  { %3855 = vmatprep.mubr.msk.bf16.mxu1 %vm4533_vm0, %v4532_v15  ;;  %3919 = vmatprep.mubr.msk.bf16.mxu0 %vm4533_vm0, %v4532_v15 }
  0x70   :  { %4036 = vmatpush3.bf16.msra.mxu0 %v4432_v43  ;;  %3971 = vmatprep.subr.bf16.mxu1 %v4532_v15 }
  0x71   :  { %4037 = vmatprep.subr.bf16.mxu0 %v4532_v15  ;;  %3972 = vmatpush3.bf16.msra.mxu1 %v4435_v25 }
  0x72   :  { %3973 = vmatprep.subr.bf16.mxu1 %v4532_v15 }
  0x74   :  { %4038 = vmatpush3.bf16.msra.mxu0 %v4434_v56  ;;  %v5054_v56 = vld [vmem:[#allocation2 + $0x24] sm:$0xf] }
  0x75   :  { %4039 = vmatprep.subr.bf16.mxu0 %v4532_v15  ;;  %3974 = vmatpush3.bf16.msra.mxu1 %v4437_v35 }
  0x76   :  { %3856 = vmatmul.mubr.bf16.gmra.mrb[36].mxu1 %v501_v6  ;;  %3920 = vmatmul.mubr.bf16.gmra.mrb[36].mxu0 %v812_v51  ;;  %v4449_v6 = vld [vmem:[%s6043_s1 + $0x180] sm:$0xff]  }
  0x77   :  { %3859 = vmatprep.mubr.msk.bf16.mxu1 %vm4533_vm0, %v4532_v15  ;;  %3923 = vmatprep.mubr.msk.bf16.mxu0 %vm4533_vm0, %v4532_v15 }
  0x78   :  { %4040 = vmatpush3.bf16.msra.mxu0 %v4436_v54  ;;  %3975 = vmatprep.subr.bf16.mxu1 %v4532_v15  ;;  %v3390_v54 = vcombine.low %v5054_v56, %v5056_v2 }
  0x79   :  { %4041 = vmatprep.subr.bf16.mxu0 %v4532_v15  ;;  %3976 = vmatpush3.bf16.msra.mxu1 %v4439_v57  ;;  %v4458_v57 = vld [vmem:[%s6043_s1 + $0x150] sm:$0xff]  }
  0x7a   :  { %3977 = vmatprep.subr.bf16.mxu1 %v4532_v15  ;;  %v1220_v5 = vshrl.u32 %v3390_v54, 16  ;;  %v1223_v63 = vshll.u32 %v3390_v54, 16 }
  0x7c   :  { %4042 = vmatpush3.bf16.msra.mxu0 %v4438_v0  ;;  %v5079_v0 = vld [vmem:[#allocation2 + $0x30] sm:$0xf] }
  0x7d   :  { %4043 = vmatprep.subr.bf16.mxu0 %v4532_v15  ;;  %3978 = vmatpush3.bf16.msra.mxu1 %v4442_v3  ;;  %v3391_v8 = vcombine.low %v5077_v9, %v5079_v0 }
  0x7e   :  { %3860 = vmatmul.mubr.bf16.gmra.mrb[40].mxu1 %v510_v4  ;;  %3924 = vmatmul.mubr.bf16.gmra.mrb[40].mxu0 %v816_v27  ;;  %v1222_v27 = vrot.slane %v1220_v5, 3  ;;  %v5188_v5 = vld [vmem:[#allocation2 + $0x54] sm:$0xf] }
  0x7f   :  { %3863 = vmatprep.mubr.msk.bf16.mxu1 %vm4533_vm0, %v4532_v15  ;;  %3927 = vmatprep.mubr.msk.bf16.mxu0 %vm4533_vm0, %v4532_v15  ;;  %v1232_v13 = vshll.u32 %v3391_v8, 16 }
  0x80   :  { %4044 = vmatpush3.bf16.msra.mxu0 %v4440_v32  ;;  %4099 = vmatprep.subr.bf16.mxu1 %v4532_v15  ;;  %v1225_v32 = vrot.slane %v1223_v63, 4  ;;  %v5190_v63 = vld [vmem:[#allocation2 + $0x58] sm:$0xf] }
  0x81   :  { %4045 = vmatprep.subr.bf16.mxu0 %v4532_v15 }
  0x84   :  { %4046 = vmatpush3.bf16.msra.mxu0 %v4443_v10  ;;  %v4468_v10 = vld [vmem:[%s6043_s1 + $0x160] sm:$0xff]  }
  0x85   :  { %4167 = vmatprep.subr.bf16.mxu0 %v4532_v15 }
  0x86   :  { %3864 = vmatmul.mubr.bf16.gmra.mrb[44].mxu1 %v519_v44  ;;  %3928 = vmatmul.mubr.bf16.gmra.mrb[44].mxu0 %v820_v12  ;;  %v1226_v44 = vor.u32 %v1225_v32, %v1222_v27  ;;  %v1229_v12 = vshrl.u32 %v3391_v8, 16 }
  0x87   :  { %3867 = vmatprep.mubr.msk.bf16.mxu1 %vm4533_vm0, %v4532_v15  ;;  %3931 = vmatprep.mubr.msk.bf16.mxu0 %vm4533_vm0, %v4532_v15 }
  0x8e   :  { %3868 = vmatmul.mubr.bf16.gmra.mrb[48].mxu1 %v528_v17  ;;  %3932 = vmatmul.mubr.bf16.gmra.mrb[48].mxu0 %v824_v18  ;;  %v4465_v17 = vld [vmem:[%s6043_s1 + $0x198] sm:$0xff]   ;;  %v4474_v18 = vld [vmem:[%s6043_s1 + $0x168] sm:$0xff]  }
  0x8f   :  { %3871 = vmatprep.mubr.msk.bf16.mxu1 %vm4533_vm0, %v4532_v15  ;;  %3935 = vmatprep.mubr.msk.bf16.mxu0 %vm4533_vm0, %v4532_v15 }
  0x96   :  { %3872 = vmatmul.mubr.bf16.gmra.mrb[52].mxu1 %v4791_v38  ;;  %3936 = vmatmul.mubr.bf16.gmra.mrb[52].mxu0 %v828_v19  ;;  %v1078_v38 = vld [vmem:[#allocation2 + $0xc] sm:$0xf]  ;;  %v3425_v19 = vcombine.low %v5026_v28, %v5036_v41 }
  0x97   :  { %3875 = vmatprep.mubr.msk.bf16.mxu1 %vm4533_vm0, %v4532_v15  ;;  %3939 = vmatprep.mubr.msk.bf16.mxu0 %vm4533_vm0, %v4532_v15 }
  0x9e   :  { %3876 = vmatmul.mubr.bf16.gmra.mrb[56].mxu1 %v4812_v62  ;;  %3940 = vmatmul.mubr.bf16.gmra.mrb[56].mxu0 %v4806_v53  ;;  %v5015_v53 = vld [vmem:[#allocation2 + $0x10] sm:$0xf]  ;;  %v3386_v62 = vcombine.low %v1076_v33, %v1077_v39 }
  0x9f   :  { %3879 = vmatprep.mubr.msk.bf16.mxu1 %vm4533_vm0, %v4532_v15  ;;  %3943 = vmatprep.mubr.msk.bf16.mxu0 %vm4533_vm0, %v4532_v15 }
  0xa6   :  { %3880 = vmatmul.mubr.bf16.gmra.mrb[60].mxu1 %v4822_v11  ;;  %3944 = vmatmul.mubr.bf16.gmra.mrb[60].mxu0 %v4817_v7  ;;  %v3387_v7 = vcombine.low %v1078_v38, %v5015_v53  ;;  %v5020_v11 = vld [vmem:[#allocation2 + $0x14] sm:$0xf] }
  0xa7   :  { %3883 = vmatprep.mubr.msk.bf16.mxu1 %vm4533_vm0, %v4532_v15  ;;  %3947 = vmatprep.mubr.msk.bf16.mxu0 %vm4533_vm0, %v4532_v15  ;;  %v3388_v58 = vcombine.low %v5020_v11, %v5026_v28  ;;  %v3424_v3 = vcombine.low %v5015_v53, %v5020_v11  ;;  %v3392_v53 = vcombine.low %v5101_v14, %v5103_v16  ;;  %v4475_v28 = vld [vmem:[%s6043_s1 + $0x1a8] sm:$0xff]  }
  0xa8   :  { %v1193_v20 = vshrl.u32 %v3387_v7, 16  ;;  %v1196_v21 = vshll.u32 %v3387_v7, 16  ;;  %v4478_v7 = vld [vmem:[%s6043_s1 + $0x170] sm:$0xff]  }
  0xa9   :  { %v1202_v37 = vshrl.u32 %v3388_v58, 16  ;;  %v1205_v40 = vshll.u32 %v3388_v58, 16  ;;  %v4483_v58 = vld [vmem:[%s6043_s1 + $0x178] sm:$0xff]  }
  0xaa   :  { %v1198_v31 = vrot.slane %v1196_v21, 4  ;;  %v5132_v21 = vld [vmem:[#allocation2 + $0x40] sm:$0xf] }
  0xab   :  { %v1204_v25 = vrot.slane %v1202_v37, 3 }
  0xae   :  { %3884 = vmatmul.mubr.bf16.gmra.mrb[64].mxu1 %v4835_v29  ;;  %3948 = vmatmul.mubr.bf16.gmra.mrb[64].mxu0 %v4830_v22  ;;  %v1185_v22 = vshrl.u32 %v3386_v62, 16  ;;  %v1188_v29 = vshll.u32 %v3386_v62, 16  ;;  %v4469_v62 = vld [vmem:[%s6043_s1 + $0x1a0] sm:$0xff]  }
  0xaf   :  { %3887 = vmatprep.mubr.msk.bf16.mxu1 %vm4533_vm0, %v4532_v15  ;;  %3951 = vmatprep.mubr.msk.bf16.mxu0 %vm4533_vm0, %v4532_v15 }
  0xb0   :  { %v1190_v30 = vrot.slane %v1188_v29, 4  ;;  %v1241_v29 = vshll.u32 %v3392_v53, 16 }
  0xb6   :  { %3888 = vmatmul.mubr.bf16.gmra.mrb[68].mxu1 %v4850_v24  ;;  %3952 = vmatmul.mubr.bf16.gmra.mrb[68].mxu0 %v4846_v23  ;;  %v1187_v24 = vrot.slane %v1185_v22, 3  ;;  %v1195_v23 = vrot.slane %v1193_v20, 3  ;;  %v1238_v22 = vshrl.u32 %v3392_v53, 16  ;;  %v5130_v20 = vld [vmem:[#allocation2 + $0x3c] sm:$0xf] }
  0xb7   :  { %3891 = vmatprep.mubr.msk.bf16.mxu1 %vm4533_vm0, %v4532_v15  ;;  %3955 = vmatprep.mubr.msk.bf16.mxu0 %vm4533_vm0, %v4532_v15 }
  0xb8   :  { %v1191_v34 = vor.u32 %v1190_v30, %v1187_v24  ;;  %v1199_v36 = vor.u32 %v1198_v31, %v1195_v23  ;;  %v3426_v24 = vcombine.low %v5038_v42, %v5054_v56  ;;  %v1240_v23 = vrot.slane %v1238_v22, 3 }
  0xb9   :  { %v1243_v31 = vrot.slane %v1241_v29, 4  ;;  %v5222_v29 = vld [vmem:[#allocation2 + $0x64] sm:$0xf] }
  0xba   :  { %v1200_v43 = vsel %vm792_vm3, %v1191_v34, %v1199_v36  ;;  %v3393_v34 = vcombine.low %v5130_v20, %v5132_v21 }
  0xbb   :  { %v1244_v37 = vor.u32 %v1243_v31, %v1240_v23 }
  0xbe   :  { %3892 = vmatmul.mubr.bf16.gmra.mrb[72].mxu1 %v4837_v55  ;;  %3956 = vmatmul.mubr.bf16.gmra.mrb[72].mxu0 %v4864_v47  ;;  %v1207_v55 = vrot.slane %v1205_v40, 4  ;;  %v3389_v47 = vcombine.low %v5036_v41, %v5038_v42  ;;  %v1247_v40 = vshrl.u32 %v3393_v34, 16  ;;  %v1250_v41 = vshll.u32 %v3393_v34, 16  ;;  %v5156_v42 = vld [vmem:[#allocation2 + $0x44] sm:$0xf] }
  0xbf   :  { %3959 = vmatprep.mubr.msk.bf16.mxu0 %vm4533_vm0, %v4532_v15  ;;  %3979 = vmatprep.mubr.msk.bf16.mxu1 %vm4533_vm0, %v4532_v15 }
  0xc0   :  { %v1208_v48 = vor.u32 %v1207_v55, %v1204_v25  ;;  %v1211_v60 = vshrl.u32 %v3389_v47, 16  ;;  %v1214_v49 = vshll.u32 %v3389_v47, 16  ;;  %v4484_v25 = vld [vmem:[%s6043_s1 + $0x1b8] sm:$0xff]   ;;  %v3427_v55 = vcombine.low %v5056_v2, %v5077_v9  ;;  %v5175_v2 = vld [vmem:[#allocation2 + $0x4c] sm:$0xf] }
  0xc1   :  { %v3429_v9 = vcombine.low %v5103_v16, %v5130_v20  ;;  %v3430_v16 = vcombine.low %v5132_v21, %v5156_v42  ;;  %v5224_v20 = vld [vmem:[#allocation2 + $0x68] sm:$0xf] }
  0xc2   :  { %v1209_v35 = vsel %vm792_vm3, %v1199_v36, %v1208_v48  ;;  %v1213_v51 = vrot.slane %v1211_v60, 3  ;;  %v1216_v52 = vrot.slane %v1214_v49, 4  ;;  %v4479_v36 = vld [vmem:[%s6043_s1 + $0x1b0] sm:$0xff]  }
  0xc4   :  { %v1217_v61 = vor.u32 %v1216_v52, %v1213_v51 }
  0xc6   :  { %3960 = vmatmul.mubr.bf16.gmra.mrb[76].mxu0 %v4854_v45  ;;  %3980 = vmatmul.mubr.bf16.vlgmr.msra.gmra.mrb[76].mxu1 %v1200_v43  ;;  %v3423_v45 = vcombine.low %v1077_v39, %v1078_v38  ;;  %v1218_v4 = vsel %vm792_vm3, %v1208_v48, %v1217_v61  ;;  %v1227_v33 = vsel %vm792_vm3, %v1217_v61, %v1226_v44  ;;  %v1231_v39 = vrot.slane %v1229_v12, 3  ;;  %v5158_v43 = vld [vmem:[#allocation2 + $0x48] sm:$0xf] }
  0xc7   :  { %3983 = vmatprep.mubr.msk.bf16.mxu1 %vm4533_vm0, %v4532_v15  ;;  %4047 = vmatprep.mubr.msk.bf16.mxu0 %vm4533_vm0, %v4532_v15  ;;  %v1234_v38 = vrot.slane %v1232_v13, 4  ;;  %v1252_v48 = vrot.slane %v1250_v41, 4  ;;  %v3394_v60 = vcombine.low %v5156_v42, %v5158_v43 }
  0xc8   :  { %4100 = vmatpush3.bf16.msra.mxu1 %v4446_v46  ;;  %v1249_v46 = vrot.slane %v1247_v40, 3  ;;  %v3398_v40 = vcombine.low %v5222_v29, %v5224_v20 }
  0xc9   :  { %4101 = vmatprep.subr.bf16.mxu1 %v4532_v15  ;;  %v1235_v11 = vor.u32 %v1234_v38, %v1231_v39  ;;  %v1259_v56 = vshll.u32 %v3394_v60, 16 }
  0xca   :  { %v1253_v49 = vor.u32 %v1252_v48, %v1249_v46 }
  0xcb   :  { %v1236_v30 = vsel %vm792_vm3, %v1226_v44, %v1235_v11  ;;  %v1245_v47 = vsel %vm792_vm3, %v1235_v11, %v1244_v37  ;;  %v1261_v52 = vrot.slane %v1259_v56, 4 }
  0xcc   :  { %4102 = vmatpush3.bf16.msra.mxu1 %v4452_v50  ;;  %v1256_v50 = vshrl.u32 %v3394_v60, 16 }
  0xcd   :  { %4103 = vmatprep.subr.bf16.mxu1 %v4532_v15 }
  0xce   :  { %3984 = vmatmul.mubr.bf16.gmra.mrb[80].mxu1 %v1209_v35  ;;  %4048 = vmatmul.mubr.bf16.vlgmr.msra.gmra.mrb[80].mxu0 %v3423_v45  ;;  %v5177_v45 = vld [vmem:[#allocation2 + $0x50] sm:$0xf]  ;;  %v3428_v35 = vcombine.low %v5079_v0, %v5101_v14  ;;  %v1258_v51 = vrot.slane %v1256_v50, 3 }
  0xcf   :  { %4168 = vmatpush3.bf16.msra.mxu0 %v4449_v6  ;;  %3987 = vmatprep.mubr.msk.bf16.mxu1 %vm4533_vm0, %v4532_v15  ;;  %v1254_v6 = vsel %vm792_vm3, %v1244_v37, %v1253_v49  ;;  %v3395_v54 = vcombine.low %v5175_v2, %v5177_v45 }
  0xd0   :  { %4051 = vmatprep.mubr.msk.bf16.mxu0 %vm4533_vm0, %v4532_v15  ;;  %4169 = vmatprep.subr.bf16.mxu0 %v4532_v15 }
  0xd1   :  { %4104 = vmatpush3.bf16.msra.mxu1 %v4458_v57  ;;  %v1262_v57 = vor.u32 %v1261_v52, %v1258_v51  ;;  %v1265_v61 = vshrl.u32 %v3395_v54, 16 }
  0xd2   :  { %4105 = vmatprep.subr.bf16.mxu1 %v4532_v15 }
  0xd3   :  { %4170 = vmatpush3.bf16.msra.mxu0 %v4453_v26  ;;  %v1268_v26 = vshll.u32 %v3395_v54, 16  ;;  %v1263_v0 = vsel %vm792_vm3, %v1253_v49, %v1262_v57  ;;  %v3432_v49 = vcombine.low %v5177_v45, %v5188_v5 }
  0xd4   :  { %4171 = vmatprep.subr.bf16.mxu0 %v4532_v15 }
  0xd5   :  { %4106 = vmatpush3.bf16.msra.mxu1 %v4462_v1  ;;  %v1267_v1 = vrot.slane %v1265_v61, 3 }
  0xd6   :  { %3988 = vmatmul.mubr.bf16.gmra.mrb[84].mxu1 %v1218_v4  ;;  %4052 = vmatmul.mubr.bf16.gmra.mrb[84].mxu0 %v3424_v3  ;;  %v1270_v3 = vrot.slane %v1268_v26, 4  ;;  %v3396_v4 = vcombine.low %v5188_v5, %v5190_v63 }
  0xd7   :  { %3991 = vmatprep.mubr.msk.bf16.mxu1 %vm4533_vm0, %v4532_v15  ;;  %4055 = vmatprep.mubr.msk.bf16.mxu0 %vm4533_vm0, %v4532_v15 }
  0xd8   :  { %4172 = vmatpush3.bf16.msra.mxu0 %v4459_v59  ;;  %4107 = vmatprep.subr.bf16.mxu1 %v4532_v15  ;;  %v1271_v27 = vor.u32 %v1270_v3, %v1267_v1  ;;  %v1274_v32 = vshrl.u32 %v3396_v4, 16  ;;  %v1277_v8 = vshll.u32 %v3396_v4, 16  ;;  %v5201_v59 = vld [vmem:[#allocation2 + $0x5c] sm:$0xf] }
  0xd9   :  { %4173 = vmatprep.subr.bf16.mxu0 %v4532_v15  ;;  %4108 = vmatpush3.bf16.msra.mxu1 %v4468_v10  ;;  %v5203_v10 = vld [vmem:[#allocation2 + $0x60] sm:$0xf]  ;;  %v3433_v5 = vcombine.low %v5190_v63, %v5201_v59  ;;  %v2208_v63 = vld [vmem:[#allocation2 + $0xc] sm:$0xf] }
  0xda   :  { %4109 = vmatprep.subr.bf16.mxu1 %v4532_v15  ;;  %v1279_v39 = vrot.slane %v1277_v8, 4  ;;  %v3397_v38 = vcombine.low %v5201_v59, %v5203_v10  ;;  %v5273_v59 = vld [vmem:[#allocation2 + $0x10] sm:$0xf] }
  0xdc   :  { %4174 = vmatpush3.bf16.msra.mxu0 %v4465_v17  ;;  %v1283_v11 = vshrl.u32 %v3397_v38, 16  ;;  %v1286_v22 = vshll.u32 %v3397_v38, 16 }
  0xdd   :  { %4175 = vmatprep.subr.bf16.mxu0 %v4532_v15  ;;  %4110 = vmatpush3.bf16.msra.mxu1 %v4474_v18  ;;  %v1272_v18 = vsel %vm792_vm3, %v1262_v57, %v1271_v27 }
  0xde   :  { %3992 = vmatmul.mubr.bf16.gmra.mrb[88].mxu1 %v1227_v33  ;;  %4056 = vmatmul.mubr.bf16.gmra.mrb[88].mxu0 %v3425_v19  ;;  %v1276_v33 = vrot.slane %v1274_v32, 3  ;;  %v1288_v37 = vrot.slane %v1286_v22, 4  ;;  %v4487_v32 = vld [vmem:[#allocation2 + $0x10] sm:$0xff]  }
  0xdf   :  { %3995 = vmatprep.mubr.msk.bf16.mxu1 %vm4533_vm0, %v4532_v15  ;;  %4059 = vmatprep.mubr.msk.bf16.mxu0 %vm4533_vm0, %v4532_v15 }
  0xe0   :  { %4176 = vmatpush3.bf16.msra.mxu0 %v4469_v62  ;;  %4111 = vmatprep.subr.bf16.mxu1 %v4532_v15 }
  0xe1   :  { %4177 = vmatprep.subr.bf16.mxu0 %v4532_v15  ;;  %4112 = vmatpush3.bf16.msra.mxu1 %v4478_v7  ;;  %v1280_v7 = vor.u32 %v1279_v39, %v1276_v33  ;;  %v3434_v33 = vcombine.low %v5203_v10, %v5222_v29  ;;  %v4489_v10 = vld [vmem:[#allocation2 + $0x18] sm:$0xff]  }
  0xe2   :  { %4113 = vmatprep.subr.bf16.mxu1 %v4532_v15  ;;  %v5290_v29 = vld [vmem:[#allocation2 + $0x14] sm:$0xff]  }
  0xe3   :  { %v1281_v31 = vsel %vm792_vm3, %v1271_v27, %v1280_v7 }
  0xe4   :  { %4178 = vmatpush3.bf16.msra.mxu0 %v4475_v28 }
  0xe5   :  { %4179 = vmatprep.subr.bf16.mxu0 %v4532_v15  ;;  %4114 = vmatpush3.bf16.msra.mxu1 %v4483_v58 }
  0xe6   :  { %3996 = vmatmul.mubr.bf16.gmra.mrb[92].mxu1 %v1236_v30  ;;  %4060 = vmatmul.mubr.bf16.gmra.mrb[92].mxu0 %v3426_v24  ;;  %v3431_v30 = vcombine.low %v5158_v43, %v5175_v2 }
  0xe7   :  { %3999 = vmatprep.mubr.msk.bf16.mxu1 %vm4533_vm0, %v4532_v15  ;;  %4063 = vmatprep.mubr.msk.bf16.mxu0 %vm4533_vm0, %v4532_v15 }
  0xe8   :  { %4180 = vmatpush3.bf16.msra.mxu0 %v4479_v36  ;;  %4235 = vmatprep.subr.bf16.mxu1 %v4532_v15  ;;  %v1285_v36 = vrot.slane %v1283_v11, 3  ;;  %v3497_v11 = vcombine.low %v2208_v63, %v5273_v59 }
  0xe9   :  { %4181 = vmatprep.subr.bf16.mxu0 %v4532_v15 }
  0xea   :  { %v1289_v43 = vor.u32 %v1288_v37, %v1285_v36 }
  0xec   :  { %4182 = vmatpush3.bf16.msra.mxu0 %v4484_v25  ;;  %v1292_v25 = vshrl.u32 %v3398_v40, 16  ;;  %v1290_v56 = vsel %vm792_vm3, %v1280_v7, %v1289_v43 }
  0xed   :  { %4303 = vmatprep.subr.bf16.mxu0 %v4532_v15 }
  0xee   :  { %4000 = vmatmul.mubr.bf16.gmra.mrb[96].mxu1 %v1245_v47  ;;  %4064 = vmatmul.mubr.bf16.gmra.mrb[96].mxu0 %v3427_v55  ;;  %v1295_v55 = vshll.u32 %v3398_v40, 16 }
  0xef   :  { %4003 = vmatprep.mubr.msk.bf16.mxu1 %vm4533_vm0, %v4532_v15  ;;  %4067 = vmatprep.mubr.msk.bf16.mxu0 %vm4533_vm0, %v4532_v15 }
  0xf6   :  { %4004 = vmatmul.mubr.bf16.gmra.mrb[100].mxu1 %v1254_v6  ;;  %4068 = vmatmul.mubr.bf16.gmra.mrb[100].mxu0 %v3428_v35  ;;  %v1294_v35 = vrot.slane %v1292_v25, 3  ;;  %v1297_v6 = vrot.slane %v1295_v55, 4  ;;  %v1895_v25 = vshrl.u32 %v4487_v32, 16 }
  0xf7   :  { %4007 = vmatprep.mubr.msk.bf16.mxu1 %vm4533_vm0, %v4532_v15  ;;  %4071 = vmatprep.mubr.msk.bf16.mxu0 %vm4533_vm0, %v4532_v15 }
  0xf8   :  { %v1298_v54 = vor.u32 %v1297_v6, %v1294_v35  ;;  %v2324_v35 = vshll.u32 %v5290_v29, 16 }
  0xfa   :  { %v1299_v1 = vsel %vm792_vm3, %v1289_v43, %v1298_v54 }
  0xfe   :  { %4008 = vmatmul.mubr.bf16.gmra.mrb[104].mxu1 %v1263_v0  ;;  %4072 = vmatmul.mubr.bf16.gmra.mrb[104].mxu0 %v3429_v9  ;;  %v4486_v9 = vld [vmem:[#allocation2 + $0x8] sm:$0xff]  }
  0xff   :  { %4011 = vmatprep.mubr.msk.bf16.mxu1 %vm4533_vm0, %v4532_v15  ;;  %4075 = vmatprep.mubr.msk.bf16.mxu0 %vm4533_vm0, %v4532_v15  ;;  %v1886_v8 = vshll.u32 %v4486_v9, 16  ;;  %v1884_v39 = vshrl.u32 %v4486_v9, 16  ;;  %v2326_v9 = vrot.slane %v2324_v35, 1 }
 0x101   :  { %v5205_v44 = vpop.f32.mrb[0].mxu0  ;;  %v5207_v12 = vpop.f32.mrb[0].mxu1  ;;  %v1888_v38 = vrot.slane %v1886_v8, 1 }
 0x102   :  { %v3777_v13 = vpop.f32.mrb[1].mxu0  ;;  %v3805_v14 = vpop.f32.mrb[1].mxu1 }
 0x103   :  { %v5211_v17 = vpop.f32.mrb[2].mxu0  ;;  %v5214_v19 = vpop.f32.mrb[2].mxu1 }
 0x104   :  { %v3778_v53 = vpop.f32.mrb[3].mxu0  ;;  %v3806_v62 = vpop.f32.mrb[3].mxu1 }
 0x105   :  { %v1891_v53 = vshll.u32 %v4487_v32, 16  ;;  %v1903_v32 = vshrl.u32 %v4489_v10, 16 }
 0x106   :  { %4012 = vmatmul.mubr.bf16.gmra.mrb[108].mxu1 %v1272_v18  ;;  %4076 = vmatmul.mubr.bf16.gmra.mrb[108].mxu0 %v3430_v16 }
 0x107   :  { %4015 = vmatprep.mubr.msk.bf16.mxu1 %vm4533_vm0, %v4532_v15  ;;  %4079 = vmatprep.mubr.msk.bf16.mxu0 %vm4533_vm0, %v4532_v15 }
 0x109   :  { %v5226_v21 = vpop.f32.mrb[4].mxu0  ;;  %v5228_v28 = vpop.f32.mrb[4].mxu1 }
 0x10a   :  { %v3781_v58 = vpop.f32.mrb[5].mxu0  ;;  %v3809_v24 = vpop.f32.mrb[5].mxu1 }
 0x10b   :  { %v5232_v23 = vpop.f32.mrb[6].mxu0  ;;  %v5235_v34 = vpop.f32.mrb[6].mxu1  ;;  %v1889_v24 = vor.u32 %v1888_v38, %v1884_v39 }
 0x10c   :  { %v3782_v41 = vpop.f32.mrb[7].mxu0  ;;  %v3810_v42 = vpop.f32.mrb[7].mxu1 }
 0x10d   :  { %v3435_v42 = vcombine.low %v5224_v20, %v5224_v20  ;;  %v5305_v20 = vld [vmem:[#allocation2 + $0x20] sm:$0xff]  }
 0x10e   :  { %4016 = vmatmul.mubr.bf16.gmra.mrb[112].mxu1 %v1281_v31  ;;  %4080 = vmatmul.mubr.bf16.gmra.mrb[112].mxu0 %v3431_v30  ;;  %v1893_v30 = vrot.slane %v1891_v53, 1  ;;  %v2319_v31 = vshll.u32 %v3497_v11, 16 }
 0x10f   :  { %4019 = vmatprep.mubr.msk.bf16.mxu1 %vm4533_vm0, %v4532_v15  ;;  %4083 = vmatprep.mubr.msk.bf16.mxu0 %vm4533_vm0, %v4532_v15 }
 0x110   :  { %v1894_v43 = vsel %vm1882_vm4, %v1889_v24, %v1893_v30 }
 0x111   :  { %v5243_v47 = vpop.f32.mrb[8].mxu0  ;;  %v5245_v46 = vpop.f32.mrb[8].mxu1 }
 0x112   :  { %v3785_v48 = vpop.f32.mrb[9].mxu0  ;;  %v3813_v60 = vpop.f32.mrb[9].mxu1 }
 0x113   :  { %v5249_v50 = vpop.f32.mrb[10].mxu0  ;;  %v5252_v2 = vpop.f32.mrb[10].mxu1  ;;  %v1899_v60 = vshll.u32 %v4489_v10, 16  ;;  %v4501_v10 = vld [vmem:[%s6043_s1 + $0x1d0] sm:$0xff]  }
 0x114   :  { %v3786_v51 = vpop.f32.mrb[11].mxu0  ;;  %v3814_v52 = vpop.f32.mrb[11].mxu1 }
 0x115   :  { %v4488_v52 = vld [vmem:[%s6043_s1 + $0x1c0] sm:$0xff]  }
 0x116   :  { %4020 = vmatmul.mubr.bf16.gmra.mrb[116].mxu1 %v1290_v56  ;;  %4084 = vmatmul.mubr.bf16.gmra.mrb[116].mxu0 %v3432_v49  ;;  %v2317_v49 = vshrl.u32 %v3497_v11, 16  ;;  %v2321_v56 = vrot.slane %v2319_v31, 1 }
 0x117   :  { %4023 = vmatprep.mubr.msk.bf16.mxu1 %vm4533_vm0, %v4532_v15  ;;  %4087 = vmatprep.mubr.msk.bf16.mxu0 %vm4533_vm0, %v4532_v15 }
 0x119   :  { %v5258_v45 = vpop.f32.mrb[12].mxu0  ;;  %v5260_v57 = vpop.f32.mrb[12].mxu1 }
 0x11a   :  { %v3789_v61 = vpop.f32.mrb[13].mxu0  ;;  %v3817_v26 = vpop.f32.mrb[13].mxu1 }
 0x11b   :  { %v5264_v0 = vpop.f32.mrb[14].mxu0  ;;  %v5267_v3 = vpop.f32.mrb[14].mxu1  ;;  %v1897_v61 = vor.u32 %v1895_v25, %v1893_v30  ;;  %v1901_v26 = vrot.slane %v1899_v60, 1  ;;  %v5348_v25 = vld [vmem:[#allocation2 + $0x24] sm:$0xff]  }
 0x11c   :  { %v3790_v4 = vpop.f32.mrb[15].mxu0  ;;  %v3818_v27 = vpop.f32.mrb[15].mxu1 }
 0x11d   :  { %v1902_v11 = vsel %vm1882_vm4, %v1897_v61, %v1901_v26  ;;  %v1905_v31 = vor.u32 %v1903_v32, %v1901_v26 }
 0x11e   :  { %4024 = vmatmul.mubr.bf16.gmra.mrb[120].mxu1 %v1299_v1  ;;  %4088 = vmatmul.mubr.bf16.gmra.mrb[120].mxu0 %v3433_v5  ;;  %v2322_v5 = vor.u32 %v2321_v56, %v2317_v49  ;;  %v4495_v1 = vld [vmem:[%s6043_s1 + $0x1c8] sm:$0xff]   ;;  %v4505_v49 = vld [vmem:[%s6043_s1 + $0x1d8] sm:$0xff]  }
 0x11f   :  { %4027 = vmatprep.mubr.msk.bf16.mxu1 %vm4533_vm0, %v4532_v15  ;;  %4091 = vmatprep.mubr.msk.bf16.mxu0 %vm4533_vm0, %v4532_v15 }
 0x121   :  { %v5275_v13 = vpop.f32.mrb[16].mxu0  ;;  %v5277_v14 = vpop.f32.mrb[16].mxu1 }
 0x122   :  { %v3793_v16 = vpop.f32.mrb[17].mxu0  ;;  %v3821_v18 = vpop.f32.mrb[17].mxu1 }
 0x123   :  { %v5281_v62 = vpop.f32.mrb[18].mxu0  ;;  %v5283_v7 = vpop.f32.mrb[18].mxu1  ;;  %v1907_v18 = vshll.u32 %v5305_v20, 16 }
 0x124   :  { %v3794_v22 = vpop.f32.mrb[19].mxu0  ;;  %v3822_v58 = vpop.f32.mrb[19].mxu1 }
 0x125   :  { %v2327_v22 = vsel %vm1882_vm4, %v2322_v5, %v2326_v9  ;;  %v4492_v58 = vld [vmem:[%s6043_s1 + $0x200] sm:$0xff]  }
 0x126   :  { %4028 = vmatmul.mubr.bf16.gmra.mrb[124].mxu1 %v1298_v54  ;;  %4092 = vmatmul.mubr.bf16.gmra.mrb[124].mxu0 %v3434_v33  ;;  %v5307_v54 = vld [vmem:[#allocation2 + $0x1c] sm:$0xff]   ;;  %v2328_v33 = vshrl.u32 %v5290_v29, 16 }
 0x127   :  { %4095 = vmatprep.mubr.msk.bf16.mxu0 %vm4533_vm0, %v4532_v15  ;;  %4115 = vmatprep.mubr.msk.bf16.mxu1 %vm4533_vm0, %v4532_v15  ;;  %v6064_v39 = vshll.u32 %v5307_v54, 16  ;;  %v2336_v32 = vshrl.u32 %v5307_v54, 16 }
 0x129   :  { %v5292_v36 = vpop.f32.mrb[20].mxu0  ;;  %v5294_v37 = vpop.f32.mrb[20].mxu1 }
 0x12a   :  { %v3797_v40 = vpop.f32.mrb[21].mxu0  ;;  %v3825_v41 = vpop.f32.mrb[21].mxu1 }
 0x12b   :  { %v5299_v55 = vpop.f32.mrb[22].mxu0  ;;  %v451_v48 = vpop.f32.mrb[22].mxu1  ;;  %v1909_v40 = vrot.slane %v1907_v18, 1  ;;  %v2330_v41 = vor.u32 %v2328_v33, %v2326_v9 }
 0x12c   :  { %v3798_v6 = vpop.f32.mrb[23].mxu0  ;;  %v3826_v51 = vpop.f32.mrb[23].mxu1 }
 0x12d   :  { %v1910_v61 = vsel %vm1882_vm4, %v1905_v31, %v1909_v40 }
 0x12e   :  { %4096 = vmatmul.mubr.bf16.gmra.mrb[128].mxu0 %v3435_v42  ;;  %4116 = vmatmul.mubr.bf16.vlgmr.msra.gmra.mrb[128].mxu1 %v1894_v43  ;;  %v2334_v42 = vrot.slane %v6064_v39, 1  ;;  %v5346_v43 = vld [vmem:[#allocation2 + $0x28] sm:$0xff]  }
 0x12f   :  { %4119 = vmatprep.mubr.msk.bf16.mxu1 %vm4533_vm0, %v4532_v15  ;;  %4183 = vmatprep.mubr.msk.bf16.mxu0 %vm4533_vm0, %v4532_v15 }
 0x130   :  { %4236 = vmatpush3.bf16.msra.mxu1 %v4488_v52  ;;  %v2335_v26 = vsel %vm1882_vm4, %v2330_v41, %v2334_v42  ;;  %v1919_v41 = vshrl.u32 %v5346_v43, 16 }
 0x131   :  { %v5318_v4 = vpop.f32.mrb[24].mxu0  ;;  %v669_v27 = vpop.f32.mrb[24].mxu1  ;;  %4237 = vmatprep.subr.bf16.mxu1 %v4532_v15 }
 0x132   :  { %v670_v8 = vadd.f32 %v669_v27, %v5205_v44  ;;  %v3801_v63 = vpop.f32.mrb[25].mxu0  ;;  %v3845_v16 = vpop.f32.mrb[25].mxu1  ;;  %v1915_v27 = vshll.u32 %v5346_v43, 16 }
 0x133   :  { %v5325_v38 = vpop.f32.mrb[26].mxu0  ;;  %v672_v53 = vpop.f32.mrb[26].mxu1 }
 0x134   :  { %v673_v44 = vadd.f32 %v672_v53, %v5211_v17  ;;  %v3802_v24 = vpop.f32.mrb[27].mxu0  ;;  %v3846_v30 = vpop.f32.mrb[27].mxu1  ;;  %4238 = vmatpush3.bf16.msra.mxu1 %v4495_v1  ;;  %v4496_v17 = vld [vmem:[%s6043_s1 + $0x208] sm:$0xff]   ;;  %v1911_v1 = vshrl.u32 %v5305_v20, 16  ;;  %v4502_v53 = vld [vmem:[%s6043_s1 + $0x210] sm:$0xff]   ;;  %v4511_v20 = vld [vmem:[%s6043_s1 + $0x1e0] sm:$0xff]  }
 0x135   :  { %4239 = vmatprep.subr.bf16.mxu1 %v4532_v15  ;;  %v4508_v30 = vld [vmem:[%s6043_s1 + $0x218] sm:$0xff]  }
 0x136   :  { %4120 = vmatmul.mubr.bf16.gmra.mrb[132].mxu1 %v1902_v11  ;;  %4184 = vmatmul.mubr.bf16.vlgmr.msra.gmra.mrb[132].mxu0 %v2327_v22  ;;  %v5373_v11 = vld [vmem:[#allocation2 + $0x30] sm:$0xff]   ;;  %v1913_v22 = vor.u32 %v1911_v1, %v1909_v40 }
 0x137   :  { %4304 = vmatpush3.bf16.msra.mxu0 %v4492_v58  ;;  %4123 = vmatprep.mubr.msk.bf16.mxu1 %vm4533_vm0, %v4532_v15  ;;  %v1917_v58 = vrot.slane %v1915_v27, 1  ;;  %v1923_v40 = vshll.u32 %v5373_v11, 16  ;;  %v4512_v27 = vld [vmem:[%s6043_s1 + $0x220] sm:$0xff]  }
 0x138   :  { %4187 = vmatprep.mubr.msk.bf16.mxu0 %vm4533_vm0, %v4532_v15  ;;  %4305 = vmatprep.subr.bf16.mxu0 %v4532_v15 }
 0x139   :  { %v677_v48 = vpop.f32.mrb[28].mxu1  ;;  %v949_v60 = vpop.f32.mrb[28].mxu0  ;;  %4240 = vmatpush3.bf16.msra.mxu1 %v4501_v10 }
 0x13a   :  { %v678_v56 = vadd.f32 %v677_v48, %v5226_v21  ;;  %v5357_v6 = vadd.f32 %v949_v60, %v670_v8  ;;  %v3849_v51 = vpop.f32.mrb[29].mxu1  ;;  %v3913_v52 = vpop.f32.mrb[29].mxu0  ;;  %4241 = vmatprep.subr.bf16.mxu1 %v4532_v15  ;;  %v6057_v21 = vshll.u32 %v5348_v25, 16 }
 0x13b   :  { %v680_v5 = vpop.f32.mrb[30].mxu1  ;;  %v952_v9 = vpop.f32.mrb[30].mxu0  ;;  %4306 = vmatpush3.bf16.msra.mxu0 %v4496_v17  ;;  %v6060_v51 = vshrl.u32 %v5348_v25, 16 }
 0x13c   :  { %v681_v8 = vadd.f32 %v680_v5, %v5232_v23  ;;  %v5367_v63 = vadd.f32 %v952_v9, %v673_v44  ;;  %v3914_v16 = vpop.f32.mrb[31].mxu0  ;;  %v3850_v18 = vpop.f32.mrb[31].mxu1  ;;  %4307 = vmatprep.subr.bf16.mxu0 %v4532_v15  ;;  %v5378_v23 = vld [vmem:[#allocation2 + $0x2c] sm:$0xff]   ;;  %v2338_v44 = vor.u32 %v2336_v32, %v2334_v42  ;;  %v2342_v24 = vrot.slane %v6057_v21, 1 }
 0x13d   :  { %4242 = vmatpush3.bf16.msra.mxu1 %v4505_v49  ;;  %v4517_v42 = vld [vmem:[%s6043_s1 + $0x1e8] sm:$0xff]   ;;  %v6051_v52 = vshll.u32 %v5378_v23, 16  ;;  %v4521_v16 = vld [vmem:[%s6043_s1 + $0x1f0] sm:$0xff]   ;;  %v1921_v18 = vor.u32 %v1919_v41, %v1917_v58 }
 0x13e   :  { %4124 = vmatmul.mubr.bf16.gmra.mrb[136].mxu1 %v1910_v61  ;;  %4188 = vmatmul.mubr.bf16.gmra.mrb[136].mxu0 %v2335_v26  ;;  %v1918_v26 = vsel %vm1882_vm4, %v1913_v22, %v1917_v58  ;;  %v2343_v5 = vsel %vm1882_vm4, %v2338_v44, %v2342_v24  ;;  %v5426_v22 = vld [vmem:[#allocation2 + $0x34] sm:$0xff]   ;;  %v4518_v58 = vld [vmem:[%s6043_s1 + $0x228] sm:$0xff]  }
 0x13f   :  { %4127 = vmatprep.mubr.msk.bf16.mxu1 %vm4533_vm0, %v4532_v15  ;;  %4191 = vmatprep.mubr.msk.bf16.mxu0 %vm4533_vm0, %v4532_v15 }
 0x140   :  { %4308 = vmatpush3.bf16.msra.mxu0 %v4502_v53  ;;  %4243 = vmatprep.subr.bf16.mxu1 %v4532_v15  ;;  %v2350_v53 = vrot.slane %v6051_v52, 1 }
 0x141   :  { %v685_v10 = vpop.f32.mrb[32].mxu1  ;;  %v957_v31 = vpop.f32.mrb[32].mxu0  ;;  %4309 = vmatprep.subr.bf16.mxu0 %v4532_v15  ;;  %4244 = vmatpush3.bf16.msra.mxu1 %v4511_v20  ;;  %v5424_v20 = vld [vmem:[#allocation2 + $0x38] sm:$0xff]  }
 0x142   :  { %v686_v17 = vadd.f32 %v685_v10, %v5243_v47  ;;  %v5399_v48 = vadd.f32 %v957_v31, %v678_v56  ;;  %v3853_v60 = vpop.f32.mrb[33].mxu1  ;;  %v3917_v49 = vpop.f32.mrb[33].mxu0  ;;  %4245 = vmatprep.subr.bf16.mxu1 %v4532_v15 }
 0x143   :  { %v688_v43 = vpop.f32.mrb[34].mxu1  ;;  %v960_v61 = vpop.f32.mrb[34].mxu0 }
 0x144   :  { %v689_v9 = vadd.f32 %v688_v43, %v5249_v50  ;;  %v5407_v1 = vadd.f32 %v960_v61, %v681_v8  ;;  %v3918_v47 = vpop.f32.mrb[35].mxu0  ;;  %v3854_v56 = vpop.f32.mrb[35].mxu1  ;;  %4310 = vmatpush3.bf16.msra.mxu0 %v4508_v30  ;;  %v1925_v50 = vrot.slane %v1923_v40, 1  ;;  %v2346_v8 = vor.u32 %v6060_v51, %v2342_v24  ;;  %v4526_v30 = vld [vmem:[%s6043_s1 + $0x1f8] sm:$0xff]  }
 0x145   :  { %4311 = vmatprep.subr.bf16.mxu0 %v4532_v15  ;;  %4246 = vmatpush3.bf16.msra.mxu1 %v4517_v42  ;;  %v1927_v61 = vshrl.u32 %v5373_v11, 16  ;;  %v5455_v11 = vld [vmem:[#allocation2 + $0x3c] sm:$0xff]  }
 0x146   :  { %4128 = vmatmul.mubr.bf16.gmra.mrb[140].mxu1 %v1918_v26  ;;  %4192 = vmatmul.mubr.bf16.gmra.mrb[140].mxu0 %v2343_v5  ;;  %v1926_v42 = vsel %vm1882_vm4, %v1921_v18, %v1925_v50  ;;  %v2351_v60 = vsel %vm1882_vm4, %v2346_v8, %v2350_v53  ;;  %v1931_v26 = vshll.u32 %v5424_v20, 16  ;;  %v6054_v5 = vshrl.u32 %v5378_v23, 16  ;;  %v5452_v18 = vld [vmem:[#allocation2 + $0x40] sm:$0xff]  }
 0x147   :  { %4131 = vmatprep.mubr.msk.bf16.mxu1 %vm4533_vm0, %v4532_v15  ;;  %4195 = vmatprep.mubr.msk.bf16.mxu0 %vm4533_vm0, %v4532_v15 }
 0x148   :  { %4312 = vmatpush3.bf16.msra.mxu0 %v4512_v27  ;;  %4247 = vmatprep.subr.bf16.mxu1 %v4532_v15  ;;  %v2354_v8 = vor.u32 %v6054_v5, %v2350_v53 }
 0x149   :  { %v693_v44 = vpop.f32.mrb[36].mxu1  ;;  %v965_v24 = vpop.f32.mrb[36].mxu0  ;;  %4313 = vmatprep.subr.bf16.mxu0 %v4532_v15  ;;  %4248 = vmatpush3.bf16.msra.mxu1 %v4521_v16  ;;  %v4522_v16 = vld [vmem:[%s6043_s1 + $0x230] sm:$0xff]  }
 0x14a   :  { %v694_v10 = vadd.f32 %v693_v44, %v5258_v45  ;;  %v5437_v31 = vadd.f32 %v965_v24, %v686_v17  ;;  %v3857_v41 = vpop.f32.mrb[37].mxu1  ;;  %v3921_v40 = vpop.f32.mrb[37].mxu0  ;;  %4249 = vmatprep.subr.bf16.mxu1 %v4532_v15  ;;  %v6046_v45 = vshll.u32 %v5426_v22, 16  ;;  %v4527_v44 = vld [vmem:[%s6043_s1 + $0x238] sm:$0xff]  }
 0x14b   :  { %v696_v49 = vpop.f32.mrb[38].mxu1  ;;  %v968_v43 = vpop.f32.mrb[38].mxu0  ;;  %v1935_v41 = vshrl.u32 %v5424_v20, 16  ;;  %v1939_v40 = vshll.u32 %v5452_v18, 16 }
 0x14c   :  { %v697_v17 = vadd.f32 %v696_v49, %v5264_v0  ;;  %v5447_v47 = vadd.f32 %v968_v43, %v689_v9  ;;  %v3922_v56 = vpop.f32.mrb[39].mxu0  ;;  %v3858_v27 = vpop.f32.mrb[39].mxu1  ;;  %4314 = vmatpush3.bf16.msra.mxu0 %v4518_v58  ;;  %v1929_v0 = vor.u32 %v1927_v61, %v1925_v50  ;;  %v1933_v9 = vrot.slane %v1931_v26, 1 }
 0x14d   :  { %4315 = vmatprep.subr.bf16.mxu0 %v4532_v15  ;;  %4250 = vmatpush3.bf16.msra.mxu1 %v4526_v30  ;;  %v2358_v58 = vrot.slane %v6046_v45, 1  ;;  %v6048_v49 = vshrl.u32 %v5426_v22, 16  ;;  %v6047_v43 = vshll.u32 %v5455_v11, 16 }
 0x14e   :  { %4132 = vmatmul.mubr.bf16.gmra.mrb[144].mxu1 %v1926_v42  ;;  %4196 = vmatmul.mubr.bf16.gmra.mrb[144].mxu0 %v2351_v60  ;;  %v1934_v56 = vsel %vm1882_vm4, %v1929_v0, %v1933_v9 }
 0x14f   :  { %4135 = vmatprep.mubr.msk.bf16.mxu1 %vm4533_vm0, %v4532_v15  ;;  %4199 = vmatprep.mubr.msk.bf16.mxu0 %vm4533_vm0, %v4532_v15  ;;  %v2359_v20 = vsel %vm1882_vm4, %v2354_v8, %v2358_v58 }
 0x150   :  { %4316 = vmatpush3.bf16.msra.mxu0 %v4522_v16 }
 0x151   :  { %v701_v24 = vpop.f32.mrb[40].mxu1  ;;  %v973_v30 = vpop.f32.mrb[40].mxu0  ;;  %4317 = vmatprep.subr.bf16.mxu0 %v4532_v15 }
 0x152   :  { %v702_v50 = vadd.f32 %v701_v24, %v5275_v13  ;;  %v5472_v42 = vadd.f32 %v973_v30, %v694_v10  ;;  %v3861_v53 = vpop.f32.mrb[41].mxu1  ;;  %v3925_v60 = vpop.f32.mrb[41].mxu0  ;;  %v1937_v10 = vor.u32 %v1935_v41, %v1933_v9  ;;  %v1941_v24 = vrot.slane %v1939_v40, 1 }
 0x153   :  { %v704_v61 = vpop.f32.mrb[42].mxu1  ;;  %v976_v26 = vpop.f32.mrb[42].mxu0  ;;  %v2362_v30 = vor.u32 %v6048_v49, %v2358_v58  ;;  %v2366_v53 = vrot.slane %v6047_v43, 1 }
 0x154   :  { %v705_v27 = vadd.f32 %v704_v61, %v5281_v62  ;;  %v5479_v16 = vadd.f32 %v976_v26, %v697_v17  ;;  %v3926_v45 = vpop.f32.mrb[43].mxu0  ;;  %v3862_v13 = vpop.f32.mrb[43].mxu1  ;;  %4318 = vmatpush3.bf16.msra.mxu0 %v4527_v44  ;;  %v4509_v62 = vld [vmem:[#allocation2 + $0x48] sm:$0xff]   ;;  %v1942_v41 = vsel %vm1882_vm4, %v1937_v10, %v1941_v24  ;;  %v1943_v26 = vshrl.u32 %v5452_v18, 16 }
 0x155   :  { %v5489_v45 = vld [vmem:[#allocation2 + $0x44] sm:$0xff]   ;;  %v2367_v40 = vsel %vm1882_vm4, %v2362_v30, %v2366_v53  ;;  %v5502_v10 = vld [vmem:[#allocation2 + $0x4c] sm:$0xff]  }
 0x156   :  { %4136 = vmatmul.mubr.bf16.gmra.mrb[148].mxu1 %v1934_v56  ;;  %4200 = vmatmul.mubr.bf16.gmra.mrb[148].mxu0 %v2359_v20  ;;  %v1947_v56 = vshll.u32 %v4509_v62, 16  ;;  %v6050_v20 = vshrl.u32 %v5455_v11, 16  ;;  %v6049_v13 = vshll.u32 %v5489_v45, 16  ;;  %v1945_v18 = vor.u32 %v1943_v26, %v1941_v24 }
 0x157   :  { %4139 = vmatprep.mubr.msk.bf16.mxu1 %vm4533_vm0, %v4532_v15  ;;  %4203 = vmatprep.mubr.msk.bf16.mxu0 %vm4533_vm0, %v4532_v15  ;;  %v6053_v49 = vshrl.u32 %v5489_v45, 16  ;;  %v6052_v24 = vshll.u32 %v5502_v10, 16 }
 0x158   :  { %v1949_v30 = vrot.slane %v1947_v56, 1 }
 0x159   :  { %v709_v17 = vpop.f32.mrb[44].mxu1  ;;  %v981_v0 = vpop.f32.mrb[44].mxu0 }
 0x15a   :  { %v710_v9 = vadd.f32 %v709_v17, %v5292_v36  ;;  %v5492_v8 = vadd.f32 %v981_v0, %v702_v50  ;;  %v3865_v44 = vpop.f32.mrb[45].mxu1  ;;  %v3929_v58 = vpop.f32.mrb[45].mxu0  ;;  %v4513_v0 = vld [vmem:[#allocation2 + $0x50] sm:$0xff]  }
 0x15b   :  { %v712_v60 = vpop.f32.mrb[46].mxu1  ;;  %v984_v61 = vpop.f32.mrb[46].mxu0 }
 0x15c   :  { %v713_v43 = vadd.f32 %v712_v60, %v5299_v55  ;;  %v5500_v36 = vadd.f32 %v984_v61, %v705_v27  ;;  %v3930_v50 = vpop.f32.mrb[47].mxu0  ;;  %v3866_v17 = vpop.f32.mrb[47].mxu1  ;;  %v2370_v55 = vor.u32 %v6050_v20, %v2366_v53  ;;  %v2374_v27 = vrot.slane %v6049_v13, 1 }
 0x15d   :  { %v1950_v53 = vsel %vm1882_vm4, %v1945_v18, %v1949_v30 }
 0x15e   :  { %4140 = vmatmul.mubr.bf16.gmra.mrb[152].mxu1 %v1942_v41  ;;  %4204 = vmatmul.mubr.bf16.gmra.mrb[152].mxu0 %v2367_v40  ;;  %v1951_v41 = vshrl.u32 %v4509_v62, 16  ;;  %v1955_v40 = vshll.u32 %v4513_v0, 16  ;;  %v2375_v13 = vsel %vm1882_vm4, %v2370_v55, %v2374_v27 }
 0x15f   :  { %4143 = vmatprep.mubr.msk.bf16.mxu1 %vm4533_vm0, %v4532_v15  ;;  %4207 = vmatprep.mubr.msk.bf16.mxu0 %vm4533_vm0, %v4532_v15 }
 0x161   :  { %v717_v44 = vpop.f32.mrb[48].mxu1  ;;  %v989_v58 = vpop.f32.mrb[48].mxu0 }
 0x162   :  { %v718_v60 = vadd.f32 %v717_v44, %v5318_v4  ;;  %v5513_v61 = vadd.f32 %v989_v58, %v710_v9  ;;  %v3869_v50 = vpop.f32.mrb[49].mxu1  ;;  %v3933_v17 = vpop.f32.mrb[49].mxu0  ;;  %v1953_v9 = vor.u32 %v1951_v41, %v1949_v30  ;;  %v1957_v44 = vrot.slane %v1955_v40, 1 }
 0x163   :  { %v720_v26 = vpop.f32.mrb[50].mxu1  ;;  %v992_v56 = vpop.f32.mrb[50].mxu0  ;;  %v2378_v58 = vor.u32 %v6053_v49, %v2374_v27  ;;  %v2382_v50 = vrot.slane %v6052_v24, 1 }
 0x164   :  { %v721_v20 = vadd.f32 %v720_v26, %v5325_v38  ;;  %v5520_v62 = vadd.f32 %v992_v56, %v713_v43  ;;  %v3934_v52 = vpop.f32.mrb[51].mxu0  ;;  %v3870_v4 = vpop.f32.mrb[51].mxu1  ;;  %v4515_v38 = vld [vmem:[#allocation2 + $0x58] sm:$0xff]   ;;  %v1958_v41 = vsel %vm1882_vm4, %v1953_v9, %v1957_v44  ;;  %v1959_v56 = vshrl.u32 %v4513_v0, 16 }
 0x165   :  { %v5530_v43 = vld [vmem:[#allocation2 + $0x54] sm:$0xff]   ;;  %v2383_v40 = vsel %vm1882_vm4, %v2378_v58, %v2382_v50  ;;  %v6056_v4 = vshrl.u32 %v5502_v10, 16 }
 0x166   :  { %4144 = vmatmul.mubr.bf16.gmra.mrb[156].mxu1 %v1950_v53  ;;  %4208 = vmatmul.mubr.bf16.gmra.mrb[156].mxu0 %v2375_v13  ;;  %v1963_v53 = vshll.u32 %v4515_v38, 16  ;;  %v6055_v24 = vshll.u32 %v5530_v43, 16  ;;  %v1961_v0 = vor.u32 %v1959_v56, %v1957_v44 }
 0x167   :  { %4147 = vmatprep.mubr.msk.bf16.mxu1 %vm4533_vm0, %v4532_v15  ;;  %4211 = vmatprep.mubr.msk.bf16.mxu0 %vm4533_vm0, %v4532_v15  ;;  %v2386_v58 = vor.u32 %v6056_v4, %v2382_v50 }
 0x168   :  { %v1965_v9 = vrot.slane %v1963_v53, 1 }
 0x169   :  { %v725_v52 = vpop.f32.mrb[52].mxu1  ;;  %v997_v18 = vpop.f32.mrb[52].mxu0 }
 0x16a   :  { %v726_v13 = vadd.f32 %v725_v52, %v5207_v12  ;;  %v5533_v30 = vadd.f32 %v997_v18, %v718_v60  ;;  %v3873_v55 = vpop.f32.mrb[53].mxu1  ;;  %v3937_v27 = vpop.f32.mrb[53].mxu0  ;;  %v4519_v52 = vld [vmem:[#allocation2 + $0x60] sm:$0xff]   ;;  %v1966_v53 = vsel %vm1882_vm4, %v1961_v0, %v1965_v9 }
 0x16b   :  { %v728_v17 = vpop.f32.mrb[54].mxu1  ;;  %v1000_v26 = vpop.f32.mrb[54].mxu0 }
 0x16c   :  { %v729_v49 = vadd.f32 %v728_v17, %v5214_v19  ;;  %v5540_v5 = vadd.f32 %v1000_v26, %v721_v20  ;;  %v3938_v12 = vpop.f32.mrb[55].mxu0  ;;  %v3874_v60 = vpop.f32.mrb[55].mxu1  ;;  %v2390_v19 = vrot.slane %v6055_v24, 1  ;;  %v5550_v20 = vld [vmem:[#allocation2 + $0x5c] sm:$0xff]   ;;  %v1967_v26 = vshrl.u32 %v4515_v38, 16 }
 0x16d   :  { %v1971_v12 = vshll.u32 %v4519_v52, 16  ;;  %v6059_v60 = vshrl.u32 %v5530_v43, 16  ;;  %v6058_v24 = vshll.u32 %v5550_v20, 16 }
 0x16e   :  { %4148 = vmatmul.mubr.bf16.gmra.mrb[160].mxu1 %v1958_v41  ;;  %4212 = vmatmul.mubr.bf16.gmra.mrb[160].mxu0 %v2383_v40  ;;  %v2391_v50 = vsel %vm1882_vm4, %v2386_v58, %v2390_v19  ;;  %v1969_v38 = vor.u32 %v1967_v26, %v1965_v9  ;;  %v5570_v58 = vld [vmem:[#allocation2 + $0x64] sm:$0xff]  }
 0x16f   :  { %4151 = vmatprep.mubr.msk.bf16.mxu1 %vm4533_vm0, %v4532_v15  ;;  %4215 = vmatprep.mubr.msk.bf16.mxu0 %vm4533_vm0, %v4532_v15  ;;  %v2394_v0 = vor.u32 %v6059_v60, %v2390_v19 }
 0x171   :  { %v733_v18 = vpop.f32.mrb[56].mxu1  ;;  %v1005_v55 = vpop.f32.mrb[56].mxu0 }
 0x172   :  { %v734_v27 = vadd.f32 %v733_v18, %v5228_v28  ;;  %v5553_v41 = vadd.f32 %v1005_v55, %v726_v13  ;;  %v3877_v40 = vpop.f32.mrb[57].mxu1  ;;  %v3941_v17 = vpop.f32.mrb[57].mxu0  ;;  %v1973_v18 = vrot.slane %v1971_v12, 1 }
 0x173   :  { %v736_v44 = vpop.f32.mrb[58].mxu1  ;;  %v1008_v56 = vpop.f32.mrb[58].mxu0 }
 0x174   :  { %v737_v4 = vadd.f32 %v736_v44, %v5235_v34  ;;  %v5560_v21 = vadd.f32 %v1008_v56, %v729_v49  ;;  %v3942_v28 = vpop.f32.mrb[59].mxu0  ;;  %v3878_v13 = vpop.f32.mrb[59].mxu1  ;;  %v2398_v34 = vrot.slane %v6058_v24, 1  ;;  %v4523_v49 = vld [vmem:[#allocation2 + $0x68] sm:$0x1f]   ;;  %v1974_v44 = vsel %vm1882_vm4, %v1969_v38, %v1973_v18 }
 0x175   :  { %v1975_v56 = vshrl.u32 %v4519_v52, 16  ;;  %v1979_v28 = vshll.u32 %v4523_v49, 16  ;;  %v6062_v13 = vshrl.u32 %v5550_v20, 16  ;;  %v6061_v24 = vshll.u32 %v5570_v58, 16 }
 0x176   :  { %4152 = vmatmul.mubr.bf16.gmra.mrb[164].mxu1 %v1966_v53  ;;  %4216 = vmatmul.mubr.bf16.gmra.mrb[164].mxu0 %v2391_v50  ;;  %v2399_v19 = vsel %vm1882_vm4, %v2394_v0, %v2398_v34 }
 0x177   :  { %4155 = vmatprep.mubr.msk.bf16.mxu1 %vm4533_vm0, %v4532_v15  ;;  %4219 = vmatprep.mubr.msk.bf16.mxu0 %vm4533_vm0, %v4532_v15  ;;  %v1977_v52 = vor.u32 %v1975_v56, %v1973_v18  ;;  %v1981_v38 = vrot.slane %v1979_v28, 1 }
 0x179   :  { %v741_v55 = vpop.f32.mrb[60].mxu1  ;;  %v1013_v40 = vpop.f32.mrb[60].mxu0  ;;  %v1982_v28 = vsel %vm1882_vm4, %v1977_v52, %v1981_v38 }
 0x17a   :  { %v742_v9 = vadd.f32 %v741_v55, %v5245_v46  ;;  %v5573_v17 = vadd.f32 %v1013_v40, %v734_v27  ;;  %v3881_v26 = vpop.f32.mrb[61].mxu1  ;;  %v3945_v12 = vpop.f32.mrb[61].mxu0  ;;  %v5582_v55 = vld [vmem:[#allocation2 + $0x6c] sm:$0xf]  ;;  %v2233_v40 = vld [vmem:[#allocation2 + $0x70] sm:$0x1] }
 0x17b   :  { %v744_v53 = vpop.f32.mrb[62].mxu1  ;;  %v1016_v50 = vpop.f32.mrb[62].mxu0  ;;  %v5593_v0 = vcombine.low %v5582_v55, %v2233_v40 }
 0x17c   :  { %v745_v60 = vadd.f32 %v744_v53, %v5252_v2  ;;  %v5580_v51 = vadd.f32 %v1016_v50, %v737_v4  ;;  %v3946_v46 = vpop.f32.mrb[63].mxu0  ;;  %v3882_v27 = vpop.f32.mrb[63].mxu1  ;;  %v2402_v2 = vor.u32 %v6062_v13, %v2398_v34  ;;  %v2406_v4 = vrot.slane %v6061_v24, 1 }
 0x17d   :  { %v6063_v46 = vshrl.u32 %v5570_v58, 16  ;;  %v2412_v27 = vshll.u32 %v5593_v0, 16 }
 0x17e   :  { %4156 = vmatmul.mubr.bf16.gmra.mrb[168].mxu1 %v1974_v44  ;;  %4220 = vmatmul.mubr.bf16.gmra.mrb[168].mxu0 %v2399_v19  ;;  %v2407_v34 = vsel %vm1882_vm4, %v2402_v2, %v2406_v4 }
 0x17f   :  { %4159 = vmatprep.mubr.msk.bf16.mxu1 %vm4533_vm0, %v4532_v15  ;;  %4223 = vmatprep.mubr.msk.bf16.mxu0 %vm4533_vm0, %v4532_v15  ;;  %v2410_v52 = vor.u32 %v6063_v46, %v2406_v4  ;;  %v2414_v2 = vrot.slane %v2412_v27, 1 }
 0x181   :  { %v749_v26 = vpop.f32.mrb[64].mxu1  ;;  %v1021_v12 = vpop.f32.mrb[64].mxu0 }
 0x182   :  { %v750_v18 = vadd.f32 %v749_v26, %v5260_v57  ;;  %v5596_v44 = vadd.f32 %v1021_v12, %v742_v9  ;;  %v3885_v56 = vpop.f32.mrb[65].mxu1  ;;  %v3949_v53 = vpop.f32.mrb[65].mxu0  ;;  %v1983_v9 = vshrl.u32 %v4523_v49, 16  ;;  %v2641_v26 = vld [vmem:[#allocation2 + $0xc] sm:$0xe] }
 0x183   :  { %v752_v50 = vpop.f32.mrb[66].mxu1  ;;  %v1024_v19 = vpop.f32.mrb[66].mxu0 }
 0x184   :  { %v753_v40 = vadd.f32 %v752_v50, %v5267_v3  ;;  %v5603_v24 = vadd.f32 %v1024_v19, %v745_v60  ;;  %v3950_v13 = vpop.f32.mrb[67].mxu0  ;;  %v3886_v57 = vpop.f32.mrb[67].mxu1  ;;  %v1985_v49 = vor.u32 %v1983_v9, %v1981_v38 }
 0x186   :  { %4160 = vmatmul.mubr.bf16.gmra.mrb[172].mxu1 %v1982_v28  ;;  %4224 = vmatmul.mubr.bf16.gmra.mrb[172].mxu0 %v2407_v34  ;;  %v2415_v28 = vsel %vm1882_vm4, %v2410_v52, %v2414_v2  ;;  %v3534_v34 = vcombine.low %v2641_v26, %v5273_v59 }
 0x187   :  { %4163 = vmatprep.mubr.msk.bf16.mxu1 %vm4533_vm0, %v4532_v15  ;;  %4227 = vmatprep.mubr.msk.bf16.mxu0 %vm4533_vm0, %v4532_v15 }
 0x188   :  { %v2663_v38 = vrot.slane %v3534_v34, 1  ;;  %v2933_v59 = vshrl.u32 %v3534_v34, 16  ;;  %v2936_v9 = vshll.u32 %v3534_v34, 16  ;;  %v2941_v34 = vrot.slane %v2324_v35, 2 }
 0x189   :  { %v757_v12 = vpop.f32.mrb[68].mxu1  ;;  %v1029_v3 = vpop.f32.mrb[68].mxu0 }
 0x18a   :  { %v758_v60 = vadd.f32 %v757_v12, %v5277_v14  ;;  %v5612_v13 = vadd.f32 %v1029_v3, %v750_v18  ;;  %v3889_v56 = vpop.f32.mrb[69].mxu1  ;;  %v3953_v53 = vpop.f32.mrb[69].mxu0  ;;  %v2416_v14 = vshrl.u32 %v5593_v0, 16  ;;  %v2664_v18 = vrot.slane %v5290_v29, 1 }
 0x18b   :  { %v760_v50 = vpop.f32.mrb[70].mxu1  ;;  %v1032_v19 = vpop.f32.mrb[70].mxu0 }
 0x18c   :  { %v761_v57 = vadd.f32 %v760_v50, %v5283_v7  ;;  %v5617_v4 = vadd.f32 %v1032_v19, %v753_v40  ;;  %v3954_v27 = vpop.f32.mrb[71].mxu0  ;;  %v3890_v46 = vpop.f32.mrb[71].mxu1  ;;  %v2418_v56 = vor.u32 %v2416_v14, %v2414_v2  ;;  %v2935_v19 = vrot.slane %v2933_v59, 1 }
 0x18d   :  { %v2940_v46 = vrot.slane %v2328_v33, 1 }
 0x18e   :  { %4164 = vmatmul.mubr.bf16.gmra.mrb[176].mxu1 %v1985_v49  ;;  %4228 = vmatmul.mubr.bf16.gmra.mrb[176].mxu0 %v2415_v28  ;;  %v2665_v49 = vsel %vm2662_vm5, %v2663_v38, %v2664_v18  ;;  %v2938_v28 = vrot.slane %v2936_v9, 2 }
 0x18f   :  { %4231 = vmatprep.mubr.msk.bf16.mxu0 %vm4533_vm0, %v4532_v15  ;;  %4251 = vmatprep.mubr.msk.bf16.mxu1 %vm4533_vm0, %v4532_v15 }
 0x190   :  { %v2939_v2 = vor.u32 %v2938_v28, %v2935_v19 }
 0x191   :  { %v765_v7 = vpop.f32.mrb[72].mxu1  ;;  %v1037_v40 = vpop.f32.mrb[72].mxu0 }
 0x192   :  { %v766_v52 = vadd.f32 %v765_v7, %v5294_v37  ;;  %v5628_v26 = vadd.f32 %v1037_v40, %v758_v60  ;;  %v3957_v12 = vpop.f32.mrb[73].mxu0  ;;  %v3893_v3 = vpop.f32.mrb[73].mxu1  ;;  %v2666_v37 = vrot.slane %v5307_v54, 1  ;;  %v2942_v60 = vor.u32 %v2941_v34, %v2940_v46 }
 0x193   :  { %v1040_v53 = vpop.f32.mrb[74].mxu0  ;;  %v768_v50 = vpop.f32.mrb[74].mxu1  ;;  %v2944_v12 = vrot.slane %v2336_v32, 1  ;;  %v6065_v46 = vshll.u32 %v5307_v54, 16 }
 0x194   :  { %v5633_v27 = vadd.f32 %v1040_v53, %v761_v57  ;;  %v3958_v39 = vpop.f32.mrb[75].mxu0  ;;  %v3894_v33 = vpop.f32.mrb[75].mxu1  ;;  %v2667_v7 = vsel %vm2662_vm5, %v2664_v18, %v2666_v37  ;;  %v2943_v40 = vsel %vm2931_vm6, %v2939_v2, %v2942_v60 }
 0x195   :  { %v2945_v3 = vrot.slane %v6065_v46, 2 }
 0x196   :  { %4232 = vmatmul.mubr.bf16.gmra.mrb[180].mxu0 %v2418_v56  ;;  %4252 = vmatmul.mubr.bf16.vlgmr.msra.gmra.mrb[180].mxu1 %v2665_v49 }
 0x197   :  { %4255 = vmatprep.mubr.msk.bf16.mxu1 %vm4533_vm0, %v4532_v15  ;;  %4319 = vmatprep.mubr.msk.bf16.mxu0 %vm4533_vm0, %v4532_v15  ;;  %v2946_v18 = vor.u32 %v2945_v3, %v2944_v12 }
 0x199   :  { %v1045_v14 = vpop.f32.mrb[76].mxu0  ;;  %v1395_v29 = vpop.f32.mrb[76].mxu1  ;;  %v2947_v2 = vsel %vm2931_vm6, %v2942_v60, %v2946_v18 }
 0x19a   :  { %v5640_v35 = vadd.f32 %v1045_v14, %v766_v52  ;;  %v1497_v39 = vadd.f32 %v1395_v29, %v5357_v6  ;;  %v3961_v57 = vpop.f32.mrb[77].mxu0  ;;  %v3981_v38 = vpop.f32.mrb[77].mxu1  ;;  %v2668_v6 = vrot.slane %v5348_v25, 1  ;;  %v6066_v14 = vshrl.u32 %v5348_v25, 16 }
 0x19b   :  { %v1048_v59 = vpop.f32.mrb[78].mxu0  ;;  %v1398_v9 = vpop.f32.mrb[78].mxu1  ;;  %v6067_v57 = vshll.u32 %v5348_v25, 16 }
 0x19c   :  { %v1498_v56 = vadd.f32 %v1398_v9, %v5367_v63  ;;  %v3962_v52 = vpop.f32.mrb[79].mxu0  ;;  %v3982_v53 = vpop.f32.mrb[79].mxu1  ;;  %v2669_v33 = vsel %vm2662_vm5, %v2666_v37, %v2668_v6  ;;  %v2948_v29 = vrot.slane %v6066_v14, 1  ;;  %v2670_v37 = vrot.slane %v5378_v23, 1 }
 0x19d   :  { %v2949_v38 = vrot.slane %v6067_v57, 2 }
 0x19e   :  { %4256 = vmatmul.mubr.bf16.gmra.mrb[184].mxu1 %v2667_v7  ;;  %4320 = vmatmul.mubr.bf16.vlgmr.msra.gmra.mrb[184].mxu0 %v2943_v40  ;;  %v2671_v52 = vsel %vm2662_vm5, %v2668_v6, %v2670_v37  ;;  %v2672_v6 = vrot.slane %v5426_v22, 1 }
 0x19f   :  { %4259 = vmatprep.mubr.msk.bf16.mxu1 %vm4533_vm0, %v4532_v15  ;;  %4323 = vmatprep.mubr.msk.bf16.mxu0 %vm4533_vm0, %v4532_v15  ;;  %v2950_v60 = vor.u32 %v2949_v38, %v2948_v29 }
 0x1a1   :  { %v1403_v49 = vpop.f32.mrb[80].mxu1  ;;  %v1647_v32 = vpop.f32.mrb[80].mxu0  ;;  %v2951_v53 = vsel %vm2931_vm6, %v2946_v18, %v2950_v60 }
 0x1a2   :  { %v1499_v54 = vadd.f32 %v1403_v49, %v5399_v48  ;;  %v5656_v50 = vadd.f32 %v1647_v32, %v1497_v39  ;;  %v3985_v63 = vpop.f32.mrb[81].mxu1  ;;  %v4049_v19 = vpop.f32.mrb[81].mxu0  ;;  %v6068_v49 = vshrl.u32 %v5378_v23, 16 }
 0x1a3   :  { %v1406_v28 = vpop.f32.mrb[82].mxu1  ;;  %v1650_v34 = vpop.f32.mrb[82].mxu0  ;;  %v6069_v63 = vshll.u32 %v5378_v23, 16 }
 0x1a4   :  { %v1500_v59 = vadd.f32 %v1406_v28, %v5407_v1  ;;  %v5665_v9 = vadd.f32 %v1650_v34, %v1498_v56  ;;  %v4050_v48 = vpop.f32.mrb[83].mxu0  ;;  %v3986_v39 = vpop.f32.mrb[83].mxu1  ;;  %v2952_v32 = vrot.slane %v6068_v49, 1 }
 0x1a5   :  { %v2953_v19 = vrot.slane %v6069_v63, 2  ;;  %v6070_v39 = vshrl.u32 %v5426_v22, 16 }
 0x1a6   :  { %4260 = vmatmul.mubr.bf16.gmra.mrb[188].mxu1 %v2669_v33  ;;  %4324 = vmatmul.mubr.bf16.gmra.mrb[188].mxu0 %v2947_v2 }
 0x1a7   :  { %4263 = vmatprep.mubr.msk.bf16.mxu1 %vm4533_vm0, %v4532_v15  ;;  %4327 = vmatprep.mubr.msk.bf16.mxu0 %vm4533_vm0, %v4532_v15  ;;  %v2954_v18 = vor.u32 %v2953_v19, %v2952_v32 }
 0x1a9   :  { %v1411_v7 = vpop.f32.mrb[84].mxu1  ;;  %v1655_v25 = vpop.f32.mrb[84].mxu0  ;;  %v2955_v48 = vsel %vm2931_vm6, %v2950_v60, %v2954_v18 }
 0x1aa   :  { %v1501_v40 = vadd.f32 %v1411_v7, %v5437_v31  ;;  %v5673_v1 = vadd.f32 %v1655_v25, %v1499_v54  ;;  %v3989_v12 = vpop.f32.mrb[85].mxu1  ;;  %v4053_v46 = vpop.f32.mrb[85].mxu0  ;;  %v2956_v7 = vrot.slane %v6070_v39, 1  ;;  %v6071_v25 = vshll.u32 %v5426_v22, 16 }
 0x1ab   :  { %v1414_v3 = vpop.f32.mrb[86].mxu1  ;;  %v1658_v56 = vpop.f32.mrb[86].mxu0 }
 0x1ac   :  { %v1502_v28 = vadd.f32 %v1414_v3, %v5447_v47  ;;  %v5682_v34 = vadd.f32 %v1658_v56, %v1500_v59  ;;  %v4054_v31 = vpop.f32.mrb[87].mxu0  ;;  %v3990_v54 = vpop.f32.mrb[87].mxu1  ;;  %v2673_v59 = vsel %vm2662_vm5, %v2670_v37, %v2672_v6  ;;  %v2957_v12 = vrot.slane %v6071_v25, 2 }
 0x1ad   :  { %v2674_v37 = vrot.slane %v5455_v11, 1  ;;  %v6072_v31 = vshrl.u32 %v5455_v11, 16 }
 0x1ae   :  { %4264 = vmatmul.mubr.bf16.gmra.mrb[192].mxu1 %v2671_v52  ;;  %4328 = vmatmul.mubr.bf16.gmra.mrb[192].mxu0 %v2951_v53  ;;  %v2958_v60 = vor.u32 %v2957_v12, %v2956_v7 }
 0x1af   :  { %4267 = vmatprep.mubr.msk.bf16.mxu1 %vm4533_vm0, %v4532_v15  ;;  %4331 = vmatprep.mubr.msk.bf16.mxu0 %vm4533_vm0, %v4532_v15  ;;  %v2675_v19 = vsel %vm2662_vm5, %v2672_v6, %v2674_v37  ;;  %v2960_v54 = vrot.slane %v6072_v31, 1  ;;  %v2676_v6 = vrot.slane %v5489_v45, 1 }
 0x1b1   :  { %v1419_v33 = vpop.f32.mrb[88].mxu1  ;;  %v1663_v23 = vpop.f32.mrb[88].mxu0  ;;  %v2677_v25 = vsel %vm2662_vm5, %v2674_v37, %v2676_v6  ;;  %v2678_v37 = vrot.slane %v5502_v10, 1 }
 0x1b2   :  { %v1503_v2 = vadd.f32 %v1419_v33, %v5472_v42  ;;  %v5690_v47 = vadd.f32 %v1663_v23, %v1501_v40  ;;  %v3993_v14 = vpop.f32.mrb[89].mxu1  ;;  %v4057_v29 = vpop.f32.mrb[89].mxu0  ;;  %v6073_v33 = vshll.u32 %v5455_v11, 16 }
 0x1b3   :  { %v1422_v57 = vpop.f32.mrb[90].mxu1  ;;  %v1666_v38 = vpop.f32.mrb[90].mxu0 }
 0x1b4   :  { %v1504_v46 = vadd.f32 %v1422_v57, %v5479_v16  ;;  %v5699_v3 = vadd.f32 %v1666_v38, %v1502_v28  ;;  %v4058_v42 = vpop.f32.mrb[91].mxu0  ;;  %v3994_v40 = vpop.f32.mrb[91].mxu1  ;;  %v2959_v28 = vsel %vm2931_vm6, %v2954_v18, %v2958_v60  ;;  %v2961_v23 = vrot.slane %v6073_v33, 2 }
 0x1b5   :  { %v6075_v40 = vshll.u32 %v5489_v45, 16 }
 0x1b6   :  { %4268 = vmatmul.mubr.bf16.gmra.mrb[196].mxu1 %v2673_v59  ;;  %4332 = vmatmul.mubr.bf16.gmra.mrb[196].mxu0 %v2955_v48  ;;  %v2962_v18 = vor.u32 %v2961_v23, %v2960_v54  ;;  %v2679_v54 = vsel %vm2662_vm5, %v2676_v6, %v2678_v37  ;;  %v6076_v23 = vshrl.u32 %v5502_v10, 16  ;;  %v2680_v6 = vrot.slane %v5530_v43, 1 }
 0x1b7   :  { %4271 = vmatprep.mubr.msk.bf16.mxu1 %vm4533_vm0, %v4532_v15  ;;  %4335 = vmatprep.mubr.msk.bf16.mxu0 %vm4533_vm0, %v4532_v15 }
 0x1b8   :  { %v2963_v12 = vsel %vm2931_vm6, %v2958_v60, %v2962_v18 }
 0x1b9   :  { %v1427_v56 = vpop.f32.mrb[92].mxu1  ;;  %v1671_v22 = vpop.f32.mrb[92].mxu0 }
 0x1ba   :  { %v1505_v52 = vadd.f32 %v1427_v56, %v5492_v8  ;;  %v5707_v16 = vadd.f32 %v1671_v22, %v1503_v2  ;;  %v3997_v53 = vpop.f32.mrb[93].mxu1  ;;  %v4061_v49 = vpop.f32.mrb[93].mxu0  ;;  %v2965_v56 = vrot.slane %v6075_v40, 2  ;;  %v6078_v40 = vshrl.u32 %v5530_v43, 16 }
 0x1bb   :  { %v1430_v32 = vpop.f32.mrb[94].mxu1  ;;  %v1674_v63 = vpop.f32.mrb[94].mxu0 }
 0x1bc   :  { %v1506_v14 = vadd.f32 %v1430_v32, %v5500_v36  ;;  %v5716_v29 = vadd.f32 %v1674_v63, %v1504_v46  ;;  %v4062_v8 = vpop.f32.mrb[95].mxu0  ;;  %v3998_v2 = vpop.f32.mrb[95].mxu1  ;;  %v6074_v46 = vshrl.u32 %v5489_v45, 16 }
 0x1bd   :  { %v6077_v8 = vshll.u32 %v5502_v10, 16 }
 0x1be   :  { %4272 = vmatmul.mubr.bf16.gmra.mrb[200].mxu1 %v2675_v19  ;;  %4336 = vmatmul.mubr.bf16.gmra.mrb[200].mxu0 %v2959_v28  ;;  %v2964_v42 = vrot.slane %v6074_v46, 1  ;;  %v2681_v46 = vsel %vm2662_vm5, %v2678_v37, %v2680_v6  ;;  %v2682_v37 = vrot.slane %v5550_v20, 1 }
 0x1bf   :  { %4275 = vmatprep.mubr.msk.bf16.mxu1 %vm4533_vm0, %v4532_v15  ;;  %4339 = vmatprep.mubr.msk.bf16.mxu0 %vm4533_vm0, %v4532_v15  ;;  %v2969_v2 = vrot.slane %v6077_v8, 2 }
 0x1c0   :  { %v2966_v60 = vor.u32 %v2965_v56, %v2964_v42  ;;  %v2972_v56 = vrot.slane %v6078_v40, 1 }
 0x1c1   :  { %v1435_v57 = vpop.f32.mrb[96].mxu1  ;;  %v1679_v11 = vpop.f32.mrb[96].mxu0 }
 0x1c2   :  { %v1507_v38 = vadd.f32 %v1435_v57, %v5513_v61  ;;  %v5724_v36 = vadd.f32 %v1679_v11, %v1505_v52  ;;  %v4001_v59 = vpop.f32.mrb[97].mxu1  ;;  %v4065_v48 = vpop.f32.mrb[97].mxu0  ;;  %v2967_v33 = vsel %vm2931_vm6, %v2962_v18, %v2966_v60 }
 0x1c3   :  { %v1438_v39 = vpop.f32.mrb[98].mxu1  ;;  %v1682_v7 = vpop.f32.mrb[98].mxu0 }
 0x1c4   :  { %v1508_v22 = vadd.f32 %v1438_v39, %v5520_v62  ;;  %v5733_v53 = vadd.f32 %v1682_v7, %v1506_v14  ;;  %v4066_v61 = vpop.f32.mrb[99].mxu0  ;;  %v4002_v52 = vpop.f32.mrb[99].mxu1  ;;  %v2968_v14 = vrot.slane %v6076_v23, 1 }
 0x1c6   :  { %4276 = vmatmul.mubr.bf16.gmra.mrb[204].mxu1 %v2677_v25  ;;  %4340 = vmatmul.mubr.bf16.gmra.mrb[204].mxu0 %v2963_v12  ;;  %v2970_v18 = vor.u32 %v2969_v2, %v2968_v14  ;;  %v6080_v14 = vshrl.u32 %v5550_v20, 16  ;;  %v6081_v2 = vshll.u32 %v5550_v20, 16 }
 0x1c7   :  { %4279 = vmatprep.mubr.msk.bf16.mxu1 %vm4533_vm0, %v4532_v15  ;;  %4343 = vmatprep.mubr.msk.bf16.mxu0 %vm4533_vm0, %v4532_v15 }
 0x1c8   :  { %v2971_v42 = vsel %vm2931_vm6, %v2966_v60, %v2970_v18  ;;  %v2976_v8 = vrot.slane %v6080_v14, 1 }
 0x1c9   :  { %v1443_v49 = vpop.f32.mrb[100].mxu1  ;;  %v1687_v45 = vpop.f32.mrb[100].mxu0 }
 0x1ca   :  { %v1509_v32 = vadd.f32 %v1443_v49, %v5533_v30  ;;  %v5741_v62 = vadd.f32 %v1687_v45, %v1507_v38  ;;  %v4005_v63 = vpop.f32.mrb[101].mxu1  ;;  %v4069_v19 = vpop.f32.mrb[101].mxu0 }
 0x1cb   :  { %v1446_v28 = vpop.f32.mrb[102].mxu1  ;;  %v1690_v31 = vpop.f32.mrb[102].mxu0 }
 0x1cc   :  { %v1510_v57 = vadd.f32 %v1446_v28, %v5540_v5  ;;  %v5750_v11 = vadd.f32 %v1690_v31, %v1508_v22  ;;  %v4070_v30 = vpop.f32.mrb[103].mxu0  ;;  %v4006_v38 = vpop.f32.mrb[103].mxu1  ;;  %v6079_v22 = vshll.u32 %v5530_v43, 16 }
 0x1ce   :  { %4280 = vmatmul.mubr.bf16.gmra.mrb[208].mxu1 %v2679_v54  ;;  %4344 = vmatmul.mubr.bf16.gmra.mrb[208].mxu0 %v2967_v33  ;;  %v2973_v61 = vrot.slane %v6079_v22, 2  ;;  %v2683_v33 = vsel %vm2662_vm5, %v2680_v6, %v2682_v37 }
 0x1cf   :  { %4283 = vmatprep.mubr.msk.bf16.mxu1 %vm4533_vm0, %v4532_v15  ;;  %4347 = vmatprep.mubr.msk.bf16.mxu0 %vm4533_vm0, %v4532_v15 }
 0x1d0   :  { %v2974_v60 = vor.u32 %v2973_v61, %v2972_v56  ;;  %v6082_v56 = vshrl.u32 %v5570_v58, 16  ;;  %v6083_v61 = vshll.u32 %v5570_v58, 16 }
 0x1d1   :  { %v1451_v59 = vpop.f32.mrb[104].mxu1  ;;  %v1695_v10 = vpop.f32.mrb[104].mxu0 }
 0x1d2   :  { %v1511_v48 = vadd.f32 %v1451_v59, %v5553_v41  ;;  %v5758_v5 = vadd.f32 %v1695_v10, %v1509_v32  ;;  %v4009_v39 = vpop.f32.mrb[105].mxu1  ;;  %v4073_v7 = vpop.f32.mrb[105].mxu0  ;;  %v2975_v23 = vsel %vm2931_vm6, %v2970_v18, %v2974_v60  ;;  %v2684_v10 = vrot.slane %v5570_v58, 1  ;;  %v2910_v18 = vld [vmem:[#allocation2 + $0x70] sm:$0x3] }
 0x1d3   :  { %v1454_v25 = vpop.f32.mrb[106].mxu1  ;;  %v1698_v12 = vpop.f32.mrb[106].mxu0  ;;  %v2980_v22 = vrot.slane %v6082_v56, 1 }
 0x1d4   :  { %v1512_v52 = vadd.f32 %v1454_v25, %v5560_v21  ;;  %v5767_v49 = vadd.f32 %v1698_v12, %v1510_v57  ;;  %v4074_v41 = vpop.f32.mrb[107].mxu0  ;;  %v4010_v45 = vpop.f32.mrb[107].mxu1  ;;  %v2977_v57 = vrot.slane %v6081_v2, 2  ;;  %v2685_v12 = vsel %vm2662_vm5, %v2682_v37, %v2684_v10 }
 0x1d5   :  { %v3559_v41 = vcombine.low %v5582_v55, %v2910_v18  ;;  %v2686_v37 = vrot.slane %v5593_v0, 1 }
 0x1d6   :  { %4284 = vmatmul.mubr.bf16.gmra.mrb[212].mxu1 %v2681_v46  ;;  %4348 = vmatmul.mubr.bf16.gmra.mrb[212].mxu0 %v2971_v42  ;;  %v2978_v6 = vor.u32 %v2977_v57, %v2976_v8 }
 0x1d7   :  { %4287 = vmatprep.mubr.msk.bf16.mxu1 %vm4533_vm0, %v4532_v15  ;;  %4351 = vmatprep.mubr.msk.bf16.mxu0 %vm4533_vm0, %v4532_v15  ;;  %v2687_v14 = vsel %vm2662_vm5, %v2684_v10, %v2686_v37 }
 0x1d8   :  { %v2979_v40 = vsel %vm2931_vm6, %v2974_v60, %v2978_v6  ;;  %v2985_v60 = vshrl.u32 %v3559_v41, 16 }
 0x1d9   :  { %v1459_v32 = vpop.f32.mrb[108].mxu1  ;;  %v1703_v43 = vpop.f32.mrb[108].mxu0 }
 0x1da   :  { %v1513_v63 = vadd.f32 %v1459_v32, %v5573_v17  ;;  %v5775_v21 = vadd.f32 %v1703_v43, %v1511_v48  ;;  %v4013_v19 = vpop.f32.mrb[109].mxu1  ;;  %v4077_v28 = vpop.f32.mrb[109].mxu0  ;;  %v2987_v2 = vrot.slane %v2985_v60, 1 }
 0x1db   :  { %v1462_v31 = vpop.f32.mrb[110].mxu1  ;;  %v1706_v54 = vpop.f32.mrb[110].mxu0 }
 0x1dc   :  { %v1514_v30 = vadd.f32 %v1462_v31, %v5580_v51  ;;  %v5784_v38 = vadd.f32 %v1706_v54, %v1512_v52  ;;  %v4078_v17 = vpop.f32.mrb[111].mxu0  ;;  %v4014_v59 = vpop.f32.mrb[111].mxu1  ;;  %v2981_v52 = vrot.slane %v6083_v61, 2 }
 0x1de   :  { %4288 = vmatmul.mubr.bf16.gmra.mrb[216].mxu1 %v2683_v33  ;;  %4352 = vmatmul.mubr.bf16.gmra.mrb[216].mxu0 %v2975_v23  ;;  %v2982_v58 = vor.u32 %v2981_v52, %v2980_v22 }
 0x1df   :  { %4291 = vmatprep.mubr.msk.bf16.mxu1 %vm4533_vm0, %v4532_v15  ;;  %4355 = vmatprep.mubr.msk.bf16.mxu0 %vm4533_vm0, %v4532_v15 }
 0x1e0   :  { %v2983_v8 = vsel %vm2931_vm6, %v2978_v6, %v2982_v58 }
 0x1e1   :  { %v1467_v20 = vpop.f32.mrb[112].mxu1  ;;  %v1711_v48 = vpop.f32.mrb[112].mxu0 }
 0x1e2   :  { %v1515_v51 = vadd.f32 %v1467_v20, %v5596_v44  ;;  %v5792_v39 = vadd.f32 %v1711_v48, %v1513_v63  ;;  %v4017_v7 = vpop.f32.mrb[113].mxu1  ;;  %v4081_v25 = vpop.f32.mrb[113].mxu0  ;;  %v2988_v63 = vshll.u32 %v3559_v41, 16 }
 0x1e3   :  { %v1470_v46 = vpop.f32.mrb[114].mxu1  ;;  %v1714_v42 = vpop.f32.mrb[114].mxu0 }
 0x1e4   :  { %v1516_v44 = vadd.f32 %v1470_v46, %v5603_v24  ;;  %v5802_v45 = vadd.f32 %v1714_v42, %v1514_v30  ;;  %v4082_v32 = vpop.f32.mrb[115].mxu0  ;;  %v4018_v43 = vpop.f32.mrb[115].mxu1  ;;  %v2990_v57 = vrot.slane %v2988_v63, 2 }
 0x1e6   :  { %4292 = vmatmul.mubr.bf16.gmra.mrb[220].mxu1 %v2685_v12  ;;  %4356 = vmatmul.mubr.bf16.gmra.mrb[220].mxu0 %v2979_v40 }
 0x1e7   :  { %4295 = vmatprep.mubr.msk.bf16.mxu1 %vm4533_vm0, %v4532_v15  ;;  %4359 = vmatprep.mubr.msk.bf16.mxu0 %vm4533_vm0, %v4532_v15 }
 0x1e9   :  { %v1475_v55 = vpop.f32.mrb[116].mxu1  ;;  %v1719_v19 = vpop.f32.mrb[116].mxu0 }
 0x1ea   :  { %v1517_v24 = vadd.f32 %v1475_v55, %v5612_v13  ;;  %v5810_v28 = vadd.f32 %v1719_v19, %v1515_v51  ;;  %v4021_v31 = vpop.f32.mrb[117].mxu1  ;;  %v4085_v54 = vpop.f32.mrb[117].mxu0  ;;  %v2991_v13 = vor.u32 %v2990_v57, %v2987_v2 }
 0x1eb   :  { %v1478_v33 = vpop.f32.mrb[118].mxu1  ;;  %v1722_v23 = vpop.f32.mrb[118].mxu0 }
 0x1ec   :  { %v1518_v0 = vadd.f32 %v1478_v33, %v5617_v4  ;;  %v5815_v30 = vadd.f32 %v1722_v23, %v1516_v44  ;;  %v4086_v17 = vpop.f32.mrb[119].mxu0  ;;  %v4022_v59 = vpop.f32.mrb[119].mxu1  ;;  %v2992_v25 = vsel %vm2931_vm6, %v2982_v58, %v2991_v13 }
 0x1ee   :  { %4296 = vmatmul.mubr.bf16.gmra.mrb[224].mxu1 %v2687_v14  ;;  %4360 = vmatmul.mubr.bf16.gmra.mrb[224].mxu0 %v2983_v8 }
 0x1ef   :  { %4299 = vmatprep.mubr.msk.bf16.mxu1 %vm4533_vm0, %v4532_v15  ;;  %4363 = vmatprep.mubr.msk.bf16.mxu0 %vm4533_vm0, %v4532_v15 }
 0x1f1   :  { %v1483_v10 = vpop.f32.mrb[120].mxu1  ;;  %v1727_v18 = vpop.f32.mrb[120].mxu0 }
 0x1f2   :  { %v1519_v6 = vadd.f32 %v1483_v10, %v5628_v26  ;;  %v5822_v20 = vadd.f32 %v1727_v18, %v1517_v24  ;;  %v4025_v4 = vpop.f32.mrb[121].mxu1  ;;  %v4089_v48 = vpop.f32.mrb[121].mxu0 }
 0x1f3   :  { %v1486_v51 = vpop.f32.mrb[122].mxu1  ;;  %v1730_v7 = vpop.f32.mrb[122].mxu0 }
 0x1f4   :  { %v1520_v12 = vadd.f32 %v1486_v51, %v5633_v27  ;;  %v5826_v46 = vadd.f32 %v1730_v7, %v1518_v0  ;;  %v4090_v42 = vpop.f32.mrb[123].mxu0  ;;  %v4026_v40 = vpop.f32.mrb[123].mxu1 }
 0x1f6   :  { %4300 = vmatmul.mubr.bf16.gmra.mrb[228].mxu1 %v2686_v37  ;;  %4364 = vmatmul.mubr.bf16.gmra.mrb[228].mxu0 %v2992_v25 }
 0x1f7   :  { %4367 = vmatprep.mubr.msk.bf16.mxu0 %vm4533_vm0, %v4532_v15 }
 0x1f9   :  { %v1491_v26 = vpop.f32.mrb[124].mxu1  ;;  %v1735_v56 = vpop.f32.mrb[124].mxu0 }
 0x1fa   :  { %v1521_v22 = vadd.f32 %v1491_v26, %v5640_v35  ;;  %v5831_v61 = vadd.f32 %v1735_v56, %v1519_v6  ;;  %v4093_v52 = vpop.f32.mrb[125].mxu0  ;;  %v4029_v41 = vpop.f32.mrb[125].mxu1 }
 0x1fb   :  { %v1738_v44 = vpop.f32.mrb[126].mxu0  ;;  %v1494_v32 = vpop.f32.mrb[126].mxu1 }
 0x1fc   :  { %v5833_v27 = vadd.f32 %v1738_v44, %v1520_v12  ;;  %v4094_v43 = vpop.f32.mrb[127].mxu0  ;;  %v4030_v58 = vpop.f32.mrb[127].mxu1 }
 0x1fe   :  { %4368 = vmatmul.mubr.bf16.gmra.mrb[232].mxu0 %v2991_v13 }
 0x201   :  { %v1743_v37 = vpop.f32.mrb[128].mxu0  ;;  %v2081_v60 = vpop.f32.mrb[128].mxu1 }
 0x202   :  { %v5835_v63 = vadd.f32 %v1743_v37, %v1521_v22  ;;  %v2183_v15 = vadd.f32 %v2081_v60, %v5656_v50  ;;  %v4097_v55 = vpop.f32.mrb[129].mxu0  ;;  %v4117_v19 = vpop.f32.mrb[129].mxu1 }
 0x203   :  { %v1746_v35 = vpop.f32.mrb[130].mxu0  ;;  %v2084_v24 = vpop.f32.mrb[130].mxu1 }
 0x204   :  { %v2184_v31 = vadd.f32 %v2084_v24, %v5665_v9  ;;  %v4098_v54 = vpop.f32.mrb[131].mxu0  ;;  %v4118_v33 = vpop.f32.mrb[131].mxu1 }
 0x209   :  { %v2089_v23 = vpop.f32.mrb[132].mxu1  ;;  %v2514_v14 = vpop.f32.mrb[132].mxu0 }
 0x20a   :  { %v2185_v8 = vadd.f32 %v2089_v23, %v5673_v1  ;;  %v5840_v2 = vadd.f32 %v2514_v14, %v2183_v15  ;;  %v4121_v57 = vpop.f32.mrb[133].mxu1  ;;  %v4185_v0 = vpop.f32.mrb[133].mxu0 }
 0x20b   :  { %v2092_v17 = vpop.f32.mrb[134].mxu1  ;;  %v2517_v59 = vpop.f32.mrb[134].mxu0 }
 0x20c   :  { %v2186_v50 = vadd.f32 %v2092_v17, %v5682_v34  ;;  %v5843_v13 = vadd.f32 %v2517_v59, %v2184_v31  ;;  %v4186_v10 = vpop.f32.mrb[135].mxu0  ;;  %v4122_v18 = vpop.f32.mrb[135].mxu1 }
 0x211   :  { %v2097_v6 = vpop.f32.mrb[136].mxu1  ;;  %v2522_v9 = vpop.f32.mrb[136].mxu0 }
 0x212   :  { %v2187_v4 = vadd.f32 %v2097_v6, %v5690_v47  ;;  %v5846_v48 = vadd.f32 %v2522_v9, %v2185_v8  ;;  %v4125_v51 = vpop.f32.mrb[137].mxu1  ;;  %v4189_v1 = vpop.f32.mrb[137].mxu0 }
 0x213   :  { %v2100_v7 = vpop.f32.mrb[138].mxu1  ;;  %v2525_v25 = vpop.f32.mrb[138].mxu0 }
 0x214   :  { %v2188_v12 = vadd.f32 %v2100_v7, %v5699_v3  ;;  %v5849_v42 = vadd.f32 %v2525_v25, %v2186_v50  ;;  %v4190_v40 = vpop.f32.mrb[139].mxu0  ;;  %v4126_v34 = vpop.f32.mrb[139].mxu1 }
 0x219   :  { %v2105_v26 = vpop.f32.mrb[140].mxu1  ;;  %v2530_v56 = vpop.f32.mrb[140].mxu0 }
 0x21a   :  { %v2189_v22 = vadd.f32 %v2105_v26, %v5707_v16  ;;  %v5852_v52 = vadd.f32 %v2530_v56, %v2187_v4  ;;  %v4129_v41 = vpop.f32.mrb[141].mxu1  ;;  %v4193_v47 = vpop.f32.mrb[141].mxu0 }
 0x21b   :  { %v2108_v44 = vpop.f32.mrb[142].mxu1  ;;  %v2533_v32 = vpop.f32.mrb[142].mxu0 }
 0x21c   :  { %v2190_v43 = vadd.f32 %v2108_v44, %v5716_v29  ;;  %v5855_v58 = vadd.f32 %v2533_v32, %v2188_v12  ;;  %v4194_v37 = vpop.f32.mrb[143].mxu0  ;;  %v4130_v3 = vpop.f32.mrb[143].mxu1 }
 0x221   :  { %v2113_v60 = vpop.f32.mrb[144].mxu1  ;;  %v2538_v15 = vpop.f32.mrb[144].mxu0 }
 0x222   :  { %v2191_v55 = vadd.f32 %v2113_v60, %v5724_v36  ;;  %v5858_v19 = vadd.f32 %v2538_v15, %v2189_v22  ;;  %v4133_v35 = vpop.f32.mrb[145].mxu1  ;;  %v4197_v16 = vpop.f32.mrb[145].mxu0 }
 0x223   :  { %v2116_v24 = vpop.f32.mrb[146].mxu1  ;;  %v2541_v31 = vpop.f32.mrb[146].mxu0 }
 0x224   :  { %v2192_v54 = vadd.f32 %v2116_v24, %v5733_v53  ;;  %v5861_v33 = vadd.f32 %v2541_v31, %v2190_v43  ;;  %v4198_v23 = vpop.f32.mrb[147].mxu0  ;;  %v4134_v29 = vpop.f32.mrb[147].mxu1 }
 0x229   :  { %v2121_v14 = vpop.f32.mrb[148].mxu1  ;;  %v2546_v8 = vpop.f32.mrb[148].mxu0 }
 0x22a   :  { %v2193_v57 = vadd.f32 %v2121_v14, %v5741_v62  ;;  %v5864_v0 = vadd.f32 %v2546_v8, %v2191_v55  ;;  %v4137_v17 = vpop.f32.mrb[149].mxu1  ;;  %v4201_v36 = vpop.f32.mrb[149].mxu0 }
 0x22b   :  { %v2124_v59 = vpop.f32.mrb[150].mxu1  ;;  %v2549_v50 = vpop.f32.mrb[150].mxu0 }
 0x22c   :  { %v2194_v10 = vadd.f32 %v2124_v59, %v5750_v11  ;;  %v5867_v18 = vadd.f32 %v2549_v50, %v2192_v54  ;;  %v4202_v6 = vpop.f32.mrb[151].mxu0  ;;  %v4138_v53 = vpop.f32.mrb[151].mxu1 }
 0x231   :  { %v2129_v9 = vpop.f32.mrb[152].mxu1  ;;  %v2554_v4 = vpop.f32.mrb[152].mxu0 }
 0x232   :  { %v2195_v51 = vadd.f32 %v2129_v9, %v5758_v5  ;;  %v5870_v1 = vadd.f32 %v2554_v4, %v2193_v57  ;;  %v4141_v7 = vpop.f32.mrb[153].mxu1  ;;  %v4205_v62 = vpop.f32.mrb[153].mxu0 }
 0x233   :  { %v2132_v25 = vpop.f32.mrb[154].mxu1  ;;  %v2557_v12 = vpop.f32.mrb[154].mxu0 }
 0x234   :  { %v2196_v40 = vadd.f32 %v2132_v25, %v5767_v49  ;;  %v5873_v34 = vadd.f32 %v2557_v12, %v2194_v10  ;;  %v4206_v26 = vpop.f32.mrb[155].mxu0  ;;  %v4142_v11 = vpop.f32.mrb[155].mxu1 }
 0x239   :  { %v2137_v56 = vpop.f32.mrb[156].mxu1  ;;  %v2562_v22 = vpop.f32.mrb[156].mxu0 }
 0x23a   :  { %v2197_v41 = vadd.f32 %v2137_v56, %v5775_v21  ;;  %v5876_v47 = vadd.f32 %v2562_v22, %v2195_v51  ;;  %v4145_v44 = vpop.f32.mrb[157].mxu1  ;;  %v4209_v5 = vpop.f32.mrb[157].mxu0 }
 0x23b   :  { %v2140_v32 = vpop.f32.mrb[158].mxu1  ;;  %v2565_v43 = vpop.f32.mrb[158].mxu0 }
 0x23c   :  { %v2198_v37 = vadd.f32 %v2140_v32, %v5784_v38  ;;  %v5879_v3 = vadd.f32 %v2565_v43, %v2196_v40  ;;  %v4210_v60 = vpop.f32.mrb[159].mxu0  ;;  %v4146_v49 = vpop.f32.mrb[159].mxu1 }
 0x241   :  { %v2145_v15 = vpop.f32.mrb[160].mxu1  ;;  %v2570_v55 = vpop.f32.mrb[160].mxu0 }
 0x242   :  { %v2199_v35 = vadd.f32 %v2145_v15, %v5792_v39  ;;  %v5882_v16 = vadd.f32 %v2570_v55, %v2197_v41  ;;  %v4149_v24 = vpop.f32.mrb[161].mxu1  ;;  %v4213_v21 = vpop.f32.mrb[161].mxu0 }
 0x243   :  { %v2148_v31 = vpop.f32.mrb[162].mxu1  ;;  %v2573_v54 = vpop.f32.mrb[162].mxu0 }
 0x244   :  { %v2200_v23 = vadd.f32 %v2148_v31, %v5802_v45  ;;  %v5885_v29 = vadd.f32 %v2573_v54, %v2198_v37  ;;  %v4214_v14 = vpop.f32.mrb[163].mxu0  ;;  %v4150_v38 = vpop.f32.mrb[163].mxu1 }
 0x249   :  { %v2153_v8 = vpop.f32.mrb[164].mxu1  ;;  %v2578_v57 = vpop.f32.mrb[164].mxu0 }
 0x24a   :  { %v2201_v17 = vadd.f32 %v2153_v8, %v5810_v28  ;;  %v5888_v36 = vadd.f32 %v2578_v57, %v2199_v35  ;;  %v4153_v59 = vpop.f32.mrb[165].mxu1  ;;  %v4217_v39 = vpop.f32.mrb[165].mxu0 }
 0x24b   :  { %v2156_v50 = vpop.f32.mrb[166].mxu1  ;;  %v2581_v10 = vpop.f32.mrb[166].mxu0 }
 0x24c   :  { %v2202_v6 = vadd.f32 %v2156_v50, %v5815_v30  ;;  %v5891_v53 = vadd.f32 %v2581_v10, %v2200_v23  ;;  %v4218_v9 = vpop.f32.mrb[167].mxu0  ;;  %v4154_v45 = vpop.f32.mrb[167].mxu1 }
 0x251   :  { %v2161_v4 = vpop.f32.mrb[168].mxu1  ;;  %v2586_v51 = vpop.f32.mrb[168].mxu0 }
 0x252   :  { %v2203_v7 = vadd.f32 %v2161_v4, %v5822_v20  ;;  %v5894_v62 = vadd.f32 %v2586_v51, %v2201_v17  ;;  %v4157_v25 = vpop.f32.mrb[169].mxu1  ;;  %v4221_v28 = vpop.f32.mrb[169].mxu0 }
 0x253   :  { %v2164_v12 = vpop.f32.mrb[170].mxu1  ;;  %v2589_v40 = vpop.f32.mrb[170].mxu0 }
 0x254   :  { %v2204_v26 = vadd.f32 %v2164_v12, %v5826_v46  ;;  %v5897_v11 = vadd.f32 %v2589_v40, %v2202_v6  ;;  %v4222_v56 = vpop.f32.mrb[171].mxu0  ;;  %v4158_v30 = vpop.f32.mrb[171].mxu1 }
 0x259   :  { %v2169_v22 = vpop.f32.mrb[172].mxu1  ;;  %v2594_v41 = vpop.f32.mrb[172].mxu0 }
 0x25a   :  { %v2205_v44 = vadd.f32 %v2169_v22, %v5831_v61  ;;  %v5900_v5 = vadd.f32 %v2594_v41, %v2203_v7  ;;  %v4161_v32 = vpop.f32.mrb[173].mxu1  ;;  %v4225_v20 = vpop.f32.mrb[173].mxu0  ;;  %v5917_v7 = vld [vmem:[%s6044_s2] ss:$0 sm:$0xff] }
 0x25b   :  { %v2172_v43 = vpop.f32.mrb[174].mxu1  ;;  %v2597_v37 = vpop.f32.mrb[174].mxu0 }
 0x25c   :  { %v2206_v60 = vadd.f32 %v2172_v43, %v5833_v27  ;;  %v5903_v49 = vadd.f32 %v2597_v37, %v2204_v26  ;;  %v4226_v15 = vpop.f32.mrb[175].mxu0  ;;  %v4162_v46 = vpop.f32.mrb[175].mxu1 }
 0x261   :  { %v2177_v55 = vpop.f32.mrb[176].mxu1  ;;  %v2602_v35 = vpop.f32.mrb[176].mxu0 }
 0x262   :  { %v2207_v24 = vadd.f32 %v2177_v55, %v5835_v63  ;;  %v5906_v21 = vadd.f32 %v2602_v35, %v2205_v44  ;;  %v4229_v31 = vpop.f32.mrb[177].mxu0  ;;  %v4165_v61 = vpop.f32.mrb[177].mxu1 }
 0x263   :  { %v2605_v54 = vpop.f32.mrb[178].mxu0  ;;  %v2180_v23 = vpop.f32.mrb[178].mxu1 }
 0x264   :  { %v5908_v14 = vadd.f32 %v2605_v54, %v2206_v60  ;;  %v4230_v38 = vpop.f32.mrb[179].mxu0  ;;  %v4166_v8 = vpop.f32.mrb[179].mxu1 }
 0x269   :  { %v2610_v57 = vpop.f32.mrb[180].mxu0  ;;  %v2783_v27 = vpop.f32.mrb[180].mxu1 }
 0x26a   :  { %v5910_v17 = vadd.f32 %v2610_v57, %v2207_v24  ;;  %v2885_v59 = vadd.f32 %v2783_v27, %v5840_v2  ;;  %v4233_v39 = vpop.f32.mrb[181].mxu0  ;;  %v4253_v50 = vpop.f32.mrb[181].mxu1 }
 0x26b   :  { %v2613_v10 = vpop.f32.mrb[182].mxu0  ;;  %v2786_v63 = vpop.f32.mrb[182].mxu1 }
 0x26c   :  { %v2886_v6 = vadd.f32 %v2786_v63, %v5843_v13  ;;  %v4234_v9 = vpop.f32.mrb[183].mxu0  ;;  %v4254_v45 = vpop.f32.mrb[183].mxu1 }
 0x271   :  { %v2791_v4 = vpop.f32.mrb[184].mxu1  ;;  %v3088_v51 = vpop.f32.mrb[184].mxu0 }
 0x272   :  { %v2887_v25 = vadd.f32 %v2791_v4, %v5846_v48  ;;  %v3190_v28 = vadd.f32 %v3088_v51, %v2885_v59  ;;  %v4257_v12 = vpop.f32.mrb[185].mxu1  ;;  %v4321_v2 = vpop.f32.mrb[185].mxu0 }
 0x273   :  { %v2794_v40 = vpop.f32.mrb[186].mxu1  ;;  %v3091_v26 = vpop.f32.mrb[186].mxu0 }
 0x274   :  { %v3222_v56 = vadd.f32 %v5917_v7, %v3190_v28  ;;  %v2888_v13 = vadd.f32 %v2794_v40, %v5849_v42  ;;  %v3191_v30 = vadd.f32 %v3091_v26, %v2886_v6  ;;  %v4322_v22 = vpop.f32.mrb[187].mxu0  ;;  %v4258_v41 = vpop.f32.mrb[187].mxu1 }
 0x276   :  { %3247 = vst [vmem:[%s6045_s3] sm:$0xff] %v3222_v56  ;;  %v3223_v44 = vadd.f32 %v5917_v7, %v3191_v30 }
 0x278   :  { %3248 = vst [vmem:[%s6045_s3 + $0x8] sm:$0xff] %v3223_v44 }
 0x279   :  { %v2799_v48 = vpop.f32.mrb[188].mxu1  ;;  %v3096_v32 = vpop.f32.mrb[188].mxu0 }
 0x27a   :  { %v2889_v20 = vadd.f32 %v2799_v48, %v5852_v52  ;;  %v3192_v43 = vadd.f32 %v3096_v32, %v2887_v25  ;;  %v4261_v37 = vpop.f32.mrb[189].mxu1  ;;  %v4325_v42 = vpop.f32.mrb[189].mxu0 }
 0x27b   :  { %v2802_v60 = vpop.f32.mrb[190].mxu1  ;;  %v3099_v15 = vpop.f32.mrb[190].mxu0 }
 0x27c   :  { %v3224_v46 = vadd.f32 %v5917_v7, %v3192_v43  ;;  %v2890_v55 = vadd.f32 %v2802_v60, %v5855_v58  ;;  %v3193_v35 = vadd.f32 %v3099_v15, %v2888_v13  ;;  %v4326_v24 = vpop.f32.mrb[191].mxu0  ;;  %v4262_v31 = vpop.f32.mrb[191].mxu1 }
 0x27e   :  { %3249 = vst [vmem:[%s6045_s3 + $0x10] sm:$0xff] %v3224_v46  ;;  %v3225_v61 = vadd.f32 %v5917_v7, %v3193_v35 }
 0x280   :  { %3250 = vst [vmem:[%s6045_s3 + $0x18] sm:$0xff] %v3225_v61 }
 0x281   :  { %v2807_v52 = vpop.f32.mrb[192].mxu1  ;;  %v3104_v54 = vpop.f32.mrb[192].mxu0 }
 0x282   :  { %v2891_v23 = vadd.f32 %v2807_v52, %v5858_v19  ;;  %v3194_v38 = vadd.f32 %v3104_v54, %v2889_v20  ;;  %v4265_v8 = vpop.f32.mrb[193].mxu1  ;;  %v4329_v58 = vpop.f32.mrb[193].mxu0 }
 0x283   :  { %v2810_v57 = vpop.f32.mrb[194].mxu1  ;;  %v3107_v27 = vpop.f32.mrb[194].mxu0 }
 0x284   :  { %v3226_v59 = vadd.f32 %v5917_v7, %v3194_v38  ;;  %v2892_v39 = vadd.f32 %v2810_v57, %v5861_v33  ;;  %v3195_v50 = vadd.f32 %v3107_v27, %v2890_v55  ;;  %v4330_v10 = vpop.f32.mrb[195].mxu0  ;;  %v4266_v63 = vpop.f32.mrb[195].mxu1 }
 0x286   :  { %3251 = vst [vmem:[%s6045_s3 + $0x20] sm:$0xff] %v3226_v59  ;;  %v3227_v6 = vadd.f32 %v5917_v7, %v3195_v50 }
 0x288   :  { %3252 = vst [vmem:[%s6045_s3 + $0x28] sm:$0xff] %v3227_v6 }
 0x289   :  { %v2815_v19 = vpop.f32.mrb[196].mxu1  ;;  %v3112_v9 = vpop.f32.mrb[196].mxu0 }
 0x28a   :  { %v2893_v45 = vadd.f32 %v2815_v19, %v5864_v0  ;;  %v3196_v4 = vadd.f32 %v3112_v9, %v2891_v23  ;;  %v4269_v51 = vpop.f32.mrb[197].mxu1  ;;  %v4333_v33 = vpop.f32.mrb[197].mxu0 }
 0x28b   :  { %v2818_v25 = vpop.f32.mrb[198].mxu1  ;;  %v3115_v28 = vpop.f32.mrb[198].mxu0 }
 0x28c   :  { %v3228_v12 = vadd.f32 %v5917_v7, %v3196_v4  ;;  %v2894_v2 = vadd.f32 %v2818_v25, %v5867_v18  ;;  %v3197_v40 = vadd.f32 %v3115_v28, %v2892_v39  ;;  %v4334_v26 = vpop.f32.mrb[199].mxu0  ;;  %v4270_v56 = vpop.f32.mrb[199].mxu1 }
 0x28e   :  { %3253 = vst [vmem:[%s6045_s3 + $0x30] sm:$0xff] %v3228_v12  ;;  %v3229_v13 = vadd.f32 %v5917_v7, %v3197_v40 }
 0x290   :  { %3254 = vst [vmem:[%s6045_s3 + $0x38] sm:$0xff] %v3229_v13 }
 0x291   :  { %v2823_v0 = vpop.f32.mrb[200].mxu1  ;;  %v3120_v30 = vpop.f32.mrb[200].mxu0 }
 0x292   :  { %v2895_v22 = vadd.f32 %v2823_v0, %v5870_v1  ;;  %v3198_v41 = vadd.f32 %v3120_v30, %v2893_v45  ;;  %v4273_v44 = vpop.f32.mrb[201].mxu1  ;;  %v4337_v18 = vpop.f32.mrb[201].mxu0 }
 0x293   :  { %v2826_v48 = vpop.f32.mrb[202].mxu1  ;;  %v3123_v32 = vpop.f32.mrb[202].mxu0 }
 0x294   :  { %v3230_v20 = vadd.f32 %v5917_v7, %v3198_v41  ;;  %v2896_v43 = vadd.f32 %v2826_v48, %v5873_v34  ;;  %v3199_v37 = vadd.f32 %v3123_v32, %v2894_v2  ;;  %v4338_v42 = vpop.f32.mrb[203].mxu0  ;;  %v4274_v60 = vpop.f32.mrb[203].mxu1 }
 0x296   :  { %3255 = vst [vmem:[%s6045_s3 + $0x40] sm:$0xff] %v3230_v20  ;;  %v3231_v15 = vadd.f32 %v5917_v7, %v3199_v37 }
 0x298   :  { %3256 = vst [vmem:[%s6045_s3 + $0x48] sm:$0xff] %v3231_v15 }
 0x299   :  { %v2831_v1 = vpop.f32.mrb[204].mxu1  ;;  %v3128_v46 = vpop.f32.mrb[204].mxu0 }
 0x29a   :  { %v2897_v55 = vadd.f32 %v2831_v1, %v5876_v47  ;;  %v3200_v35 = vadd.f32 %v3128_v46, %v2895_v22  ;;  %v4277_v24 = vpop.f32.mrb[205].mxu1  ;;  %v4341_v34 = vpop.f32.mrb[205].mxu0 }
 0x29b   :  { %v2834_v31 = vpop.f32.mrb[206].mxu1  ;;  %v3131_v61 = vpop.f32.mrb[206].mxu0 }
 0x29c   :  { %v3232_v52 = vadd.f32 %v5917_v7, %v3200_v35  ;;  %v2898_v54 = vadd.f32 %v2834_v31, %v5879_v3  ;;  %v3201_v23 = vadd.f32 %v3131_v61, %v2896_v43  ;;  %v4342_v38 = vpop.f32.mrb[207].mxu0  ;;  %v4278_v8 = vpop.f32.mrb[207].mxu1 }
 0x29e   :  { %3257 = vst [vmem:[%s6045_s3 + $0x50] sm:$0xff] %v3232_v52  ;;  %v3233_v58 = vadd.f32 %v5917_v7, %v3201_v23 }
 0x2a0   :  { %3258 = vst [vmem:[%s6045_s3 + $0x58] sm:$0xff] %v3233_v58 }
 0x2a1   :  { %v2839_v47 = vpop.f32.mrb[208].mxu1  ;;  %v3136_v57 = vpop.f32.mrb[208].mxu0 }
 0x2a2   :  { %v2899_v27 = vadd.f32 %v2839_v47, %v5882_v16  ;;  %v3202_v59 = vadd.f32 %v3136_v57, %v2897_v55  ;;  %v4281_v39 = vpop.f32.mrb[209].mxu1  ;;  %v4345_v3 = vpop.f32.mrb[209].mxu0 }
 0x2a3   :  { %v2842_v50 = vpop.f32.mrb[210].mxu1  ;;  %v3139_v10 = vpop.f32.mrb[210].mxu0 }
 0x2a4   :  { %v3234_v63 = vadd.f32 %v5917_v7, %v3202_v59  ;;  %v2900_v6 = vadd.f32 %v2842_v50, %v5885_v29  ;;  %v3203_v19 = vadd.f32 %v3139_v10, %v2898_v54  ;;  %v4346_v9 = vpop.f32.mrb[211].mxu0  ;;  %v4282_v45 = vpop.f32.mrb[211].mxu1 }
 0x2a6   :  { %3259 = vst [vmem:[%s6045_s3 + $0x60] sm:$0xff] %v3234_v63  ;;  %v3235_v4 = vadd.f32 %v5917_v7, %v3203_v19 }
 0x2a8   :  { %3260 = vst [vmem:[%s6045_s3 + $0x68] sm:$0xff] %v3235_v4 }
 0x2a9   :  { %v2847_v16 = vpop.f32.mrb[212].mxu1  ;;  %v3144_v51 = vpop.f32.mrb[212].mxu0 }
 0x2aa   :  { %v2901_v33 = vadd.f32 %v2847_v16, %v5888_v36  ;;  %v3204_v25 = vadd.f32 %v3144_v51, %v2899_v27  ;;  %v4285_v28 = vpop.f32.mrb[213].mxu1  ;;  %v4349_v29 = vpop.f32.mrb[213].mxu0 }
 0x2ab   :  { %v2850_v12 = vpop.f32.mrb[214].mxu1  ;;  %v3147_v2 = vpop.f32.mrb[214].mxu0 }
 0x2ac   :  { %v3236_v40 = vadd.f32 %v5917_v7, %v3204_v25  ;;  %v2902_v26 = vadd.f32 %v2850_v12, %v5891_v53  ;;  %v3205_v56 = vadd.f32 %v3147_v2, %v2900_v6  ;;  %v4350_v13 = vpop.f32.mrb[215].mxu0  ;;  %v4286_v0 = vpop.f32.mrb[215].mxu1 }
 0x2ae   :  { %3261 = vst [vmem:[%s6045_s3 + $0x70] sm:$0xff] %v3236_v40  ;;  %v3237_v30 = vadd.f32 %v5917_v7, %v3205_v56 }
 0x2b0   :  { %3262 = vst [vmem:[%s6045_s3 + $0x78] sm:$0xff] %v3237_v30 }
 0x2b1   :  { %v2855_v36 = vpop.f32.mrb[216].mxu1  ;;  %v3152_v22 = vpop.f32.mrb[216].mxu0 }
 0x2b2   :  { %v2903_v41 = vadd.f32 %v2855_v36, %v5894_v62  ;;  %v3206_v44 = vadd.f32 %v3152_v22, %v2901_v33  ;;  %v4289_v18 = vpop.f32.mrb[217].mxu1  ;;  %v4353_v53 = vpop.f32.mrb[217].mxu0 }
 0x2b3   :  { %v2858_v48 = vpop.f32.mrb[218].mxu1  ;;  %v3155_v32 = vpop.f32.mrb[218].mxu0 }
 0x2b4   :  { %v3238_v20 = vadd.f32 %v5917_v7, %v3206_v44  ;;  %v2904_v43 = vadd.f32 %v2858_v48, %v5897_v11  ;;  %v3207_v37 = vadd.f32 %v3155_v32, %v2902_v26  ;;  %v4354_v42 = vpop.f32.mrb[219].mxu0  ;;  %v4290_v60 = vpop.f32.mrb[219].mxu1 }
 0x2b6   :  { %3263 = vst [vmem:[%s6045_s3 + $0x80] sm:$0xff] %v3238_v20  ;;  %v3239_v15 = vadd.f32 %v5917_v7, %v3207_v37 }
 0x2b8   :  { %3264 = vst [vmem:[%s6045_s3 + $0x88] sm:$0xff] %v3239_v15 }
 0x2b9   :  { %v2863_v62 = vpop.f32.mrb[220].mxu1  ;;  %v3160_v1 = vpop.f32.mrb[220].mxu0 }
 0x2ba   :  { %v2905_v46 = vadd.f32 %v2863_v62, %v5900_v5  ;;  %v3208_v55 = vadd.f32 %v3160_v1, %v2903_v41  ;;  %v4293_v35 = vpop.f32.mrb[221].mxu1  ;;  %v4357_v11 = vpop.f32.mrb[221].mxu0 }
 0x2bb   :  { %v2866_v24 = vpop.f32.mrb[222].mxu1  ;;  %v3163_v34 = vpop.f32.mrb[222].mxu0 }
 0x2bc   :  { %v3240_v31 = vadd.f32 %v5917_v7, %v3208_v55  ;;  %v2906_v61 = vadd.f32 %v2866_v24, %v5903_v49  ;;  %v3209_v52 = vadd.f32 %v3163_v34, %v2904_v43  ;;  %v4358_v54 = vpop.f32.mrb[223].mxu0  ;;  %v4294_v23 = vpop.f32.mrb[223].mxu1 }
 0x2be   :  { %3265 = vst [vmem:[%s6045_s3 + $0x90] sm:$0xff] %v3240_v31  ;;  %v3241_v38 = vadd.f32 %v5917_v7, %v3209_v52 }
 0x2c0   :  { %3266 = vst [vmem:[%s6045_s3 + $0x98] sm:$0xff] %v3241_v38 }
 0x2c1   :  { %v2871_v5 = vpop.f32.mrb[224].mxu1  ;;  %v3168_v8 = vpop.f32.mrb[224].mxu0 }
 0x2c2   :  { %v2907_v58 = vadd.f32 %v2871_v5, %v5906_v21  ;;  %v3210_v47 = vadd.f32 %v3168_v8, %v2905_v46  ;;  %v4297_v57 = vpop.f32.mrb[225].mxu1  ;;  %v4361_v49 = vpop.f32.mrb[225].mxu0 }
 0x2c3   :  { %v2874_v27 = vpop.f32.mrb[226].mxu1  ;;  %v3171_v59 = vpop.f32.mrb[226].mxu0 }
 0x2c4   :  { %v3242_v39 = vadd.f32 %v5917_v7, %v3210_v47  ;;  %v2908_v3 = vadd.f32 %v2874_v27, %v5908_v14  ;;  %v3211_v50 = vadd.f32 %v3171_v59, %v2906_v61  ;;  %v4362_v10 = vpop.f32.mrb[227].mxu0  ;;  %v4298_v63 = vpop.f32.mrb[227].mxu1 }
 0x2c6   :  { %3267 = vst [vmem:[%s6045_s3 + $0xa0] sm:$0xff] %v3242_v39  ;;  %v3243_v6 = vadd.f32 %v5917_v7, %v3211_v50 }
 0x2c8   :  { %3268 = vst [vmem:[%s6045_s3 + $0xa8] sm:$0xff] %v3243_v6 }
 0x2c9   :  { %v2879_v21 = vpop.f32.mrb[228].mxu1  ;;  %v3176_v19 = vpop.f32.mrb[228].mxu0 }
 0x2ca   :  { %v2909_v9 = vadd.f32 %v2879_v21, %v5910_v17  ;;  %v3212_v45 = vadd.f32 %v3176_v19, %v2907_v58  ;;  %v4365_v4 = vpop.f32.mrb[229].mxu0  ;;  %v4301_v14 = vpop.f32.mrb[229].mxu1 }
 0x2cb   :  { %v3179_v16 = vpop.f32.mrb[230].mxu0  ;;  %v2882_v51 = vpop.f32.mrb[230].mxu1 }
 0x2cc   :  { %v3244_v33 = vadd.f32 %v5917_v7, %v3212_v45  ;;  %v3213_v25 = vadd.f32 %v3179_v16, %v2908_v3  ;;  %v4366_v28 = vpop.f32.mrb[231].mxu0  ;;  %v4302_v29 = vpop.f32.mrb[231].mxu1 }
 0x2ce   :  { %3269 = vst [vmem:[%s6045_s3 + $0xb0] sm:$0xff] %v3244_v33  ;;  %v3245_v12 = vadd.f32 %v5917_v7, %v3213_v25 }
 0x2d0   :  { %3270 = vst [vmem:[%s6045_s3 + $0xb8] sm:$0xff] %v3245_v12 }
 0x2d1   :  { %v3184_v17 = vpop.f32.mrb[232].mxu0 }
 0x2d2   :  { %v3214_v2 = vadd.f32 %v3184_v17, %v2909_v9  ;;  %v4369_v40 = vpop.f32.mrb[233].mxu0 }
 0x2d3   :  { %v3187_v26 = vpop.f32.mrb[234].mxu0 }
 0x2d4   :  { %v3246_v56 = vadd.f32 %v5917_v7, %v3214_v2  ;;  %v4370_v13 = vpop.f32.mrb[235].mxu0 }
 0x2d6   :  { %3271 = vst [vmem:[%s6045_s3 + $0xc0] sm:$0xff] %v3246_v56 }
 0x2d7   :  { %3276 = vsyncmov [#allocation3] }
 0x2da   :  { %s3277_s11 = vpop.sfrf %3276 }
 0x2db   :  { %p3569_p0 = scmp.ne.s32.totalorder %s3277_s11, 0 }
 0x2dd   :  { %3281 = shalt.err (%p3569_p0)  }

</bundles_post_ra>
